<compile_context>
chip_gen: v7x
topology: tpu7x:2x2x1
jax: 0.10.0
libtpu: 0.0.40
codegen_flags: <defaults>
</compile_context>

<pallas_src>
import functools

import jax
import jax.numpy as jnp
from jax.experimental import pallas as pl
from jax.experimental.pallas import tpu as pltpu

_VMEM_LIMIT = 40 * 1024 * 1024  # scoped-VMEM budget; headroom under v7x 64 MiB


def _choose_row_tile(n, cap=128, min_steps=4):
    """Largest dst-row tile <= cap that divides n, preferring >= min_steps grid
    steps (keeps both v7x TensorCores busy and the mask-tile DMA pipelined)."""
    candidates = [t for t in (256, 128, 64, 32, 16, 8)
                  if t <= cap and t <= n and n % t == 0]
    if not candidates:
        return n  # single full-array tile
    for t in candidates:          # descending; first with enough steps
        if n // t >= min_steps:
            return t
    return candidates[-1]         # small n: best effort


# ---------------------------------------------------------------------------
# Kernel 1: fused projection  [h | alpha] = x @ [W | W@a_cat]
# ---------------------------------------------------------------------------
def gat_project_kernel(x_ref, w_ref, h_ref, alpha_ref, *, hc):
    hz = jnp.dot(x_ref[...], w_ref[...], preferred_element_type=jnp.float32)
    h_ref[...] = hz[:, :hc].astype(h_ref.dtype)      # bf16 features
    alpha_ref[...] = hz[:, hc:]                       # f32 [src|dst] scores


def gat_project(x, w_combo, *, hc, tile):
    n, fin = x.shape
    wtot = w_combo.shape[1]
    kernel = functools.partial(gat_project_kernel, hc=hc)
    return pl.pallas_call(
        kernel,
        out_shape=(jax.ShapeDtypeStruct((n, hc), jnp.bfloat16),
                   jax.ShapeDtypeStruct((n, wtot - hc), jnp.float32)),
        grid_spec=pltpu.PrefetchScalarGridSpec(
            num_scalar_prefetch=0,
            grid=(n // tile,),
            in_specs=[pl.BlockSpec((tile, fin), lambda i: (i, 0)),
                      pl.BlockSpec((fin, wtot), lambda i: (0, 0))],
            out_specs=[pl.BlockSpec((tile, hc), lambda i: (i, 0)),
                       pl.BlockSpec((tile, wtot - hc), lambda i: (i, 0))]),
        compiler_params=pltpu.CompilerParams(
            dimension_semantics=("parallel",),
            vmem_limit_bytes=_VMEM_LIMIT),
    )(x, w_combo)


# ---------------------------------------------------------------------------
# Kernel 2: masked attention softmax + aggregation over a dst-row tile
# ---------------------------------------------------------------------------
def gat_attention_kernel(mask_ref, haug_ref, asrct_ref, adst_ref, bias_ref,
                         out_ref, *, heads, out_ch, concat, apply_elu,
                         neg_slope=0.2):
    """mask_ref  : [TM, N]        additive mask (0 edge / -1e30), bf16
       haug_ref  : [N, H*(C+1)]   bf16, each head block = [h_head | ones]
       asrct_ref : [H, N]         per-head source scores (pre-transposed), f32
       adst_ref  : [TM, H]        per-head destination scores for this tile
       bias_ref  : [1, H*C] if concat else [1, C]
       out_ref   : [TM, H*C] if concat else [TM, C]
    """
    mask = mask_ref[...]                               # bf16; promoted per add
    h_aug = haug_ref[...]                              # [N, H*(C+1)] bf16
    a_src_t = asrct_ref[...]                           # [H, N]
    a_dst = adst_ref[...]                              # [TM, H]
    bias = bias_ref[...]                               # [1, out_dim]
    caug = out_ch + 1

    def elu(v):
        return jnp.where(v > 0, v, jnp.exp(jnp.minimum(v, 0.0)) - 1.0)

    head_out = []
    acc = None
    for hd in range(heads):
        raw = a_dst[:, hd:hd + 1] + a_src_t[hd:hd + 1, :]          # [TM, N] f32
        # LeakyReLU(0.2) + shared additive mask (bf16 convert fuses into add)
        e = jnp.where(raw > 0, raw, neg_slope * raw) + mask
        # numerically-stable un-normalized softmax weights
        e = e - jnp.max(e, axis=-1, keepdims=True)
        p = jnp.exp(e).astype(jnp.bfloat16)                        # [TM, N]
        # one MXU matmul yields both the aggregate and the softmax denominator
        hh_aug = h_aug[:, hd * caug:(hd + 1) * caug]               # [N, C+1]
        agg_aug = jnp.dot(p, hh_aug, preferred_element_type=jnp.float32)
        inv = pl.reciprocal(agg_aug[:, out_ch:out_ch + 1], approx=True)
        agg = agg_aug[:, :out_ch] * inv                            # [TM, C]
        if concat:
            head_out.append(agg)
        else:
            acc = agg if acc is None else acc + agg

    if concat:
        o = jnp.concatenate(head_out, axis=-1) + bias              # [TM, H*C]
    else:
        o = acc * (1.0 / float(heads)) + bias                      # mean + bias
    if apply_elu:
        o = elu(o)
    out_ref[...] = o.astype(out_ref.dtype)                         # one store


def gat_attention(mask_add, h_aug, a_src_t, a_dst, bias, *, heads, out_ch,
                  concat, apply_elu, tile):
    n = h_aug.shape[0]
    caug = out_ch + 1
    out_dim = heads * out_ch if concat else out_ch
    kernel = functools.partial(gat_attention_kernel, heads=heads,
                               out_ch=out_ch, concat=concat,
                               apply_elu=apply_elu)
    return pl.pallas_call(
        kernel,
        out_shape=jax.ShapeDtypeStruct((n, out_dim), jnp.float32),
        grid_spec=pltpu.PrefetchScalarGridSpec(
            num_scalar_prefetch=0,
            grid=(n // tile,),
            in_specs=[pl.BlockSpec((tile, n), lambda i: (i, 0)),        # mask
                      pl.BlockSpec((n, heads * caug), lambda i: (0, 0)),  # h_aug
                      pl.BlockSpec((heads, n), lambda i: (0, 0)),       # a_srcT
                      pl.BlockSpec((tile, heads), lambda i: (i, 0)),    # a_dst
                      pl.BlockSpec((1, out_dim), lambda i: (0, 0))],    # bias
            out_specs=pl.BlockSpec((tile, out_dim), lambda i: (i, 0))),
        compiler_params=pltpu.CompilerParams(
            dimension_semantics=("parallel",),
            vmem_limit_bytes=_VMEM_LIMIT),
    )(mask_add, h_aug, a_src_t, a_dst, bias)


# ---------------------------------------------------------------------------
# Parameter / input construction helpers (plain JAX, trace-time / tiny XLA ops)
# ---------------------------------------------------------------------------
def glorot(key, shape):
    fan_in, fan_out = shape[-2], shape[-1]
    limit = jnp.sqrt(6.0 / (fan_in + fan_out))
    return jax.random.uniform(key, shape, jnp.float32, -limit, limit)


def init_gat_params(key, in_channels, out_channels, hid=8, heads=8):
    k = jax.random.split(key, 6)
    return {
        # layer 1: GATConv(in_channels, hid, heads=heads, concat=True)
        "w1": glorot(k[0], (in_channels, heads * hid)),
        "att_src1": glorot(k[1], (heads, hid)),
        "att_dst1": glorot(k[2], (heads, hid)),
        "bias1": jnp.zeros((1, heads * hid), jnp.float32),
        # layer 2: GATConv(heads*hid, out_channels, heads=1, concat=False)
        "w2": glorot(k[3], (heads * hid, out_channels)),
        "att_src2": glorot(k[4], (1, out_channels)),
        "att_dst2": glorot(k[5], (1, out_channels)),
        "bias2": jnp.zeros((1, out_channels), jnp.float32),
    }


def build_att_matrix(att_src, att_dst):
    """Block-diagonal [H*C, 2H] so (x@W)@a_cat gives all per-head scores."""
    h, c = att_src.shape
    a = jnp.zeros((h * c, 2 * h), jnp.float32)
    for hd in range(h):
        a = a.at[hd * c:(hd + 1) * c, hd].set(att_src[hd])
        a = a.at[hd * c:(hd + 1) * c, h + hd].set(att_dst[hd])
    return a


def build_additive_mask(edge_index, num_nodes):
    """Additive mask[dst, src]: 0.0 on edges (+ self loops), -1e30 elsewhere.
    Stored in bf16 (halves the dominant N^2 HBM traffic); shared by both layers
    and all heads."""
    src, dst = edge_index[0], edge_index[1]
    adj = jnp.zeros((num_nodes, num_nodes), jnp.float32)
    adj = adj.at[dst, src].set(1.0)
    adj = jnp.maximum(adj, jnp.eye(num_nodes, dtype=jnp.float32))
    return jnp.where(adj > 0, 0.0, -1e30).astype(jnp.bfloat16)


def _append_ones_per_head(h, heads, out_ch):
    """[N, H*C] -> [N, H*(C+1)] with a ones column per head (softmax denom
    folded into the aggregation matmul)."""
    n = h.shape[0]
    h3 = h.reshape(n, heads, out_ch)
    ones = jnp.ones((n, heads, 1), h.dtype)
    return jnp.concatenate([h3, ones], axis=-1).reshape(n, heads * (out_ch + 1))


def gat_layer(x, mask_add, w, att_src, att_dst, bias, *, heads, out_ch,
              concat, apply_elu, tile):
    a_cat = build_att_matrix(att_src, att_dst)
    w_combo = jnp.concatenate([w, w @ a_cat], axis=1)     # trace-time fusion
    h, alpha = gat_project(x, w_combo, hc=heads * out_ch, tile=tile)
    h_aug = _append_ones_per_head(h, heads, out_ch)
    a_src_t = jnp.transpose(alpha[:, :heads])              # [H, N], once/layer
    a_dst = alpha[:, heads:]                               # [N, H]
    return gat_attention(mask_add, h_aug, a_src_t, a_dst, bias, heads=heads,
                         out_ch=out_ch, concat=concat, apply_elu=apply_elu,
                         tile=tile)


def gat_forward(params, x, edge_index, edge_weight=None, *, hid=8, heads=8,
                max_row_tile=128):
    # edge_weight is unused by GATConv.
    # TODO(synk): dropout (p=0.6) on features and attention coefficients is an
    # inference-mode identity here.
    n = x.shape[0]
    tile = _choose_row_tile(n, cap=max_row_tile)
    mask_add = build_additive_mask(edge_index, n)          # shared by layers

    # Layer 1: GATConv(in, hid, heads=8, concat=True) fused with ELU.
    z1 = gat_layer(x, mask_add, params["w1"], params["att_src1"],
                   params["att_dst1"], params["bias1"], heads=heads,
                   out_ch=hid, concat=True, apply_elu=True, tile=tile)

    # Layer 2: GATConv(heads*hid, out, heads=1, concat=False), no activation.
    out_ch = params["w2"].shape[1]
    out = gat_layer(z1, mask_add, params["w2"], params["att_src2"],
                    params["att_dst2"], params["bias2"], heads=1,
                    out_ch=out_ch, concat=False, apply_elu=False, tile=tile)
    return out


if __name__ == "__main__":
    key = jax.random.PRNGKey(0)
    k_x, k_p = jax.random.split(key)

    N = 256           # number of graph nodes
    IN_CHANNELS = 32  # input feature dim
    OUT_CHANNELS = 4  # output classes
    HID = 8
    HEADS = 8

    # Node features.
    x = jax.random.normal(k_x, (N, IN_CHANNELS), jnp.float32)

    # Deterministic ring graph, both directions: E = 2*N edges.
    idx = jnp.arange(N)
    src = jnp.concatenate([idx, (idx + 1) % N])
    dst = jnp.concatenate([(idx + 1) % N, idx])
    edge_index = jnp.stack([src, dst], axis=0)  # [2, 2N]

    params = init_gat_params(k_p, IN_CHANNELS, OUT_CHANNELS, hid=HID,
                             heads=HEADS)

    fwd = jax.jit(functools.partial(gat_forward, hid=HID, heads=HEADS,
                                    max_row_tile=128))
    out = fwd(params, x, edge_index)
    out = jax.block_until_ready(out)
    assert out.shape == (N, OUT_CHANNELS)
    assert bool(jnp.all(jnp.isfinite(out)))
    print("KERNEL_OK")
</pallas_src>

<mosaic_0001>
module attributes {stable_mosaic.version = 11 : i64} {
  func.func @gat_project_kernel(%arg0: i32, %arg1: memref<64x32xf32, #tpu.memory_space<vmem>>, %arg2: memref<32x80xf32, #tpu.memory_space<vmem>>, %arg3: memref<64x64xbf16, #tpu.memory_space<vmem>>, %arg4: memref<64x16xf32, #tpu.memory_space<vmem>>) attributes {dimension_semantics = [#tpu.dimension_semantics<parallel>], iteration_bounds = array<i64: 4>, scalar_prefetch = 0 : i64, scratch_operands = 0 : i64, tpu.core_type = #tpu.core_type<tc>, window_params = [{transform_indices = @transform_0, window_bounds = array<i64: 64, 32>}, {pipeline_mode = #tpu.pipeline_mode<synchronous>, transform_indices = @transform_1, window_bounds = array<i64: 32, 80>}, {transform_indices = @transform_2, window_bounds = array<i64: 64, 64>}, {transform_indices = @transform_3, window_bounds = array<i64: 64, 16>}]} {
    %c0 = arith.constant 0 : index
    %c0_0 = arith.constant 0 : index
    %0 = vector.load %arg1[%c0, %c0_0] : memref<64x32xf32, #tpu.memory_space<vmem>>, vector<64x32xf32>
    %c0_1 = arith.constant 0 : index
    %c0_2 = arith.constant 0 : index
    %1 = vector.load %arg2[%c0_1, %c0_2] : memref<32x80xf32, #tpu.memory_space<vmem>>, vector<32x80xf32>
    %cst = arith.constant dense<0.000000e+00> : vector<64x80xf32>
    %2 = tpu.matmul %0, %1, %cst {dimension_numbers = #tpu.dot_dimension_numbers<[1], [0], [0], [1], [0, 0, 1, 1], [], []>} : vector<64x32xf32>, vector<32x80xf32>, vector<64x80xf32> -> vector<64x80xf32>
    %3 = vector.extract_strided_slice %2 {offsets = [0, 0], sizes = [64, 64], strides = [1, 1]} : vector<64x80xf32> to vector<64x64xf32>
    %4 = arith.truncf %3 : vector<64x64xf32> to vector<64x64xbf16>
    %c0_3 = arith.constant 0 : index
    %c0_4 = arith.constant 0 : index
    %5 = vector.load %arg3[%c0_3, %c0_4] : memref<64x64xbf16, #tpu.memory_space<vmem>>, vector<64x64xbf16>
    tpu.vector_store %arg3[%c0_3, %c0_4], %4 {strides = array<i32>} : memref<64x64xbf16, #tpu.memory_space<vmem>>, vector<64x64xbf16>,
    %6 = vector.extract_strided_slice %2 {offsets = [0, 64], sizes = [64, 16], strides = [1, 1]} : vector<64x80xf32> to vector<64x16xf32>
    %c0_5 = arith.constant 0 : index
    %c0_6 = arith.constant 0 : index
    %7 = vector.load %arg4[%c0_5, %c0_6] : memref<64x16xf32, #tpu.memory_space<vmem>>, vector<64x16xf32>
    tpu.vector_store %arg4[%c0_5, %c0_6], %6 {strides = array<i32>} : memref<64x16xf32, #tpu.memory_space<vmem>>, vector<64x16xf32>,
    return
  }
  func.func @transform_0(%arg0: i32) -> (i32, i32) {
    %c0_i32 = arith.constant 0 : i32
    %c0_i32_0 = arith.constant 0 : i32
    return %arg0, %c0_i32 : i32, i32
  }
  func.func @transform_1(%arg0: i32) -> (i32, i32) {
    %c0_i32 = arith.constant 0 : i32
    %c0_i32_0 = arith.constant 0 : i32
    %c0_i32_1 = arith.constant 0 : i32
    return %c0_i32, %c0_i32_0 : i32, i32
  }
  func.func @transform_2(%arg0: i32) -> (i32, i32) {
    %c0_i32 = arith.constant 0 : i32
    %c0_i32_0 = arith.constant 0 : i32
    return %arg0, %c0_i32 : i32, i32
  }
  func.func @transform_3(%arg0: i32) -> (i32, i32) {
    %c0_i32 = arith.constant 0 : i32
    %c0_i32_0 = arith.constant 0 : i32
    return %arg0, %c0_i32 : i32, i32
  }
}

module attributes {stable_mosaic.version = 11 : i64} {
  func.func @gat_project_kernel(%arg0: i32, %arg1: memref<64x64xf32, #tpu.memory_space<vmem>>, %arg2: memref<64x6xf32, #tpu.memory_space<vmem>>, %arg3: memref<64x4xbf16, #tpu.memory_space<vmem>>, %arg4: memref<64x2xf32, #tpu.memory_space<vmem>>) attributes {dimension_semantics = [#tpu.dimension_semantics<parallel>], iteration_bounds = array<i64: 4>, scalar_prefetch = 0 : i64, scratch_operands = 0 : i64, tpu.core_type = #tpu.core_type<tc>, window_params = [{transform_indices = @transform_0, window_bounds = array<i64: 64, 64>}, {pipeline_mode = #tpu.pipeline_mode<synchronous>, transform_indices = @transform_1, window_bounds = array<i64: 64, 6>}, {transform_indices = @transform_2, window_bounds = array<i64: 64, 4>}, {transform_indices = @transform_3, window_bounds = array<i64: 64, 2>}]} {
    %c0 = arith.constant 0 : index
    %c0_0 = arith.constant 0 : index
    %0 = vector.load %arg1[%c0, %c0_0] : memref<64x64xf32, #tpu.memory_space<vmem>>, vector<64x64xf32>
    %c0_1 = arith.constant 0 : index
    %c0_2 = arith.constant 0 : index
    %1 = vector.load %arg2[%c0_1, %c0_2] : memref<64x6xf32, #tpu.memory_space<vmem>>, vector<64x6xf32>
    %cst = arith.constant dense<0.000000e+00> : vector<64x6xf32>
    %2 = tpu.matmul %0, %1, %cst {dimension_numbers = #tpu.dot_dimension_numbers<[1], [0], [0], [1], [0, 0, 1, 1], [], []>} : vector<64x64xf32>, vector<64x6xf32>, vector<64x6xf32> -> vector<64x6xf32>
    %3 = vector.extract_strided_slice %2 {offsets = [0, 0], sizes = [64, 4], strides = [1, 1]} : vector<64x6xf32> to vector<64x4xf32>
    %4 = arith.truncf %3 : vector<64x4xf32> to vector<64x4xbf16>
    %c0_3 = arith.constant 0 : index
    %c0_4 = arith.constant 0 : index
    %5 = vector.load %arg3[%c0_3, %c0_4] : memref<64x4xbf16, #tpu.memory_space<vmem>>, vector<64x4xbf16>
    tpu.vector_store %arg3[%c0_3, %c0_4], %4 {strides = array<i32>} : memref<64x4xbf16, #tpu.memory_space<vmem>>, vector<64x4xbf16>,
    %6 = vector.extract_strided_slice %2 {offsets = [0, 4], sizes = [64, 2], strides = [1, 1]} : vector<64x6xf32> to vector<64x2xf32>
    %c0_5 = arith.constant 0 : index
    %c0_6 = arith.constant 0 : index
    %7 = vector.load %arg4[%c0_5, %c0_6] : memref<64x2xf32, #tpu.memory_space<vmem>>, vector<64x2xf32>
    tpu.vector_store %arg4[%c0_5, %c0_6], %6 {strides = array<i32>} : memref<64x2xf32, #tpu.memory_space<vmem>>, vector<64x2xf32>,
    return
  }
  func.func @transform_0(%arg0: i32) -> (i32, i32) {
    %c0_i32 = arith.constant 0 : i32
    %c0_i32_0 = arith.constant 0 : i32
    return %arg0, %c0_i32 : i32, i32
  }
  func.func @transform_1(%arg0: i32) -> (i32, i32) {
    %c0_i32 = arith.constant 0 : i32
    %c0_i32_0 = arith.constant 0 : i32
    %c0_i32_1 = arith.constant 0 : i32
    return %c0_i32, %c0_i32_0 : i32, i32
  }
  func.func @transform_2(%arg0: i32) -> (i32, i32) {
    %c0_i32 = arith.constant 0 : i32
    %c0_i32_0 = arith.constant 0 : i32
    return %arg0, %c0_i32 : i32, i32
  }
  func.func @transform_3(%arg0: i32) -> (i32, i32) {
    %c0_i32 = arith.constant 0 : i32
    %c0_i32_0 = arith.constant 0 : i32
    return %arg0, %c0_i32 : i32, i32
  }
}

module attributes {stable_mosaic.version = 11 : i64} {
  func.func @gat_attention_kernel(%arg0: i32, %arg1: memref<64x256xbf16, #tpu.memory_space<vmem>>, %arg2: memref<256x72xbf16, #tpu.memory_space<vmem>>, %arg3: memref<8x256xf32, #tpu.memory_space<vmem>>, %arg4: memref<64x8xf32, #tpu.memory_space<vmem>>, %arg5: memref<1x64xf32, #tpu.memory_space<vmem>>, %arg6: memref<64x64xf32, #tpu.memory_space<vmem>>) attributes {dimension_semantics = [#tpu.dimension_semantics<parallel>], iteration_bounds = array<i64: 4>, scalar_prefetch = 0 : i64, scratch_operands = 0 : i64, tpu.core_type = #tpu.core_type<tc>, window_params = [{transform_indices = @transform_0, window_bounds = array<i64: 64, 256>}, {pipeline_mode = #tpu.pipeline_mode<synchronous>, transform_indices = @transform_1, window_bounds = array<i64: 256, 72>}, {pipeline_mode = #tpu.pipeline_mode<synchronous>, transform_indices = @transform_2, window_bounds = array<i64: 8, 256>}, {transform_indices = @transform_3, window_bounds = array<i64: 64, 8>}, {pipeline_mode = #tpu.pipeline_mode<synchronous>, transform_indices = @transform_4, window_bounds = array<i64: 1, 64>}, {transform_indices = @transform_5, window_bounds = array<i64: 64, 64>}]} {
    %c0 = arith.constant 0 : index
    %c0_0 = arith.constant 0 : index
    %0 = vector.load %arg1[%c0, %c0_0] : memref<64x256xbf16, #tpu.memory_space<vmem>>, vector<64x256xbf16>
    %c0_1 = arith.constant 0 : index
    %c0_2 = arith.constant 0 : index
    %1 = vector.load %arg2[%c0_1, %c0_2] : memref<256x72xbf16, #tpu.memory_space<vmem>>, vector<256x72xbf16>
    %c0_3 = arith.constant 0 : index
    %c0_4 = arith.constant 0 : index
    %2 = vector.load %arg3[%c0_3, %c0_4] : memref<8x256xf32, #tpu.memory_space<vmem>>, vector<8x256xf32>
    %c0_5 = arith.constant 0 : index
    %c0_6 = arith.constant 0 : index
    %3 = vector.load %arg4[%c0_5, %c0_6] : memref<64x8xf32, #tpu.memory_space<vmem>>, vector<64x8xf32>
    %c0_7 = arith.constant 0 : index
    %c0_8 = arith.constant 0 : index
    %4 = vector.load %arg5[%c0_7, %c0_8] : memref<1x64xf32, #tpu.memory_space<vmem>>, vector<1x64xf32>
    %5 = vector.extract_strided_slice %3 {offsets = [0, 0], sizes = [64, 1], strides = [1, 1]} : vector<64x8xf32> to vector<64x1xf32>
    %6 = vector.extract_strided_slice %2 {offsets = [0, 0], sizes = [1, 256], strides = [1, 1]} : vector<8x256xf32> to vector<1x256xf32>
    %7 = vector.broadcast %5 : vector<64x1xf32> to vector<64x256xf32>
    %8 = vector.broadcast %6 : vector<1x256xf32> to vector<64x256xf32>
    %9 = arith.addf %7, %8 : vector<64x256xf32>
    %cst = arith.constant 0.000000e+00 : f32
    %10 = vector.broadcast %cst : f32 to vector<64x256xf32>
    %11 = arith.cmpf ogt, %9, %10 : vector<64x256xf32>
    %cst_9 = arith.constant 2.000000e-01 : f32
    %12 = vector.broadcast %cst_9 : f32 to vector<64x256xf32>
    %13 = arith.mulf %12, %9 : vector<64x256xf32>
    %14 = arith.select %11, %9, %13 : vector<64x256xi1>, vector<64x256xf32>
    %15 = arith.extf %0 : vector<64x256xbf16> to vector<64x256xf32>
    %16 = arith.addf %14, %15 : vector<64x256xf32>
    %cst_10 = arith.constant dense<0xFF800000> : vector<64xf32>
    %17 = vector.multi_reduction <maximumf>, %16, %cst_10 [1] : vector<64x256xf32> to vector<64xf32>
    %18 = vector.shape_cast %17 : vector<64xf32> to vector<64x1xf32>
    %19 = vector.broadcast %18 : vector<64x1xf32> to vector<64x256xf32>
    %20 = arith.subf %16, %19 : vector<64x256xf32>
    %21 = math.exp %20 : vector<64x256xf32>
    %22 = arith.truncf %21 : vector<64x256xf32> to vector<64x256xbf16>
    %23 = vector.extract_strided_slice %1 {offsets = [0, 0], sizes = [256, 9], strides = [1, 1]} : vector<256x72xbf16> to vector<256x9xbf16>
    %cst_11 = arith.constant dense<0.000000e+00> : vector<64x9xf32>
    %24 = tpu.matmul %22, %23, %cst_11 {dimension_numbers = #tpu.dot_dimension_numbers<[1], [0], [0], [1], [0, 0, 1, 1], [], []>} : vector<64x256xbf16>, vector<256x9xbf16>, vector<64x9xf32> -> vector<64x9xf32>
    %25 = vector.extract_strided_slice %24 {offsets = [0, 8], sizes = [64, 1], strides = [1, 1]} : vector<64x9xf32> to vector<64x1xf32>
    %26 = tpu.reciprocal %25 {approx = true} : vector<64x1xf32> -> vector<64x1xf32>
    %27 = vector.extract_strided_slice %24 {offsets = [0, 0], sizes = [64, 8], strides = [1, 1]} : vector<64x9xf32> to vector<64x8xf32>
    %28 = vector.broadcast %26 : vector<64x1xf32> to vector<64x8xf32>
    %29 = arith.mulf %27, %28 : vector<64x8xf32>
    %30 = vector.extract_strided_slice %3 {offsets = [0, 1], sizes = [64, 1], strides = [1, 1]} : vector<64x8xf32> to vector<64x1xf32>
    %31 = vector.extract_strided_slice %2 {offsets = [1, 0], sizes = [1, 256], strides = [1, 1]} : vector<8x256xf32> to vector<1x256xf32>
    %32 = vector.broadcast %30 : vector<64x1xf32> to vector<64x256xf32>
    %33 = vector.broadcast %31 : vector<1x256xf32> to vector<64x256xf32>
    %34 = arith.addf %32, %33 : vector<64x256xf32>
    %cst_12 = arith.constant 0.000000e+00 : f32
    %35 = vector.broadcast %cst_12 : f32 to vector<64x256xf32>
    %36 = arith.cmpf ogt, %34, %35 : vector<64x256xf32>
    %cst_13 = arith.constant 2.000000e-01 : f32
    %37 = vector.broadcast %cst_13 : f32 to vector<64x256xf32>
    %38 = arith.mulf %37, %34 : vector<64x256xf32>
    %39 = arith.select %36, %34, %38 : vector<64x256xi1>, vector<64x256xf32>
    %40 = arith.extf %0 : vector<64x256xbf16> to vector<64x256xf32>
    %41 = arith.addf %39, %40 : vector<64x256xf32>
    %cst_14 = arith.constant dense<0xFF800000> : vector<64xf32>
    %42 = vector.multi_reduction <maximumf>, %41, %cst_14 [1] : vector<64x256xf32> to vector<64xf32>
    %43 = vector.shape_cast %42 : vector<64xf32> to vector<64x1xf32>
    %44 = vector.broadcast %43 : vector<64x1xf32> to vector<64x256xf32>
    %45 = arith.subf %41, %44 : vector<64x256xf32>
    %46 = math.exp %45 : vector<64x256xf32>
    %47 = arith.truncf %46 : vector<64x256xf32> to vector<64x256xbf16>
    %48 = vector.extract_strided_slice %1 {offsets = [0, 9], sizes = [256, 9], strides = [1, 1]} : vector<256x72xbf16> to vector<256x9xbf16>
    %cst_15 = arith.constant dense<0.000000e+00> : vector<64x9xf32>
    %49 = tpu.matmul %47, %48, %cst_15 {dimension_numbers = #tpu.dot_dimension_numbers<[1], [0], [0], [1], [0, 0, 1, 1], [], []>} : vector<64x256xbf16>, vector<256x9xbf16>, vector<64x9xf32> -> vector<64x9xf32>
    %50 = vector.extract_strided_slice %49 {offsets = [0, 8], sizes = [64, 1], strides = [1, 1]} : vector<64x9xf32> to vector<64x1xf32>
    %51 = tpu.reciprocal %50 {approx = true} : vector<64x1xf32> -> vector<64x1xf32>
    %52 = vector.extract_strided_slice %49 {offsets = [0, 0], sizes = [64, 8], strides = [1, 1]} : vector<64x9xf32> to vector<64x8xf32>
    %53 = vector.broadcast %51 : vector<64x1xf32> to vector<64x8xf32>
    %54 = arith.mulf %52, %53 : vector<64x8xf32>
    %55 = vector.extract_strided_slice %3 {offsets = [0, 2], sizes = [64, 1], strides = [1, 1]} : vector<64x8xf32> to vector<64x1xf32>
    %56 = vector.extract_strided_slice %2 {offsets = [2, 0], sizes = [1, 256], strides = [1, 1]} : vector<8x256xf32> to vector<1x256xf32>
    %57 = vector.broadcast %55 : vector<64x1xf32> to vector<64x256xf32>
    %58 = vector.broadcast %56 : vector<1x256xf32> to vector<64x256xf32>
    %59 = arith.addf %57, %58 : vector<64x256xf32>
    %cst_16 = arith.constant 0.000000e+00 : f32
    %60 = vector.broadcast %cst_16 : f32 to vector<64x256xf32>
    %61 = arith.cmpf ogt, %59, %60 : vector<64x256xf32>
    %cst_17 = arith.constant 2.000000e-01 : f32
    %62 = vector.broadcast %cst_17 : f32 to vector<64x256xf32>
    %63 = arith.mulf %62, %59 : vector<64x256xf32>
    %64 = arith.select %61, %59, %63 : vector<64x256xi1>, vector<64x256xf32>
    %65 = arith.extf %0 : vector<64x256xbf16> to vector<64x256xf32>
    %66 = arith.addf %64, %65 : vector<64x256xf32>
    %cst_18 = arith.constant dense<0xFF800000> : vector<64xf32>
    %67 = vector.multi_reduction <maximumf>, %66, %cst_18 [1] : vector<64x256xf32> to vector<64xf32>
    %68 = vector.shape_cast %67 : vector<64xf32> to vector<64x1xf32>
    %69 = vector.broadcast %68 : vector<64x1xf32> to vector<64x256xf32>
    %70 = arith.subf %66, %69 : vector<64x256xf32>
    %71 = math.exp %70 : vector<64x256xf32>
    %72 = arith.truncf %71 : vector<64x256xf32> to vector<64x256xbf16>
    %73 = vector.extract_strided_slice %1 {offsets = [0, 18], sizes = [256, 9], strides = [1, 1]} : vector<256x72xbf16> to vector<256x9xbf16>
    %cst_19 = arith.constant dense<0.000000e+00> : vector<64x9xf32>
    %74 = tpu.matmul %72, %73, %cst_19 {dimension_numbers = #tpu.dot_dimension_numbers<[1], [0], [0], [1], [0, 0, 1, 1], [], []>} : vector<64x256xbf16>, vector<256x9xbf16>, vector<64x9xf32> -> vector<64x9xf32>
    %75 = vector.extract_strided_slice %74 {offsets = [0, 8], sizes = [64, 1], strides = [1, 1]} : vector<64x9xf32> to vector<64x1xf32>
    %76 = tpu.reciprocal %75 {approx = true} : vector<64x1xf32> -> vector<64x1xf32>
    %77 = vector.extract_strided_slice %74 {offsets = [0, 0], sizes = [64, 8], strides = [1, 1]} : vector<64x9xf32> to vector<64x8xf32>
    %78 = vector.broadcast %76 : vector<64x1xf32> to vector<64x8xf32>
    %79 = arith.mulf %77, %78 : vector<64x8xf32>
    %80 = vector.extract_strided_slice %3 {offsets = [0, 3], sizes = [64, 1], strides = [1, 1]} : vector<64x8xf32> to vector<64x1xf32>
    %81 = vector.extract_strided_slice %2 {offsets = [3, 0], sizes = [1, 256], strides = [1, 1]} : vector<8x256xf32> to vector<1x256xf32>
    %82 = vector.broadcast %80 : vector<64x1xf32> to vector<64x256xf32>
    %83 = vector.broadcast %81 : vector<1x256xf32> to vector<64x256xf32>
    %84 = arith.addf %82, %83 : vector<64x256xf32>
    %cst_20 = arith.constant 0.000000e+00 : f32
    %85 = vector.broadcast %cst_20 : f32 to vector<64x256xf32>
    %86 = arith.cmpf ogt, %84, %85 : vector<64x256xf32>
    %cst_21 = arith.constant 2.000000e-01 : f32
    %87 = vector.broadcast %cst_21 : f32 to vector<64x256xf32>
    %88 = arith.mulf %87, %84 : vector<64x256xf32>
    %89 = arith.select %86, %84, %88 : vector<64x256xi1>, vector<64x256xf32>
    %90 = arith.extf %0 : vector<64x256xbf16> to vector<64x256xf32>
    %91 = arith.addf %89, %90 : vector<64x256xf32>
    %cst_22 = arith.constant dense<0xFF800000> : vector<64xf32>
    %92 = vector.multi_reduction <maximumf>, %91, %cst_22 [1] : vector<64x256xf32> to vector<64xf32>
    %93 = vector.shape_cast %92 : vector<64xf32> to vector<64x1xf32>
    %94 = vector.broadcast %93 : vector<64x1xf32> to vector<64x256xf32>
    %95 = arith.subf %91, %94 : vector<64x256xf32>
    %96 = math.exp %95 : vector<64x256xf32>
    %97 = arith.truncf %96 : vector<64x256xf32> to vector<64x256xbf16>
    %98 = vector.extract_strided_slice %1 {offsets = [0, 27], sizes = [256, 9], strides = [1, 1]} : vector<256x72xbf16> to vector<256x9xbf16>
    %cst_23 = arith.constant dense<0.000000e+00> : vector<64x9xf32>
    %99 = tpu.matmul %97, %98, %cst_23 {dimension_numbers = #tpu.dot_dimension_numbers<[1], [0], [0], [1], [0, 0, 1, 1], [], []>} : vector<64x256xbf16>, vector<256x9xbf16>, vector<64x9xf32> -> vector<64x9xf32>
    %100 = vector.extract_strided_slice %99 {offsets = [0, 8], sizes = [64, 1], strides = [1, 1]} : vector<64x9xf32> to vector<64x1xf32>
    %101 = tpu.reciprocal %100 {approx = true} : vector<64x1xf32> -> vector<64x1xf32>
    %102 = vector.extract_strided_slice %99 {offsets = [0, 0], sizes = [64, 8], strides = [1, 1]} : vector<64x9xf32> to vector<64x8xf32>
    %103 = vector.broadcast %101 : vector<64x1xf32> to vector<64x8xf32>
    %104 = arith.mulf %102, %103 : vector<64x8xf32>
    %105 = vector.extract_strided_slice %3 {offsets = [0, 4], sizes = [64, 1], strides = [1, 1]} : vector<64x8xf32> to vector<64x1xf32>
    %106 = vector.extract_strided_slice %2 {offsets = [4, 0], sizes = [1, 256], strides = [1, 1]} : vector<8x256xf32> to vector<1x256xf32>
    %107 = vector.broadcast %105 : vector<64x1xf32> to vector<64x256xf32>
    %108 = vector.broadcast %106 : vector<1x256xf32> to vector<64x256xf32>
    %109 = arith.addf %107, %108 : vector<64x256xf32>
    %cst_24 = arith.constant 0.000000e+00 : f32
    %110 = vector.broadcast %cst_24 : f32 to vector<64x256xf32>
    %111 = arith.cmpf ogt, %109, %110 : vector<64x256xf32>
    %cst_25 = arith.constant 2.000000e-01 : f32
    %112 = vector.broadcast %cst_25 : f32 to vector<64x256xf32>
    %113 = arith.mulf %112, %109 : vector<64x256xf32>
    %114 = arith.select %111, %109, %113 : vector<64x256xi1>, vector<64x256xf32>
    %115 = arith.extf %0 : vector<64x256xbf16> to vector<64x256xf32>
    %116 = arith.addf %114, %115 : vector<64x256xf32>
    %cst_26 = arith.constant dense<0xFF800000> : vector<64xf32>
    %117 = vector.multi_reduction <maximumf>, %116, %cst_26 [1] : vector<64x256xf32> to vector<64xf32>
    %118 = vector.shape_cast %117 : vector<64xf32> to vector<64x1xf32>
    %119 = vector.broadcast %118 : vector<64x1xf32> to vector<64x256xf32>
    %120 = arith.subf %116, %119 : vector<64x256xf32>
    %121 = math.exp %120 : vector<64x256xf32>
    %122 = arith.truncf %121 : vector<64x256xf32> to vector<64x256xbf16>
    %123 = vector.extract_strided_slice %1 {offsets = [0, 36], sizes = [256, 9], strides = [1, 1]} : vector<256x72xbf16> to vector<256x9xbf16>
    %cst_27 = arith.constant dense<0.000000e+00> : vector<64x9xf32>
    %124 = tpu.matmul %122, %123, %cst_27 {dimension_numbers = #tpu.dot_dimension_numbers<[1], [0], [0], [1], [0, 0, 1, 1], [], []>} : vector<64x256xbf16>, vector<256x9xbf16>, vector<64x9xf32> -> vector<64x9xf32>
    %125 = vector.extract_strided_slice %124 {offsets = [0, 8], sizes = [64, 1], strides = [1, 1]} : vector<64x9xf32> to vector<64x1xf32>
    %126 = tpu.reciprocal %125 {approx = true} : vector<64x1xf32> -> vector<64x1xf32>
    %127 = vector.extract_strided_slice %124 {offsets = [0, 0], sizes = [64, 8], strides = [1, 1]} : vector<64x9xf32> to vector<64x8xf32>
    %128 = vector.broadcast %126 : vector<64x1xf32> to vector<64x8xf32>
    %129 = arith.mulf %127, %128 : vector<64x8xf32>
    %130 = vector.extract_strided_slice %3 {offsets = [0, 5], sizes = [64, 1], strides = [1, 1]} : vector<64x8xf32> to vector<64x1xf32>
    %131 = vector.extract_strided_slice %2 {offsets = [5, 0], sizes = [1, 256], strides = [1, 1]} : vector<8x256xf32> to vector<1x256xf32>
    %132 = vector.broadcast %130 : vector<64x1xf32> to vector<64x256xf32>
    %133 = vector.broadcast %131 : vector<1x256xf32> to vector<64x256xf32>
    %134 = arith.addf %132, %133 : vector<64x256xf32>
    %cst_28 = arith.constant 0.000000e+00 : f32
    %135 = vector.broadcast %cst_28 : f32 to vector<64x256xf32>
    %136 = arith.cmpf ogt, %134, %135 : vector<64x256xf32>
    %cst_29 = arith.constant 2.000000e-01 : f32
    %137 = vector.broadcast %cst_29 : f32 to vector<64x256xf32>
    %138 = arith.mulf %137, %134 : vector<64x256xf32>
    %139 = arith.select %136, %134, %138 : vector<64x256xi1>, vector<64x256xf32>
    %140 = arith.extf %0 : vector<64x256xbf16> to vector<64x256xf32>
    %141 = arith.addf %139, %140 : vector<64x256xf32>
    %cst_30 = arith.constant dense<0xFF800000> : vector<64xf32>
    %142 = vector.multi_reduction <maximumf>, %141, %cst_30 [1] : vector<64x256xf32> to vector<64xf32>
    %143 = vector.shape_cast %142 : vector<64xf32> to vector<64x1xf32>
    %144 = vector.broadcast %143 : vector<64x1xf32> to vector<64x256xf32>
    %145 = arith.subf %141, %144 : vector<64x256xf32>
    %146 = math.exp %145 : vector<64x256xf32>
    %147 = arith.truncf %146 : vector<64x256xf32> to vector<64x256xbf16>
    %148 = vector.extract_strided_slice %1 {offsets = [0, 45], sizes = [256, 9], strides = [1, 1]} : vector<256x72xbf16> to vector<256x9xbf16>
    %cst_31 = arith.constant dense<0.000000e+00> : vector<64x9xf32>
    %149 = tpu.matmul %147, %148, %cst_31 {dimension_numbers = #tpu.dot_dimension_numbers<[1], [0], [0], [1], [0, 0, 1, 1], [], []>} : vector<64x256xbf16>, vector<256x9xbf16>, vector<64x9xf32> -> vector<64x9xf32>
    %150 = vector.extract_strided_slice %149 {offsets = [0, 8], sizes = [64, 1], strides = [1, 1]} : vector<64x9xf32> to vector<64x1xf32>
    %151 = tpu.reciprocal %150 {approx = true} : vector<64x1xf32> -> vector<64x1xf32>
    %152 = vector.extract_strided_slice %149 {offsets = [0, 0], sizes = [64, 8], strides = [1, 1]} : vector<64x9xf32> to vector<64x8xf32>
    %153 = vector.broadcast %151 : vector<64x1xf32> to vector<64x8xf32>
    %154 = arith.mulf %152, %153 : vector<64x8xf32>
    %155 = vector.extract_strided_slice %3 {offsets = [0, 6], sizes = [64, 1], strides = [1, 1]} : vector<64x8xf32> to vector<64x1xf32>
    %156 = vector.extract_strided_slice %2 {offsets = [6, 0], sizes = [1, 256], strides = [1, 1]} : vector<8x256xf32> to vector<1x256xf32>
    %157 = vector.broadcast %155 : vector<64x1xf32> to vector<64x256xf32>
    %158 = vector.broadcast %156 : vector<1x256xf32> to vector<64x256xf32>
    %159 = arith.addf %157, %158 : vector<64x256xf32>
    %cst_32 = arith.constant 0.000000e+00 : f32
    %160 = vector.broadcast %cst_32 : f32 to vector<64x256xf32>
    %161 = arith.cmpf ogt, %159, %160 : vector<64x256xf32>
    %cst_33 = arith.constant 2.000000e-01 : f32
    %162 = vector.broadcast %cst_33 : f32 to vector<64x256xf32>
    %163 = arith.mulf %162, %159 : vector<64x256xf32>
    %164 = arith.select %161, %159, %163 : vector<64x256xi1>, vector<64x256xf32>
    %165 = arith.extf %0 : vector<64x256xbf16> to vector<64x256xf32>
    %166 = arith.addf %164, %165 : vector<64x256xf32>
    %cst_34 = arith.constant dense<0xFF800000> : vector<64xf32>
    %167 = vector.multi_reduction <maximumf>, %166, %cst_34 [1] : vector<64x256xf32> to vector<64xf32>
    %168 = vector.shape_cast %167 : vector<64xf32> to vector<64x1xf32>
    %169 = vector.broadcast %168 : vector<64x1xf32> to vector<64x256xf32>
    %170 = arith.subf %166, %169 : vector<64x256xf32>
    %171 = math.exp %170 : vector<64x256xf32>
    %172 = arith.truncf %171 : vector<64x256xf32> to vector<64x256xbf16>
    %173 = vector.extract_strided_slice %1 {offsets = [0, 54], sizes = [256, 9], strides = [1, 1]} : vector<256x72xbf16> to vector<256x9xbf16>
    %cst_35 = arith.constant dense<0.000000e+00> : vector<64x9xf32>
    %174 = tpu.matmul %172, %173, %cst_35 {dimension_numbers = #tpu.dot_dimension_numbers<[1], [0], [0], [1], [0, 0, 1, 1], [], []>} : vector<64x256xbf16>, vector<256x9xbf16>, vector<64x9xf32> -> vector<64x9xf32>
    %175 = vector.extract_strided_slice %174 {offsets = [0, 8], sizes = [64, 1], strides = [1, 1]} : vector<64x9xf32> to vector<64x1xf32>
    %176 = tpu.reciprocal %175 {approx = true} : vector<64x1xf32> -> vector<64x1xf32>
    %177 = vector.extract_strided_slice %174 {offsets = [0, 0], sizes = [64, 8], strides = [1, 1]} : vector<64x9xf32> to vector<64x8xf32>
    %178 = vector.broadcast %176 : vector<64x1xf32> to vector<64x8xf32>
    %179 = arith.mulf %177, %178 : vector<64x8xf32>
    %180 = vector.extract_strided_slice %3 {offsets = [0, 7], sizes = [64, 1], strides = [1, 1]} : vector<64x8xf32> to vector<64x1xf32>
    %181 = vector.extract_strided_slice %2 {offsets = [7, 0], sizes = [1, 256], strides = [1, 1]} : vector<8x256xf32> to vector<1x256xf32>
    %182 = vector.broadcast %180 : vector<64x1xf32> to vector<64x256xf32>
    %183 = vector.broadcast %181 : vector<1x256xf32> to vector<64x256xf32>
    %184 = arith.addf %182, %183 : vector<64x256xf32>
    %cst_36 = arith.constant 0.000000e+00 : f32
    %185 = vector.broadcast %cst_36 : f32 to vector<64x256xf32>
    %186 = arith.cmpf ogt, %184, %185 : vector<64x256xf32>
    %cst_37 = arith.constant 2.000000e-01 : f32
    %187 = vector.broadcast %cst_37 : f32 to vector<64x256xf32>
    %188 = arith.mulf %187, %184 : vector<64x256xf32>
    %189 = arith.select %186, %184, %188 : vector<64x256xi1>, vector<64x256xf32>
    %190 = arith.extf %0 : vector<64x256xbf16> to vector<64x256xf32>
    %191 = arith.addf %189, %190 : vector<64x256xf32>
    %cst_38 = arith.constant dense<0xFF800000> : vector<64xf32>
    %192 = vector.multi_reduction <maximumf>, %191, %cst_38 [1] : vector<64x256xf32> to vector<64xf32>
    %193 = vector.shape_cast %192 : vector<64xf32> to vector<64x1xf32>
    %194 = vector.broadcast %193 : vector<64x1xf32> to vector<64x256xf32>
    %195 = arith.subf %191, %194 : vector<64x256xf32>
    %196 = math.exp %195 : vector<64x256xf32>
    %197 = arith.truncf %196 : vector<64x256xf32> to vector<64x256xbf16>
    %198 = vector.extract_strided_slice %1 {offsets = [0, 63], sizes = [256, 9], strides = [1, 1]} : vector<256x72xbf16> to vector<256x9xbf16>
    %cst_39 = arith.constant dense<0.000000e+00> : vector<64x9xf32>
    %199 = tpu.matmul %197, %198, %cst_39 {dimension_numbers = #tpu.dot_dimension_numbers<[1], [0], [0], [1], [0, 0, 1, 1], [], []>} : vector<64x256xbf16>, vector<256x9xbf16>, vector<64x9xf32> -> vector<64x9xf32>
    %200 = vector.extract_strided_slice %199 {offsets = [0, 8], sizes = [64, 1], strides = [1, 1]} : vector<64x9xf32> to vector<64x1xf32>
    %201 = tpu.reciprocal %200 {approx = true} : vector<64x1xf32> -> vector<64x1xf32>
    %202 = vector.extract_strided_slice %199 {offsets = [0, 0], sizes = [64, 8], strides = [1, 1]} : vector<64x9xf32> to vector<64x8xf32>
    %203 = vector.broadcast %201 : vector<64x1xf32> to vector<64x8xf32>
    %204 = arith.mulf %202, %203 : vector<64x8xf32>
    %205 = tpu.concatenate %29, %54, %79, %104, %129, %154, %179, %204 in 1 : vector<64x8xf32>, vector<64x8xf32>, vector<64x8xf32>, vector<64x8xf32>, vector<64x8xf32>, vector<64x8xf32>, vector<64x8xf32>, vector<64x8xf32> -> vector<64x64xf32>
    %206 = vector.broadcast %4 : vector<1x64xf32> to vector<64x64xf32>
    %207 = arith.addf %205, %206 : vector<64x64xf32>
    %cst_40 = arith.constant 0.000000e+00 : f32
    %208 = vector.broadcast %cst_40 : f32 to vector<64x64xf32>
    %209 = arith.cmpf ogt, %207, %208 : vector<64x64xf32>
    %cst_41 = arith.constant 0.000000e+00 : f32
    %210 = vector.broadcast %cst_41 : f32 to vector<64x64xf32>
    %211 = arith.minimumf %207, %210 : vector<64x64xf32>
    %212 = math.exp %211 : vector<64x64xf32>
    %cst_42 = arith.constant 1.000000e+00 : f32
    %213 = vector.broadcast %cst_42 : f32 to vector<64x64xf32>
    %214 = arith.subf %212, %213 : vector<64x64xf32>
    %215 = arith.select %209, %207, %214 : vector<64x64xi1>, vector<64x64xf32>
    %c0_43 = arith.constant 0 : index
    %c0_44 = arith.constant 0 : index
    %216 = vector.load %arg6[%c0_43, %c0_44] : memref<64x64xf32, #tpu.memory_space<vmem>>, vector<64x64xf32>
    tpu.vector_store %arg6[%c0_43, %c0_44], %215 {strides = array<i32>} : memref<64x64xf32, #tpu.memory_space<vmem>>, vector<64x64xf32>,
    return
  }
  func.func @transform_0(%arg0: i32) -> (i32, i32) {
    %c0_i32 = arith.constant 0 : i32
    %c0_i32_0 = arith.constant 0 : i32
    return %arg0, %c0_i32 : i32, i32
  }
  func.func @transform_1(%arg0: i32) -> (i32, i32) {
    %c0_i32 = arith.constant 0 : i32
    %c0_i32_0 = arith.constant 0 : i32
    %c0_i32_1 = arith.constant 0 : i32
    return %c0_i32, %c0_i32_0 : i32, i32
  }
  func.func @transform_2(%arg0: i32) -> (i32, i32) {
    %c0_i32 = arith.constant 0 : i32
    %c0_i32_0 = arith.constant 0 : i32
    %c0_i32_1 = arith.constant 0 : i32
    return %c0_i32, %c0_i32_0 : i32, i32
  }
  func.func @transform_3(%arg0: i32) -> (i32, i32) {
    %c0_i32 = arith.constant 0 : i32
    %c0_i32_0 = arith.constant 0 : i32
    return %arg0, %c0_i32 : i32, i32
  }
  func.func @transform_4(%arg0: i32) -> (i32, i32) {
    %c0_i32 = arith.constant 0 : i32
    %c0_i32_0 = arith.constant 0 : i32
    %c0_i32_1 = arith.constant 0 : i32
    return %c0_i32, %c0_i32_0 : i32, i32
  }
  func.func @transform_5(%arg0: i32) -> (i32, i32) {
    %c0_i32 = arith.constant 0 : i32
    %c0_i32_0 = arith.constant 0 : i32
    return %arg0, %c0_i32 : i32, i32
  }
}

module attributes {stable_mosaic.version = 11 : i64} {
  func.func @gat_attention_kernel(%arg0: i32, %arg1: memref<64x256xbf16, #tpu.memory_space<vmem>>, %arg2: memref<256x5xbf16, #tpu.memory_space<vmem>>, %arg3: memref<1x256xf32, #tpu.memory_space<vmem>>, %arg4: memref<64x1xf32, #tpu.memory_space<vmem>>, %arg5: memref<1x4xf32, #tpu.memory_space<vmem>>, %arg6: memref<64x4xf32, #tpu.memory_space<vmem>>) attributes {dimension_semantics = [#tpu.dimension_semantics<parallel>], iteration_bounds = array<i64: 4>, scalar_prefetch = 0 : i64, scratch_operands = 0 : i64, tpu.core_type = #tpu.core_type<tc>, window_params = [{transform_indices = @transform_0, window_bounds = array<i64: 64, 256>}, {pipeline_mode = #tpu.pipeline_mode<synchronous>, transform_indices = @transform_1, window_bounds = array<i64: 256, 5>}, {pipeline_mode = #tpu.pipeline_mode<synchronous>, transform_indices = @transform_2, window_bounds = array<i64: 1, 256>}, {transform_indices = @transform_3, window_bounds = array<i64: 64, 1>}, {pipeline_mode = #tpu.pipeline_mode<synchronous>, transform_indices = @transform_4, window_bounds = array<i64: 1, 4>}, {transform_indices = @transform_5, window_bounds = array<i64: 64, 4>}]} {
    %c0 = arith.constant 0 : index
    %c0_0 = arith.constant 0 : index
    %0 = vector.load %arg1[%c0, %c0_0] : memref<64x256xbf16, #tpu.memory_space<vmem>>, vector<64x256xbf16>
    %c0_1 = arith.constant 0 : index
    %c0_2 = arith.constant 0 : index
    %1 = vector.load %arg2[%c0_1, %c0_2] : memref<256x5xbf16, #tpu.memory_space<vmem>>, vector<256x5xbf16>
    %c0_3 = arith.constant 0 : index
    %c0_4 = arith.constant 0 : index
    %2 = vector.load %arg3[%c0_3, %c0_4] : memref<1x256xf32, #tpu.memory_space<vmem>>, vector<1x256xf32>
    %c0_5 = arith.constant 0 : index
    %c0_6 = arith.constant 0 : index
    %3 = vector.load %arg4[%c0_5, %c0_6] : memref<64x1xf32, #tpu.memory_space<vmem>>, vector<64x1xf32>
    %c0_7 = arith.constant 0 : index
    %c0_8 = arith.constant 0 : index
    %4 = vector.load %arg5[%c0_7, %c0_8] : memref<1x4xf32, #tpu.memory_space<vmem>>, vector<1x4xf32>
    %5 = vector.broadcast %3 : vector<64x1xf32> to vector<64x256xf32>
    %6 = vector.broadcast %2 : vector<1x256xf32> to vector<64x256xf32>
    %7 = arith.addf %5, %6 : vector<64x256xf32>
    %cst = arith.constant 0.000000e+00 : f32
    %8 = vector.broadcast %cst : f32 to vector<64x256xf32>
    %9 = arith.cmpf ogt, %7, %8 : vector<64x256xf32>
    %cst_9 = arith.constant 2.000000e-01 : f32
    %10 = vector.broadcast %cst_9 : f32 to vector<64x256xf32>
    %11 = arith.mulf %10, %7 : vector<64x256xf32>
    %12 = arith.select %9, %7, %11 : vector<64x256xi1>, vector<64x256xf32>
    %13 = arith.extf %0 : vector<64x256xbf16> to vector<64x256xf32>
    %14 = arith.addf %12, %13 : vector<64x256xf32>
    %cst_10 = arith.constant dense<0xFF800000> : vector<64xf32>
    %15 = vector.multi_reduction <maximumf>, %14, %cst_10 [1] : vector<64x256xf32> to vector<64xf32>
    %16 = vector.shape_cast %15 : vector<64xf32> to vector<64x1xf32>
    %17 = vector.broadcast %16 : vector<64x1xf32> to vector<64x256xf32>
    %18 = arith.subf %14, %17 : vector<64x256xf32>
    %19 = math.exp %18 : vector<64x256xf32>
    %20 = arith.truncf %19 : vector<64x256xf32> to vector<64x256xbf16>
    %cst_11 = arith.constant dense<0.000000e+00> : vector<64x5xf32>
    %21 = tpu.matmul %20, %1, %cst_11 {dimension_numbers = #tpu.dot_dimension_numbers<[1], [0], [0], [1], [0, 0, 1, 1], [], []>} : vector<64x256xbf16>, vector<256x5xbf16>, vector<64x5xf32> -> vector<64x5xf32>
    %22 = vector.extract_strided_slice %21 {offsets = [0, 4], sizes = [64, 1], strides = [1, 1]} : vector<64x5xf32> to vector<64x1xf32>
    %23 = tpu.reciprocal %22 {approx = true} : vector<64x1xf32> -> vector<64x1xf32>
    %24 = vector.extract_strided_slice %21 {offsets = [0, 0], sizes = [64, 4], strides = [1, 1]} : vector<64x5xf32> to vector<64x4xf32>
    %25 = vector.broadcast %23 : vector<64x1xf32> to vector<64x4xf32>
    %26 = arith.mulf %24, %25 : vector<64x4xf32>
    %cst_12 = arith.constant 1.000000e+00 : f32
    %27 = vector.broadcast %cst_12 : f32 to vector<64x4xf32>
    %28 = arith.mulf %26, %27 : vector<64x4xf32>
    %29 = vector.broadcast %4 : vector<1x4xf32> to vector<64x4xf32>
    %30 = arith.addf %28, %29 : vector<64x4xf32>
    %c0_13 = arith.constant 0 : index
    %c0_14 = arith.constant 0 : index
    %31 = vector.load %arg6[%c0_13, %c0_14] : memref<64x4xf32, #tpu.memory_space<vmem>>, vector<64x4xf32>
    tpu.vector_store %arg6[%c0_13, %c0_14], %30 {strides = array<i32>} : memref<64x4xf32, #tpu.memory_space<vmem>>, vector<64x4xf32>,
    return
  }
  func.func @transform_0(%arg0: i32) -> (i32, i32) {
    %c0_i32 = arith.constant 0 : i32
    %c0_i32_0 = arith.constant 0 : i32
    return %arg0, %c0_i32 : i32, i32
  }
  func.func @transform_1(%arg0: i32) -> (i32, i32) {
    %c0_i32 = arith.constant 0 : i32
    %c0_i32_0 = arith.constant 0 : i32
    %c0_i32_1 = arith.constant 0 : i32
    return %c0_i32, %c0_i32_0 : i32, i32
  }
  func.func @transform_2(%arg0: i32) -> (i32, i32) {
    %c0_i32 = arith.constant 0 : i32
    %c0_i32_0 = arith.constant 0 : i32
    %c0_i32_1 = arith.constant 0 : i32
    return %c0_i32, %c0_i32_0 : i32, i32
  }
  func.func @transform_3(%arg0: i32) -> (i32, i32) {
    %c0_i32 = arith.constant 0 : i32
    %c0_i32_0 = arith.constant 0 : i32
    return %arg0, %c0_i32 : i32, i32
  }
  func.func @transform_4(%arg0: i32) -> (i32, i32) {
    %c0_i32 = arith.constant 0 : i32
    %c0_i32_0 = arith.constant 0 : i32
    %c0_i32_1 = arith.constant 0 : i32
    return %c0_i32, %c0_i32_0 : i32, i32
  }
  func.func @transform_5(%arg0: i32) -> (i32, i32) {
    %c0_i32 = arith.constant 0 : i32
    %c0_i32_0 = arith.constant 0 : i32
    return %arg0, %c0_i32 : i32, i32
  }
}

</mosaic_0001>

<bundles_post_ra>
// kernel: gat_forward.6
= control target key start
LH: loop header
LB: loop body
LE: loop exit
PB: predicated region body
PF: predicated region fallthrough
CT: control target
= control target key end

     0   :  { %s649_s12 = smov 0   ;;  %s725_s0 = inlined_call_operand.vmem [shape: f32[256,64], index: 0, kind: input, shape index: {}]   ;;  %s726_s1 = inlined_call_operand.vmem [shape: f32[64,6], index: 1, kind: input, shape index: {}]   ;;  %s727_s2 = inlined_call_operand.vmem [shape: bf16[256,4], index: 2, kind: output, shape index: {0}]   ;;  %s728_s3 = inlined_call_operand.vmem [shape: f32[256,2], index: 3, kind: output, shape index: {1}]  }
   0x1 LB: > { %s506_s13 = sadd.s32 4294967295, %s626_s12   ;;  %p510_p0 = scmp.ge.s32.totalorder %s626_s12, 1  ;;  %s626_s12 = sphi %s649_s12, %s14_s12  }
   0x2   : > { %p141_p1 = scmp.lt.s32.totalorder %s626_s12, 5 }
   0x4   : > { %p142_p2 = pnand %p510_p0, %p141_p1 }
   0x5   : > { %v196_v0 = vld [vmem:[%s726_s1] sm:$0xff] (!%p142_p2)  ;;  %v197_v1 = vld [vmem:[%s726_s1 + $0x8] sm:$0xff] (!%p142_p2)  ;;  %v198_v2 = vld [vmem:[%s726_s1 + $0x10] sm:$0xff] (!%p142_p2)  ;;  %s511_s20 = sshll.u32 (!%p142_p2), %s506_s13, 3  ;;  %vm204_vm0 = vcmask (!%p142_p2), 523264   ;;  %vm366_vm1 = vcmask (!%p142_p2), 27648  }
   0x6   : > { %145 = sbr.rel (%p142_p2) target bundleno = 365 (0x16d), region = 28  ;;  %v587_v3 = vpack.c.bf16 (!%p142_p2), %v197_v1, %v196_v0  ;;  %v199_v4 = vld [vmem:[%s726_s1 + $0x18] sm:$0xff] (!%p142_p2)  ;;  %p171_p3 = scmp.lt.s32.totalorder (!%p142_p2), %s511_s20, 31  ;;  %v200_v6 = vld [vmem:[%s726_s1 + $0x20] sm:$0xff] (!%p142_p2)  ;;  %v201_v7 = vld [vmem:[%s726_s1 + $0x28] sm:$0xff] (!%p142_p2)  ;;  %vm407_vm2 = vcmask (!%p142_p2), 15360  }
   0x7   : > { %v591_v5 = vpack.c.bf16 (!%p142_p2), %v199_v4, %v198_v2  ;;  %v595_v8 = vpack.c.bf16 (!%p142_p2), %v201_v7, %v200_v6  ;;  %v202_v9 = vld [vmem:[%s726_s1 + $0x30] sm:$0xff] (!%p142_p2)  ;;  %v203_v10 = vld [vmem:[%s726_s1 + $0x38] sm:$0xff] (!%p142_p2)  ;;  %s628_s13 = smov (!%p142_p2), 124  }
   0x8   : > { %588 = vmatprep.subr.bf16.mxu0 (!%p142_p2), %v587_v3  ;;  %603 = vmatprep.subr.bf16.mxu1 (!%p142_p2), %v587_v3  ;;  %v599_v13 = vpack.c.bf16 (!%p142_p2), %v203_v10, %v202_v9 }
   0x9   : > { %590 = vmatpush3.bf16.msra.mxu0 (!%p142_p2), %v587_v3  ;;  %607 = vmatpush3.bf16.msra.mxu1 (!%p142_p2), %v587_v3 }
   0xa   : > { %592 = vmatprep.subr.bf16.mxu0 (!%p142_p2), %v591_v5  ;;  %604 = vmatprep.subr.bf16.mxu1 (!%p142_p2), %v591_v5 }
   0xd   : > { %s730_s20 = smov (!%p171_p3, %s511_s20), 31  ;;  %594 = vmatpush3.bf16.msra.mxu0 %v591_v5  ;;  %608 = vmatpush3.bf16.msra.mxu1 %v591_v5 }
   0xe   : > { %s512_s27 = sshll.u32 %s730_s20, 3  ;;  %596 = vmatprep.subr.bf16.mxu0 %v595_v8  ;;  %605 = vmatprep.subr.bf16.mxu1 %v595_v8  ;;  %s514_s8 = sshll.u32 %s730_s20, 2 }
   0xf   : > { %s174_s7 = scalar_lea.vmem %s725_s0, %s512_s27  ;;  %s180_s11 = scalar_lea.vmem %s727_s2, %s514_s8 }
  0x10   : > { %v188_v11 = vld [vmem:[%s174_s7] sm:$0xff]  ;;  %v189_v14 = vld [vmem:[%s174_s7 + $0x8] sm:$0xff]  ;;  %v190_v16 = vld [vmem:[%s174_s7 + $0x10] sm:$0xff]  ;;  %s186_s16 = scalar_lea.vmem %s728_s3, %s512_s27 }
  0x11   : > { %v192_v12 = vld [vmem:[%s174_s7 + $0x20] sm:$0xff]  ;;  %575 = vmatprep.mubr.msk.f32.mxu0 %vm204_vm0, %v188_v11  ;;  %598 = vmatpush3.bf16.msra.mxu0 %v595_v8  ;;  %v193_v15 = vld [vmem:[%s174_s7 + $0x28] sm:$0xff]  ;;  %v194_v17 = vld [vmem:[%s174_s7 + $0x30] sm:$0xff] }
  0x12   : > { %581 = vmatprep.mubr.msk.f32.mxu1 %vm204_vm0, %v192_v12  ;;  %609 = vmatpush3.bf16.msra.mxu1 %v595_v8  ;;  %v191_v18 = vld [vmem:[%s174_s7 + $0x18] sm:$0xff] }
  0x13   : > { %600 = vmatprep.subr.bf16.mxu0 %v599_v13  ;;  %606 = vmatprep.subr.bf16.mxu1 %v599_v13  ;;  %v195_v19 = vld [vmem:[%s174_s7 + $0x38] sm:$0xff] }
  0x15   : > { %602 = vmatpush3.bf16.msra.mxu0 %v599_v13 }
  0x16   : > { %610 = vmatpush3.bf16.msra.mxu1 %v599_v13 }
  0x18   : > { %576 = vmatmul.mubr.msk.f32.vlgmr.msra.gmra.mrb[0].mxu0 %vm204_vm0, %v189_v14 }
  0x19   : > { %582 = vmatmul.mubr.msk.f32.vlgmr.msra.gmra.mrb[0].mxu1 %vm204_vm0, %v193_v15  ;;  %578 = vmatprep.mubr.msk.f32.mxu0 %vm204_vm0, %v190_v16 }
  0x1a   : > { %584 = vmatprep.mubr.msk.f32.mxu1 %vm204_vm0, %v194_v17 }
  0x1c   : > { %579 = vmatmul.mubr.msk.f32.gmra.mrb[2].mxu0 %vm204_vm0, %v191_v18 }
  0x1d   : > { %585 = vmatmul.mubr.msk.f32.gmra.mrb[2].mxu1 %vm204_vm0, %v195_v19 }
  0xeb   : > { %v577_v20 = vpop.f32.mrb[0].mxu0 }
  0xec   : > { %v583_v21 = vpop.f32.mrb[0].mxu1  ;;  %v536_v22 = vpack.c.bf16 %v577_v20, %v577_v20  ;;  %385 = vrot.lane.b32.xlu0 %v577_v20, %s628_s13  ;;  %v295_v25 = vpop.f32.mrb[1].mxu0 }
  0xed   : > { %v540_v23 = vpack.c.bf16 %v583_v21, %v583_v21  ;;  %393 = vrot.lane.b32.xlu1 %v583_v21, %s628_s13  ;;  %v315_v24 = vpop.f32.mrb[1].mxu1  ;;  %v535_v27 = vpack.c.bf16 %v295_v25, %v295_v25 }
  0xee   : > { %v539_v26 = vpack.c.bf16 %v315_v24, %v315_v24  ;;  %368 = vst.msk [vmem:[%s180_s11 + $0x4] sm:$0xf] %vm366_vm1, %v536_v22 }
  0xef   : > { %372 = vst.msk [vmem:[%s180_s11 + $0x14] sm:$0xf] %vm366_vm1, %v540_v23  ;;  %367 = vst.msk [vmem:[%s180_s11] sm:$0xf] %vm366_vm1, %v535_v27  ;;  %v580_v28 = vpop.f32.mrb[2].mxu0 }
  0xf0   : > { %371 = vst.msk [vmem:[%s180_s11 + $0x10] sm:$0xf] %vm366_vm1, %v539_v26  ;;  %v586_v29 = vpop.f32.mrb[2].mxu1  ;;  %v538_v30 = vpack.c.bf16 %v580_v28, %v580_v28  ;;  %383 = vrot.lane.b32.xlu0 %v295_v25, %s628_s13  ;;  %v305_v31 = vpop.f32.mrb[3].mxu0 }
  0xf1   : > { %389 = vrot.lane.b32.xlu1 %v580_v28, %s628_s13  ;;  %v542_v32 = vpack.c.bf16 %v586_v29, %v586_v29  ;;  %v325_v33 = vpop.f32.mrb[3].mxu1  ;;  %v537_v34 = vpack.c.bf16 %v305_v31, %v305_v31 }
  0xf2   : > { %v541_v35 = vpack.c.bf16 %v325_v33, %v325_v33  ;;  %370 = vst.msk [vmem:[%s180_s11 + $0xc] sm:$0xf] %vm366_vm1, %v538_v30 }
  0xf3   : > { %374 = vst.msk [vmem:[%s180_s11 + $0x1c] sm:$0xf] %vm366_vm1, %v542_v32  ;;  %369 = vst.msk [vmem:[%s180_s11 + $0x8] sm:$0xf] %vm366_vm1, %v537_v34 }
  0xf4   : > { %373 = vst.msk [vmem:[%s180_s11 + $0x18] sm:$0xf] %vm366_vm1, %v541_v35  ;;  %391 = vrot.lane.b32.xlu0 %v315_v24, %s628_s13 }
  0xf5   : > { %387 = vrot.lane.b32.xlu1 %v305_v31, %s628_s13 }
  0xf8   : > { %395 = vrot.lane.b32.xlu0 %v325_v33, %s628_s13 }
  0xf9   : > { %397 = vrot.lane.b32.xlu1 %v586_v29, %s628_s13 }
 0x15e   : > { %v386_v37 = vpop.permute.xlu0 %385 }
 0x15f   : > { %v394_v36 = vpop.permute.xlu1 %393  ;;  %409 = vst.msk [vmem:[%s186_s16 + $0x8] sm:$0xff] %vm407_vm2, %v386_v37 }
 0x160   : > { %413 = vst.msk [vmem:[%s186_s16 + $0x28] sm:$0xff] %vm407_vm2, %v394_v36 }
 0x162   : > { %v384_v38 = vpop.permute.xlu0 %383 }
 0x163   : > { %v390_v39 = vpop.permute.xlu1 %389  ;;  %408 = vst.msk [vmem:[%s186_s16] sm:$0xff] %vm407_vm2, %v384_v38 }
 0x164   : > { %411 = vst.msk [vmem:[%s186_s16 + $0x18] sm:$0xff] %vm407_vm2, %v390_v39 }
 0x166   : > { %v392_v40 = vpop.permute.xlu0 %391 }
 0x167   : > { %v388_v41 = vpop.permute.xlu1 %387  ;;  %412 = vst.msk [vmem:[%s186_s16 + $0x20] sm:$0xff] %vm407_vm2, %v392_v40 }
 0x168   : > { %410 = vst.msk [vmem:[%s186_s16 + $0x10] sm:$0xff] %vm407_vm2, %v388_v41 }
 0x16a   : > { %v396_v42 = vpop.permute.xlu0 %395 }
 0x16b   : > { %v398_v43 = vpop.permute.xlu1 %397  ;;  %414 = vst.msk [vmem:[%s186_s16 + $0x30] sm:$0xff] %vm407_vm2, %v396_v42 }
 0x16c   : > { %415 = vst.msk [vmem:[%s186_s16 + $0x38] sm:$0xff] %vm407_vm2, %v398_v43 }
 0x16d PF: > { %s14_s12 = sadd.s32 1, %s626_s12  }
 0x16e   : > { %p11_p4 = scmp.ge.s32.totalorder %s14_s12, 6  }
 0x170   :  { %13 = sbr.rel (!%p11_p4) target bundleno = 1 (0x1), region = 70 }

// kernel: gat_forward.4
= control target key start
LH: loop header
LB: loop body
LE: loop exit
PB: predicated region body
PF: predicated region fallthrough
CT: control target
= control target key end

     0   :  { %s621_s12 = smov 0   ;;  %s685_s0 = inlined_call_operand.vmem [shape: f32[256,32], index: 0, kind: input, shape index: {}]   ;;  %s686_s1 = inlined_call_operand.vmem [shape: f32[32,80], index: 1, kind: input, shape index: {}]   ;;  %s687_s2 = inlined_call_operand.vmem [shape: bf16[256,64], index: 2, kind: output, shape index: {0}]   ;;  %s688_s3 = inlined_call_operand.vmem [shape: f32[256,16], index: 3, kind: output, shape index: {1}]  }
   0x1 LB: > { %s502_s13 = sadd.s32 4294967295, %s598_s12   ;;  %p506_p0 = scmp.ge.s32.totalorder %s598_s12, 1  ;;  %s598_s12 = sphi %s621_s12, %s14_s12  }
   0x2   : > { %p141_p1 = scmp.lt.s32.totalorder %s598_s12, 5 }
   0x4   : > { %p142_p2 = pnand %p506_p0, %p141_p1 }
   0x5   : > { %v196_v0 = vld [vmem:[%s686_s1] sm:$0xff] (!%p142_p2)  ;;  %v197_v1 = vld [vmem:[%s686_s1 + $0x8] sm:$0xff] (!%p142_p2)  ;;  %v198_v2 = vld [vmem:[%s686_s1 + $0x10] sm:$0xff] (!%p142_p2)  ;;  %s507_s20 = sshll.u32 (!%p142_p2), %s502_s13, 3  ;;  %vm200_vm0 = vcmask (!%p142_p2), 261120   ;;  %vm362_vm1 = vcmask (!%p142_p2), 519168  }
   0x6   : > { %145 = sbr.rel (%p142_p2) target bundleno = 359 (0x167), region = 28  ;;  %v571_v3 = vpack.c.bf16 (!%p142_p2), %v197_v1, %v196_v0  ;;  %v199_v4 = vld [vmem:[%s686_s1 + $0x18] sm:$0xff] (!%p142_p2)  ;;  %p171_p3 = scmp.lt.s32.totalorder (!%p142_p2), %s507_s20, 31  ;;  %vm403_vm2 = vcmask (!%p142_p2), 130048  }
   0x7   : > { %v575_v5 = vpack.c.bf16 (!%p142_p2), %v199_v4, %v198_v2  ;;  %s600_s4 = smov (!%p142_p2), 64  }
   0x8   : > { %572 = vmatprep.subr.bf16.mxu0 (!%p142_p2), %v571_v3  ;;  %579 = vmatprep.subr.bf16.mxu1 (!%p142_p2), %v571_v3 }
   0x9   : > { %574 = vmatpush3.bf16.msra.mxu0 (!%p142_p2), %v571_v3  ;;  %581 = vmatpush3.bf16.msra.mxu1 (!%p142_p2), %v571_v3 }
   0xa   : > { %576 = vmatprep.subr.bf16.mxu0 (!%p142_p2), %v575_v5  ;;  %580 = vmatprep.subr.bf16.mxu1 (!%p142_p2), %v575_v5 }
   0xd   : > { %s690_s20 = smov (!%p171_p3, %s507_s20), 31  ;;  %578 = vmatpush3.bf16.msra.mxu0 %v575_v5  ;;  %582 = vmatpush3.bf16.msra.mxu1 %v575_v5 }
   0xe   : > { %s508_s23 = sshll.u32 %s690_s20, 3  ;;  %s510_s27 = sshll.u32 %s690_s20, 2 }
   0xf   : > { %s174_s26 = scalar_lea.vmem %s685_s0, %s508_s23  ;;  %s180_s30 = scalar_lea.vmem %s687_s2, %s510_s27 }
  0x10   : > { %v188_v6 = vld [vmem:[%s174_s26] sm:$0xff]  ;;  %v189_v8 = vld [vmem:[%s174_s26 + $0x8] sm:$0xff]  ;;  %v190_v10 = vld [vmem:[%s174_s26 + $0x10] sm:$0xff]  ;;  %s186_s7 = scalar_lea.vmem %s688_s3, %s508_s23 }
  0x11   : > { %v192_v7 = vld [vmem:[%s174_s26 + $0x20] sm:$0xff]  ;;  %v193_v9 = vld [vmem:[%s174_s26 + $0x28] sm:$0xff]  ;;  %559 = vmatprep.mubr.msk.f32.mxu0 %vm200_vm0, %v188_v6  ;;  %v194_v11 = vld [vmem:[%s174_s26 + $0x30] sm:$0xff] }
  0x12   : > { %565 = vmatprep.mubr.msk.f32.mxu1 %vm200_vm0, %v192_v7  ;;  %560 = vmatmul.mubr.msk.f32.vlgmr.msra.gmra.mrb[0].mxu0 %vm200_vm0, %v189_v8  ;;  %v191_v12 = vld [vmem:[%s174_s26 + $0x18] sm:$0xff] }
  0x13   : > { %566 = vmatmul.mubr.msk.f32.vlgmr.msra.gmra.mrb[0].mxu1 %vm200_vm0, %v193_v9  ;;  %562 = vmatprep.mubr.msk.f32.mxu0 %vm200_vm0, %v190_v10  ;;  %v195_v13 = vld [vmem:[%s174_s26 + $0x38] sm:$0xff] }
  0x14   : > { %568 = vmatprep.mubr.msk.f32.mxu1 %vm200_vm0, %v194_v11 }
  0x16   : > { %563 = vmatmul.mubr.msk.f32.gmra.mrb[2].mxu0 %vm200_vm0, %v191_v12 }
  0x17   : > { %569 = vmatmul.mubr.msk.f32.gmra.mrb[2].mxu1 %vm200_vm0, %v195_v13 }
  0xe5   : > { %v561_v14 = vpop.f32.mrb[0].mxu0 }
  0xe6   : > { %v567_v15 = vpop.f32.mrb[0].mxu1  ;;  %v532_v16 = vpack.c.bf16 %v561_v14, %v561_v14  ;;  %381 = vrot.lane.b32.xlu0 %v561_v14, %s600_s4  ;;  %v291_v19 = vpop.f32.mrb[1].mxu0 }
  0xe7   : > { %v536_v17 = vpack.c.bf16 %v567_v15, %v567_v15  ;;  %389 = vrot.lane.b32.xlu1 %v567_v15, %s600_s4  ;;  %v311_v18 = vpop.f32.mrb[1].mxu1  ;;  %v531_v21 = vpack.c.bf16 %v291_v19, %v291_v19 }
  0xe8   : > { %v535_v20 = vpack.c.bf16 %v311_v18, %v311_v18  ;;  %364 = vst.msk [vmem:[%s180_s30 + $0x4] sm:$0xf] %vm362_vm1, %v532_v16 }
  0xe9   : > { %368 = vst.msk [vmem:[%s180_s30 + $0x14] sm:$0xf] %vm362_vm1, %v536_v17  ;;  %363 = vst.msk [vmem:[%s180_s30] sm:$0xf] %vm362_vm1, %v531_v21  ;;  %v564_v22 = vpop.f32.mrb[2].mxu0 }
  0xea   : > { %367 = vst.msk [vmem:[%s180_s30 + $0x10] sm:$0xf] %vm362_vm1, %v535_v20  ;;  %v570_v23 = vpop.f32.mrb[2].mxu1  ;;  %v534_v24 = vpack.c.bf16 %v564_v22, %v564_v22  ;;  %379 = vrot.lane.b32.xlu0 %v291_v19, %s600_s4  ;;  %v301_v25 = vpop.f32.mrb[3].mxu0 }
  0xeb   : > { %385 = vrot.lane.b32.xlu1 %v564_v22, %s600_s4  ;;  %v538_v26 = vpack.c.bf16 %v570_v23, %v570_v23  ;;  %v321_v27 = vpop.f32.mrb[3].mxu1  ;;  %v533_v28 = vpack.c.bf16 %v301_v25, %v301_v25 }
  0xec   : > { %v537_v29 = vpack.c.bf16 %v321_v27, %v321_v27  ;;  %366 = vst.msk [vmem:[%s180_s30 + $0xc] sm:$0xf] %vm362_vm1, %v534_v24 }
  0xed   : > { %370 = vst.msk [vmem:[%s180_s30 + $0x1c] sm:$0xf] %vm362_vm1, %v538_v26  ;;  %365 = vst.msk [vmem:[%s180_s30 + $0x8] sm:$0xf] %vm362_vm1, %v533_v28 }
  0xee   : > { %369 = vst.msk [vmem:[%s180_s30 + $0x18] sm:$0xf] %vm362_vm1, %v537_v29  ;;  %387 = vrot.lane.b32.xlu0 %v311_v18, %s600_s4 }
  0xef   : > { %383 = vrot.lane.b32.xlu1 %v301_v25, %s600_s4 }
  0xf2   : > { %391 = vrot.lane.b32.xlu0 %v321_v27, %s600_s4 }
  0xf3   : > { %393 = vrot.lane.b32.xlu1 %v570_v23, %s600_s4 }
 0x158   : > { %v382_v31 = vpop.permute.xlu0 %381 }
 0x159   : > { %v390_v30 = vpop.permute.xlu1 %389  ;;  %405 = vst.msk [vmem:[%s186_s7 + $0x8] sm:$0xff] %vm403_vm2, %v382_v31 }
 0x15a   : > { %409 = vst.msk [vmem:[%s186_s7 + $0x28] sm:$0xff] %vm403_vm2, %v390_v30 }
 0x15c   : > { %v380_v32 = vpop.permute.xlu0 %379 }
 0x15d   : > { %v386_v33 = vpop.permute.xlu1 %385  ;;  %404 = vst.msk [vmem:[%s186_s7] sm:$0xff] %vm403_vm2, %v380_v32 }
 0x15e   : > { %407 = vst.msk [vmem:[%s186_s7 + $0x18] sm:$0xff] %vm403_vm2, %v386_v33 }
 0x160   : > { %v388_v34 = vpop.permute.xlu0 %387 }
 0x161   : > { %v384_v35 = vpop.permute.xlu1 %383  ;;  %408 = vst.msk [vmem:[%s186_s7 + $0x20] sm:$0xff] %vm403_vm2, %v388_v34 }
 0x162   : > { %406 = vst.msk [vmem:[%s186_s7 + $0x10] sm:$0xff] %vm403_vm2, %v384_v35 }
 0x164   : > { %v392_v36 = vpop.permute.xlu0 %391 }
 0x165   : > { %v394_v37 = vpop.permute.xlu1 %393  ;;  %410 = vst.msk [vmem:[%s186_s7 + $0x30] sm:$0xff] %vm403_vm2, %v392_v36 }
 0x166   : > { %411 = vst.msk [vmem:[%s186_s7 + $0x38] sm:$0xff] %vm403_vm2, %v394_v37 }
 0x167 PF: > { %s14_s12 = sadd.s32 1, %s598_s12  }
 0x168   : > { %p11_p4 = scmp.ge.s32.totalorder %s14_s12, 6  }
 0x16a   :  { %13 = sbr.rel (!%p11_p4) target bundleno = 1 (0x1), region = 70 }

// kernel: gat_forward.7
= control target key start
LH: loop header
LB: loop body
LE: loop exit
PB: predicated region body
PF: predicated region fallthrough
CT: control target
= control target key end

     0   :  { %s1045_s18 = smov 0   ;;  %s1300_s0 = inlined_call_operand.vmem [shape: bf16[256,256], index: 0, kind: input, shape index: {}]   ;;  %s1301_s1 = inlined_call_operand.vmem [shape: bf16[256,5], index: 1, kind: input, shape index: {}]   ;;  %s1302_s2 = inlined_call_operand.vmem [shape: f32[1,256], index: 2, kind: input, shape index: {}]   ;;  %s1303_s3 = inlined_call_operand.vmem [shape: f32[256,1], index: 3, kind: input, shape index: {}]   ;;  %s1304_s4 = inlined_call_operand.vmem [shape: f32[1,4], index: 4, kind: input, shape index: {}]   ;;  %s1305_s5 = inlined_call_operand.vmem [shape: f32[256,4], index: 5, kind: output, shape index: {}]  }
   0x1 LB: > { %s839_s19 = sadd.s32 4294967295, %s1011_s18   ;;  %p843_p0 = scmp.ge.s32.totalorder %s1011_s18, 1  ;;  %s1011_s18 = sphi %s1045_s18, %s15_s18  }
   0x2   : > { %p200_p1 = scmp.lt.s32.totalorder %s1011_s18, 5 }
   0x4   : > { %p201_p2 = pnand %p843_p0, %p200_p1 }
   0x5   : > { %s844_s20 = sshll.u32 (!%p201_p2), %s839_s19, 3  ;;  %v1013_v0 = vmov (!%p201_p2), 0   ;;  %v941_v9 = vld [vmem:[%s1301_s1 + $0x40] sm:$0xff] (!%p201_p2)   ;;  %v943_v11 = vld [vmem:[%s1301_s1 + $0x48] sm:$0xff] (!%p201_p2)   ;;  %v945_v13 = vld [vmem:[%s1301_s1 + $0x50] sm:$0xff] (!%p201_p2)   ;;  %v345_v15 = vlaneseq (!%p201_p2) }
   0x6   : > { %204 = sbr.rel (%p201_p2) target bundleno = 708 (0x2c4), region = 40  ;;  %938 = vset.pattern.permute.xlu1 (!%p201_p2), %v1013_v0  ;;  %937 = vset.pattern.permute.xlu0 (!%p201_p2), %v1013_v0  ;;  %p235_p3 = scmp.lt.s32.totalorder (!%p201_p2), %s844_s20, 31  ;;  %v942_v10 = vld [vmem:[%s1301_s1] sm:$0xff] (!%p201_p2)   ;;  %v944_v12 = vld [vmem:[%s1301_s1 + $0x8] sm:$0xff] (!%p201_p2)   ;;  %v946_v14 = vld [vmem:[%s1301_s1 + $0x10] sm:$0xff] (!%p201_p2)  }
   0x7   : > { %871 = vmatprep.subr.bf16.mxu0 (!%p201_p2), %v941_v9  ;;  %911 = vmatprep.subr.bf16.mxu1 (!%p201_p2), %v941_v9  ;;  %v346_v16 = vshrl.u32 (!%p201_p2), %v345_v15, 7  ;;  %v294_v19 = vld [vmem:[%s1302_s2] sm:$0x3] (!%p201_p2) }
   0x8   : > { %872 = vmatpush3.bf16.msra.mxu0 (!%p201_p2), %v942_v10  ;;  %919 = vmatpush3.bf16.msra.mxu1 (!%p201_p2), %v942_v10 }
   0x9   : > { %873 = vmatprep.subr.bf16.mxu0 (!%p201_p2), %v943_v11  ;;  %912 = vmatprep.subr.bf16.mxu1 (!%p201_p2), %v943_v11  ;;  %v347_v17 = vsub.s32 (!%p201_p2), 0, %v346_v16  ;;  %v351_v18 = vsub.s32 (!%p201_p2), 1, %v346_v16 }
   0xb   : > { %v1092_v22 = vrot.slane (!%p201_p2), %v294_v19, %v347_v17  ;;  %v1094_v23 = vrot.slane (!%p201_p2), %v294_v19, %v351_v18 }
   0xc   : > { %874 = vmatpush3.bf16.msra.mxu0 (!%p201_p2), %v944_v12  ;;  %920 = vmatpush3.bf16.msra.mxu1 (!%p201_p2), %v944_v12 }
   0xd   : > { %s1307_s20 = smov (!%p235_p3, %s844_s20), 31  ;;  %875 = vmatprep.subr.bf16.mxu0 %v945_v13  ;;  %913 = vmatprep.subr.bf16.mxu1 %v945_v13 }
   0xe   : > { %s1053_s21 = sshll.u32 %s1307_s20, 3 }
   0xf   : > { %s245_s24 = scalar_lea.vmem %s1303_s3, %s1053_s21  ;;  %s1081_s14 = scalar_lea.vmem %s1300_s0, %s1053_s21 }
  0x10   : > { %v299_v1 = vld [vmem:[%s245_s24 + $0x20] sm:$0xff]  ;;  %v300_v3 = vld [vmem:[%s245_s24 + $0x28] sm:$0xff]  ;;  %v298_v5 = vld [vmem:[%s245_s24 + $0x18] sm:$0xff]  ;;  %876 = vmatpush3.bf16.msra.mxu0 %v946_v14  ;;  %921 = vmatpush3.bf16.msra.mxu1 %v946_v14  ;;  %s1279_s19 = scalar_lea.vmem %s1305_s5, %s1053_s21 }
  0x11   : > { %v295_v2 = vld [vmem:[%s245_s24] sm:$0xff]  ;;  %326 = vperm.xlu1 %938, %v299_v1   ;;  %v296_v4 = vld [vmem:[%s245_s24 + $0x8] sm:$0xff]  ;;  %v297_v6 = vld [vmem:[%s245_s24 + $0x10] sm:$0xff] }
  0x12   : > { %306 = vperm.xlu0 %937, %v295_v2   ;;  %v302_v7 = vld [vmem:[%s245_s24 + $0x38] sm:$0xff]  ;;  %v301_v8 = vld [vmem:[%s245_s24 + $0x30] sm:$0xff]  ;;  %v1087_v20 = vld [vmem:[%s1081_s14] sm:$0xff] }
  0x13   : > { %v1090_v21 = vld [vmem:[%s1081_s14 + $0x20] sm:$0xff]  ;;  %v1097_v24 = vld [vmem:[%s1081_s14 + $0x8] sm:$0xff]  ;;  %v419_v26 = vunpack.c.l.bf16 %v1087_v20  ;;  %v420_v27 = vunpack.c.h.bf16 %v1087_v20  ;;  %v1107_v30 = vld [vmem:[%s1081_s14 + $0x10] sm:$0xff] }
  0x14   : > { %v1100_v25 = vld [vmem:[%s1081_s14 + $0x28] sm:$0xff]  ;;  %v427_v28 = vunpack.c.l.bf16 %v1090_v21  ;;  %v428_v29 = vunpack.c.h.bf16 %v1090_v21  ;;  %v1110_v31 = vld [vmem:[%s1081_s14 + $0x18] sm:$0xff]  ;;  %v421_v34 = vunpack.c.l.bf16 %v1097_v24  ;;  %v422_v35 = vunpack.c.h.bf16 %v1097_v24  ;;  %v1123_v44 = vld [vmem:[%s1081_s14 + $0x30] sm:$0xff] }
  0x15   : > { %331 = vperm.xlu1 %938, %v300_v3   ;;  %v429_v36 = vunpack.c.l.bf16 %v1100_v25  ;;  %v430_v37 = vunpack.c.h.bf16 %v1100_v25  ;;  %v423_v42 = vunpack.c.l.bf16 %v1107_v30  ;;  %v424_v43 = vunpack.c.h.bf16 %v1107_v30 }
  0x16   : > { %311 = vperm.xlu0 %937, %v296_v4   ;;  %v425_v45 = vunpack.c.l.bf16 %v1110_v31  ;;  %v426_v46 = vunpack.c.h.bf16 %v1110_v31  ;;  %v431_v59 = vunpack.c.l.bf16 %v1123_v44  ;;  %v432_v60 = vunpack.c.h.bf16 %v1123_v44  ;;  %v947_v31 = vld [vmem:[%s1301_s1 + $0x58] sm:$0xff]  }
  0x17   : > { %877 = vmatprep.subr.bf16.mxu0 %v947_v31  ;;  %914 = vmatprep.subr.bf16.mxu1 %v947_v31 }
  0x19   : > { %321 = vperm.xlu1 %938, %v298_v5  }
  0x1a   : > { %316 = vperm.xlu0 %937, %v297_v6  }
  0x1d   : > { %341 = vperm.xlu1 %938, %v302_v7  }
  0x1e   : > { %336 = vperm.xlu0 %937, %v301_v8  }
  0x90   : > { %v327_v32 = vpop.permute.xlu1 %326 }
  0x91   : > { %v307_v33 = vpop.permute.xlu0 %306  ;;  %v363_v38 = vadd.f32 %v1092_v22, %v327_v32  ;;  %v364_v39 = vadd.f32 %v1094_v23, %v327_v32 }
  0x92   : > { %v355_v40 = vadd.f32 %v1092_v22, %v307_v33  ;;  %v356_v41 = vadd.f32 %v1094_v23, %v307_v33 }
  0x93   : > { %vm379_vm0 = vcmp.gt.f32.partialorder %v363_v38, 0.0  ;;  %vm380_vm1 = vcmp.gt.f32.partialorder %v364_v39, 0.0  ;;  %v395_v47 = vmul.f32 0.2, %v363_v38  ;;  %v396_v48 = vmul.f32 0.2, %v364_v39 }
  0x94   : > { %vm371_vm2 = vcmp.gt.f32.partialorder %v355_v40, 0.0  ;;  %vm372_vm3 = vcmp.gt.f32.partialorder %v356_v41, 0.0  ;;  %v387_v49 = vmul.f32 0.2, %v355_v40  ;;  %v388_v50 = vmul.f32 0.2, %v356_v41  ;;  %v332_v51 = vpop.permute.xlu1 %331 }
  0x95   : > { %v312_v52 = vpop.permute.xlu0 %311  ;;  %v365_v53 = vadd.f32 %v1092_v22, %v332_v51  ;;  %v366_v54 = vadd.f32 %v1094_v23, %v332_v51  ;;  %v411_v61 = vsel %vm379_vm0, %v363_v38, %v395_v47  ;;  %v412_v62 = vsel %vm380_vm1, %v364_v39, %v396_v48 }
  0x96   : > { %v357_v55 = vadd.f32 %v1092_v22, %v312_v52  ;;  %v358_v56 = vadd.f32 %v1094_v23, %v312_v52  ;;  %v403_v57 = vsel %vm371_vm2, %v355_v40, %v387_v49  ;;  %v404_v58 = vsel %vm372_vm3, %v356_v41, %v388_v50 }
  0x97   : > { %vm381_vm4 = vcmp.gt.f32.partialorder %v365_v53, 0.0  ;;  %vm382_vm5 = vcmp.gt.f32.partialorder %v366_v54, 0.0  ;;  %v397_v7 = vmul.f32 0.2, %v365_v53  ;;  %v398_v8 = vmul.f32 0.2, %v366_v54 }
  0x98   : > { %vm373_vm6 = vcmp.gt.f32.partialorder %v357_v55, 0.0  ;;  %vm374_vm7 = vcmp.gt.f32.partialorder %v358_v56, 0.0  ;;  %v389_v63 = vmul.f32 0.2, %v357_v55  ;;  %v390_v0 = vmul.f32 0.2, %v358_v56  ;;  %v322_v1 = vpop.permute.xlu1 %321 }
  0x99   : > { %v317_v2 = vpop.permute.xlu0 %316  ;;  %v361_v3 = vadd.f32 %v1092_v22, %v322_v1  ;;  %v362_v4 = vadd.f32 %v1094_v23, %v322_v1  ;;  %v1139_v9 = vadd.f32 %v419_v26, %v403_v57  ;;  %v1141_v10 = vadd.f32 %v420_v27, %v404_v58  ;;  %v950_v1 = vld [vmem:[%s1301_s1 + $0x20] sm:$0xff]  }
  0x9a   : > { %v359_v5 = vadd.f32 %v1092_v22, %v317_v2  ;;  %v360_v6 = vadd.f32 %v1094_v23, %v317_v2  ;;  %v405_v12 = vsel %vm373_vm6, %v357_v55, %v389_v63  ;;  %v406_v13 = vsel %vm374_vm7, %v358_v56, %v390_v0  ;;  %v949_v0 = vld [vmem:[%s1301_s1 + $0x60] sm:$0xff]   ;;  %v951_v2 = vld [vmem:[%s1301_s1 + $0x68] sm:$0xff]  }
  0x9b   : > { %vm377_vm8 = vcmp.gt.f32.partialorder %v361_v3, 0.0  ;;  %v393_v11 = vmul.f32 0.2, %v361_v3  ;;  %vm378_vm9 = vcmp.gt.f32.partialorder %v362_v4, 0.0  ;;  %v451_v18 = vmax.f32 %v1139_v9, %v1141_v10 }
  0x9c   : > { %vm375_vm10 = vcmp.gt.f32.partialorder %v359_v5, 0.0  ;;  %v391_v14 = vmul.f32 0.2, %v359_v5  ;;  %v392_v15 = vmul.f32 0.2, %v360_v6  ;;  %v342_v16 = vpop.permute.xlu1 %341  ;;  %vm376_vm11 = vcmp.gt.f32.partialorder %v360_v6, 0.0 }
  0x9d   : > { %v337_v17 = vpop.permute.xlu0 %336  ;;  %v369_v19 = vadd.f32 %v1092_v22, %v342_v16  ;;  %v370_v20 = vadd.f32 %v1094_v23, %v342_v16  ;;  %v1153_v32 = vadd.f32 %v421_v34, %v405_v12  ;;  %v1157_v33 = vadd.f32 %v422_v35, %v406_v13  ;;  %452 = vmax.xlane.f32.xlu0 %v451_v18 }
  0x9e   : > { %v367_v26 = vadd.f32 %v1092_v22, %v337_v17  ;;  %v368_v27 = vadd.f32 %v1094_v23, %v337_v17  ;;  %v394_v38 = vmul.f32 0.2, %v362_v4  ;;  %v1161_v41 = vadd.f32 %v427_v28, %v411_v61 }
  0x9f   : > { %v401_v39 = vmul.f32 0.2, %v369_v19  ;;  %v402_v40 = vmul.f32 0.2, %v370_v20  ;;  %v454_v34 = vmax.f32 %v1153_v32, %v1157_v33  ;;  %v1167_v24 = vadd.f32 %v428_v29, %v412_v62 }
  0xa0   : > { %vm383_vm12 = vcmp.gt.f32.partialorder %v367_v26, 0.0  ;;  %vm384_vm13 = vcmp.gt.f32.partialorder %v368_v27, 0.0  ;;  %v399_v22 = vmul.f32 0.2, %v367_v26  ;;  %v400_v23 = vmul.f32 0.2, %v368_v27 }
  0xa1   : > { %v407_v35 = vsel %vm375_vm10, %v359_v5, %v391_v14  ;;  %v408_v47 = vsel %vm376_vm11, %v360_v6, %v392_v15  ;;  %v413_v49 = vsel %vm381_vm4, %v365_v53, %v397_v7  ;;  %v414_v50 = vsel %vm382_vm5, %v366_v54, %v398_v8  ;;  %455 = vmax.xlane.f32.xlu1 %v454_v34  ;;  %v954_v5 = vld [vmem:[%s1301_s1 + $0x30] sm:$0xff]   ;;  %v955_v6 = vld [vmem:[%s1301_s1 + $0x78] sm:$0xff]  }
  0xa2   : > { %v1173_v28 = vadd.f32 %v423_v42, %v407_v35  ;;  %v1177_v48 = vadd.f32 %v424_v43, %v408_v47  ;;  %v463_v21 = vmax.f32 %v1161_v41, %v1167_v24  ;;  %v1185_v29 = vadd.f32 %v429_v36, %v413_v49  ;;  %v261_v43 = vld [vmem:[%s1081_s14 + $0x38] sm:$0xff] }
  0xa3   : > { %v1189_v42 = vadd.f32 %v430_v37, %v414_v50  ;;  %v415_v30 = vsel %vm383_vm12, %v367_v26, %v399_v22  ;;  %v416_v52 = vsel %vm384_vm13, %v368_v27, %v400_v23  ;;  %v409_v54 = vsel %vm377_vm8, %v361_v3, %v393_v11  ;;  %v952_v3 = vld [vmem:[%s1301_s1 + $0x28] sm:$0xff]   ;;  %v956_v7 = vld [vmem:[%s1301_s1 + $0x38] sm:$0xff]  }
  0xa4   : > { %v457_v51 = vmax.f32 %v1173_v28, %v1177_v48  ;;  %v1198_v53 = vadd.f32 %v431_v59, %v415_v30  ;;  %vm385_vm14 = vcmp.gt.f32.partialorder %v369_v19, 0.0  ;;  %vm386_vm15 = vcmp.gt.f32.partialorder %v370_v20, 0.0  ;;  %464 = vmax.xlane.f32.xlu0 %v463_v21 }
  0xa5   : > { %v1203_v25 = vadd.f32 %v432_v60, %v416_v52  ;;  %v410_v36 = vsel %vm378_vm9, %v362_v4, %v394_v38  ;;  %v433_v37 = vunpack.c.l.bf16 %v261_v43  ;;  %v434_v55 = vunpack.c.h.bf16 %v261_v43  ;;  %v953_v4 = vld [vmem:[%s1301_s1 + $0x70] sm:$0xff]  }
  0xa6   : > { %458 = vmax.xlane.f32.xlu1 %v457_v51  ;;  %v466_v56 = vmax.f32 %v1185_v29, %v1189_v42  ;;  %v1212_v58 = vadd.f32 %v425_v45, %v409_v54  ;;  %v1216_v44 = vadd.f32 %v426_v46, %v410_v36  ;;  %v417_v59 = vsel %vm385_vm14, %v369_v19, %v401_v39  ;;  %v948_v46 = vld [vmem:[%s1301_s1 + $0x18] sm:$0xff]  }
  0xa7   : > { %v469_v57 = vmax.f32 %v1198_v53, %v1203_v25  ;;  %v418_v60 = vsel %vm386_vm15, %v370_v20, %v402_v40  ;;  %v1220_v62 = vadd.f32 %v433_v37, %v417_v59  ;;  %878 = vmatpush3.bf16.msra.mxu0 %v948_v46  ;;  %922 = vmatpush3.bf16.msra.mxu1 %v948_v46  ;;  %vm762_vm0 = vcmask 31744  }
  0xa8   : > { %467 = vmax.xlane.f32.xlu0 %v466_v56  ;;  %v460_v61 = vmax.f32 %v1212_v58, %v1216_v44  ;;  %v1222_v63 = vadd.f32 %v434_v55, %v418_v60  ;;  %879 = vmatprep.subr.bf16.mxu0 %v949_v0 }
  0xa9   : > { %915 = vmatprep.subr.bf16.mxu1 %v949_v0 }
  0xaa   : > { %470 = vmax.xlane.f32.xlu1 %v469_v57  ;;  %v472_v45 = vmax.f32 %v1220_v62, %v1222_v63 }
  0xab   : > { %880 = vmatpush3.bf16.msra.mxu0 %v950_v1  ;;  %923 = vmatpush3.bf16.msra.mxu1 %v950_v1 }
  0xac   : > { %461 = vmax.xlane.f32.xlu0 %v460_v61  ;;  %881 = vmatprep.subr.bf16.mxu0 %v951_v2 }
  0xad   : > { %916 = vmatprep.subr.bf16.mxu1 %v951_v2 }
  0xaf   : > { %882 = vmatpush3.bf16.msra.mxu0 %v952_v3  ;;  %924 = vmatpush3.bf16.msra.mxu1 %v952_v3 }
  0xb0   : > { %473 = vmax.xlane.f32.xlu0 %v472_v45  ;;  %883 = vmatprep.subr.bf16.mxu0 %v953_v4 }
  0xb1   : > { %917 = vmatprep.subr.bf16.mxu1 %v953_v4 }
  0xb3   : > { %884 = vmatpush3.bf16.msra.mxu0 %v954_v5  ;;  %925 = vmatpush3.bf16.msra.mxu1 %v954_v5 }
  0xb4   : > { %885 = vmatprep.subr.bf16.mxu0 %v955_v6  ;;  %918 = vmatprep.subr.bf16.mxu1 %v955_v6 }
  0xb7   : > { %886 = vmatpush3.bf16.msra.mxu0 %v956_v7  ;;  %926 = vmatpush3.bf16.msra.mxu1 %v956_v7 }
 0x12a   : > { %v453_v8 = vpop.xlane.xlu0 %452 }
 0x12b   : > { %v475_v11 = vsub.f32 %v1139_v9, %v453_v8  ;;  %v476_v12 = vsub.f32 %v1141_v10, %v453_v8  ;;  %v1014_v8 = vmov 4  }
 0x12c   : > { %939 = vset.pattern.permute.xlu1 %v1014_v8  ;;  %940 = vset.pattern.permute.xlu0 %v1014_v8 }
 0x12d   : > { %v491_v13 = vmul.f32 1.442695, %v475_v11  ;;  %v493_v14 = vmul.f32 1.442695, %v476_v12 }
 0x12e   : > { %v456_v15 = vpop.xlane.xlu1 %455 }
 0x12f   : > { %v477_v16 = vsub.f32 %v1153_v32, %v456_v15  ;;  %v478_v17 = vsub.f32 %v1157_v33, %v456_v15  ;;  %957 = vpow2.f32 %v491_v13 }
 0x130   : > { %959 = vpow2.f32 %v493_v14 }
 0x131   : > { %v465_v18 = vpop.xlane.xlu0 %464  ;;  %v495_v19 = vmul.f32 1.442695, %v477_v16  ;;  %v497_v20 = vmul.f32 1.442695, %v478_v17 }
 0x132   : > { %v483_v26 = vsub.f32 %v1161_v41, %v465_v18  ;;  %v484_v27 = vsub.f32 %v1167_v24, %v465_v18 }
 0x133   : > { %v459_v38 = vpop.xlane.xlu1 %458  ;;  %961 = vpow2.f32 %v495_v19 }
 0x134   : > { %v507_v9 = vmul.f32 1.442695, %v483_v26  ;;  %v479_v10 = vsub.f32 %v1173_v28, %v459_v38  ;;  %963 = vpow2.f32 %v497_v20  ;;  %v509_v39 = vmul.f32 1.442695, %v484_v27 }
 0x135   : > { %v480_v32 = vsub.f32 %v1177_v48, %v459_v38  ;;  %v468_v40 = vpop.xlane.xlu0 %467 }
 0x136   : > { %v485_v33 = vsub.f32 %v1185_v29, %v468_v40  ;;  %v486_v22 = vsub.f32 %v1189_v42, %v468_v40  ;;  %965 = vpow2.f32 %v507_v9  ;;  %v499_v41 = vmul.f32 1.442695, %v479_v10 }
 0x137   : > { %v471_v23 = vpop.xlane.xlu1 %470  ;;  %967 = vpow2.f32 %v509_v39  ;;  %v501_v47 = vmul.f32 1.442695, %v480_v32 }
 0x138   : > { %v511_v34 = vmul.f32 1.442695, %v485_v33  ;;  %v513_v24 = vmul.f32 1.442695, %v486_v22  ;;  %v487_v35 = vsub.f32 %v1198_v53, %v471_v23  ;;  %v488_v28 = vsub.f32 %v1203_v25, %v471_v23 }
 0x139   : > { %v462_v49 = vpop.xlane.xlu0 %461  ;;  %v958_v21 = vpop.eup %957 }
 0x13a   : > { %969 = vpow2.f32 %v511_v34  ;;  %v481_v48 = vsub.f32 %v1212_v58, %v462_v49  ;;  %v482_v50 = vsub.f32 %v1216_v44, %v462_v49  ;;  %v515_v29 = vmul.f32 1.442695, %v487_v35  ;;  %v960_v43 = vpop.eup %959 }
 0x13b   : > { %971 = vpow2.f32 %v513_v24  ;;  %v517_v51 = vmul.f32 1.442695, %v488_v28 }
 0x13c   : > { %973 = vpow2.f32 %v499_v41  ;;  %v503_v42 = vmul.f32 1.442695, %v481_v48  ;;  %v505_v30 = vmul.f32 1.442695, %v482_v50 }
 0x13d   : > { %975 = vpow2.f32 %v501_v47  ;;  %v474_v52 = vpop.xlane.xlu0 %473  ;;  %v962_v53 = vpop.eup %961 }
 0x13e   : > { %977 = vpow2.f32 %v503_v42  ;;  %v489_v54 = vsub.f32 %v1220_v62, %v474_v52  ;;  %v490_v25 = vsub.f32 %v1222_v63, %v474_v52  ;;  %v964_v36 = vpop.eup %963  ;;  %v523_v37 = vpack.c.bf16 %v962_v53, %v958_v21  ;;  %v867_v42 = vld [vmem:[%s1304_s4] ss:$0 sm:$0xff] }
 0x13f   : > { %979 = vpow2.f32 %v505_v30  ;;  %v524_v57 = vpack.c.bf16 %v964_v36, %v960_v43 }
 0x140   : > { %981 = vpow2.f32 %v515_v29  ;;  %v519_v55 = vmul.f32 1.442695, %v489_v54  ;;  %v521_v56 = vmul.f32 1.442695, %v490_v25  ;;  %v966_v58 = vpop.eup %965 }
 0x141   : > { %983 = vpow2.f32 %v517_v51  ;;  %659 = vmatprep.mubr.bf16.mxu0 %v524_v57  ;;  %v968_v44 = vpop.eup %967 }
 0x142   : > { %985 = vpow2.f32 %v519_v55  ;;  %660 = vmatmul.mubr.bf16.vlgmr.msra.gmra.mrb[0].mxu0 %v523_v37 }
 0x143   : > { %987 = vpow2.f32 %v521_v56 }
 0x144   : > { %v970_v59 = vpop.eup %969 }
 0x145   : > { %v972_v60 = vpop.eup %971  ;;  %v527_v61 = vpack.c.bf16 %v970_v59, %v966_v58 }
 0x146   : > { %v974_v62 = vpop.eup %973  ;;  %v528_v45 = vpack.c.bf16 %v972_v60, %v968_v44 }
 0x147   : > { %v976_v63 = vpop.eup %975 }
 0x148   : > { %v978_v31 = vpop.eup %977  ;;  %675 = vmatprep.mubr.bf16.mxu1 %v528_v45 }
 0x149   : > { %v980_v46 = vpop.eup %979  ;;  %676 = vmatmul.mubr.bf16.vlgmr.msra.gmra.mrb[0].mxu1 %v527_v61  ;;  %v525_v0 = vpack.c.bf16 %v978_v31, %v974_v62 }
 0x14a   : > { %v982_v1 = vpop.eup %981  ;;  %v526_v2 = vpack.c.bf16 %v980_v46, %v976_v63 }
 0x14b   : > { %v984_v3 = vpop.eup %983 }
 0x14c   : > { %v986_v4 = vpop.eup %985  ;;  %667 = vmatprep.mubr.bf16.mxu0 %v526_v2 }
 0x14d   : > { %v988_v5 = vpop.eup %987  ;;  %668 = vmatmul.mubr.bf16.gmra.mrb[4].mxu0 %v525_v0  ;;  %v529_v6 = vpack.c.bf16 %v986_v4, %v982_v1 }
 0x14e   : > { %v530_v7 = vpack.c.bf16 %v988_v5, %v984_v3 }
 0x150   : > { %683 = vmatprep.mubr.bf16.mxu1 %v530_v7 }
 0x151   : > { %684 = vmatmul.mubr.bf16.gmra.mrb[4].mxu1 %v529_v6 }
 0x215   : > { %v887_v11 = vpop.f32.mrb[0].mxu0 }
 0x216   : > { %v888_v12 = vpop.f32.mrb[1].mxu0 }
 0x217   : > { %v889_v13 = vadd.f32 %v888_v12, %v887_v11  ;;  %v890_v14 = vpop.f32.mrb[2].mxu0 }
 0x218   : > { %v891_v15 = vpop.f32.mrb[3].mxu0 }
 0x219   : > { %989 = vrcp.f32 %v889_v13  ;;  %v892_v16 = vadd.f32 %v891_v15, %v890_v14 }
 0x21b   : > { %991 = vrcp.f32 %v892_v16 }
 0x21c   : > { %v899_v17 = vpop.f32.mrb[0].mxu1 }
 0x21d   : > { %v900_v18 = vpop.f32.mrb[1].mxu1 }
 0x21e   : > { %v901_v19 = vadd.f32 %v900_v18, %v899_v17  ;;  %v902_v20 = vpop.f32.mrb[2].mxu1 }
 0x21f   : > { %v903_v26 = vpop.f32.mrb[3].mxu1 }
 0x220   : > { %993 = vrcp.f32 %v901_v19  ;;  %v904_v27 = vadd.f32 %v903_v26, %v902_v20  ;;  %v893_v38 = vpop.f32.mrb[4].mxu0 }
 0x221   : > { %v894_v9 = vpop.f32.mrb[5].mxu0 }
 0x222   : > { %v895_v10 = vadd.f32 %v894_v9, %v893_v38  ;;  %v896_v39 = vpop.f32.mrb[6].mxu0  ;;  %995 = vrcp.f32 %v904_v27 }
 0x223   : > { %v897_v32 = vpop.f32.mrb[7].mxu0  ;;  %v990_v40 = vpop.eup %989 }
 0x224   : > { %v898_v33 = vadd.f32 %v897_v32, %v896_v39  ;;  %v905_v22 = vpop.f32.mrb[4].mxu1  ;;  %702 = vperm.xlu1 %939, %v990_v40   ;;  %997 = vrcp.f32 %v895_v10 }
 0x225   : > { %v906_v23 = vpop.f32.mrb[5].mxu1  ;;  %v992_v41 = vpop.eup %991 }
 0x226   : > { %v907_v34 = vadd.f32 %v906_v23, %v905_v22  ;;  %v908_v24 = vpop.f32.mrb[6].mxu1  ;;  %707 = vperm.xlu0 %940, %v992_v41  }
 0x227   : > { %v909_v35 = vpop.f32.mrb[7].mxu1 }
 0x228   : > { %v910_v47 = vadd.f32 %v909_v35, %v908_v24  ;;  %999 = vrcp.f32 %v907_v34 }
 0x229   : > { %1001 = vrcp.f32 %v898_v33 }
 0x22a   : > { %v994_v28 = vpop.eup %993  ;;  %1003 = vrcp.f32 %v910_v47 }
 0x22b   : > { %722 = vperm.xlu1 %939, %v994_v28  }
 0x22c   : > { %v996_v49 = vpop.eup %995 }
 0x22e   : > { %v998_v48 = vpop.eup %997 }
 0x22f   : > { %727 = vperm.xlu1 %939, %v996_v49  }
 0x232   : > { %v1000_v50 = vpop.eup %999 }
 0x233   : > { %712 = vperm.xlu1 %939, %v998_v48   ;;  %v1002_v21 = vpop.eup %1001 }
 0x234   : > { %v1004_v29 = vpop.eup %1003 }
 0x237   : > { %732 = vperm.xlu1 %939, %v1000_v50  }
 0x23b   : > { %717 = vperm.xlu1 %939, %v1002_v21  }
 0x23f   : > { %737 = vperm.xlu1 %939, %v1004_v29  }
 0x2a3   : > { %v703_v30 = vpop.permute.xlu1 %702 }
 0x2a4   : > { %v740_v43 = vmul.f32 %v889_v13, %v703_v30 }
 0x2a5   : > { %v708_v51 = vpop.permute.xlu0 %707 }
 0x2a6   : > { %v754_v52 = vadd.f32 %v867_v42, %v740_v43  ;;  %v741_v53 = vmul.f32 %v892_v16, %v708_v51 }
 0x2a8   : > { %763 = vst.msk [vmem:[%s1279_s19] sm:$0xff] %vm762_vm0, %v754_v52  ;;  %v755_v54 = vadd.f32 %v867_v42, %v741_v53 }
 0x2aa   : > { %v723_v25 = vpop.permute.xlu1 %722  ;;  %764 = vst.msk [vmem:[%s1279_s19 + $0x8] sm:$0xff] %vm762_vm0, %v755_v54 }
 0x2ab   : > { %v744_v36 = vmul.f32 %v901_v19, %v723_v25 }
 0x2ad   : > { %v758_v37 = vadd.f32 %v867_v42, %v744_v36 }
 0x2ae   : > { %v728_v55 = vpop.permute.xlu1 %727 }
 0x2af   : > { %767 = vst.msk [vmem:[%s1279_s19 + $0x20] sm:$0xff] %vm762_vm0, %v758_v37  ;;  %v745_v56 = vmul.f32 %v904_v27, %v728_v55 }
 0x2b1   : > { %v759_v57 = vadd.f32 %v867_v42, %v745_v56 }
 0x2b2   : > { %v713_v58 = vpop.permute.xlu1 %712 }
 0x2b3   : > { %768 = vst.msk [vmem:[%s1279_s19 + $0x28] sm:$0xff] %vm762_vm0, %v759_v57  ;;  %v742_v44 = vmul.f32 %v895_v10, %v713_v58 }
 0x2b5   : > { %v756_v59 = vadd.f32 %v867_v42, %v742_v44 }
 0x2b6   : > { %v733_v60 = vpop.permute.xlu1 %732 }
 0x2b7   : > { %765 = vst.msk [vmem:[%s1279_s19 + $0x10] sm:$0xff] %vm762_vm0, %v756_v59  ;;  %v746_v61 = vmul.f32 %v907_v34, %v733_v60 }
 0x2b9   : > { %v760_v62 = vadd.f32 %v867_v42, %v746_v61 }
 0x2ba   : > { %v718_v45 = vpop.permute.xlu1 %717 }
 0x2bb   : > { %769 = vst.msk [vmem:[%s1279_s19 + $0x30] sm:$0xff] %vm762_vm0, %v760_v62  ;;  %v743_v63 = vmul.f32 %v898_v33, %v718_v45 }
 0x2bd   : > { %v757_v31 = vadd.f32 %v867_v42, %v743_v63 }
 0x2be   : > { %v738_v46 = vpop.permute.xlu1 %737 }
 0x2bf   : > { %766 = vst.msk [vmem:[%s1279_s19 + $0x18] sm:$0xff] %vm762_vm0, %v757_v31  ;;  %v747_v0 = vmul.f32 %v910_v47, %v738_v46 }
 0x2c1   : > { %v761_v1 = vadd.f32 %v867_v42, %v747_v0 }
 0x2c3   : > { %770 = vst.msk [vmem:[%s1279_s19 + $0x38] sm:$0xff] %vm762_vm0, %v761_v1 }
 0x2c4 PF: > { %s15_s18 = sadd.s32 1, %s1011_s18  }
 0x2c5   : > { %p12_p4 = scmp.ge.s32.totalorder %s15_s18, 6  }
 0x2c7   :  { %14 = sbr.rel (!%p12_p4) target bundleno = 1 (0x1), region = 73 }

// kernel: gat_forward.5
= control target key start
LH: loop header
LB: loop body
LE: loop exit
PB: predicated region body
PF: predicated region fallthrough
CT: control target
= control target key end

     0   :  { %s4705_s18 = smov 0   ;;  %s7214_s0 = inlined_call_operand.vmem [shape: bf16[256,256], index: 0, kind: input, shape index: {}]   ;;  %s7215_s1 = inlined_call_operand.vmem [shape: bf16[256,72], index: 1, kind: input, shape index: {}]   ;;  %s7216_s2 = inlined_call_operand.vmem [shape: f32[8,256], index: 2, kind: input, shape index: {}]   ;;  %s7217_s3 = inlined_call_operand.vmem [shape: f32[256,8], index: 3, kind: input, shape index: {}]   ;;  %s7218_s4 = inlined_call_operand.vmem [shape: f32[1,64], index: 4, kind: input, shape index: {}]   ;;  %s7219_s5 = inlined_call_operand.vmem [shape: f32[256,64], index: 5, kind: output, shape index: {}]  }
   0x1 LB: > { %s3755_s19 = sadd.s32 4294967295, %s4650_s18   ;;  %p3759_p0 = scmp.ge.s32.totalorder %s4650_s18, 1  ;;  %s4650_s18 = sphi %s4705_s18, %s15_s18  }
   0x2   : > { %p200_p1 = scmp.lt.s32.totalorder %s4650_s18, 5 }
   0x4   : > { %p201_p2 = pnand %p3759_p0, %p200_p1 }
   0x6   : > { %204 = sbr.rel (%p201_p2) target bundleno = 2437 (0x985), region = 40 }
   0xd   : > { %s3760_s20 = sshll.u32 %s3755_s19, 3  ;;  %v4652_v0 = vmov 0   ;;  %v4653_v9 = vmov 1   ;;  %v4171_v10 = vld [vmem:[%s7215_s1] sm:$0xff]   ;;  %s4654_s27 = smov 119   ;;  %v4173_v11 = vld [vmem:[%s7215_s1 + $0x18] sm:$0xff]   ;;  %v345_v27 = vlaneseq }
   0xe   : > { %4147 = vset.pattern.permute.xlu1 %v4652_v0  ;;  %4146 = vset.pattern.permute.xlu0 %v4652_v0  ;;  %p235_p3 = scmp.lt.s32.totalorder %s3760_s20, 31  ;;  %v4170_v12 = vld [vmem:[%s7215_s1 + $0x8] sm:$0xff]   ;;  %v4172_v13 = vld [vmem:[%s7215_s1 + $0x10] sm:$0xff]   ;;  %v4780_v14 = vld [vmem:[%s7215_s1 + $0x40] sm:$0xff]   ;;  %v4655_v19 = vmov 2   ;;  %s4657_s22 = smov 110  }
   0xf   : > { %3795 = vmatprep.subr.bf16.mxu0 %v4780_v14  ;;  %v4786_v15 = vld [vmem:[%s7215_s1 + $0x48] sm:$0xff]   ;;  %v4791_v16 = vld [vmem:[%s7215_s1 + $0x50] sm:$0xff]   ;;  %v4798_v17 = vld [vmem:[%s7215_s1 + $0x58] sm:$0xff]   ;;  %v4849_v28 = vshrl.u32 %v345_v27, 7  ;;  %s4659_s12 = smov 101   ;;  %s4663_s15 = smov 92  }
  0x10   : > { %s7781_s20 = smov (!%p235_p3, %s3760_s20), 31  ;;  %3796 = vmatpush3.bf16.msra.mxu0 %v4171_v10  ;;  %7407 = vst [vmem:[#allocation10_spill] sm:$0xff] %v4798_v17  ;;  %v4804_v18 = vld [vmem:[%s7215_s1 + $0x60] sm:$0xff]   ;;  %v4815_v21 = vld [vmem:[%s7215_s1 + $0x68] sm:$0xff]   ;;  %v4827_v23 = vld [vmem:[%s7215_s1 + $0x70] sm:$0xff]   ;;  %s4664_s17 = smov 83  }
  0x11   : > { %s4713_s21 = sshll.u32 %s7781_s20, 3  ;;  %3797 = vmatprep.subr.bf16.mxu0 %v4786_v15  ;;  %v4809_v20 = vld [vmem:[%s7215_s1 + $0x20] sm:$0xff]   ;;  %7408 = vst [vmem:[#allocation11_spill] sm:$0xff] %v4815_v21  ;;  %v4822_v22 = vld [vmem:[%s7215_s1 + $0x28] sm:$0xff]   ;;  %7409 = vst [vmem:[#allocation12_spill] sm:$0xff] %v4827_v23  ;;  %v347_v29 = vsub.s32 0, %v4849_v28 }
  0x12   : > { %s4719_s24 = scalar_lea.vmem %s7217_s3, %s4713_s21  ;;  %v4834_v24 = vld [vmem:[%s7215_s1 + $0x30] sm:$0xff]   ;;  %v4839_v25 = vld [vmem:[%s7215_s1 + $0x78] sm:$0xff]   ;;  %7411 = vst [vmem:[#allocation14_spill] sm:$0xff] %v4849_v28  ;;  %s239_s14 = scalar_lea.vmem %s7214_s0, %s4713_s21  ;;  %v4859_v30 = vld [vmem:[%s7216_s2] sm:$0xff]  ;;  %v780_v35 = vsub.s32 1, %v4849_v28 }
  0x13   : > { %v4722_v1 = vld [vmem:[%s4719_s24 + $0x10] sm:$0xff]  ;;  %v4725_v2 = vld [vmem:[%s4719_s24] sm:$0xff]  ;;  %v4730_v3 = vld [vmem:[%s4719_s24 + $0x18] sm:$0xff]  ;;  %7410 = vst [vmem:[#allocation13_spill] sm:$0xff] %v4839_v25  ;;  %v4868_v37 = vrot.slane %v4859_v30, %v347_v29  ;;  %s4665_s6 = smov 74   ;;  %s4666_s7 = smov 65  }
  0x14   : > { %7399 = vst [vmem:[#allocation2_spill] sm:$0xff] %v4722_v1  ;;  %7400 = vst [vmem:[#allocation3_spill] sm:$0xff] %v4725_v2  ;;  %317 = vperm.xlu1 %4147, %v4722_v1   ;;  %307 = vperm.xlu0 %4146, %v4725_v2   ;;  %v4733_v4 = vld [vmem:[%s4719_s24 + $0x8] sm:$0xff]  ;;  %v4741_v6 = vld [vmem:[%s4719_s24 + $0x20] sm:$0xff]  ;;  %v4886_v47 = vrot.slane %v4859_v30, %v780_v35  ;;  %s4668_s20 = smov 8   ;;  %s4669_s23 = smov 16  }
  0x15   : > { %7401 = vst [vmem:[#allocation4_spill] sm:$0xff] %v4730_v3  ;;  %7402 = vst [vmem:[#allocation5_spill] sm:$0xff] %v4733_v4  ;;  %v4736_v5 = vld [vmem:[%s4719_s24 + $0x28] sm:$0xff]  ;;  %v4746_v7 = vld [vmem:[%s4719_s24 + $0x38] sm:$0xff]  ;;  %3798 = vmatpush3.bf16.msra.mxu0 %v4170_v12  ;;  %s4670_s25 = smov 24   ;;  %s4671_s26 = smov 32  }
  0x16   : > { %7403 = vst [vmem:[#allocation6_spill] sm:$0xff] %v4736_v5  ;;  %7404 = vst [vmem:[#allocation7_spill] sm:$0xff] %v4741_v6  ;;  %v4749_v8 = vld [vmem:[%s4719_s24 + $0x30] sm:$0xff]  ;;  %3799 = vmatprep.subr.bf16.mxu0 %v4791_v16  ;;  %v4846_v26 = vld [vmem:[%s7215_s1 + $0x38] sm:$0xff]   ;;  %s4672_s28 = smov 40   ;;  %s4673_s29 = smov 48  }
  0x17   : > { %7405 = vst [vmem:[#allocation8_spill] sm:$0xff] %v4746_v7  ;;  %7406 = vst [vmem:[#allocation9_spill] sm:$0xff] %v4749_v8  ;;  %v4864_v31 = vld [vmem:[%s7216_s2 + $0x8] sm:$0xff]  ;;  %v254_v32 = vld [vmem:[%s239_s14] sm:$0xff]  ;;  %s7187_s8 = scalar_lea.vmem %s7219_s5, %s4713_s21 }
  0x18   : > { %322 = vperm.xlu1 %4147, %v4730_v3   ;;  %312 = vperm.xlu0 %4146, %v4733_v4   ;;  %7412 = vst [vmem:[#allocation15_spill] sm:$0xff] %v4859_v30  ;;  %7413 = vst [vmem:[#allocation16_spill] sm:$0xff] %v4864_v31  ;;  %v255_v33 = vld [vmem:[%s239_s14 + $0x8] sm:$0xff]  ;;  %v256_v34 = vld [vmem:[%s239_s14 + $0x10] sm:$0xff]  ;;  %v4871_v38 = vrot.slane %v4864_v31, %v347_v29  ;;  %v4873_v39 = vunpack.c.l.bf16 %v254_v32  ;;  %v4875_v42 = vunpack.c.h.bf16 %v254_v32 }
  0x19   : > { %3800 = vmatpush3.bf16.msra.mxu0 %v4172_v13  ;;  %v258_v36 = vld [vmem:[%s239_s14 + $0x20] sm:$0xff]  ;;  %v257_v40 = vld [vmem:[%s239_s14 + $0x18] sm:$0xff]  ;;  %v259_v41 = vld [vmem:[%s239_s14 + $0x28] sm:$0xff]  ;;  %v4877_v43 = vunpack.c.l.bf16 %v255_v33  ;;  %v4879_v44 = vunpack.c.l.bf16 %v256_v34  ;;  %v4881_v45 = vunpack.c.h.bf16 %v256_v34  ;;  %v4883_v46 = vunpack.c.h.bf16 %v255_v33 }
  0x1a   : > { %3801 = vmatprep.subr.bf16.mxu0 %v4798_v17  ;;  %7414 = vst [vmem:[#allocation17_spill] sm:$0xff] %v4873_v39  ;;  %7415 = vst [vmem:[#allocation18_spill] sm:$0xff] %v4875_v42  ;;  %v4889_v48 = vrot.slane %v4864_v31, %v780_v35  ;;  %v4891_v49 = vunpack.c.l.bf16 %v258_v36  ;;  %v260_v50 = vld [vmem:[%s239_s14 + $0x30] sm:$0xff]  ;;  %v261_v51 = vld [vmem:[%s239_s14 + $0x38] sm:$0xff]  ;;  %v4893_v54 = vunpack.c.h.bf16 %v258_v36  ;;  %v4895_v55 = vunpack.c.l.bf16 %v257_v40 }
  0x1b   : > { %7416 = vst [vmem:[#allocation19_spill] sm:$0xff] %v4877_v43  ;;  %7417 = vst [vmem:[#allocation20_spill] sm:$0xff] %v4883_v46  ;;  %v4897_v56 = vunpack.c.h.bf16 %v257_v40  ;;  %v4899_v57 = vunpack.c.l.bf16 %v259_v41  ;;  %v4905_v62 = vunpack.c.l.bf16 %v260_v50  ;;  %v4907_v63 = vunpack.c.h.bf16 %v260_v50 }
  0x1c   : > { %332 = vperm.xlu1 %4147, %v4736_v5   ;;  %327 = vperm.xlu0 %4146, %v4741_v6   ;;  %7418 = vst [vmem:[#allocation21_spill] sm:$0xff] %v4891_v49  ;;  %7419 = vst [vmem:[#allocation22_spill] sm:$0xff] %v4893_v54  ;;  %v4909_v0 = vunpack.c.h.bf16 %v259_v41 }
  0x1d   : > { %3802 = vmatpush3.bf16.msra.mxu0 %v4173_v11  ;;  %7420 = vst [vmem:[#allocation23_spill] sm:$0xff] %v4899_v57  ;;  %7421 = vst [vmem:[#allocation24_spill] sm:$0xff] %v4905_v62 }
  0x1e   : > { %3803 = vmatprep.subr.bf16.mxu0 %v4804_v18  ;;  %7422 = vst [vmem:[#allocation25_spill] sm:$0xff] %v4907_v63  ;;  %7423 = vst [vmem:[#allocation26_spill] sm:$0xff] %v4909_v0 }
  0x20   : > { %342 = vperm.xlu1 %4147, %v4746_v7   ;;  %337 = vperm.xlu0 %4146, %v4749_v8  }
  0x21   : > { %3804 = vmatpush3.bf16.msra.mxu0 %v4809_v20 }
  0x22   : > { %3805 = vmatprep.subr.bf16.mxu0 %v4815_v21 }
  0x24   : > { %4148 = vset.pattern.permute.xlu1 %v4653_v9  ;;  %4149 = vset.pattern.permute.xlu0 %v4653_v9  ;;  %v4911_v9 = vunpack.c.l.bf16 %v261_v51 }
  0x25   : > { %747 = vperm.xlu1 %4148, %v4725_v2   ;;  %755 = vperm.xlu0 %4149, %v4722_v1  }
  0x26   : > { %3806 = vmatpush3.bf16.msra.mxu0 %v4822_v22  ;;  %7424 = vst [vmem:[#allocation27_spill] sm:$0xff] %v4911_v9 }
  0x27   : > { %3807 = vmatprep.subr.bf16.mxu0 %v4827_v23 }
  0x29   : > { %751 = vperm.xlu1 %4148, %v4733_v4   ;;  %767 = vperm.xlu0 %4149, %v4736_v5  }
  0x2a   : > { %3808 = vmatpush3.bf16.msra.mxu0 %v4834_v24 }
  0x2b   : > { %3809 = vmatprep.subr.bf16.mxu0 %v4839_v25 }
  0x2d   : > { %759 = vperm.xlu1 %4148, %v4730_v3   ;;  %775 = vperm.xlu0 %4149, %v4746_v7  }
  0x2e   : > { %3810 = vmatpush3.bf16.msra.mxu0 %v4846_v26 }
  0x31   : > { %763 = vperm.xlu1 %4148, %v4741_v6   ;;  %946 = vrot.lane.b32.xlu0 %v4171_v10, %s4654_s27 }
  0x32   : > { %4150 = vset.pattern.permute.xlu0 %v4655_v19 }
  0x35   : > { %771 = vperm.xlu1 %4148, %v4749_v8   ;;  %952 = vrot.lane.b32.xlu0 %v4173_v11, %s4654_s27 }
  0x39   : > { %948 = vrot.lane.b32.xlu1 %v4170_v12, %s4654_s27 }
  0x3a   : > { %4151 = vset.pattern.permute.xlu1 %v4655_v19 }
  0x3d   : > { %950 = vrot.lane.b32.xlu1 %v4172_v13, %s4654_s27  ;;  %v4913_v13 = vunpack.c.h.bf16 %v261_v51 }
  0x3f   : > { %7425 = vst [vmem:[#allocation28_spill] sm:$0xff] %v4913_v13 }
  0x93   : > { %v318_v52 = vpop.permute.xlu1 %317  ;;  %v308_v53 = vpop.permute.xlu0 %307 }
  0x94   : > { %v357_v58 = vadd.f32 %v4868_v37, %v318_v52  ;;  %v358_v59 = vadd.f32 %v4871_v38, %v318_v52  ;;  %v353_v60 = vadd.f32 %v4868_v37, %v308_v53  ;;  %v354_v61 = vadd.f32 %v4871_v38, %v308_v53 }
  0x96   : > { %v389_v10 = vmul.f32 0.2, %v357_v58  ;;  %v390_v11 = vmul.f32 0.2, %v358_v59  ;;  %v385_v12 = vmul.f32 0.2, %v353_v60 }
  0x97   : > { %v386_v19 = vmul.f32 0.2, %v354_v61  ;;  %v323_v27 = vpop.permute.xlu1 %322  ;;  %v313_v29 = vpop.permute.xlu0 %312  ;;  %vm369_vm0 = vcmp.gt.f32.partialorder %v353_v60, 0.0  ;;  %vm370_vm1 = vcmp.gt.f32.partialorder %v354_v61, 0.0  ;;  %vm373_vm2 = vcmp.gt.f32.partialorder %v357_v58, 0.0 }
  0x98   : > { %v359_v32 = vadd.f32 %v4868_v37, %v323_v27  ;;  %v4917_v33 = vadd.f32 %v4871_v38, %v323_v27  ;;  %v355_v34 = vadd.f32 %v4868_v37, %v313_v29  ;;  %v356_v35 = vadd.f32 %v4871_v38, %v313_v29 }
  0x99   : > { %v401_v36 = vsel %vm369_vm0, %v353_v60, %v385_v12  ;;  %v402_v40 = vsel %vm370_vm1, %v354_v61, %v386_v19  ;;  %vm374_vm3 = vcmp.gt.f32.partialorder %v358_v59, 0.0  ;;  %v405_v41 = vsel %vm373_vm2, %v357_v58, %v389_v10 }
  0x9a   : > { %v391_v50 = vmul.f32 0.2, %v359_v32  ;;  %v392_v51 = vmul.f32 0.2, %v4917_v33  ;;  %v387_v52 = vmul.f32 0.2, %v355_v34  ;;  %v4923_v53 = vadd.f32 %v4873_v39, %v401_v36 }
  0x9b   : > { %v388_v31 = vmul.f32 0.2, %v356_v35  ;;  %v333_v30 = vpop.permute.xlu1 %332  ;;  %v328_v28 = vpop.permute.xlu0 %327  ;;  %v4926_v27 = vadd.f32 %v4875_v42, %v402_v40  ;;  %vm371_vm4 = vcmp.gt.f32.partialorder %v355_v34, 0.0  ;;  %vm372_vm5 = vcmp.gt.f32.partialorder %v356_v35, 0.0 }
  0x9c   : > { %7426 = vst [vmem:[#allocation29_spill] sm:$0xff] %v4923_v53  ;;  %v4929_v60 = vadd.f32 %v4868_v37, %v333_v30  ;;  %v4932_v58 = vadd.f32 %v4871_v38, %v333_v30  ;;  %v361_v61 = vadd.f32 %v4868_v37, %v328_v28  ;;  %v362_v10 = vadd.f32 %v4871_v38, %v328_v28 }
  0x9d   : > { %7427 = vst [vmem:[#allocation30_spill] sm:$0xff] %v4926_v27  ;;  %v449_v12 = vmax.f32 %v4923_v53, %v4926_v27  ;;  %v403_v19 = vsel %vm371_vm4, %v355_v34, %v387_v52  ;;  %v404_v29 = vsel %vm372_vm5, %v356_v35, %v388_v31  ;;  %v406_v36 = vsel %vm374_vm3, %v358_v59, %v390_v11 }
  0x9e   : > { %v4940_v40 = vmul.f32 0.2, %v4929_v60  ;;  %v4943_v7 = vmul.f32 0.2, %v4932_v58  ;;  %v393_v5 = vmul.f32 0.2, %v361_v61  ;;  %v4946_v30 = vadd.f32 %v4877_v43, %v403_v19 }
  0x9f   : > { %v394_v8 = vmul.f32 0.2, %v362_v10  ;;  %450 = vmax.xlane.f32.xlu0 %v449_v12  ;;  %v343_v28 = vpop.permute.xlu1 %342  ;;  %v338_v3 = vpop.permute.xlu0 %337  ;;  %v4949_v27 = vadd.f32 %v4883_v46, %v404_v29  ;;  %v4952_v31 = vadd.f32 %v4879_v44, %v405_v41  ;;  %v4955_v59 = vadd.f32 %v4881_v45, %v406_v36 }
  0xa0   : > { %7428 = vst [vmem:[#allocation31_spill] sm:$0xff] %v4946_v30  ;;  %v4958_v11 = vadd.f32 %v4868_v37, %v343_v28  ;;  %v4961_v34 = vadd.f32 %v4871_v38, %v343_v28  ;;  %v365_v35 = vadd.f32 %v4868_v37, %v338_v3  ;;  %v366_v52 = vadd.f32 %v4871_v38, %v338_v3 }
  0xa1   : > { %7429 = vst [vmem:[#allocation32_spill] sm:$0xff] %v4949_v27  ;;  %7430 = vst [vmem:[#allocation33_spill] sm:$0xff] %v4952_v31  ;;  %v452_v12 = vmax.f32 %v4946_v30, %v4949_v27  ;;  %v455_v41 = vmax.f32 %v4952_v31, %v4955_v59  ;;  %vm377_vm6 = vcmp.gt.f32.partialorder %v361_v61, 0.0  ;;  %vm378_vm7 = vcmp.gt.f32.partialorder %v362_v10, 0.0 }
  0xa2   : > { %7431 = vst [vmem:[#allocation34_spill] sm:$0xff] %v4955_v59  ;;  %v4970_v19 = vmul.f32 0.2, %v4958_v11  ;;  %v4973_v29 = vmul.f32 0.2, %v4961_v34  ;;  %v409_v28 = vsel %vm377_vm6, %v361_v61, %v393_v5  ;;  %v410_v3 = vsel %vm378_vm7, %v362_v10, %v394_v8 }
  0xa3   : > { %v397_v36 = vmul.f32 0.2, %v365_v35  ;;  %v398_v53 = vmul.f32 0.2, %v366_v52  ;;  %453 = vmax.xlane.f32.xlu1 %v452_v12  ;;  %456 = vmax.xlane.f32.xlu0 %v455_v41  ;;  %v4976_v37 = vadd.f32 %v4891_v49, %v409_v28  ;;  %vm375_vm8 = vcmp.gt.f32.partialorder %v359_v32, 0.0 }
  0xa4   : > { %v748_v38 = vpop.permute.xlu1 %747  ;;  %v756_v59 = vpop.permute.xlu0 %755  ;;  %v4979_v31 = vadd.f32 %v4893_v54, %v410_v3  ;;  %vm376_vm9 = vcmp.gt.f32.partialorder %v4917_v33, 0.0  ;;  %v407_v27 = vsel %vm375_vm8, %v359_v32, %v391_v50  ;;  %vm381_vm10 = vcmp.gt.f32.partialorder %v365_v35, 0.0 }
  0xa5   : > { %7432 = vst [vmem:[#allocation35_spill] sm:$0xff] %v4976_v37  ;;  %v786_v30 = vadd.f32 %v4886_v47, %v748_v38  ;;  %v787_v5 = vadd.f32 %v4889_v48, %v748_v38  ;;  %v4985_v61 = vadd.f32 %v4886_v47, %v756_v59  ;;  %v4988_v8 = vadd.f32 %v4889_v48, %v756_v59 }
  0xa6   : > { %7433 = vst [vmem:[#allocation36_spill] sm:$0xff] %v4979_v31  ;;  %v461_v10 = vmax.f32 %v4976_v37, %v4979_v31  ;;  %v408_v12 = vsel %vm376_vm9, %v4917_v33, %v392_v51  ;;  %v4994_v41 = vadd.f32 %v4895_v55, %v407_v27  ;;  %vm382_vm11 = vcmp.gt.f32.partialorder %v366_v52, 0.0 }
  0xa7   : > { %v818_v32 = vmul.f32 0.2, %v786_v30  ;;  %v819_v50 = vmul.f32 0.2, %v787_v5  ;;  %v4997_v28 = vmul.f32 0.2, %v4985_v61  ;;  %v5000_v3 = vadd.f32 %v4897_v56, %v408_v12 }
  0xa8   : > { %7434 = vst [vmem:[#allocation37_spill] sm:$0xff] %v4994_v41  ;;  %v5003_v59 = vmul.f32 0.2, %v4988_v8  ;;  %462 = vmax.xlane.f32.xlu1 %v461_v10  ;;  %v752_v38 = vpop.permute.xlu1 %751  ;;  %v768_v37 = vpop.permute.xlu0 %767  ;;  %v413_v33 = vsel %vm381_vm10, %v365_v35, %v397_v36  ;;  %v414_v51 = vsel %vm382_vm11, %v366_v52, %v398_v53  ;;  %vm379_vm12 = vcmp.gt.f32.partialorder %v4929_v60, 0.0 }
  0xa9   : > { %7435 = vst [vmem:[#allocation38_spill] sm:$0xff] %v5000_v3  ;;  %v458_v27 = vmax.f32 %v4994_v41, %v5000_v3  ;;  %v788_v31 = vadd.f32 %v4886_v47, %v752_v38  ;;  %v789_v6 = vadd.f32 %v4889_v48, %v752_v38  ;;  %v5012_v12 = vadd.f32 %v4886_v47, %v768_v37 }
  0xaa   : > { %v5015_v2 = vadd.f32 %v4889_v48, %v768_v37  ;;  %v5018_v10 = vadd.f32 %v4905_v62, %v413_v33  ;;  %v5021_v53 = vadd.f32 %v4907_v63, %v414_v51  ;;  %vm380_vm13 = vcmp.gt.f32.partialorder %v4932_v58, 0.0 }
  0xab   : > { %459 = vmax.xlane.f32.xlu0 %v458_v27  ;;  %v820_v35 = vmul.f32 0.2, %v788_v31  ;;  %v821_v52 = vmul.f32 0.2, %v789_v6  ;;  %v5025_v36 = vmul.f32 0.2, %v5012_v12  ;;  %v411_v38 = vsel %vm379_vm12, %v4929_v60, %v4940_v40 }
  0xac   : > { %7436 = vst [vmem:[#allocation39_spill] sm:$0xff] %v5018_v10  ;;  %7437 = vst [vmem:[#allocation40_spill] sm:$0xff] %v5021_v53  ;;  %v5030_v37 = vmul.f32 0.2, %v5015_v2  ;;  %v467_v33 = vmax.f32 %v5018_v10, %v5021_v53  ;;  %v412_v51 = vsel %vm380_vm13, %v4932_v58, %v4943_v7  ;;  %v5037_v3 = vadd.f32 %v4899_v57, %v411_v38  ;;  %v760_v27 = vpop.permute.xlu1 %759  ;;  %v776_v41 = vpop.permute.xlu0 %775 }
  0xad   : > { %v5040_v1 = vadd.f32 %v4909_v0, %v412_v51  ;;  %v792_v25 = vadd.f32 %v4886_v47, %v760_v27  ;;  %v793_v60 = vadd.f32 %v4889_v48, %v760_v27  ;;  %v5045_v40 = vadd.f32 %v4886_v47, %v776_v41 }
  0xae   : > { %7438 = vst [vmem:[#allocation41_spill] sm:$0xff] %v5037_v3  ;;  %468 = vmax.xlane.f32.xlu1 %v467_v33  ;;  %v5048_v10 = vadd.f32 %v4889_v48, %v776_v41  ;;  %vm383_vm14 = vcmp.gt.f32.partialorder %v4958_v11, 0.0  ;;  %vm384_vm15 = vcmp.gt.f32.partialorder %v4961_v34, 0.0  ;;  %vm802_vm0 = vcmp.gt.f32.partialorder %v786_v30, 0.0 }
  0xaf   : > { %7439 = vst [vmem:[#allocation42_spill] sm:$0xff] %v5040_v1  ;;  %v464_v7 = vmax.f32 %v5037_v3, %v5040_v1  ;;  %v824_v58 = vmul.f32 0.2, %v792_v25  ;;  %v825_v38 = vmul.f32 0.2, %v793_v60  ;;  %v415_v41 = vsel %vm383_vm14, %v4958_v11, %v4970_v19 }
  0xb0   : > { %v5055_v51 = vmul.f32 0.2, %v5045_v40  ;;  %v5058_v27 = vmul.f32 0.2, %v5048_v10  ;;  %v416_v33 = vsel %vm384_vm15, %v4961_v34, %v4973_v29  ;;  %vm803_vm1 = vcmp.gt.f32.partialorder %v787_v5, 0.0  ;;  %v764_v53 = vpop.permute.xlu1 %763 }
  0xb1   : > { %465 = vmax.xlane.f32.xlu0 %v464_v7  ;;  %v5065_v4 = vadd.f32 %v4911_v9, %v415_v41  ;;  %v5068_v1 = vadd.f32 %v4913_v13, %v416_v33  ;;  %v834_v3 = vsel %vm802_vm0, %v786_v30, %v818_v32  ;;  %v835_v21 = vsel %vm803_vm1, %v787_v5, %v819_v50 }
  0xb2   : > { %v5071_v23 = vadd.f32 %v834_v3, %v4873_v39  ;;  %v5074_v17 = vadd.f32 %v835_v21, %v4875_v42  ;;  %v794_v11 = vadd.f32 %v4886_v47, %v764_v53  ;;  %v795_v34 = vadd.f32 %v4889_v48, %v764_v53 }
  0xb3   : > { %v470_v19 = vmax.f32 %v5065_v4, %v5068_v1  ;;  %vm804_vm2 = vcmp.gt.f32.partialorder %v788_v31, 0.0  ;;  %vm805_vm3 = vcmp.gt.f32.partialorder %v789_v6, 0.0  ;;  %vm808_vm4 = vcmp.gt.f32.partialorder %v792_v25, 0.0 }
  0xb4   : > { %v866_v30 = vmax.f32 %v5071_v23, %v5074_v17  ;;  %v826_v29 = vmul.f32 0.2, %v794_v11  ;;  %v827_v5 = vmul.f32 0.2, %v795_v34  ;;  %v836_v32 = vsel %vm804_vm2, %v788_v31, %v820_v35  ;;  %v772_v50 = vpop.permute.xlu1 %771 }
  0xb5   : > { %471 = vmax.xlane.f32.xlu0 %v470_v19  ;;  %v837_v21 = vsel %vm805_vm3, %v789_v6, %v821_v52  ;;  %v5083_v3 = vadd.f32 %v836_v32, %v4877_v43  ;;  %v798_v53 = vadd.f32 %v4886_v47, %v772_v50  ;;  %v799_v7 = vadd.f32 %v4889_v48, %v772_v50 }
  0xb6   : > { %867 = vmax.xlane.f32.xlu1 %v866_v30  ;;  %v5088_v41 = vadd.f32 %v837_v21, %v4883_v46  ;;  %vm809_vm5 = vcmp.gt.f32.partialorder %v793_v60, 0.0  ;;  %v840_v33 = vsel %vm808_vm4, %v792_v25, %v824_v58  ;;  %vm806_vm6 = vcmp.gt.f32.partialorder %v4985_v61, 0.0 }
  0xb7   : > { %v830_v42 = vmul.f32 0.2, %v798_v53  ;;  %v831_v31 = vmul.f32 0.2, %v799_v7  ;;  %v841_v35 = vsel %vm809_vm5, %v793_v60, %v825_v38  ;;  %v5092_v6 = vadd.f32 %v840_v33, %v4895_v55 }
  0xb8   : > { %v869_v52 = vmax.f32 %v5083_v3, %v5088_v41  ;;  %v5097_v47 = vadd.f32 %v841_v35, %v4897_v56  ;;  %vm807_vm7 = vcmp.gt.f32.partialorder %v4988_v8, 0.0  ;;  %v838_v48 = vsel %vm806_vm6, %v4985_v61, %v4997_v28  ;;  %v5192_v35 = vpop.permute.xlu1 %948 }
  0xb9   : > { %v839_v25 = vsel %vm807_vm7, %v4988_v8, %v5003_v59  ;;  %v5105_v58 = vadd.f32 %v838_v48, %v4879_v44  ;;  %vm812_vm8 = vcmp.gt.f32.partialorder %v5012_v12, 0.0  ;;  %vm813_vm9 = vcmp.gt.f32.partialorder %v5015_v2, 0.0 }
  0xba   : > { %870 = vmax.xlane.f32.xlu0 %v869_v52  ;;  %v875_v60 = vmax.f32 %v5092_v6, %v5097_v47  ;;  %v5112_v38 = vadd.f32 %v839_v25, %v4881_v45  ;;  %v844_v61 = vsel %vm812_vm8, %v5012_v12, %v5025_v36  ;;  %v845_v8 = vsel %vm813_vm9, %v5015_v2, %v5030_v37 }
  0xbb   : > { %v5119_v28 = vadd.f32 %v844_v61, %v4899_v57  ;;  %v5122_v59 = vadd.f32 %v845_v8, %v4909_v0  ;;  %vm810_vm10 = vcmp.gt.f32.partialorder %v794_v11, 0.0  ;;  %vm811_vm11 = vcmp.gt.f32.partialorder %v795_v34, 0.0  ;;  %v7453_v8 = vld [vmem:[#allocation30_spill] sm:$0xff] }
  0xbc   : > { %876 = vmax.xlane.f32.xlu1 %v875_v60  ;;  %v872_v19 = vmax.f32 %v5105_v58, %v5112_v38  ;;  %v842_v30 = vsel %vm810_vm10, %v794_v11, %v826_v29  ;;  %v843_v32 = vsel %vm811_vm11, %v795_v34, %v827_v5  ;;  %vm816_vm12 = vcmp.gt.f32.partialorder %v5045_v40, 0.0  ;;  %v5196_v48 = vpop.permute.xlu1 %950  ;;  %v7452_v60 = vld [vmem:[#allocation29_spill] sm:$0xff] }
  0xbd   : > { %v881_v12 = vmax.f32 %v5119_v28, %v5122_v59  ;;  %v5130_v2 = vadd.f32 %v842_v30, %v4891_v49  ;;  %v5133_v36 = vadd.f32 %v843_v32, %v4893_v54  ;;  %vm817_vm13 = vcmp.gt.f32.partialorder %v5048_v10, 0.0 }
  0xbe   : > { %873 = vmax.xlane.f32.xlu0 %v872_v19  ;;  %v848_v37 = vsel %vm816_vm12, %v5045_v40, %v5055_v51  ;;  %v849_v11 = vsel %vm817_vm13, %v5048_v10, %v5058_v27  ;;  %vm814_vm14 = vcmp.gt.f32.partialorder %v798_v53, 0.0  ;;  %vm815_vm15 = vcmp.gt.f32.partialorder %v799_v7, 0.0  ;;  %v7449_v27 = vld [vmem:[#allocation9_spill] sm:$0xff] }
  0xbf   : > { %v878_v34 = vmax.f32 %v5130_v2, %v5133_v36  ;;  %v5143_v29 = vadd.f32 %v848_v37, %v4911_v9  ;;  %v5146_v5 = vadd.f32 %v849_v11, %v4913_v13  ;;  %v846_v50 = vsel %vm814_vm14, %v798_v53, %v830_v42  ;;  %v7447_v42 = vld [vmem:[#allocation7_spill] sm:$0xff]  ;;  %v7450_v53 = vld [vmem:[#allocation6_spill] sm:$0xff] }
  0xc0   : > { %882 = vmax.xlane.f32.xlu1 %v881_v12  ;;  %v847_v21 = vsel %vm815_vm15, %v799_v7, %v831_v31  ;;  %v5149_v33 = vadd.f32 %v846_v50, %v4905_v62  ;;  %v7451_v7 = vld [vmem:[#allocation8_spill] sm:$0xff]  ;;  %v5190_v31 = vpop.permute.xlu0 %946  ;;  %v7454_v11 = vld [vmem:[#allocation31_spill] sm:$0xff] }
  0xc1   : > { %v5152_v40 = vadd.f32 %v847_v21, %v4907_v63  ;;  %v887_v10 = vmax.f32 %v5143_v29, %v5146_v5  ;;  %v7455_v50 = vld [vmem:[#allocation32_spill] sm:$0xff] }
  0xc2   : > { %879 = vmax.xlane.f32.xlu0 %v878_v34 }
  0xc3   : > { %v884_v51 = vmax.f32 %v5149_v33, %v5152_v40 }
  0xc4   : > { %888 = vmax.xlane.f32.xlu1 %v887_v10  ;;  %v5194_v52 = vpop.permute.xlu0 %952 }
  0xc6   : > { %885 = vmax.xlane.f32.xlu0 %v884_v51 }
  0xd5   : > { %954 = vrot.lane.b32.xlu1 %v4809_v20, %s4654_s27  ;;  %v7440_v20 = vld [vmem:[#allocation10_spill] sm:$0xff] }
  0xd9   : > { %958 = vrot.lane.b32.xlu1 %v4834_v24, %s4654_s27  ;;  %v7443_v24 = vld [vmem:[#allocation5_spill] sm:$0xff] }
  0xdc   : > { %956 = vrot.lane.b32.xlu0 %v4822_v22, %s4654_s27  ;;  %v7441_v22 = vld [vmem:[#allocation12_spill] sm:$0xff] }
  0xdd   : > { %962 = vrot.lane.b32.xlu1 %v4780_v14, %s4654_s27  ;;  %v7442_v14 = vld [vmem:[#allocation11_spill] sm:$0xff] }
  0xe0   : > { %960 = vrot.lane.b32.xlu0 %v4846_v26, %s4654_s27  ;;  %v7444_v26 = vld [vmem:[#allocation13_spill] sm:$0xff] }
  0xe1   : > { %966 = vrot.lane.b32.xlu1 %v4791_v16, %s4654_s27  ;;  %v7445_v16 = vld [vmem:[#allocation2_spill] sm:$0xff] }
  0xe4   : > { %964 = vrot.lane.b32.xlu0 %v4786_v15, %s4654_s27  ;;  %v7446_v15 = vld [vmem:[#allocation3_spill] sm:$0xff] }
  0xe5   : > { %970 = vrot.lane.b32.xlu1 %v4804_v18, %s4654_s27  ;;  %v7448_v18 = vld [vmem:[#allocation4_spill] sm:$0xff] }
  0xe8   : > { %968 = vrot.lane.b32.xlu0 %v7440_v20, %s4654_s27  ;;  %v7456_v20 = vld [vmem:[#allocation33_spill] sm:$0xff] }
  0xe9   : > { %974 = vrot.lane.b32.xlu1 %v7441_v22, %s4654_s27 }
  0xec   : > { %972 = vrot.lane.b32.xlu0 %v7442_v14, %s4654_s27  ;;  %v7457_v14 = vld [vmem:[#allocation34_spill] sm:$0xff] }
  0xed   : > { %1120 = vperm.xlu1 %4151, %v7443_v24  }
  0xf0   : > { %976 = vrot.lane.b32.xlu0 %v7444_v26, %s4654_s27 }
  0xf1   : > { %1124 = vperm.xlu1 %4151, %v7445_v16  }
  0xf4   : > { %1116 = vperm.xlu0 %4150, %v7446_v15  }
  0xf5   : > { %1132 = vperm.xlu1 %4151, %v7447_v42  }
  0xf8   : > { %1128 = vperm.xlu0 %4150, %v7448_v18   ;;  %v7458_v18 = vld [vmem:[#allocation37_spill] sm:$0xff] }
  0xf9   : > { %1140 = vperm.xlu1 %4151, %v7449_v27  }
  0xfc   : > { %1136 = vperm.xlu0 %4150, %v7450_v53   ;;  %v7459_v53 = vld [vmem:[#allocation38_spill] sm:$0xff] }
 0x100   : > { %1144 = vperm.xlu0 %4150, %v7451_v7  }
 0x12c   : > { %v451_v25 = vpop.xlane.xlu0 %450 }
 0x12d   : > { %v473_v61 = vsub.f32 %v7452_v60, %v451_v25  ;;  %v474_v19 = vsub.f32 %v7453_v8, %v451_v25  ;;  %v7460_v25 = vld [vmem:[#allocation36_spill] sm:$0xff] }
 0x12f   : > { %v489_v30 = vmul.f32 1.442695, %v473_v61  ;;  %v491_v32 = vmul.f32 1.442695, %v474_v19  ;;  %v4656_v19 = vmov 3  }
 0x130   : > { %v454_v12 = vpop.xlane.xlu1 %453  ;;  %v457_v37 = vpop.xlane.xlu0 %456  ;;  %4153 = vset.pattern.permute.xlu1 %v4656_v19  ;;  %4152 = vset.pattern.permute.xlu0 %v4656_v19 }
 0x131   : > { %v475_v34 = vsub.f32 %v7454_v11, %v454_v12  ;;  %v476_v21 = vsub.f32 %v7455_v50, %v454_v12  ;;  %4186 = vpow2.f32 %v489_v30  ;;  %v477_v22 = vsub.f32 %v7456_v20, %v457_v37  ;;  %v7463_v20 = vld [vmem:[#allocation41_spill] sm:$0xff] }
 0x132   : > { %4188 = vpow2.f32 %v491_v32  ;;  %v478_v24 = vsub.f32 %v7457_v14, %v457_v37  ;;  %v7461_v37 = vld [vmem:[#allocation35_spill] sm:$0xff]  ;;  %v7464_v14 = vld [vmem:[#allocation42_spill] sm:$0xff] }
 0x133   : > { %v493_v10 = vmul.f32 1.442695, %v475_v34  ;;  %v495_v51 = vmul.f32 1.442695, %v476_v21  ;;  %v497_v16 = vmul.f32 1.442695, %v477_v22 }
 0x134   : > { %v499_v15 = vmul.f32 1.442695, %v478_v24 }
 0x135   : > { %4190 = vpow2.f32 %v493_v10  ;;  %v463_v26 = vpop.xlane.xlu1 %462  ;;  %v7462_v10 = vld [vmem:[#allocation40_spill] sm:$0xff] }
 0x136   : > { %4192 = vpow2.f32 %v495_v51  ;;  %v482_v60 = vsub.f32 %v7460_v25, %v463_v26  ;;  %v481_v11 = vsub.f32 %v7461_v37, %v463_v26 }
 0x137   : > { %4194 = vpow2.f32 %v497_v16 }
 0x138   : > { %v460_v42 = vpop.xlane.xlu0 %459  ;;  %4196 = vpow2.f32 %v499_v15  ;;  %v507_v21 = vmul.f32 1.442695, %v482_v60 }
 0x139   : > { %v479_v27 = vsub.f32 %v7458_v18, %v460_v42  ;;  %v480_v7 = vsub.f32 %v7459_v53, %v460_v42  ;;  %v505_v53 = vmul.f32 1.442695, %v481_v11  ;;  %v7465_v11 = vld [vmem:[#allocation39_spill] sm:$0xff] }
 0x13b   : > { %v501_v61 = vmul.f32 1.442695, %v479_v27  ;;  %v503_v8 = vmul.f32 1.442695, %v480_v7  ;;  %v469_v30 = vpop.xlane.xlu1 %468  ;;  %v4187_v32 = vpop.eup %4186 }
 0x13c   : > { %v4189_v12 = vpop.eup %4188  ;;  %v486_v51 = vsub.f32 %v7462_v10, %v469_v30 }
 0x13d   : > { %4198 = vpow2.f32 %v501_v61 }
 0x13e   : > { %4200 = vpow2.f32 %v503_v8  ;;  %v466_v34 = vpop.xlane.xlu0 %465  ;;  %v515_v25 = vmul.f32 1.442695, %v486_v51 }
 0x13f   : > { %v4191_v50 = vpop.eup %4190  ;;  %v483_v22 = vsub.f32 %v7463_v20, %v466_v34  ;;  %v484_v24 = vsub.f32 %v7464_v14, %v466_v34  ;;  %4202 = vpow2.f32 %v507_v21  ;;  %v485_v34 = vsub.f32 %v7465_v11, %v469_v30 }
 0x140   : > { %v4193_v16 = vpop.eup %4192  ;;  %v521_v42 = vpack.c.bf16 %v4191_v50, %v4187_v32 }
 0x141   : > { %v509_v18 = vmul.f32 1.442695, %v483_v22  ;;  %v511_v15 = vmul.f32 1.442695, %v484_v24  ;;  %v522_v27 = vpack.c.bf16 %v4193_v16, %v4189_v12  ;;  %v4195_v19 = vpop.eup %4194  ;;  %v513_v14 = vmul.f32 1.442695, %v485_v34 }
 0x142   : > { %v472_v7 = vpop.xlane.xlu0 %471  ;;  %v4197_v12 = vpop.eup %4196 }
 0x143   : > { %v487_v26 = vsub.f32 %v5065_v4, %v472_v7  ;;  %v488_v61 = vsub.f32 %v5068_v1, %v472_v7  ;;  %v5213_v60 = vpop.xlane.xlu1 %867  ;;  %657 = vmatprep.mubr.bf16.mxu0 %v522_v27  ;;  %4204 = vpow2.f32 %v511_v15 }
 0x144   : > { %v891_v8 = vsub.f32 %v5074_v17, %v5213_v60  ;;  %658 = vmatmul.mubr.bf16.vlgmr.msra.gmra.mrb[0].mxu0 %v521_v42  ;;  %4206 = vpow2.f32 %v509_v18 }
 0x145   : > { %v519_v32 = vmul.f32 1.442695, %v488_v61  ;;  %4208 = vpow2.f32 %v505_v53  ;;  %v517_v4 = vmul.f32 1.442695, %v487_v26 }
 0x146   : > { %4210 = vpow2.f32 %v515_v25  ;;  %v908_v21 = vmul.f32 1.442695, %v891_v8 }
 0x147   : > { %v4199_v37 = vpop.eup %4198  ;;  %v871_v50 = vpop.xlane.xlu0 %870  ;;  %4212 = vpow2.f32 %v519_v32 }
 0x148   : > { %v4201_v1 = vpop.eup %4200  ;;  %v893_v10 = vsub.f32 %v5088_v41, %v871_v50  ;;  %v523_v22 = vpack.c.bf16 %v4199_v37, %v4195_v19  ;;  %4214 = vpow2.f32 %v517_v4 }
 0x149   : > { %v877_v51 = vpop.xlane.xlu1 %876  ;;  %v524_v20 = vpack.c.bf16 %v4201_v1, %v4197_v12  ;;  %4216 = vpow2.f32 %v908_v21  ;;  %v4203_v16 = vpop.eup %4202  ;;  %v890_v1 = vsub.f32 %v5071_v23, %v5213_v60 }
 0x14a   : > { %v912_v17 = vmul.f32 1.442695, %v893_v10  ;;  %v892_v10 = vsub.f32 %v5083_v3, %v871_v50 }
 0x14b   : > { %v874_v24 = vpop.xlane.xlu0 %873  ;;  %665 = vmatprep.mubr.bf16.mxu0 %v524_v20 }
 0x14c   : > { %666 = vmatmul.mubr.bf16.gmra.mrb[4].mxu0 %v523_v22  ;;  %4218 = vpow2.f32 %v912_v17  ;;  %v896_v17 = vsub.f32 %v5092_v6, %v877_v51  ;;  %v895_v23 = vsub.f32 %v5112_v38, %v874_v24 }
 0x14d   : > { %v5219_v30 = vpop.xlane.xlu1 %882  ;;  %v4205_v42 = vpop.eup %4204  ;;  %4220 = vpow2.f32 %v513_v14  ;;  %v897_v14 = vsub.f32 %v5097_v47, %v877_v51 }
 0x14e   : > { %v4207_v18 = vpop.eup %4206  ;;  %v526_v41 = vpack.c.bf16 %v4205_v42, %v4203_v16  ;;  %v906_v16 = vmul.f32 1.442695, %v890_v1  ;;  %v894_v42 = vsub.f32 %v5105_v58, %v874_v24  ;;  %v918_v60 = vmul.f32 1.442695, %v896_v17 }
 0x14f   : > { %v5221_v15 = vpop.xlane.xlu0 %879  ;;  %v4209_v27 = vpop.eup %4208  ;;  %v901_v3 = vsub.f32 %v5122_v59, %v5219_v30  ;;  %v920_v6 = vmul.f32 1.442695, %v897_v14 }
 0x150   : > { %v4211_v53 = vpop.eup %4210  ;;  %673 = vmatprep.mubr.bf16.mxu0 %v526_v41  ;;  %v525_v26 = vpack.c.bf16 %v4207_v18, %v4209_v27  ;;  %v910_v41 = vmul.f32 1.442695, %v892_v10  ;;  %v899_v47 = vsub.f32 %v5133_v36, %v5221_v15  ;;  %4222 = vpow2.f32 %v906_v16 }
 0x151   : > { %v5223_v7 = vpop.xlane.xlu1 %888  ;;  %v4213_v25 = vpop.eup %4212  ;;  %v914_v51 = vmul.f32 1.442695, %v894_v42  ;;  %v916_v27 = vmul.f32 1.442695, %v895_v23  ;;  %v928_v38 = vmul.f32 1.442695, %v901_v3  ;;  %v898_v36 = vsub.f32 %v5130_v2, %v5221_v15 }
 0x152   : > { %v528_v8 = vpack.c.bf16 %v4213_v25, %v4211_v53  ;;  %v4215_v19 = vpop.eup %4214  ;;  %4224 = vpow2.f32 %v910_v41  ;;  %v924_v59 = vmul.f32 1.442695, %v899_v47  ;;  %v7466_v25 = vld [vmem:[#allocation14_spill] sm:$0xff]  ;;  %v7468_v2 = vld [vmem:[#allocation16_spill] sm:$0xff] }
 0x153   : > { %v5225_v61 = vpop.xlane.xlu0 %885  ;;  %v4217_v12 = vpop.eup %4216  ;;  %4226 = vpow2.f32 %v918_v60 }
 0x154   : > { %674 = vmatmul.mubr.bf16.gmra.mrb[8].mxu0 %v525_v26  ;;  %4228 = vpow2.f32 %v920_v6  ;;  %v1149_v26 = vsub.s32 2, %v7466_v25  ;;  %v902_v10 = vsub.f32 %v5149_v33, %v5225_v61 }
 0x155   : > { %v5227_v32 = vpop.permute.xlu1 %954  ;;  %681 = vmatprep.mubr.bf16.mxu0 %v528_v8  ;;  %4230 = vpow2.f32 %v914_v51  ;;  %v905_v8 = vsub.f32 %v5146_v5, %v5223_v7 }
 0x156   : > { %v4219_v37 = vpop.eup %4218  ;;  %4232 = vpow2.f32 %v916_v27  ;;  %v5262_v15 = vrot.slane %v7468_v2, %v1149_v26  ;;  %v5288_v23 = vmul.f32 1.442695, %v902_v10 }
 0x157   : > { %v5229_v11 = vpop.permute.xlu0 %956  ;;  %v939_v34 = vpack.c.bf16 %v4219_v37, %v4217_v12  ;;  %v4221_v4 = vpop.eup %4220  ;;  %4234 = vpow2.f32 %v928_v38  ;;  %v922_v12 = vmul.f32 1.442695, %v898_v36  ;;  %v7467_v37 = vld [vmem:[#allocation15_spill] sm:$0xff]  ;;  %v936_v5 = vmul.f32 1.442695, %v905_v8 }
 0x158   : > { %v527_v20 = vpack.c.bf16 %v4215_v19, %v4221_v4  ;;  %4236 = vpow2.f32 %v924_v59  ;;  %v903_v19 = vsub.f32 %v5152_v40, %v5225_v61  ;;  %v904_v40 = vsub.f32 %v5143_v29, %v5223_v7 }
 0x159   : > { %v5233_v21 = vpop.permute.xlu1 %958  ;;  %1026 = vmatprep.mubr.bf16.mxu1 %v939_v34  ;;  %v5259_v34 = vrot.slane %v7467_v37, %v1149_v26 }
 0x15a   : > { %v5264_v4 = vpop.eup %4222  ;;  %v5286_v61 = vmul.f32 1.442695, %v904_v40 }
 0x15b   : > { %v5237_v22 = vpop.permute.xlu0 %960 }
 0x15c   : > { %682 = vmatmul.mubr.bf16.gmra.mrb[12].mxu0 %v527_v20  ;;  %v932_v20 = vmul.f32 1.442695, %v903_v19 }
 0x15d   : > { %v963_v18 = vpop.permute.xlu1 %962 }
 0x15e   : > { %3835 = vmatprep.subr.bf16.mxu1 %v963_v18 }
 0x15f   : > { %v965_v50 = vpop.permute.xlu0 %964  ;;  %3836 = vmatpush3.bf16.msra.mxu1 %v5190_v31  ;;  %v900_v31 = vsub.f32 %v5119_v28, %v5219_v30 }
 0x160   : > { %3837 = vmatprep.subr.bf16.mxu1 %v965_v50 }
 0x161   : > { %v967_v58 = vpop.permute.xlu1 %966 }
 0x163   : > { %v969_v24 = vpop.permute.xlu0 %968  ;;  %3838 = vmatpush3.bf16.msra.mxu1 %v5192_v35  ;;  %v926_v35 = vmul.f32 1.442695, %v900_v31 }
 0x164   : > { %3839 = vmatprep.subr.bf16.mxu1 %v967_v58 }
 0x165   : > { %v971_v53 = vpop.permute.xlu1 %970  ;;  %4238 = vpow2.f32 %v926_v35 }
 0x166   : > { %4240 = vpow2.f32 %v922_v12 }
 0x167   : > { %3840 = vmatpush3.bf16.msra.mxu1 %v5196_v48  ;;  %v973_v28 = vpop.permute.xlu0 %972  ;;  %v5267_v48 = vpop.eup %4224  ;;  %4242 = vpow2.f32 %v936_v5 }
 0x168   : > { %3841 = vmatprep.subr.bf16.mxu1 %v969_v24  ;;  %v5269_v1 = vpop.eup %4226  ;;  %4244 = vpow2.f32 %v932_v20  ;;  %v938_v3 = vpack.c.bf16 %v5267_v48, %v5264_v4 }
 0x169   : > { %v975_v30 = vpop.permute.xlu1 %974  ;;  %v5275_v14 = vpop.eup %4228  ;;  %4246 = vpow2.f32 %v5286_v61 }
 0x16a   : > { %v5279_v42 = vpop.eup %4230  ;;  %4248 = vpow2.f32 %v5288_v23 }
 0x16b   : > { %3842 = vmatpush3.bf16.msra.mxu1 %v5194_v52  ;;  %v977_v18 = vpop.permute.xlu0 %976  ;;  %v5282_v41 = vpop.eup %4232 }
 0x16c   : > { %3843 = vmatprep.subr.bf16.mxu1 %v971_v53  ;;  %v5284_v33 = vpop.eup %4234  ;;  %v941_v24 = vpack.c.bf16 %v5275_v14, %v5282_v41 }
 0x16d   : > { %v1121_v17 = vpop.permute.xlu1 %1120  ;;  %v5292_v50 = vpop.eup %4236 }
 0x16e   : > { %v1157_v16 = vadd.f32 %v5259_v34, %v1121_v17  ;;  %v1158_v52 = vadd.f32 %v5262_v15, %v1121_v17 }
 0x16f   : > { %3844 = vmatpush3.bf16.msra.mxu1 %v5227_v32  ;;  %v5315_v2 = vpop.eup %4238 }
 0x170   : > { %v1189_v29 = vmul.f32 0.2, %v1157_v16  ;;  %v1190_v7 = vmul.f32 0.2, %v1158_v52  ;;  %3845 = vmatprep.subr.bf16.mxu1 %v973_v28  ;;  %vm1173_vm0 = vcmp.gt.f32.partialorder %v1157_v16, 0.0  ;;  %vm1174_vm1 = vcmp.gt.f32.partialorder %v1158_v52, 0.0  ;;  %v5318_v10 = vpop.eup %4240 }
 0x171   : > { %v1125_v60 = vpop.permute.xlu1 %1124 }
 0x172   : > { %v1159_v32 = vadd.f32 %v5259_v34, %v1125_v60  ;;  %v1160_v6 = vadd.f32 %v5262_v15, %v1125_v60  ;;  %v1205_v47 = vsel %vm1173_vm0, %v1157_v16, %v1189_v29  ;;  %v1206_v51 = vsel %vm1174_vm1, %v1158_v52, %v1190_v7  ;;  %v5322_v29 = vpop.eup %4242 }
 0x173   : > { %v1117_v58 = vpop.permute.xlu0 %1116  ;;  %3846 = vmatpush3.bf16.msra.mxu1 %v5229_v11  ;;  %v5298_v27 = vadd.f32 %v1205_v47, %v4877_v43  ;;  %v5301_v38 = vadd.f32 %v1206_v51, %v4883_v46 }
 0x174   : > { %v1191_v31 = vmul.f32 0.2, %v1159_v32  ;;  %v1192_v53 = vmul.f32 0.2, %v1160_v6  ;;  %v1155_v36 = vadd.f32 %v5259_v34, %v1117_v58  ;;  %v1156_v26 = vadd.f32 %v5262_v15, %v1117_v58  ;;  %3847 = vmatprep.subr.bf16.mxu1 %v975_v30 }
 0x175   : > { %v1133_v11 = vpop.permute.xlu1 %1132  ;;  %v1238_v8 = vmax.f32 %v5298_v27, %v5301_v38  ;;  %vm1175_vm2 = vcmp.gt.f32.partialorder %v1159_v32, 0.0  ;;  %vm1176_vm3 = vcmp.gt.f32.partialorder %v1160_v6, 0.0 }
 0x176   : > { %v1187_v19 = vmul.f32 0.2, %v1155_v36  ;;  %v1188_v28 = vmul.f32 0.2, %v1156_v26  ;;  %v1163_v12 = vadd.f32 %v5259_v34, %v1133_v11  ;;  %v1164_v37 = vadd.f32 %v5262_v15, %v1133_v11 }
 0x177   : > { %v1129_v5 = vpop.permute.xlu0 %1128  ;;  %1239 = vmax.xlane.f32.xlu0 %v1238_v8  ;;  %3848 = vmatpush3.bf16.msra.mxu1 %v5233_v21  ;;  %v1207_v30 = vsel %vm1175_vm2, %v1159_v32, %v1191_v31  ;;  %v1208_v40 = vsel %vm1176_vm3, %v1160_v6, %v1192_v53  ;;  %vm1171_vm4 = vcmp.gt.f32.partialorder %v1155_v36, 0.0  ;;  %vm1172_vm5 = vcmp.gt.f32.partialorder %v1156_v26, 0.0  ;;  %v5332_v53 = vpop.eup %4244 }
 0x178   : > { %v1195_v20 = vmul.f32 0.2, %v1163_v12  ;;  %v1196_v17 = vmul.f32 0.2, %v1164_v37  ;;  %v1161_v16 = vadd.f32 %v5259_v34, %v1129_v5  ;;  %v1162_v52 = vadd.f32 %v5262_v15, %v1129_v5  ;;  %3849 = vmatprep.subr.bf16.mxu1 %v977_v18  ;;  %v7469_v5 = vld [vmem:[#allocation18_spill] sm:$0xff] }
 0x179   : > { %v1141_v7 = vpop.permute.xlu1 %1140  ;;  %v5325_v60 = vadd.f32 %v1207_v30, %v4879_v44  ;;  %v5328_v21 = vadd.f32 %v1208_v40, %v4881_v45  ;;  %v1203_v32 = vsel %vm1171_vm4, %v1155_v36, %v1187_v19  ;;  %v1204_v6 = vsel %vm1172_vm5, %v1156_v26, %v1188_v28 }
 0x17a   : > { %v1193_v47 = vmul.f32 0.2, %v1161_v16  ;;  %v1194_v51 = vmul.f32 0.2, %v1162_v52  ;;  %v1167_v58 = vadd.f32 %v5259_v34, %v1141_v7  ;;  %v1168_v31 = vadd.f32 %v5262_v15, %v1141_v7 }
 0x17b   : > { %v1137_v18 = vpop.permute.xlu0 %1136  ;;  %v1241_v11 = vmax.f32 %v5325_v60, %v5328_v21  ;;  %3850 = vmatpush3.bf16.msra.mxu1 %v5237_v22  ;;  %v5338_v8 = vadd.f32 %v1203_v32, %v4873_v39  ;;  %v5341_v36 = vadd.f32 %v1204_v6, %v7469_v5  ;;  %vm1179_vm6 = vcmp.gt.f32.partialorder %v1163_v12, 0.0 }
 0x17c   : > { %v1199_v26 = vmul.f32 0.2, %v1167_v58  ;;  %v1200_v19 = vmul.f32 0.2, %v1168_v31  ;;  %v1165_v28 = vadd.f32 %v5259_v34, %v1137_v18  ;;  %v1166_v30 = vadd.f32 %v5262_v15, %v1137_v18 }
 0x17d   : > { %1242 = vmax.xlane.f32.xlu0 %v1241_v11  ;;  %v1235_v40 = vmax.f32 %v5338_v8, %v5341_v36  ;;  %vm1180_vm7 = vcmp.gt.f32.partialorder %v1164_v37, 0.0  ;;  %v1211_v7 = vsel %vm1179_vm6, %v1163_v12, %v1195_v20  ;;  %vm1177_vm8 = vcmp.gt.f32.partialorder %v1161_v16, 0.0 }
 0x17e   : > { %v1197_v22 = vmul.f32 0.2, %v1165_v28  ;;  %v1198_v32 = vmul.f32 0.2, %v1166_v30  ;;  %1027 = vmatmul.mubr.bf16.vlgmr.msra.gmra.mrb[0].mxu1 %v938_v3  ;;  %v1212_v6 = vsel %vm1180_vm7, %v1164_v37, %v1196_v17  ;;  %v5351_v35 = vadd.f32 %v1211_v7, %v4891_v49  ;;  %v4247_v7 = vpop.eup %4246 }
 0x17f   : > { %1236 = vmax.xlane.f32.xlu1 %v1235_v40  ;;  %v1145_v59 = vpop.permute.xlu0 %1144  ;;  %v5354_v18 = vadd.f32 %v1212_v6, %v4893_v54  ;;  %1034 = vmatprep.mubr.bf16.mxu1 %v941_v24  ;;  %vm1178_vm9 = vcmp.gt.f32.partialorder %v1162_v52, 0.0  ;;  %v1209_v12 = vsel %vm1177_vm8, %v1161_v16, %v1193_v47  ;;  %vm1183_vm10 = vcmp.gt.f32.partialorder %v1167_v58, 0.0  ;;  %v5452_v6 = vld [vmem:[%s7215_s1 + $0x38] sm:$0xff]  }
 0x180   : > { %v1169_v20 = vadd.f32 %v5259_v34, %v1145_v59  ;;  %v1170_v4 = vadd.f32 %v5262_v15, %v1145_v59  ;;  %v1210_v48 = vsel %vm1178_vm9, %v1162_v52, %v1194_v51  ;;  %v5362_v3 = vadd.f32 %v1209_v12, %v4895_v55  ;;  %7475 = vst [vmem:[#allocation5_spill] sm:$0xff] %v5452_v6  ;;  %v5459_v12 = vld [vmem:[%s7215_s1 + $0x30] sm:$0xff]  }
 0x181   : > { %v1247_v37 = vmax.f32 %v5351_v35, %v5354_v18  ;;  %v5367_v17 = vadd.f32 %v1210_v48, %v4897_v56  ;;  %vm1184_vm11 = vcmp.gt.f32.partialorder %v1168_v31, 0.0  ;;  %v1215_v14 = vsel %vm1183_vm10, %v1167_v58, %v1199_v26  ;;  %7476 = vst [vmem:[#allocation13_spill] sm:$0xff] %v5459_v12  ;;  %v5480_v48 = vld [vmem:[%s7215_s1 + $0x58] sm:$0xff]  }
 0x182   : > { %v1201_v41 = vmul.f32 0.2, %v1169_v20  ;;  %v1202_v24 = vmul.f32 0.2, %v1170_v4  ;;  %v1216_v16 = vsel %vm1184_vm11, %v1168_v31, %v1200_v19  ;;  %v5370_v47 = vadd.f32 %v1215_v14, %v4905_v62  ;;  %7479 = vst [vmem:[#allocation7_spill] sm:$0xff] %v5480_v48  ;;  %v5494_v14 = vld [vmem:[%s7215_s1 + $0x68] sm:$0xff]  }
 0x183   : > { %1248 = vmax.xlane.f32.xlu0 %v1247_v37  ;;  %v1244_v34 = vmax.f32 %v5362_v3, %v5367_v17  ;;  %v5375_v15 = vadd.f32 %v1216_v16, %v4907_v63  ;;  %vm1181_vm12 = vcmp.gt.f32.partialorder %v1165_v28, 0.0  ;;  %vm1182_vm13 = vcmp.gt.f32.partialorder %v1166_v30, 0.0  ;;  %v5487_v37 = vld [vmem:[%s7215_s1 + $0x50] sm:$0xff]   ;;  %7481 = vst [vmem:[#allocation9_spill] sm:$0xff] %v5494_v14 }
 0x184   : > { %v1213_v59 = vsel %vm1181_vm12, %v1165_v28, %v1197_v22  ;;  %v1214_v52 = vsel %vm1182_vm13, %v1166_v30, %v1198_v32  ;;  %vm1185_vm14 = vcmp.gt.f32.partialorder %v1169_v20, 0.0  ;;  %vm1186_vm15 = vcmp.gt.f32.partialorder %v1170_v4, 0.0  ;;  %v4249_v22 = vpop.eup %4248  ;;  %v5445_v32 = vld [vmem:[%s7215_s1 + $0x20] sm:$0xff]   ;;  %7480 = vst [vmem:[#allocation4_spill] sm:$0xff] %v5487_v37  ;;  %v5515_v16 = vld [vmem:[%s7215_s1 + $0x70] sm:$0xff]  }
 0x185   : > { %1245 = vmax.xlane.f32.xlu1 %v1244_v34  ;;  %v1253_v51 = vmax.f32 %v5370_v47, %v5375_v15  ;;  %v5380_v58 = vadd.f32 %v1213_v59, %v4899_v57  ;;  %v5383_v31 = vadd.f32 %v1214_v52, %v4909_v0  ;;  %v1217_v11 = vsel %vm1185_vm14, %v1169_v20, %v1201_v41  ;;  %v5466_v20 = vld [vmem:[%s7215_s1 + $0x48] sm:$0xff]   ;;  %v5501_v41 = vld [vmem:[%s7215_s1 + $0x60] sm:$0xff]   ;;  %v5528_v52 = vld [vmem:[%s4719_s24 + $0x18] sm:$0xff] }
 0x186   : > { %v7470_v26 = vpack.c.bf16 %v5269_v1, %v5279_v42  ;;  %v1218_v19 = vsel %vm1186_vm15, %v1170_v4, %v1202_v24  ;;  %v5390_v28 = vadd.f32 %v1217_v11, %v4911_v9  ;;  %v7471_v40 = vpack.c.bf16 %v5284_v33, %v5292_v50  ;;  %v5410_v50 = vld [vmem:[%s7215_s1] sm:$0xff]   ;;  %7474 = vst [vmem:[#allocation11_spill] sm:$0xff] %v5445_v32  ;;  %v5508_v24 = vld [vmem:[%s7215_s1 + $0x78] sm:$0xff]   ;;  %v5524_v59 = vld [vmem:[%s4719_s24 + $0x8] sm:$0xff] }
 0x187   : > { %1254 = vmax.xlane.f32.xlu0 %v1253_v51  ;;  %v1250_v30 = vmax.f32 %v5380_v58, %v5383_v31  ;;  %v5399_v61 = vadd.f32 %v1218_v19, %v4913_v13  ;;  %v942_v42 = vpack.c.bf16 %v5315_v2, %v5318_v10  ;;  %v945_v23 = vpack.c.bf16 %v5322_v29, %v5332_v53  ;;  %v5417_v2 = vld [vmem:[%s7215_s1 + $0x8] sm:$0xff]   ;;  %v5424_v10 = vld [vmem:[%s7215_s1 + $0x18] sm:$0xff]   ;;  %v5431_v29 = vld [vmem:[%s7215_s1 + $0x10] sm:$0xff]  }
 0x188   : > { %1035 = vmatmul.mubr.bf16.gmra.mrb[4].mxu1 %v7470_v26  ;;  %v944_v33 = vpack.c.bf16 %v4247_v7, %v4249_v22  ;;  %7472 = vst [vmem:[#allocation10_spill] sm:$0xff] %v5424_v10  ;;  %v5438_v53 = vld [vmem:[%s7215_s1 + $0x28] sm:$0xff]   ;;  %7477 = vst [vmem:[#allocation2_spill] sm:$0xff] %v5466_v20  ;;  %v5473_v4 = vld [vmem:[%s7215_s1 + $0x40] sm:$0xff]  }
 0x189   : > { %1042 = vmatprep.mubr.bf16.mxu1 %v7471_v40  ;;  %1251 = vmax.xlane.f32.xlu1 %v1250_v30  ;;  %v1256_v1 = vmax.f32 %v5390_v28, %v5399_v61  ;;  %7473 = vst [vmem:[#allocation12_spill] sm:$0xff] %v5438_v53  ;;  %7478 = vst [vmem:[#allocation3_spill] sm:$0xff] %v5473_v4  ;;  %v5520_v34 = vld [vmem:[%s4719_s24] sm:$0xff]  ;;  %v5532_v51 = vld [vmem:[%s4719_s24 + $0x10] sm:$0xff] }
 0x18a   : > { %7482 = vst [vmem:[#allocation6_spill] sm:$0xff] %v5501_v41  ;;  %7483 = vst [vmem:[#allocation8_spill] sm:$0xff] %v5508_v24  ;;  %v5536_v11 = vld [vmem:[%s4719_s24 + $0x28] sm:$0xff]  ;;  %v5540_v26 = vld [vmem:[%s4719_s24 + $0x20] sm:$0xff] }
 0x18b   : > { %7484 = vst [vmem:[#allocation29_spill] sm:$0xff] %v5515_v16  ;;  %7485 = vst [vmem:[#allocation30_spill] sm:$0xff] %v5520_v34  ;;  %v5544_v19 = vld [vmem:[%s4719_s24 + $0x38] sm:$0xff]  ;;  %v5548_v30 = vld [vmem:[%s4719_s24 + $0x30] sm:$0xff] }
 0x18c   : > { %7486 = vst [vmem:[#allocation31_spill] sm:$0xff] %v5524_v59  ;;  %7487 = vst [vmem:[#allocation32_spill] sm:$0xff] %v5528_v52 }
 0x18d   : > { %1257 = vmax.xlane.f32.xlu1 %v1256_v1  ;;  %7488 = vst [vmem:[#allocation33_spill] sm:$0xff] %v5532_v51  ;;  %7489 = vst [vmem:[#allocation34_spill] sm:$0xff] %v5536_v11  ;;  %v4658_v1 = vmov 4  }
 0x18e   : > { %7490 = vst [vmem:[#allocation37_spill] sm:$0xff] %v5540_v26  ;;  %7491 = vst [vmem:[#allocation38_spill] sm:$0xff] %v5544_v19 }
 0x18f   : > { %7492 = vst [vmem:[#allocation36_spill] sm:$0xff] %v5548_v30 }
 0x190   : > { %1043 = vmatmul.mubr.bf16.gmra.mrb[8].mxu1 %v942_v42 }
 0x191   : > { %1050 = vmatprep.mubr.bf16.mxu1 %v945_v23 }
 0x198   : > { %1051 = vmatmul.mubr.bf16.gmra.mrb[12].mxu1 %v944_v33 }
 0x19d   : > { %1315 = vrot.lane.b32.xlu0 %v5410_v50, %s4657_s22 }
 0x19e   : > { %1317 = vrot.lane.b32.xlu1 %v5417_v2, %s4657_s22 }
 0x1a1   : > { %1321 = vrot.lane.b32.xlu0 %v5424_v10, %s4657_s22 }
 0x1a2   : > { %1319 = vrot.lane.b32.xlu1 %v5431_v29, %s4657_s22 }
 0x1a5   : > { %1325 = vrot.lane.b32.xlu0 %v5438_v53, %s4657_s22 }
 0x1a6   : > { %1323 = vrot.lane.b32.xlu1 %v5445_v32, %s4657_s22 }
 0x1a9   : > { %1329 = vrot.lane.b32.xlu0 %v5452_v6, %s4657_s22 }
 0x1aa   : > { %1327 = vrot.lane.b32.xlu1 %v5459_v12, %s4657_s22 }
 0x1ad   : > { %1333 = vrot.lane.b32.xlu0 %v5466_v20, %s4657_s22 }
 0x1ae   : > { %1331 = vrot.lane.b32.xlu1 %v5473_v4, %s4657_s22 }
 0x1b1   : > { %1337 = vrot.lane.b32.xlu0 %v5480_v48, %s4657_s22 }
 0x1b2   : > { %1335 = vrot.lane.b32.xlu1 %v5487_v37, %s4657_s22 }
 0x1b5   : > { %1341 = vrot.lane.b32.xlu0 %v5494_v14, %s4657_s22 }
 0x1b6   : > { %1339 = vrot.lane.b32.xlu1 %v5501_v41, %s4657_s22 }
 0x1b9   : > { %1345 = vrot.lane.b32.xlu0 %v5508_v24, %s4657_s22 }
 0x1ba   : > { %1343 = vrot.lane.b32.xlu1 %v5515_v16, %s4657_s22 }
 0x1bd   : > { %1485 = vperm.xlu0 %4152, %v5520_v34  }
 0x1be   : > { %1489 = vperm.xlu1 %4153, %v5524_v59  }
 0x1c1   : > { %1497 = vperm.xlu0 %4152, %v5528_v52  }
 0x1c2   : > { %1493 = vperm.xlu1 %4153, %v5532_v51  }
 0x1c5   : > { %1505 = vperm.xlu0 %4152, %v5536_v11  }
 0x1c6   : > { %1501 = vperm.xlu1 %4153, %v5540_v26  }
 0x1c9   : > { %1513 = vperm.xlu0 %4152, %v5544_v19  }
 0x1ca   : > { %1509 = vperm.xlu1 %4153, %v5548_v30  }
 0x1cd   : > { %4154 = vset.pattern.permute.xlu0 %v4658_v1 }
 0x1ce   : > { %4155 = vset.pattern.permute.xlu1 %v4658_v1 }
 0x204   : > { %v1240_v40 = vpop.xlane.xlu0 %1239 }
 0x205   : > { %v1262_v42 = vsub.f32 %v5301_v38, %v1240_v40 }
 0x207   : > { %v1281_v22 = vmul.f32 1.442695, %v1262_v42 }
 0x209   : > { %4250 = vpow2.f32 %v1281_v22 }
 0x20a   : > { %v5552_v23 = vpop.xlane.xlu0 %1242 }
 0x20b   : > { %v1264_v32 = vsub.f32 %v5328_v21, %v5552_v23 }
 0x20c   : > { %v1237_v7 = vpop.xlane.xlu1 %1236 }
 0x20d   : > { %v1260_v33 = vsub.f32 %v5341_v36, %v1237_v7 }
 0x20f   : > { %v1277_v11 = vmul.f32 1.442695, %v1260_v33 }
 0x210   : > { %v5555_v26 = vpop.xlane.xlu0 %1248 }
 0x211   : > { %4252 = vpow2.f32 %v1277_v11 }
 0x212   : > { %v5557_v19 = vpop.xlane.xlu1 %1245 }
 0x213   : > { %v4251_v33 = vpop.eup %4250 }
 0x214   : > { %v5559_v30 = vpop.xlane.xlu0 %1254 }
 0x216   : > { %v5561_v52 = vpop.xlane.xlu1 %1251 }
 0x217   : > { %v3811_v1 = vpop.f32.mrb[0].mxu0 }
 0x218   : > { %v1316_v51 = vpop.permute.xlu0 %1315  ;;  %v3812_v38 = vpop.f32.mrb[1].mxu0 }
 0x219   : > { %v5563_v34 = vadd.f32 %v3812_v38, %v3811_v1  ;;  %v3814_v59 = vpop.f32.mrb[2].mxu0 }
 0x21a   : > { %v5565_v42 = vpop.xlane.xlu1 %1257  ;;  %v3815_v36 = vpop.f32.mrb[3].mxu0 }
 0x21b   : > { %7493 = vst [vmem:[#allocation35_spill] sm:$0xff] %v5563_v34  ;;  %v5567_v24 = vadd.f32 %v3815_v36, %v3814_v59  ;;  %v4253_v22 = vpop.eup %4252 }
 0x21c   : > { %v5569_v11 = vpop.permute.xlu0 %1321  ;;  %v1308_v16 = vpack.c.bf16 %v4251_v33, %v4253_v22 }
 0x21d   : > { %7494 = vst [vmem:[#allocation40_spill] sm:$0xff] %v5567_v24 }
 0x21e   : > { %v1318_v14 = vpop.permute.xlu1 %1317  ;;  %1395 = vmatprep.mubr.bf16.mxu0 %v1308_v16  ;;  %v1259_v16 = vsub.f32 %v5338_v8, %v1237_v7 }
 0x21f   : > { %v3817_v41 = vpop.f32.mrb[4].mxu0 }
 0x220   : > { %v5571_v48 = vpop.permute.xlu0 %1325  ;;  %v3818_v37 = vpop.f32.mrb[5].mxu0  ;;  %v1275_v53 = vmul.f32 1.442695, %v1259_v16  ;;  %v1268_v16 = vsub.f32 %v5354_v18, %v5555_v26  ;;  %v1518_v18 = vsub.s32 3, %v7466_v25 }
 0x221   : > { %v5573_v20 = vadd.f32 %v3818_v37, %v3817_v41  ;;  %v3820_v1 = vpop.f32.mrb[6].mxu0  ;;  %v1261_v37 = vsub.f32 %v5298_v27, %v1240_v40  ;;  %v1263_v27 = vsub.f32 %v5325_v60, %v5552_v23  ;;  %v1265_v60 = vsub.f32 %v5362_v3, %v5557_v19 }
 0x222   : > { %v1320_v38 = vpop.permute.xlu1 %1319  ;;  %v3821_v34 = vpop.f32.mrb[7].mxu0  ;;  %4254 = vpow2.f32 %v1275_v53  ;;  %v1270_v3 = vsub.f32 %v5383_v31, %v5561_v52 }
 0x223   : > { %7495 = vst [vmem:[#allocation41_spill] sm:$0xff] %v5573_v20  ;;  %v5575_v4 = vadd.f32 %v3821_v34, %v3820_v1  ;;  %v1266_v34 = vsub.f32 %v5367_v17, %v5557_v19  ;;  %v1279_v10 = vmul.f32 1.442695, %v1261_v37  ;;  %v1285_v17 = vmul.f32 1.442695, %v1264_v32 }
 0x224   : > { %v5577_v6 = vpop.permute.xlu0 %1329  ;;  %v1283_v53 = vmul.f32 1.442695, %v1263_v27  ;;  %v1287_v23 = vmul.f32 1.442695, %v1265_v60 }
 0x225   : > { %7496 = vst [vmem:[#allocation42_spill] sm:$0xff] %v5575_v4  ;;  %v1289_v7 = vmul.f32 1.442695, %v1266_v34  ;;  %4256 = vpow2.f32 %v1279_v10  ;;  %v1269_v10 = vsub.f32 %v5380_v58, %v5561_v52  ;;  %v5621_v58 = vld [vmem:[%s7216_s2] sm:$0xff]  ;;  %v5629_v52 = vld [vmem:[%s7216_s2 + $0x8] sm:$0xff] }
 0x226   : > { %v5579_v59 = vpop.permute.xlu1 %1323  ;;  %7501 = vst [vmem:[#allocation44_spill] sm:$0xff] %v5621_v58  ;;  %v5624_v31 = vrot.slane %v5621_v58, %v1518_v18  ;;  %7502 = vst [vmem:[#allocation45_spill] sm:$0xff] %v5629_v52 }
 0x227   : > { %v3823_v36 = vpop.f32.mrb[8].mxu0  ;;  %4258 = vpow2.f32 %v1289_v7  ;;  %v5632_v7 = vrot.slane %v5629_v52, %v1518_v18 }
 0x228   : > { %v1334_v24 = vpop.permute.xlu0 %1333  ;;  %v3824_v33 = vpop.f32.mrb[9].mxu0  ;;  %4260 = vpow2.f32 %v1285_v17 }
 0x229   : > { %v5582_v22 = vadd.f32 %v3824_v33, %v3823_v36  ;;  %v3826_v12 = vpop.f32.mrb[10].mxu0  ;;  %4262 = vpow2.f32 %v1283_v53 }
 0x22a   : > { %v5585_v41 = vpop.permute.xlu1 %1327  ;;  %v3827_v20 = vpop.f32.mrb[11].mxu0 }
 0x22b   : > { %7497 = vst [vmem:[#allocation39_spill] sm:$0xff] %v5582_v22  ;;  %v5589_v1 = vadd.f32 %v3827_v20, %v3826_v12  ;;  %v1267_v12 = vsub.f32 %v5351_v35, %v5555_v26  ;;  %v1272_v35 = vsub.f32 %v5375_v15, %v5559_v30  ;;  %v1274_v15 = vsub.f32 %v5399_v61, %v5565_v42 }
 0x22c   : > { %v1338_v4 = vpop.permute.xlu0 %1337  ;;  %v1297_v61 = vmul.f32 1.442695, %v1270_v3 }
 0x22d   : > { %7498 = vst [vmem:[#allocation15_spill] sm:$0xff] %v5589_v1  ;;  %v1291_v32 = vmul.f32 1.442695, %v1267_v12  ;;  %v1305_v27 = vmul.f32 1.442695, %v1274_v15 }
 0x22e   : > { %v1332_v8 = vpop.permute.xlu1 %1331 }
 0x22f   : > { %3875 = vmatprep.subr.bf16.mxu0 %v1332_v8  ;;  %v3829_v36 = vpop.f32.mrb[12].mxu0  ;;  %v1301_v8 = vmul.f32 1.442695, %v1272_v35  ;;  %4264 = vpow2.f32 %v1291_v32 }
 0x230   : > { %3876 = vmatpush3.bf16.msra.mxu0 %v1316_v51  ;;  %v5595_v40 = vpop.permute.xlu0 %1341  ;;  %v3830_v33 = vpop.f32.mrb[13].mxu0 }
 0x231   : > { %3877 = vmatprep.subr.bf16.mxu0 %v1334_v24  ;;  %v5599_v20 = vadd.f32 %v3830_v33, %v3829_v36  ;;  %v3832_v21 = vpop.f32.mrb[14].mxu0  ;;  %v1293_v24 = vmul.f32 1.442695, %v1268_v16 }
 0x232   : > { %v1336_v37 = vpop.permute.xlu1 %1335  ;;  %v3833_v34 = vpop.f32.mrb[15].mxu0 }
 0x233   : > { %7499 = vst [vmem:[#allocation16_spill] sm:$0xff] %v5599_v20  ;;  %v5605_v51 = vadd.f32 %v3833_v34, %v3832_v21  ;;  %4266 = vpow2.f32 %v1293_v24 }
 0x234   : > { %3878 = vmatpush3.bf16.msra.mxu0 %v1318_v14  ;;  %v5614_v19 = vpop.permute.xlu0 %1345  ;;  %v1295_v14 = vmul.f32 1.442695, %v1269_v10  ;;  %4268 = vpow2.f32 %v1287_v23 }
 0x235   : > { %7500 = vst [vmem:[#allocation43_spill] sm:$0xff] %v5605_v51  ;;  %3879 = vmatprep.subr.bf16.mxu0 %v1336_v37  ;;  %4270 = vpow2.f32 %v1301_v8 }
 0x236   : > { %v1340_v26 = vpop.permute.xlu1 %1339  ;;  %4272 = vpow2.f32 %v1295_v14 }
 0x237   : > { %4274 = vpow2.f32 %v1297_v61 }
 0x238   : > { %3880 = vmatpush3.bf16.msra.mxu0 %v1320_v38  ;;  %4276 = vpow2.f32 %v1305_v27 }
 0x239   : > { %3881 = vmatprep.subr.bf16.mxu0 %v1338_v4  ;;  %v5634_v4 = vpop.eup %4254 }
 0x23a   : > { %v1344_v38 = vpop.permute.xlu1 %1343  ;;  %v5636_v36 = vpop.eup %4256 }
 0x23b   : > { %v5639_v17 = vpop.eup %4258 }
 0x23c   : > { %3882 = vmatpush3.bf16.msra.mxu0 %v5569_v11  ;;  %v1486_v33 = vpop.permute.xlu0 %1485  ;;  %v5649_v60 = vpop.eup %4260 }
 0x23d   : > { %3883 = vmatprep.subr.bf16.mxu0 %v1340_v26  ;;  %v1524_v12 = vadd.f32 %v5624_v31, %v1486_v33  ;;  %v1525_v21 = vadd.f32 %v5632_v7, %v1486_v33  ;;  %v5661_v15 = vpop.eup %4262 }
 0x23e   : > { %v1490_v34 = vpop.permute.xlu1 %1489  ;;  %v5663_v27 = vpop.eup %4264 }
 0x23f   : > { %v1526_v53 = vadd.f32 %v5624_v31, %v1490_v34  ;;  %v1527_v35 = vadd.f32 %v5632_v7, %v1490_v34  ;;  %v1556_v32 = vmul.f32 0.2, %v1524_v12  ;;  %v1557_v10 = vmul.f32 0.2, %v1525_v21 }
 0x240   : > { %3884 = vmatpush3.bf16.msra.mxu0 %v5579_v59  ;;  %v1498_v18 = vpop.permute.xlu0 %1497  ;;  %vm1540_vm0 = vcmp.gt.f32.partialorder %v1524_v12, 0.0  ;;  %vm1541_vm1 = vcmp.gt.f32.partialorder %v1525_v21, 0.0 }
 0x241   : > { %v1558_v3 = vmul.f32 0.2, %v1526_v53  ;;  %v1559_v26 = vmul.f32 0.2, %v1527_v35  ;;  %v1530_v23 = vadd.f32 %v5624_v31, %v1498_v18  ;;  %v5658_v8 = vadd.f32 %v5632_v7, %v1498_v18  ;;  %3885 = vmatprep.subr.bf16.mxu0 %v5595_v40  ;;  %v5668_v18 = vpop.eup %4266 }
 0x242   : > { %v1494_v14 = vpop.permute.xlu1 %1493  ;;  %vm1542_vm2 = vcmp.gt.f32.partialorder %v1526_v53, 0.0  ;;  %vm1543_vm3 = vcmp.gt.f32.partialorder %v1527_v35, 0.0  ;;  %v1572_v59 = vsel %vm1540_vm0, %v1524_v12, %v1556_v32  ;;  %v1573_v61 = vsel %vm1541_vm1, %v1525_v21, %v1557_v10  ;;  %v5677_v21 = vpop.eup %4268 }
 0x243   : > { %v1528_v33 = vadd.f32 %v5624_v31, %v1494_v14  ;;  %v1529_v34 = vadd.f32 %v5632_v7, %v1494_v14  ;;  %v1562_v16 = vmul.f32 0.2, %v1530_v23  ;;  %v1563_v37 = vmul.f32 0.2, %v5658_v8  ;;  %v5681_v1 = vpop.eup %4270 }
 0x244   : > { %3886 = vmatpush3.bf16.msra.mxu0 %v5571_v48  ;;  %v1506_v40 = vpop.permute.xlu0 %1505  ;;  %v1574_v24 = vsel %vm1542_vm2, %v1526_v53, %v1558_v3  ;;  %v1575_v11 = vsel %vm1543_vm3, %v1527_v35, %v1559_v26  ;;  %v5672_v51 = vadd.f32 %v1572_v59, %v4873_v39  ;;  %v5675_v12 = vadd.f32 %v1573_v61, %v7469_v5  ;;  %v5691_v26 = vpop.eup %4272 }
 0x245   : > { %v1560_v32 = vmul.f32 0.2, %v1528_v33  ;;  %v1561_v10 = vmul.f32 0.2, %v1529_v34  ;;  %3887 = vmatprep.subr.bf16.mxu0 %v1344_v38  ;;  %v1534_v14 = vadd.f32 %v5624_v31, %v1506_v40  ;;  %v1535_v20 = vadd.f32 %v5632_v7, %v1506_v40  ;;  %v5695_v22 = vpop.eup %4274 }
 0x246   : > { %7503 = vst [vmem:[#allocation46_spill] sm:$0xff] %v5672_v51  ;;  %v1502_v48 = vpop.permute.xlu1 %1501  ;;  %v5684_v53 = vadd.f32 %v1574_v24, %v4877_v43  ;;  %v5687_v35 = vadd.f32 %v1575_v11, %v4883_v46  ;;  %v1604_v3 = vmax.f32 %v5672_v51, %v5675_v12  ;;  %vm1544_vm4 = vcmp.gt.f32.partialorder %v1528_v33, 0.0  ;;  %v5703_v52 = vpop.eup %4276 }
 0x247   : > { %v1532_v38 = vadd.f32 %v5624_v31, %v1502_v48  ;;  %v1533_v59 = vadd.f32 %v5632_v7, %v1502_v48  ;;  %v1566_v61 = vmul.f32 0.2, %v1534_v14  ;;  %v1567_v40 = vmul.f32 0.2, %v1535_v20 }
 0x248   : > { %7504 = vst [vmem:[#allocation47_spill] sm:$0xff] %v5684_v53  ;;  %v1607_v24 = vmax.f32 %v5684_v53, %v5687_v35  ;;  %3888 = vmatpush3.bf16.msra.mxu0 %v5585_v41  ;;  %1605 = vmax.xlane.f32.xlu1 %v1604_v3  ;;  %v1514_v11 = vpop.permute.xlu0 %1513  ;;  %vm1545_vm5 = vcmp.gt.f32.partialorder %v1529_v34, 0.0  ;;  %v1576_v5 = vsel %vm1544_vm4, %v1528_v33, %v1560_v32  ;;  %vm1546_vm6 = vcmp.gt.f32.partialorder %v1530_v23, 0.0 }
 0x249   : > { %v1564_v39 = vmul.f32 0.2, %v1532_v38  ;;  %v1565_v46 = vmul.f32 0.2, %v1533_v59  ;;  %v1538_v43 = vadd.f32 %v5624_v31, %v1514_v11  ;;  %v1539_v48 = vadd.f32 %v5632_v7, %v1514_v11  ;;  %3889 = vmatprep.subr.bf16.mxu0 %v5614_v19 }
 0x24a   : > { %1608 = vmax.xlane.f32.xlu0 %v1607_v24  ;;  %v1510_v58 = vpop.permute.xlu1 %1509  ;;  %v1577_v25 = vsel %vm1545_vm5, %v1529_v34, %v1561_v10  ;;  %v5706_v41 = vadd.f32 %v1576_v5, %v4879_v44  ;;  %vm1547_vm7 = vcmp.gt.f32.partialorder %v5658_v8, 0.0  ;;  %v1578_v33 = vsel %vm1546_vm6, %v1530_v23, %v1562_v16 }
 0x24b   : > { %v1536_v32 = vadd.f32 %v5624_v31, %v1510_v58  ;;  %v1537_v3 = vadd.f32 %v5632_v7, %v1510_v58  ;;  %v1570_v53 = vmul.f32 0.2, %v1538_v43  ;;  %v1571_v51 = vmul.f32 0.2, %v1539_v48 }
 0x24c   : > { %v5712_v11 = vadd.f32 %v1577_v25, %v4881_v45  ;;  %3890 = vmatpush3.bf16.msra.mxu0 %v5577_v6  ;;  %v1579_v19 = vsel %vm1547_vm7, %v5658_v8, %v1563_v37  ;;  %v5717_v34 = vadd.f32 %v1578_v33, %v4895_v55  ;;  %vm1548_vm8 = vcmp.gt.f32.partialorder %v1532_v38, 0.0 }
 0x24d   : > { %v1568_v5 = vmul.f32 0.2, %v1536_v32  ;;  %v1569_v10 = vmul.f32 0.2, %v1537_v3  ;;  %v5720_v16 = vadd.f32 %v1579_v19, %v4897_v56  ;;  %vm1549_vm9 = vcmp.gt.f32.partialorder %v1533_v59, 0.0 }
 0x24e   : > { %v1610_v58 = vmax.f32 %v5706_v41, %v5712_v11  ;;  %v1580_v31 = vsel %vm1548_vm8, %v1532_v38, %v1564_v39  ;;  %v1581_v25 = vsel %vm1549_vm9, %v1533_v59, %v1565_v46  ;;  %vm1550_vm10 = vcmp.gt.f32.partialorder %v1534_v14, 0.0 }
 0x24f   : > { %v1613_v6 = vmax.f32 %v5717_v34, %v5720_v16  ;;  %v7505_v7 = vpack.c.bf16 %v5636_v36, %v5634_v4  ;;  %v5730_v37 = vadd.f32 %v1580_v31, %v4891_v49  ;;  %v5733_v23 = vadd.f32 %v1581_v25, %v4893_v54 }
 0x250   : > { %vm1551_vm11 = vcmp.gt.f32.partialorder %v1535_v20, 0.0  ;;  %1611 = vmax.xlane.f32.xlu0 %v1610_v58  ;;  %v7506_v39 = vpack.c.bf16 %v5639_v17, %v5649_v60  ;;  %v1582_v46 = vsel %vm1550_vm10, %v1534_v14, %v1566_v61  ;;  %vm1552_vm12 = vcmp.gt.f32.partialorder %v1536_v32, 0.0 }
 0x251   : > { %1396 = vmatmul.mubr.bf16.vlgmr.msra.gmra.mrb[16].mxu0 %v7505_v7  ;;  %v1583_v8 = vsel %vm1551_vm11, %v1535_v20, %v1567_v40  ;;  %vm1553_vm13 = vcmp.gt.f32.partialorder %v1537_v3, 0.0  ;;  %1614 = vmax.xlane.f32.xlu1 %v1613_v6  ;;  %v1616_v4 = vmax.f32 %v5730_v37, %v5733_v23  ;;  %v5741_v36 = vadd.f32 %v1582_v46, %v4899_v57  ;;  %v3851_v24 = vpop.f32.mrb[0].mxu1 }
 0x252   : > { %1403 = vmatprep.mubr.bf16.mxu0 %v7506_v39  ;;  %v5744_v38 = vadd.f32 %v1583_v8, %v4909_v0  ;;  %v1584_v59 = vsel %vm1552_vm12, %v1536_v32, %v1568_v5  ;;  %v1585_v33 = vsel %vm1553_vm13, %v1537_v3, %v1569_v10  ;;  %vm1554_vm14 = vcmp.gt.f32.partialorder %v1538_v43, 0.0  ;;  %v3852_v20 = vpop.f32.mrb[1].mxu1 }
 0x253   : > { %v5747_v17 = vadd.f32 %v1584_v59, %v4905_v62  ;;  %vm1555_vm15 = vcmp.gt.f32.partialorder %v1539_v48, 0.0  ;;  %v5752_v14 = vadd.f32 %v1585_v33, %v4907_v63  ;;  %v1586_v61 = vsel %vm1554_vm14, %v1538_v43, %v1570_v53  ;;  %v3854_v19 = vpop.f32.mrb[2].mxu1 }
 0x254   : > { %v1619_v60 = vmax.f32 %v5741_v36, %v5744_v38  ;;  %v1587_v40 = vsel %vm1555_vm15, %v1539_v48, %v1571_v51  ;;  %v7507_v32 = vsub.f32 %v5390_v28, %v5565_v42  ;;  %1617 = vmax.xlane.f32.xlu0 %v1616_v4  ;;  %v5758_v3 = vadd.f32 %v1586_v61, %v4911_v9  ;;  %v3855_v31 = vpop.f32.mrb[3].mxu1 }
 0x255   : > { %v5761_v10 = vadd.f32 %v1587_v40, %v4913_v13  ;;  %v5763_v58 = vadd.f32 %v3852_v20, %v3851_v24  ;;  %v1622_v43 = vmax.f32 %v5747_v17, %v5752_v14  ;;  %v1309_v51 = vpack.c.bf16 %v5677_v21, %v5661_v15 }
 0x256   : > { %v1303_v5 = vmul.f32 1.442695, %v7507_v32  ;;  %1620 = vmax.xlane.f32.xlu1 %v1619_v60  ;;  %v5769_v53 = vadd.f32 %v3855_v31, %v3854_v19  ;;  %v7510_v28 = vsub.f32 %v5370_v47, %v5559_v30  ;;  %v1312_v25 = vpack.c.bf16 %v5695_v22, %v5668_v18  ;;  %v7517_v19 = vld [vmem:[#allocation10_spill] sm:$0xff]  ;;  %v7518_v32 = vld [vmem:[#allocation11_spill] sm:$0xff]  ;;  %v7520_v31 = vld [vmem:[#allocation13_spill] sm:$0xff] }
 0x257   : > { %7508 = vst [vmem:[#allocation48_spill] sm:$0xff] %v5763_v58  ;;  %v1625_v48 = vmax.f32 %v5758_v3, %v5761_v10  ;;  %v1311_v47 = vpack.c.bf16 %v5691_v26, %v5663_v27  ;;  %v1314_v22 = vpack.c.bf16 %v5703_v52, %v5681_v1 }
 0x258   : > { %7509 = vst [vmem:[#allocation49_spill] sm:$0xff] %v5769_v53  ;;  %v1299_v42 = vmul.f32 1.442695, %v7510_v28  ;;  %4278 = vpow2.f32 %v1303_v5  ;;  %1623 = vmax.xlane.f32.xlu0 %v1622_v43  ;;  %v7519_v5 = vld [vmem:[#allocation12_spill] sm:$0xff]  ;;  %v7522_v43 = vld [vmem:[#allocation3_spill] sm:$0xff] }
 0x259   : > { %1404 = vmatmul.mubr.bf16.gmra.mrb[20].mxu0 %v1309_v51  ;;  %v7523_v51 = vld [vmem:[#allocation2_spill] sm:$0xff]  ;;  %v7524_v28 = vld [vmem:[#allocation4_spill] sm:$0xff] }
 0x25a   : > { %1411 = vmatprep.mubr.bf16.mxu0 %v1312_v25  ;;  %1626 = vmax.xlane.f32.xlu1 %v1625_v48  ;;  %4280 = vpow2.f32 %v1299_v42  ;;  %v7525_v42 = vld [vmem:[#allocation7_spill] sm:$0xff]  ;;  %v7528_v48 = vld [vmem:[#allocation29_spill] sm:$0xff]  ;;  %v7529_v25 = vld [vmem:[#allocation8_spill] sm:$0xff] }
 0x25b   : > { %v3857_v6 = vpop.f32.mrb[4].mxu1 }
 0x25c   : > { %v3858_v15 = vpop.f32.mrb[5].mxu1 }
 0x25d   : > { %v5778_v21 = vadd.f32 %v3858_v15, %v3857_v6  ;;  %v3860_v7 = vpop.f32.mrb[6].mxu1  ;;  %v7530_v6 = vld [vmem:[#allocation31_spill] sm:$0xff]  ;;  %v7531_v15 = vld [vmem:[#allocation30_spill] sm:$0xff] }
 0x25e   : > { %v3861_v39 = vpop.f32.mrb[7].mxu1 }
 0x25f   : > { %7511 = vst [vmem:[#allocation50_spill] sm:$0xff] %v5778_v21  ;;  %v5782_v30 = vadd.f32 %v3861_v39, %v3860_v7  ;;  %v7532_v7 = vld [vmem:[#allocation33_spill] sm:$0xff]  ;;  %v7533_v39 = vld [vmem:[#allocation32_spill] sm:$0xff] }
 0x261   : > { %7512 = vst [vmem:[#allocation51_spill] sm:$0xff] %v5782_v30  ;;  %1412 = vmatmul.mubr.bf16.gmra.mrb[24].mxu0 %v1311_v47  ;;  %v7534_v47 = vld [vmem:[#allocation37_spill] sm:$0xff] }
 0x262   : > { %1419 = vmatprep.mubr.bf16.mxu0 %v1314_v22  ;;  %v4279_v46 = vpop.eup %4278  ;;  %v7535_v22 = vld [vmem:[#allocation34_spill] sm:$0xff] }
 0x263   : > { %v3863_v18 = vpop.f32.mrb[8].mxu1 }
 0x264   : > { %v3864_v8 = vpop.f32.mrb[9].mxu1  ;;  %v4281_v24 = vpop.eup %4280 }
 0x265   : > { %v5786_v4 = vadd.f32 %v3864_v8, %v3863_v18  ;;  %v3866_v59 = vpop.f32.mrb[10].mxu1  ;;  %v1313_v20 = vpack.c.bf16 %v4279_v46, %v4281_v24  ;;  %v7536_v18 = vld [vmem:[#allocation36_spill] sm:$0xff]  ;;  %v7537_v46 = vld [vmem:[#allocation38_spill] sm:$0xff]  ;;  %v4660_v8 = vmov 5  }
 0x266   : > { %v3867_v33 = vpop.f32.mrb[11].mxu1 }
 0x267   : > { %7513 = vst [vmem:[#allocation52_spill] sm:$0xff] %v5786_v4  ;;  %v5788_v60 = vadd.f32 %v3867_v33, %v3866_v59 }
 0x269   : > { %7514 = vst [vmem:[#allocation53_spill] sm:$0xff] %v5788_v60  ;;  %1420 = vmatmul.mubr.bf16.gmra.mrb[28].mxu0 %v1313_v20 }
 0x26b   : > { %v3869_v27 = vpop.f32.mrb[12].mxu1  ;;  %1686 = vrot.lane.b32.xlu1 %v5417_v2, %s4659_s12  ;;  %v7521_v2 = vld [vmem:[#allocation5_spill] sm:$0xff] }
 0x26c   : > { %v3870_v26 = vpop.f32.mrb[13].mxu1 }
 0x26d   : > { %v5791_v1 = vadd.f32 %v3870_v26, %v3869_v27  ;;  %v3872_v52 = vpop.f32.mrb[14].mxu1 }
 0x26e   : > { %v3873_v61 = vpop.f32.mrb[15].mxu1  ;;  %1684 = vrot.lane.b32.xlu0 %v5410_v50, %s4659_s12  ;;  %v7526_v50 = vld [vmem:[#allocation6_spill] sm:$0xff] }
 0x26f   : > { %7515 = vst [vmem:[#allocation54_spill] sm:$0xff] %v5791_v1  ;;  %v5793_v40 = vadd.f32 %v3873_v61, %v3872_v52  ;;  %1688 = vrot.lane.b32.xlu1 %v5431_v29, %s4659_s12  ;;  %v7527_v29 = vld [vmem:[#allocation9_spill] sm:$0xff] }
 0x271   : > { %7516 = vst [vmem:[#allocation55_spill] sm:$0xff] %v5793_v40 }
 0x272   : > { %1690 = vrot.lane.b32.xlu0 %v7517_v19, %s4659_s12 }
 0x273   : > { %1692 = vrot.lane.b32.xlu1 %v7518_v32, %s4659_s12 }
 0x276   : > { %1694 = vrot.lane.b32.xlu0 %v7519_v5, %s4659_s12 }
 0x277   : > { %1696 = vrot.lane.b32.xlu1 %v7520_v31, %s4659_s12 }
 0x27a   : > { %1698 = vrot.lane.b32.xlu0 %v7521_v2, %s4659_s12 }
 0x27b   : > { %1700 = vrot.lane.b32.xlu1 %v7522_v43, %s4659_s12 }
 0x27e   : > { %1702 = vrot.lane.b32.xlu0 %v7523_v51, %s4659_s12 }
 0x27f   : > { %1704 = vrot.lane.b32.xlu1 %v7524_v28, %s4659_s12 }
 0x282   : > { %1706 = vrot.lane.b32.xlu0 %v7525_v42, %s4659_s12 }
 0x283   : > { %1708 = vrot.lane.b32.xlu1 %v7526_v50, %s4659_s12 }
 0x286   : > { %1710 = vrot.lane.b32.xlu0 %v7527_v29, %s4659_s12 }
 0x287   : > { %1712 = vrot.lane.b32.xlu1 %v7528_v48, %s4659_s12 }
 0x28a   : > { %1714 = vrot.lane.b32.xlu0 %v7529_v25, %s4659_s12  ;;  %v7538_v25 = vld [vmem:[#allocation46_spill] sm:$0xff] }
 0x28b   : > { %1858 = vperm.xlu1 %4155, %v7530_v6  }
 0x28e   : > { %1854 = vperm.xlu0 %4154, %v7531_v15  }
 0x28f   : > { %1862 = vperm.xlu1 %4155, %v7532_v7   ;;  %v7539_v7 = vld [vmem:[#allocation47_spill] sm:$0xff] }
 0x292   : > { %1866 = vperm.xlu0 %4154, %v7533_v39  }
 0x293   : > { %1870 = vperm.xlu1 %4155, %v7534_v47  }
 0x296   : > { %1874 = vperm.xlu0 %4154, %v7535_v22  }
 0x297   : > { %1878 = vperm.xlu1 %4155, %v7536_v18  }
 0x29a   : > { %1882 = vperm.xlu0 %4154, %v7537_v46  }
 0x29b   : > { %4157 = vset.pattern.permute.xlu1 %v4660_v8 }
 0x29e   : > { %4156 = vset.pattern.permute.xlu0 %v4660_v8 }
 0x2d5   : > { %v1606_v59 = vpop.xlane.xlu1 %1605 }
 0x2d6   : > { %v1629_v24 = vsub.f32 %v5675_v12, %v1606_v59  ;;  %v1628_v6 = vsub.f32 %v7538_v25, %v1606_v59 }
 0x2d7   : > { %v1609_v33 = vpop.xlane.xlu0 %1608 }
 0x2d8   : > { %v1646_v20 = vmul.f32 1.442695, %v1629_v24  ;;  %v1631_v27 = vsub.f32 %v5687_v35, %v1609_v33  ;;  %v1630_v39 = vsub.f32 %v7539_v7, %v1609_v33  ;;  %v1644_v22 = vmul.f32 1.442695, %v1628_v6 }
 0x2da   : > { %v1650_v26 = vmul.f32 1.442695, %v1631_v27  ;;  %4282 = vpow2.f32 %v1646_v20  ;;  %v1648_v46 = vmul.f32 1.442695, %v1630_v39 }
 0x2dc   : > { %4284 = vpow2.f32 %v1650_v26 }
 0x2dd   : > { %v1612_v52 = vpop.xlane.xlu0 %1611  ;;  %4286 = vpow2.f32 %v1644_v22 }
 0x2de   : > { %v1615_v61 = vpop.xlane.xlu1 %1614  ;;  %v1632_v24 = vsub.f32 %v5706_v41, %v1612_v52  ;;  %4288 = vpow2.f32 %v1648_v46  ;;  %v1633_v33 = vsub.f32 %v5712_v11, %v1612_v52  ;;  %v7540_v41 = vld [vmem:[#allocation14_spill] sm:$0xff] }
 0x2df   : > { %v1634_v27 = vsub.f32 %v5717_v34, %v1615_v61  ;;  %v1635_v59 = vsub.f32 %v5720_v16, %v1615_v61  ;;  %v1887_v6 = vsub.s32 4, %v7540_v41 }
 0x2e0   : > { %v1652_v26 = vmul.f32 1.442695, %v1632_v24  ;;  %v1654_v16 = vmul.f32 1.442695, %v1633_v33 }
 0x2e1   : > { %v5820_v19 = vpop.xlane.xlu0 %1617  ;;  %v1658_v7 = vmul.f32 1.442695, %v1635_v59 }
 0x2e2   : > { %4290 = vpow2.f32 %v1652_v26  ;;  %v1637_v11 = vsub.f32 %v5733_v23, %v5820_v19 }
 0x2e3   : > { %v1621_v32 = vpop.xlane.xlu1 %1620 }
 0x2e4   : > { %v4283_v5 = vpop.eup %4282  ;;  %v1639_v34 = vsub.f32 %v5744_v38, %v1621_v32 }
 0x2e5   : > { %v5822_v31 = vpop.xlane.xlu0 %1623 }
 0x2e6   : > { %v4285_v43 = vpop.eup %4284  ;;  %v1666_v38 = vmul.f32 1.442695, %v1639_v34 }
 0x2e7   : > { %v5824_v2 = vpop.xlane.xlu1 %1626  ;;  %v1677_v51 = vpack.c.bf16 %v4285_v43, %v4283_v5  ;;  %v1636_v5 = vsub.f32 %v5730_v37, %v5820_v19  ;;  %v5851_v22 = vpop.eup %4286  ;;  %v1662_v19 = vmul.f32 1.442695, %v1637_v11 }
 0x2e9   : > { %v1685_v12 = vpop.permute.xlu0 %1684  ;;  %1764 = vmatprep.mubr.bf16.mxu1 %v1677_v51  ;;  %v1656_v51 = vmul.f32 1.442695, %v1634_v27  ;;  %v1660_v52 = vmul.f32 1.442695, %v1636_v5 }
 0x2eb   : > { %v1687_v28 = vpop.permute.xlu1 %1686  ;;  %4292 = vpow2.f32 %v1656_v51 }
 0x2ec   : > { %4294 = vpow2.f32 %v1658_v7 }
 0x2ed   : > { %v1691_v42 = vpop.permute.xlu0 %1690  ;;  %4296 = vpow2.f32 %v1654_v16 }
 0x2ee   : > { %4298 = vpow2.f32 %v1660_v52 }
 0x2ef   : > { %v1689_v35 = vpop.permute.xlu1 %1688 }
 0x2f1   : > { %v5826_v50 = vpop.permute.xlu0 %1694 }
 0x2f3   : > { %v1693_v29 = vpop.permute.xlu1 %1692 }
 0x2f5   : > { %v5828_v48 = vpop.permute.xlu0 %1698 }
 0x2f7   : > { %v5831_v15 = vpop.permute.xlu1 %1696 }
 0x2f9   : > { %v1703_v47 = vpop.permute.xlu0 %1702 }
 0x2fb   : > { %v1701_v18 = vpop.permute.xlu1 %1700 }
 0x2fc   : > { %3915 = vmatprep.subr.bf16.mxu1 %v1701_v18  ;;  %v1641_v18 = vsub.f32 %v5752_v14, %v5822_v31 }
 0x2fd   : > { %3916 = vmatpush3.bf16.msra.mxu1 %v1685_v12  ;;  %v1707_v8 = vpop.permute.xlu0 %1706  ;;  %v1638_v12 = vsub.f32 %v5741_v36, %v1621_v32  ;;  %v7542_v36 = vld [vmem:[#allocation45_spill] sm:$0xff]  ;;  %v1643_v32 = vsub.f32 %v5761_v10, %v5824_v2 }
 0x2fe   : > { %3917 = vmatprep.subr.bf16.mxu1 %v1703_v47  ;;  %v5849_v47 = vrot.slane %v7542_v36, %v1887_v6  ;;  %v5867_v33 = vmul.f32 1.442695, %v1641_v18  ;;  %v7543_v18 = vld [vmem:[#allocation19_spill] sm:$0xff] }
 0x2ff   : > { %v1705_v20 = vpop.permute.xlu1 %1704  ;;  %v1664_v37 = vmul.f32 1.442695, %v1638_v12  ;;  %v1674_v10 = vmul.f32 1.442695, %v1643_v32 }
 0x301   : > { %3918 = vmatpush3.bf16.msra.mxu1 %v1687_v28  ;;  %v1711_v25 = vpop.permute.xlu0 %1710  ;;  %v7541_v28 = vld [vmem:[#allocation44_spill] sm:$0xff]  ;;  %4300 = vpow2.f32 %v1664_v37 }
 0x302   : > { %3919 = vmatprep.subr.bf16.mxu1 %v1705_v20  ;;  %v5846_v39 = vrot.slane %v7541_v28, %v1887_v6  ;;  %4302 = vpow2.f32 %v1666_v38 }
 0x303   : > { %v1709_v43 = vpop.permute.xlu1 %1708  ;;  %4304 = vpow2.f32 %v1662_v19 }
 0x304   : > { %4306 = vpow2.f32 %v1674_v10 }
 0x305   : > { %3920 = vmatpush3.bf16.msra.mxu1 %v1689_v35  ;;  %v5855_v35 = vpop.eup %4288  ;;  %v5857_v23 = vpop.permute.xlu0 %1714  ;;  %4308 = vpow2.f32 %v5867_v33 }
 0x306   : > { %3921 = vmatprep.subr.bf16.mxu1 %v1707_v8  ;;  %v5873_v7 = vpop.eup %4290 }
 0x307   : > { %v1713_v61 = vpop.permute.xlu1 %1712  ;;  %v5876_v34 = vpop.eup %4292 }
 0x308   : > { %v4295_v37 = vpop.eup %4294 }
 0x309   : > { %3922 = vmatpush3.bf16.msra.mxu1 %v1691_v42 }
 0x30a   : > { %3923 = vmatprep.subr.bf16.mxu1 %v1709_v43 }
 0x30b   : > { %v1859_v46 = vpop.permute.xlu1 %1858 }
 0x30c   : > { %v1895_v8 = vadd.f32 %v5846_v39, %v1859_v46  ;;  %v1896_v24 = vadd.f32 %v5849_v47, %v1859_v46 }
 0x30d   : > { %3924 = vmatpush3.bf16.msra.mxu1 %v1693_v29  ;;  %v1855_v14 = vpop.permute.xlu0 %1854 }
 0x30e   : > { %vm1911_vm0 = vcmp.gt.f32.partialorder %v1895_v8, 0.0  ;;  %vm1912_vm1 = vcmp.gt.f32.partialorder %v1896_v24, 0.0  ;;  %v1927_v27 = vmul.f32 0.2, %v1895_v8  ;;  %v1928_v59 = vmul.f32 0.2, %v1896_v24  ;;  %3925 = vmatprep.subr.bf16.mxu1 %v1711_v25 }
 0x30f   : > { %v1863_v26 = vpop.permute.xlu1 %1862  ;;  %v1893_v5 = vadd.f32 %v5846_v39, %v1855_v14  ;;  %v1894_v43 = vadd.f32 %v5849_v47, %v1855_v14 }
 0x310   : > { %v1897_v51 = vadd.f32 %v5846_v39, %v1863_v26  ;;  %v1898_v29 = vadd.f32 %v5849_v47, %v1863_v26  ;;  %v1943_v12 = vsel %vm1911_vm0, %v1895_v8, %v1927_v27  ;;  %v1944_v6 = vsel %vm1912_vm1, %v1896_v24, %v1928_v59  ;;  %v7544_v8 = vld [vmem:[#allocation20_spill] sm:$0xff] }
 0x311   : > { %vm1909_vm2 = vcmp.gt.f32.partialorder %v1893_v5, 0.0  ;;  %vm1910_vm3 = vcmp.gt.f32.partialorder %v1894_v43, 0.0  ;;  %v1925_v25 = vmul.f32 0.2, %v1893_v5  ;;  %3926 = vmatpush3.bf16.msra.mxu1 %v5826_v50  ;;  %v1867_v52 = vpop.permute.xlu0 %1866  ;;  %v5881_v46 = vadd.f32 %v1943_v12, %v7543_v18  ;;  %v4297_v50 = vpop.eup %4296 }
 0x312   : > { %vm1913_vm4 = vcmp.gt.f32.partialorder %v1897_v51, 0.0  ;;  %vm1914_vm5 = vcmp.gt.f32.partialorder %v1898_v29, 0.0  ;;  %v1929_v16 = vmul.f32 0.2, %v1897_v51  ;;  %v1930_v11 = vmul.f32 0.2, %v1898_v29  ;;  %3927 = vmatprep.subr.bf16.mxu1 %v1713_v61  ;;  %v5889_v14 = vpop.eup %4298 }
 0x313   : > { %v1871_v38 = vpop.permute.xlu1 %1870  ;;  %v1899_v32 = vadd.f32 %v5846_v39, %v1867_v52  ;;  %v1900_v19 = vadd.f32 %v5849_v47, %v1867_v52  ;;  %v5884_v24 = vadd.f32 %v1944_v6, %v7544_v8  ;;  %v1926_v10 = vmul.f32 0.2, %v1894_v43  ;;  %v5893_v52 = vpop.eup %4300 }
 0x314   : > { %v1901_v27 = vadd.f32 %v5846_v39, %v1871_v38  ;;  %v1902_v59 = vadd.f32 %v5849_v47, %v1871_v38  ;;  %v1945_v61 = vsel %vm1913_vm4, %v1897_v51, %v1929_v16  ;;  %v1946_v12 = vsel %vm1914_vm5, %v1898_v29, %v1930_v11  ;;  %v4303_v40 = vpop.eup %4302 }
 0x315   : > { %vm1915_vm6 = vcmp.gt.f32.partialorder %v1899_v32, 0.0  ;;  %v1931_v26 = vmul.f32 0.2, %v1899_v32  ;;  %v1932_v42 = vmul.f32 0.2, %v1900_v19  ;;  %3928 = vmatpush3.bf16.msra.mxu1 %v5831_v15  ;;  %v1875_v38 = vpop.permute.xlu0 %1874  ;;  %v1976_v51 = vmax.f32 %v5881_v46, %v5884_v24  ;;  %v4305_v21 = vpop.eup %4304 }
 0x316   : > { %vm1917_vm7 = vcmp.gt.f32.partialorder %v1901_v27, 0.0  ;;  %vm1918_vm8 = vcmp.gt.f32.partialorder %v1902_v59, 0.0  ;;  %v1933_v6 = vmul.f32 0.2, %v1901_v27  ;;  %v1934_v20 = vmul.f32 0.2, %v1902_v59  ;;  %3929 = vmatprep.subr.bf16.mxu1 %v5857_v23 }
 0x317   : > { %v1903_v16 = vadd.f32 %v5846_v39, %v1875_v38  ;;  %v1904_v60 = vadd.f32 %v5849_v47, %v1875_v38  ;;  %v5901_v15 = vadd.f32 %v1945_v61, %v4879_v44  ;;  %v5904_v29 = vadd.f32 %v1946_v12, %v4881_v45  ;;  %1977 = vmax.xlane.f32.xlu0 %v1976_v51  ;;  %v7547_v38 = vld [vmem:[#allocation17_spill] sm:$0xff]  ;;  %v7548_v12 = vld [vmem:[#allocation18_spill] sm:$0xff] }
 0x318   : > { %v1941_v11 = vsel %vm1909_vm2, %v1893_v5, %v1925_v25  ;;  %v1942_v30 = vsel %vm1910_vm3, %v1894_v43, %v1926_v10  ;;  %v1949_v23 = vsel %vm1917_vm7, %v1901_v27, %v1933_v6  ;;  %vm1916_vm9 = vcmp.gt.f32.partialorder %v1900_v19, 0.0  ;;  %v4307_v43 = vpop.eup %4306 }
 0x319   : > { %7545 = vst [vmem:[#allocation10_spill] sm:$0xff] %v5901_v15  ;;  %7546 = vst [vmem:[#allocation11_spill] sm:$0xff] %v5904_v29  ;;  %vm1919_vm10 = vcmp.gt.f32.partialorder %v1903_v16, 0.0  ;;  %v1935_v58 = vmul.f32 0.2, %v1903_v16  ;;  %3930 = vmatpush3.bf16.msra.mxu1 %v5828_v48  ;;  %v1979_v61 = vmax.f32 %v5901_v15, %v5904_v29  ;;  %v5912_v4 = vadd.f32 %v1941_v11, %v7547_v38 }
 0x31a   : > { %v1936_v1 = vmul.f32 0.2, %v1904_v60  ;;  %v5915_v53 = vadd.f32 %v1942_v30, %v7548_v12  ;;  %v1950_v5 = vsel %vm1918_vm8, %v1902_v59, %v1934_v20  ;;  %vm1920_vm11 = vcmp.gt.f32.partialorder %v1904_v60, 0.0 }
 0x31b   : > { %v5919_v25 = vadd.f32 %v1949_v23, %v4891_v49  ;;  %v5922_v10 = vadd.f32 %v1950_v5, %v4893_v54  ;;  %v1679_v48 = vpack.c.bf16 %v4295_v37, %v4297_v50  ;;  %v7551_v6 = vpack.c.bf16 %v5855_v35, %v5851_v22  ;;  %1980 = vmax.xlane.f32.xlu0 %v1979_v61  ;;  %v4309_v23 = vpop.eup %4308 }
 0x31c   : > { %v1973_v27 = vmax.f32 %v5912_v4, %v5915_v53  ;;  %v1947_v30 = vsel %vm1915_vm6, %v1899_v32, %v1931_v26  ;;  %v1948_v20 = vsel %vm1916_vm9, %v1900_v19, %v1932_v42  ;;  %v1951_v59 = vsel %vm1919_vm10, %v1903_v16, %v1935_v58 }
 0x31d   : > { %7549 = vst [vmem:[#allocation12_spill] sm:$0xff] %v5919_v25  ;;  %7550 = vst [vmem:[#allocation13_spill] sm:$0xff] %v5922_v10  ;;  %1765 = vmatmul.mubr.bf16.vlgmr.msra.gmra.mrb[16].mxu1 %v7551_v6  ;;  %v1642_v51 = vsub.f32 %v5758_v3, %v5824_v2  ;;  %v1985_v37 = vmax.f32 %v5919_v25, %v5922_v10  ;;  %v5938_v22 = vadd.f32 %v1947_v30, %v4895_v55 }
 0x31e   : > { %1772 = vmatprep.mubr.bf16.mxu1 %v1679_v48  ;;  %1974 = vmax.xlane.f32.xlu1 %v1973_v27  ;;  %v5941_v35 = vadd.f32 %v1948_v20, %v4897_v56  ;;  %v1952_v42 = vsel %vm1920_vm11, %v1904_v60, %v1936_v1  ;;  %v5945_v58 = vadd.f32 %v1951_v59, %v4899_v57 }
 0x31f   : > { %7552 = vst [vmem:[#allocation5_spill] sm:$0xff] %v5938_v22  ;;  %v5948_v3 = vadd.f32 %v1952_v42, %v4909_v0  ;;  %v7556_v2 = vsub.f32 %v5747_v17, %v5822_v31  ;;  %v1672_v19 = vmul.f32 1.442695, %v1642_v51  ;;  %1986 = vmax.xlane.f32.xlu0 %v1985_v37  ;;  %v1678_v60 = vpack.c.bf16 %v5876_v34, %v5873_v7  ;;  %v4612_v42 = vld [vmem:[%s4719_s24 + $0x8] sm:$0xff] }
 0x320   : > { %7553 = vst [vmem:[#allocation3_spill] sm:$0xff] %v5941_v35  ;;  %7554 = vst [vmem:[#allocation2_spill] sm:$0xff] %v5945_v58  ;;  %v1982_v32 = vmax.f32 %v5938_v22, %v5941_v35  ;;  %v1681_v1 = vpack.c.bf16 %v4303_v40, %v4305_v21  ;;  %v1680_v5 = vpack.c.bf16 %v5893_v52, %v5889_v14 }
 0x321   : > { %7555 = vst [vmem:[#allocation4_spill] sm:$0xff] %v5948_v3  ;;  %v1668_v33 = vmul.f32 1.442695, %v7556_v2  ;;  %v1988_v50 = vmax.f32 %v5945_v58, %v5948_v3  ;;  %v1683_v48 = vpack.c.bf16 %v4307_v43, %v4309_v23  ;;  %v4613_v2 = vld [vmem:[%s4719_s24] sm:$0xff] }
 0x322   : > { %1983 = vmax.xlane.f32.xlu1 %v1982_v32  ;;  %v4614_v32 = vld [vmem:[%s4719_s24 + $0x10] sm:$0xff]  ;;  %v4616_v23 = vld [vmem:[%s4719_s24 + $0x20] sm:$0xff] }
 0x323   : > { %4310 = vpow2.f32 %v1668_v33 }
 0x324   : > { %v3891_v26 = vpop.f32.mrb[16].mxu0  ;;  %4312 = vpow2.f32 %v1672_v19 }
 0x325   : > { %1773 = vmatmul.mubr.bf16.gmra.mrb[20].mxu1 %v1678_v60  ;;  %v3892_v16 = vpop.f32.mrb[17].mxu0 }
 0x326   : > { %1780 = vmatprep.mubr.bf16.mxu1 %v1681_v1  ;;  %v5959_v17 = vadd.f32 %v3892_v16, %v3891_v26  ;;  %v3894_v31 = vpop.f32.mrb[18].mxu0  ;;  %1989 = vmax.xlane.f32.xlu1 %v1988_v50  ;;  %v4661_v50 = vmov 6  }
 0x327   : > { %v3895_v11 = vpop.f32.mrb[19].mxu0 }
 0x328   : > { %7557 = vst [vmem:[#allocation7_spill] sm:$0xff] %v5959_v17  ;;  %v5961_v61 = vadd.f32 %v3895_v11, %v3894_v31  ;;  %v4615_v31 = vld [vmem:[%s4719_s24 + $0x18] sm:$0xff] }
 0x32a   : > { %7558 = vst [vmem:[#allocation6_spill] sm:$0xff] %v5961_v61 }
 0x32c   : > { %v3897_v7 = vpop.f32.mrb[20].mxu0 }
 0x32d   : > { %1781 = vmatmul.mubr.bf16.gmra.mrb[24].mxu1 %v1680_v5  ;;  %v3898_v21 = vpop.f32.mrb[21].mxu0  ;;  %v4311_v27 = vpop.eup %4310  ;;  %v4662_v5 = vmov 7  }
 0x32e   : > { %1788 = vmatprep.mubr.bf16.mxu1 %v1683_v48  ;;  %v5965_v40 = vadd.f32 %v3898_v21, %v3897_v7  ;;  %v3900_v34 = vpop.f32.mrb[22].mxu0  ;;  %v4313_v30 = vpop.eup %4312  ;;  %v4617_v48 = vld [vmem:[%s4719_s24 + $0x28] sm:$0xff]  ;;  %v4618_v7 = vld [vmem:[%s4719_s24 + $0x30] sm:$0xff]  ;;  %v4619_v21 = vld [vmem:[%s4719_s24 + $0x38] sm:$0xff] }
 0x32f   : > { %v3901_v6 = vpop.f32.mrb[23].mxu0  ;;  %v1682_v59 = vpack.c.bf16 %v4313_v30, %v4311_v27  ;;  %v5995_v27 = vld [vmem:[%s7215_s1] sm:$0xff]  }
 0x330   : > { %7559 = vst [vmem:[#allocation9_spill] sm:$0xff] %v5965_v40  ;;  %v5967_v20 = vadd.f32 %v3901_v6, %v3900_v34  ;;  %v5988_v34 = vld [vmem:[%s7215_s1 + $0x40] sm:$0xff]   ;;  %v5999_v6 = vpop.permute.xlu0 %1882 }
 0x332   : > { %7560 = vst [vmem:[#allocation29_spill] sm:$0xff] %v5967_v20 }
 0x334   : > { %v3903_v51 = vpop.f32.mrb[24].mxu0 }
 0x335   : > { %1789 = vmatmul.mubr.bf16.gmra.mrb[28].mxu1 %v1682_v59  ;;  %v3904_v14 = vpop.f32.mrb[25].mxu0  ;;  %2223 = vperm.xlu0 %4156, %v4613_v2   ;;  %v6003_v59 = vpop.permute.xlu1 %1878 }
 0x336   : > { %v5969_v52 = vadd.f32 %v3904_v14, %v3903_v51  ;;  %v3906_v43 = vpop.f32.mrb[26].mxu0 }
 0x337   : > { %v3907_v37 = vpop.f32.mrb[27].mxu0  ;;  %2227 = vperm.xlu1 %4157, %v4612_v42  }
 0x338   : > { %7561 = vst [vmem:[#allocation8_spill] sm:$0xff] %v5969_v52  ;;  %v5973_v33 = vadd.f32 %v3907_v37, %v3906_v43  ;;  %v6096_v52 = vld [vmem:[%s7215_s1 + $0x10] sm:$0xff]  }
 0x339   : > { %4158 = vset.pattern.permute.xlu0 %v4661_v50 }
 0x33a   : > { %7562 = vst [vmem:[#allocation31_spill] sm:$0xff] %v5973_v33  ;;  %2592 = vperm.xlu0 %4158, %v4613_v2  }
 0x33b   : > { %2231 = vperm.xlu1 %4157, %v4614_v32  }
 0x33c   : > { %v3909_v19 = vpop.f32.mrb[28].mxu0 }
 0x33d   : > { %v3910_v60 = vpop.f32.mrb[29].mxu0 }
 0x33e   : > { %v5976_v1 = vadd.f32 %v3910_v60, %v3909_v19  ;;  %v3912_v26 = vpop.f32.mrb[30].mxu0  ;;  %2608 = vperm.xlu0 %4158, %v4616_v23   ;;  %v2256_v19 = vsub.s32 5, %v7540_v41 }
 0x33f   : > { %v3913_v16 = vpop.f32.mrb[31].mxu0  ;;  %2235 = vperm.xlu1 %4157, %v4615_v31  }
 0x340   : > { %7563 = vst [vmem:[#allocation30_spill] sm:$0xff] %v5976_v1  ;;  %v5979_v11 = vadd.f32 %v3913_v16, %v3912_v26  ;;  %v6024_v26 = vrot.slane %v7542_v36, %v2256_v19 }
 0x342   : > { %7564 = vst [vmem:[#allocation33_spill] sm:$0xff] %v5979_v11  ;;  %4163 = vset.pattern.permute.xlu0 %v4662_v5 }
 0x343   : > { %2239 = vperm.xlu1 %4157, %v4616_v23   ;;  %2965 = vperm.xlu0 %4163, %v4612_v42  }
 0x347   : > { %2243 = vperm.xlu1 %4157, %v4617_v48   ;;  %2969 = vperm.xlu0 %4163, %v4614_v32  }
 0x34b   : > { %2247 = vperm.xlu1 %4157, %v4618_v7   ;;  %2981 = vperm.xlu0 %4163, %v4617_v48  }
 0x34f   : > { %2251 = vperm.xlu1 %4157, %v4619_v21   ;;  %2985 = vperm.xlu0 %4163, %v4618_v7  }
 0x353   : > { %4159 = vset.pattern.permute.xlu1 %v4661_v50  ;;  %2069 = vrot.lane.b32.xlu0 %v5988_v34, %s4663_s15 }
 0x354   : > { %2596 = vperm.xlu1 %4159, %v4612_v42  }
 0x358   : > { %4160 = vset.pattern.permute.xlu1 %v4662_v5 }
 0x359   : > { %2961 = vperm.xlu1 %4160, %v4613_v2  }
 0x35d   : > { %4161 = vset.pattern.permute.xlu1 %v4661_v50 }
 0x35e   : > { %2600 = vperm.xlu1 %4161, %v4614_v32  }
 0x362   : > { %2604 = vperm.xlu1 %4161, %v4615_v31  }
 0x366   : > { %4162 = vset.pattern.permute.xlu1 %v4662_v5 }
 0x367   : > { %2973 = vperm.xlu1 %4162, %v4615_v31  }
 0x36b   : > { %4164 = vset.pattern.permute.xlu1 %v4661_v50 }
 0x36c   : > { %2612 = vperm.xlu1 %4164, %v4617_v48  }
 0x370   : > { %4165 = vset.pattern.permute.xlu1 %v4662_v5 }
 0x371   : > { %2977 = vperm.xlu1 %4165, %v4616_v23  }
 0x375   : > { %4166 = vset.pattern.permute.xlu1 %v4661_v50 }
 0x376   : > { %2616 = vperm.xlu1 %4166, %v4618_v7  }
 0x37a   : > { %2620 = vperm.xlu1 %4166, %v4619_v21  }
 0x37e   : > { %4167 = vset.pattern.permute.xlu1 %v4662_v5 }
 0x37f   : > { %2989 = vperm.xlu1 %4167, %v4619_v21  }
 0x383   : > { %2053 = vrot.lane.b32.xlu1 %v5995_v27, %s4663_s15 }
 0x3a4   : > { %v6001_v30 = vpop.xlane.xlu0 %1977 }
 0x3a5   : > { %v2000_v51 = vsub.f32 %v5884_v24, %v6001_v30  ;;  %v6021_v24 = vrot.slane %v7541_v28, %v2256_v19 }
 0x3a7   : > { %v2019_v43 = vmul.f32 1.442695, %v2000_v51 }
 0x3a8   : > { %v6011_v42 = vpop.xlane.xlu0 %1980 }
 0x3a9   : > { %4314 = vpow2.f32 %v2019_v43 }
 0x3ab   : > { %v6007_v14 = vpop.xlane.xlu1 %1974 }
 0x3ac   : > { %v1998_v37 = vsub.f32 %v5915_v53, %v6007_v14  ;;  %v6016_v50 = vpop.xlane.xlu0 %1986 }
 0x3ad   : > { %7566 = vst [vmem:[#allocation37_spill] sm:$0xff] %v6016_v50 }
 0x3ae   : > { %v2015_v2 = vmul.f32 1.442695, %v1998_v37 }
 0x3af   : > { %v6013_v32 = vpop.xlane.xlu1 %1983 }
 0x3b0   : > { %7565 = vst [vmem:[#allocation32_spill] sm:$0xff] %v6013_v32  ;;  %4316 = vpow2.f32 %v2015_v2 }
 0x3b3   : > { %v6018_v60 = vpop.xlane.xlu1 %1989  ;;  %v4315_v21 = vpop.eup %4314 }
 0x3b4   : > { %7567 = vst [vmem:[#allocation34_spill] sm:$0xff] %v6018_v60  ;;  %v2224_v53 = vpop.permute.xlu0 %2223 }
 0x3b5   : > { %v2262_v31 = vadd.f32 %v6021_v24, %v2224_v53  ;;  %v2263_v23 = vadd.f32 %v6024_v26, %v2224_v53 }
 0x3b7   : > { %v2228_v16 = vpop.permute.xlu1 %2227  ;;  %vm2278_vm12 = vcmp.gt.f32.partialorder %v2262_v31, 0.0  ;;  %vm2279_vm13 = vcmp.gt.f32.partialorder %v2263_v23, 0.0  ;;  %v2294_v7 = vmul.f32 0.2, %v2262_v31  ;;  %v2295_v43 = vmul.f32 0.2, %v2263_v23 }
 0x3b8   : > { %v2264_v5 = vadd.f32 %v6021_v24, %v2228_v16  ;;  %v2265_v48 = vadd.f32 %v6024_v26, %v2228_v16 }
 0x3b9   : > { %v2310_v2 = vsel %vm2278_vm12, %v2262_v31, %v2294_v7  ;;  %v6030_v19 = vpop.permute.xlu0 %2592  ;;  %v2311_v16 = vsel %vm2279_vm13, %v2263_v23, %v2295_v43 }
 0x3ba   : > { %vm2280_vm14 = vcmp.gt.f32.partialorder %v2264_v5, 0.0  ;;  %vm2281_vm15 = vcmp.gt.f32.partialorder %v2265_v48, 0.0  ;;  %v2296_v28 = vmul.f32 0.2, %v2264_v5  ;;  %v2297_v51 = vmul.f32 0.2, %v2265_v48  ;;  %v4317_v36 = vpop.eup %4316 }
 0x3bb   : > { %v2232_v37 = vpop.permute.xlu1 %2231  ;;  %v2046_v11 = vpack.c.bf16 %v4315_v21, %v4317_v36  ;;  %v6037_v40 = vadd.f32 %v2310_v2, %v7547_v38  ;;  %v6043_v31 = vadd.f32 %v2311_v16, %v7548_v12  ;;  %v6074_v16 = vld [vmem:[%s7215_s1 + $0x8] sm:$0xff]  }
 0x3bc   : > { %v2312_v53 = vsel %vm2280_vm14, %v2264_v5, %v2296_v28  ;;  %v2313_v33 = vsel %vm2281_vm15, %v2265_v48, %v2297_v51  ;;  %7574 = vst [vmem:[#allocation45_spill] sm:$0xff] %v6074_v16  ;;  %v2267_v10 = vadd.f32 %v6024_v26, %v2232_v37 }
 0x3bd   : > { %v6033_v20 = vadd.f32 %v2312_v53, %v7543_v18  ;;  %7569 = vst [vmem:[#allocation38_spill] sm:$0xff] %v6037_v40  ;;  %2133 = vmatprep.mubr.bf16.mxu0 %v2046_v11  ;;  %v6040_v1 = vadd.f32 %v2313_v33, %v7544_v8  ;;  %v6045_v7 = vpop.permute.xlu0 %2608  ;;  %v2342_v48 = vmax.f32 %v6037_v40, %v6043_v31 }
 0x3be   : > { %7570 = vst [vmem:[#allocation46_spill] sm:$0xff] %v6045_v7  ;;  %vm2283_vm2 = vcmp.gt.f32.partialorder %v2267_v10, 0.0 }
 0x3bf   : > { %7568 = vst [vmem:[#allocation36_spill] sm:$0xff] %v6033_v20  ;;  %v2236_v17 = vpop.permute.xlu1 %2235  ;;  %v2345_v5 = vmax.f32 %v6033_v20, %v6040_v1  ;;  %2343 = vmax.xlane.f32.xlu0 %v2342_v48  ;;  %v6087_v48 = vld [vmem:[%s7215_s1 + $0x48] sm:$0xff]  }
 0x3c0   : > { %7575 = vst [vmem:[#allocation19_spill] sm:$0xff] %v6087_v48  ;;  %v2268_v3 = vadd.f32 %v6021_v24, %v2236_v17  ;;  %v2269_v50 = vadd.f32 %v6024_v26, %v2236_v17 }
 0x3c1   : > { %2346 = vmax.xlane.f32.xlu1 %v2345_v5 }
 0x3c2   : > { %v6053_v11 = vpop.permute.xlu0 %2965  ;;  %v2300_v15 = vmul.f32 0.2, %v2268_v3  ;;  %vm2284_vm0 = vcmp.gt.f32.partialorder %v2268_v3, 0.0  ;;  %vm2285_vm3 = vcmp.gt.f32.partialorder %v2269_v50, 0.0 }
 0x3c3   : > { %v6051_v23 = vpop.permute.xlu1 %2239 }
 0x3c6   : > { %v6057_v33 = vpop.permute.xlu0 %2969 }
 0x3c7   : > { %v6055_v21 = vpop.permute.xlu1 %2243  ;;  %7571 = vst [vmem:[#allocation47_spill] sm:$0xff] %v6057_v33 }
 0x3ca   : > { %v6061_v51 = vpop.permute.xlu0 %2981 }
 0x3cb   : > { %v6059_v28 = vpop.permute.xlu1 %2247  ;;  %7572 = vst [vmem:[#allocation14_spill] sm:$0xff] %v6061_v51 }
 0x3ce   : > { %v6065_v43 = vpop.permute.xlu0 %2985 }
 0x3cf   : > { %v6063_v36 = vpop.permute.xlu1 %2251  ;;  %7573 = vst [vmem:[#allocation44_spill] sm:$0xff] %v6065_v43  ;;  %v6107_v43 = vld [vmem:[%s7215_s1 + $0x50] sm:$0xff]  }
 0x3d2   : > { %2422 = vrot.lane.b32.xlu1 %v5995_v27, %s4664_s17  ;;  %v2070_v53 = vpop.permute.xlu0 %2069 }
 0x3d3   : > { %v6067_v2 = vpop.permute.xlu1 %2596  ;;  %3955 = vmatprep.subr.bf16.mxu0 %v2070_v53 }
 0x3d5   : > { %2438 = vrot.lane.b32.xlu0 %v5988_v34, %s4664_s17 }
 0x3d6   : > { %2055 = vrot.lane.b32.xlu1 %v6074_v16, %s4663_s15 }
 0x3d8   : > { %v6078_v5 = vpop.permute.xlu1 %2961 }
 0x3d9   : > { %2071 = vrot.lane.b32.xlu0 %v6087_v48, %s4663_s15 }
 0x3da   : > { %2424 = vrot.lane.b32.xlu1 %v6074_v16, %s4664_s17  ;;  %v2299_v16 = vmul.f32 0.2, %v2267_v10 }
 0x3dc   : > { %v2315_v20 = vsel %vm2283_vm2, %v2267_v10, %v2299_v16 }
 0x3dd   : > { %v6091_v53 = vpop.permute.xlu1 %2600  ;;  %2440 = vrot.lane.b32.xlu0 %v6087_v48, %s4664_s17 }
 0x3de   : > { %7576 = vst [vmem:[#allocation20_spill] sm:$0xff] %v6091_v53  ;;  %2057 = vrot.lane.b32.xlu1 %v6096_v52, %s4663_s15 }
 0x3e1   : > { %v6102_v61 = vpop.permute.xlu1 %2604  ;;  %2073 = vrot.lane.b32.xlu0 %v6107_v43, %s4663_s15 }
 0x3e2   : > { %7577 = vst [vmem:[#allocation17_spill] sm:$0xff] %v6102_v61  ;;  %v2266_v61 = vadd.f32 %v6021_v24, %v2232_v37 }
 0x3e4   : > { %vm2282_vm1 = vcmp.gt.f32.partialorder %v2266_v61, 0.0 }
 0x3e6   : > { %v6111_v51 = vpop.permute.xlu1 %2973 }
 0x3e7   : > { %7578 = vst [vmem:[#allocation18_spill] sm:$0xff] %v6111_v51 }
 0x3eb   : > { %v6113_v7 = vpop.permute.xlu1 %2612 }
 0x3ec   : > { %7579 = vst [vmem:[#allocation56_spill] sm:$0xff] %v6113_v7  ;;  %v2298_v7 = vmul.f32 0.2, %v2266_v61 }
 0x3f0   : > { %v3931_v33 = vpop.f32.mrb[16].mxu1  ;;  %v6115_v25 = vpop.permute.xlu1 %2977 }
 0x3f1   : > { %v3932_v53 = vpop.f32.mrb[17].mxu1  ;;  %7580 = vst [vmem:[#allocation57_spill] sm:$0xff] %v6115_v25 }
 0x3f2   : > { %v6117_v58 = vadd.f32 %v3932_v53, %v3931_v33  ;;  %v3934_v48 = vpop.f32.mrb[18].mxu1  ;;  %v2301_v33 = vmul.f32 0.2, %v2269_v50 }
 0x3f3   : > { %v3935_v60 = vpop.f32.mrb[19].mxu1 }
 0x3f4   : > { %7581 = vst [vmem:[#allocation58_spill] sm:$0xff] %v6117_v58  ;;  %v6123_v22 = vadd.f32 %v3935_v60, %v3934_v48  ;;  %v2316_v60 = vsel %vm2284_vm0, %v2268_v3, %v2300_v15 }
 0x3f5   : > { %v6125_v51 = vpop.permute.xlu1 %2616  ;;  %v6134_v35 = vadd.f32 %v2316_v60, %v4895_v55 }
 0x3f6   : > { %7582 = vst [vmem:[#allocation59_spill] sm:$0xff] %v6123_v22  ;;  %7583 = vst [vmem:[#allocation60_spill] sm:$0xff] %v6125_v51  ;;  %v2317_v22 = vsel %vm2285_vm3, %v2269_v50, %v2301_v33  ;;  %v2314_v51 = vsel %vm2282_vm1, %v2266_v61, %v2298_v7 }
 0x3f7   : > { %v6137_v32 = vadd.f32 %v2317_v22, %v4897_v56  ;;  %v6140_v29 = vadd.f32 %v2314_v51, %v4879_v44 }
 0x3f8   : > { %v3937_v53 = vpop.f32.mrb[20].mxu1 }
 0x3f9   : > { %v3938_v58 = vpop.f32.mrb[21].mxu1  ;;  %v6129_v37 = vpop.permute.xlu1 %2620  ;;  %v2351_v10 = vmax.f32 %v6134_v35, %v6137_v32 }
 0x3fa   : > { %v6127_v25 = vadd.f32 %v3938_v58, %v3937_v53  ;;  %v3940_v40 = vpop.f32.mrb[22].mxu1  ;;  %7585 = vst [vmem:[#allocation62_spill] sm:$0xff] %v6129_v37  ;;  %v6143_v58 = vadd.f32 %v2315_v20, %v4881_v45 }
 0x3fb   : > { %v3941_v17 = vpop.f32.mrb[23].mxu1 }
 0x3fc   : > { %7584 = vst [vmem:[#allocation61_spill] sm:$0xff] %v6127_v25  ;;  %v6131_v48 = vadd.f32 %v3941_v17, %v3940_v40  ;;  %v2348_v22 = vmax.f32 %v6140_v29, %v6143_v58 }
 0x3fe   : > { %7586 = vst [vmem:[#allocation63_spill] sm:$0xff] %v6131_v48  ;;  %v6145_v53 = vpop.permute.xlu1 %2989 }
 0x3ff   : > { %7587 = vst [vmem:[#allocation64_spill] sm:$0xff] %v6145_v53 }
 0x400   : > { %v3943_v15 = vpop.f32.mrb[24].mxu1  ;;  %2349 = vmax.xlane.f32.xlu0 %v2348_v22  ;;  %v6191_v22 = vld [vmem:[%s7215_s1 + $0x60] sm:$0xff]  }
 0x401   : > { %v3944_v3 = vpop.f32.mrb[25].mxu1  ;;  %7595 = vst [vmem:[#allocation72_spill] sm:$0xff] %v6191_v22 }
 0x402   : > { %v6147_v40 = vadd.f32 %v3944_v3, %v3943_v15  ;;  %v3946_v61 = vpop.f32.mrb[26].mxu1  ;;  %v2054_v7 = vpop.permute.xlu1 %2053  ;;  %2352 = vmax.xlane.f32.xlu1 %v2351_v10  ;;  %v6164_v3 = vld [vmem:[%s7215_s1 + $0x18] sm:$0xff]   ;;  %v6182_v10 = vld [vmem:[%s7215_s1 + $0x20] sm:$0xff]  }
 0x403   : > { %v3947_v50 = vpop.f32.mrb[27].mxu1  ;;  %3956 = vmatpush3.bf16.msra.mxu0 %v2054_v7  ;;  %7592 = vst [vmem:[#allocation69_spill] sm:$0xff] %v6164_v3  ;;  %7594 = vst [vmem:[#allocation71_spill] sm:$0xff] %v6182_v10  ;;  %v2271_v7 = vadd.f32 %v6024_v26, %v6051_v23 }
 0x404   : > { %7588 = vst [vmem:[#allocation65_spill] sm:$0xff] %v6147_v40  ;;  %v6153_v51 = vadd.f32 %v3947_v50, %v3946_v61  ;;  %v6175_v61 = vld [vmem:[%s7215_s1 + $0x58] sm:$0xff]   ;;  %v2270_v50 = vadd.f32 %v6021_v24, %v6051_v23 }
 0x405   : > { %7593 = vst [vmem:[#allocation70_spill] sm:$0xff] %v6175_v61  ;;  %vm2287_vm5 = vcmp.gt.f32.partialorder %v2271_v7, 0.0 }
 0x406   : > { %7589 = vst [vmem:[#allocation66_spill] sm:$0xff] %v6153_v51  ;;  %vm2286_vm4 = vcmp.gt.f32.partialorder %v2270_v50, 0.0 }
 0x408   : > { %v3949_v20 = vpop.f32.mrb[28].mxu1 }
 0x409   : > { %v3950_v16 = vpop.f32.mrb[29].mxu1 }
 0x40a   : > { %v6155_v33 = vadd.f32 %v3950_v16, %v3949_v20  ;;  %v3952_v17 = vpop.f32.mrb[30].mxu1  ;;  %v2272_v20 = vadd.f32 %v6021_v24, %v6055_v21  ;;  %v2273_v16 = vadd.f32 %v6024_v26, %v6055_v21 }
 0x40b   : > { %v3953_v60 = vpop.f32.mrb[31].mxu1 }
 0x40c   : > { %7590 = vst [vmem:[#allocation67_spill] sm:$0xff] %v6155_v33  ;;  %v6157_v15 = vadd.f32 %v3953_v60, %v3952_v17  ;;  %v2302_v17 = vmul.f32 0.2, %v2270_v50  ;;  %v2303_v60 = vmul.f32 0.2, %v2271_v7  ;;  %vm2288_vm6 = vcmp.gt.f32.partialorder %v2272_v20, 0.0 }
 0x40d   : > { %v2305_v51 = vmul.f32 0.2, %v2273_v16  ;;  %vm2289_vm7 = vcmp.gt.f32.partialorder %v2273_v16, 0.0 }
 0x40e   : > { %7591 = vst [vmem:[#allocation68_spill] sm:$0xff] %v6157_v15  ;;  %v2304_v15 = vmul.f32 0.2, %v2272_v20  ;;  %v2318_v33 = vsel %vm2286_vm4, %v2270_v50, %v2302_v17  ;;  %v2319_v40 = vsel %vm2287_vm5, %v2271_v7, %v2303_v60  ;;  %v6243_v60 = vld [vmem:[%s7215_s1 + $0x68] sm:$0xff]  }
 0x40f   : > { %v2321_v25 = vsel %vm2289_vm7, %v2273_v16, %v2305_v51  ;;  %v6210_v21 = vadd.f32 %v2318_v33, %v4891_v49  ;;  %v6213_v37 = vadd.f32 %v2319_v40, %v4893_v54  ;;  %7597 = vst [vmem:[#allocation74_spill] sm:$0xff] %v6243_v60 }
 0x410   : > { %v2320_v48 = vsel %vm2288_vm6, %v2272_v20, %v2304_v15  ;;  %v6207_v53 = vadd.f32 %v2321_v25, %v4909_v0 }
 0x411   : > { %v6204_v23 = vadd.f32 %v2320_v48, %v4899_v57  ;;  %v2354_v51 = vmax.f32 %v6210_v21, %v6213_v37 }
 0x413   : > { %2426 = vrot.lane.b32.xlu1 %v6096_v52, %s4664_s17 }
 0x416   : > { %2442 = vrot.lane.b32.xlu0 %v6107_v43, %s4664_s17 }
 0x417   : > { %2059 = vrot.lane.b32.xlu1 %v6164_v3, %s4663_s15 }
 0x41a   : > { %2075 = vrot.lane.b32.xlu0 %v6175_v61, %s4663_s15 }
 0x41b   : > { %2428 = vrot.lane.b32.xlu1 %v6164_v3, %s4664_s17 }
 0x41e   : > { %2444 = vrot.lane.b32.xlu0 %v6175_v61, %s4664_s17  ;;  %v2357_v61 = vmax.f32 %v6204_v23, %v6207_v53 }
 0x41f   : > { %2061 = vrot.lane.b32.xlu1 %v6182_v10, %s4663_s15 }
 0x422   : > { %2077 = vrot.lane.b32.xlu0 %v6191_v22, %s4663_s15 }
 0x441   : > { %2355 = vmax.xlane.f32.xlu0 %v2354_v51 }
 0x443   : > { %2358 = vmax.xlane.f32.xlu1 %v2357_v61 }
 0x44c   : > { %v6221_v48 = vpop.xlane.xlu0 %2343 }
 0x44d   : > { %v2367_v33 = vsub.f32 %v6043_v31, %v6221_v48 }
 0x44e   : > { %v6219_v15 = vpop.xlane.xlu1 %2346 }
 0x44f   : > { %v2369_v25 = vsub.f32 %v6040_v1, %v6219_v15  ;;  %v2384_v50 = vmul.f32 1.442695, %v2367_v33  ;;  %v6232_v1 = vld [vmem:[%s7215_s1 + $0x28] sm:$0xff]  }
 0x450   : > { %v2439_v20 = vpop.permute.xlu0 %2438  ;;  %7596 = vst [vmem:[#allocation73_spill] sm:$0xff] %v6232_v1 }
 0x451   : > { %v2388_v40 = vmul.f32 1.442695, %v2369_v25  ;;  %3995 = vmatprep.subr.bf16.mxu1 %v2439_v20  ;;  %v1908_v20 = vadd.f32 %v5849_v47, %v5999_v6 }
 0x452   : > { %v2423_v7 = vpop.permute.xlu1 %2422 }
 0x453   : > { %4318 = vpow2.f32 %v2388_v40  ;;  %3996 = vmatpush3.bf16.msra.mxu1 %v2423_v7  ;;  %v1907_v7 = vadd.f32 %v5846_v39, %v5999_v6  ;;  %vm1924_vm9 = vcmp.gt.f32.partialorder %v1908_v20, 0.0 }
 0x454   : > { %2430 = vrot.lane.b32.xlu1 %v6182_v10, %s4664_s17  ;;  %4320 = vpow2.f32 %v2384_v50  ;;  %v2072_v16 = vpop.permute.xlu0 %2071 }
 0x455   : > { %3957 = vmatprep.subr.bf16.mxu0 %v2072_v16  ;;  %v1906_v16 = vadd.f32 %v5849_v47, %v6003_v59  ;;  %vm1923_vm8 = vcmp.gt.f32.partialorder %v1907_v7, 0.0 }
 0x456   : > { %v2056_v61 = vpop.permute.xlu1 %2055 }
 0x457   : > { %3958 = vmatpush3.bf16.msra.mxu0 %v2056_v61  ;;  %2446 = vrot.lane.b32.xlu0 %v6191_v22, %s4664_s17  ;;  %v1905_v61 = vadd.f32 %v5846_v39, %v6003_v59  ;;  %vm1922_vm11 = vcmp.gt.f32.partialorder %v1906_v16, 0.0 }
 0x458   : > { %2063 = vrot.lane.b32.xlu1 %v6232_v1, %s4663_s15  ;;  %v2441_v17 = vpop.permute.xlu0 %2440 }
 0x459   : > { %3997 = vmatprep.subr.bf16.mxu1 %v2441_v17  ;;  %v1940_v17 = vmul.f32 0.2, %v1908_v20  ;;  %vm1921_vm10 = vcmp.gt.f32.partialorder %v1905_v61, 0.0 }
 0x45a   : > { %v2425_v31 = vpop.permute.xlu1 %2424 }
 0x45b   : > { %3998 = vmatpush3.bf16.msra.mxu1 %v2425_v31  ;;  %2079 = vrot.lane.b32.xlu0 %v6243_v60, %s4663_s15  ;;  %v1939_v31 = vmul.f32 0.2, %v1907_v7 }
 0x45c   : > { %2432 = vrot.lane.b32.xlu1 %v6232_v1, %s4664_s17  ;;  %v2074_v33 = vpop.permute.xlu0 %2073 }
 0x45d   : > { %v4319_v51 = vpop.eup %4318  ;;  %3959 = vmatprep.subr.bf16.mxu0 %v2074_v33  ;;  %v1955_v33 = vsel %vm1923_vm8, %v1907_v7, %v1939_v31 }
 0x45e   : > { %v2058_v25 = vpop.permute.xlu1 %2057  ;;  %v4321_v40 = vpop.eup %4320  ;;  %v6258_v6 = vadd.f32 %v1955_v33, %v4911_v9 }
 0x45f   : > { %3960 = vmatpush3.bf16.msra.mxu0 %v2058_v25  ;;  %v2415_v50 = vpack.c.bf16 %v4319_v51, %v4321_v40  ;;  %2448 = vrot.lane.b32.xlu0 %v6243_v60, %s4664_s17  ;;  %v1937_v25 = vmul.f32 0.2, %v1905_v61  ;;  %v1938_v51 = vmul.f32 0.2, %v1906_v16  ;;  %v1956_v40 = vsel %vm1924_vm9, %v1908_v20, %v1940_v17  ;;  %v4633_v17 = vld [vmem:[%s7215_s1 + $0x70] sm:$0xff]  }
 0x460   : > { %v6261_v39 = vadd.f32 %v1956_v40, %v4913_v13 }
 0x461   : > { %2502 = vmatprep.mubr.bf16.mxu1 %v2415_v50  ;;  %v1953_v50 = vsel %vm1921_vm10, %v1905_v61, %v1937_v25  ;;  %v1954_v60 = vsel %vm1922_vm11, %v1906_v16, %v1938_v51  ;;  %v4632_v16 = vld [vmem:[%s7215_s1 + $0x30] sm:$0xff]  }
 0x462   : > { %v6264_v47 = vadd.f32 %v1953_v50, %v4905_v62  ;;  %v6267_v59 = vadd.f32 %v1954_v60, %v4907_v63  ;;  %v1994_v1 = vmax.f32 %v6258_v6, %v6261_v39 }
 0x464   : > { %v1991_v7 = vmax.f32 %v6264_v47, %v6267_v59 }
 0x47e   : > { %1992 = vmax.xlane.f32.xlu0 %v1991_v7  ;;  %v2274_v7 = vadd.f32 %v6021_v24, %v6059_v28 }
 0x480   : > { %1995 = vmax.xlane.f32.xlu1 %v1994_v1  ;;  %vm2290_vm12 = vcmp.gt.f32.partialorder %v2274_v7, 0.0 }
 0x48d   : > { %v6275_v61 = vpop.xlane.xlu0 %2349 }
 0x48f   : > { %v6273_v20 = vpop.xlane.xlu1 %2352 }
 0x491   : > { %2065 = vrot.lane.b32.xlu1 %v4632_v16, %s4663_s15  ;;  %v2443_v31 = vpop.permute.xlu0 %2442 }
 0x492   : > { %3999 = vmatprep.subr.bf16.mxu1 %v2443_v31  ;;  %v2276_v31 = vadd.f32 %v6021_v24, %v6063_v36 }
 0x493   : > { %v2427_v60 = vpop.permute.xlu1 %2426 }
 0x494   : > { %4000 = vmatpush3.bf16.msra.mxu1 %v2427_v60  ;;  %2081 = vrot.lane.b32.xlu0 %v4633_v17, %s4663_s15  ;;  %v2275_v60 = vadd.f32 %v6024_v26, %v6059_v28  ;;  %vm2292_vm14 = vcmp.gt.f32.partialorder %v2276_v31, 0.0 }
 0x495   : > { %v2076_v25 = vpop.permute.xlu0 %2075 }
 0x496   : > { %3961 = vmatprep.subr.bf16.mxu0 %v2076_v25  ;;  %v2306_v25 = vmul.f32 0.2, %v2274_v7  ;;  %v2307_v22 = vmul.f32 0.2, %v2275_v60  ;;  %vm2291_vm13 = vcmp.gt.f32.partialorder %v2275_v60, 0.0 }
 0x497   : > { %v2060_v1 = vpop.permute.xlu1 %2059 }
 0x498   : > { %3962 = vmatpush3.bf16.msra.mxu0 %v2060_v1  ;;  %v2277_v1 = vadd.f32 %v6024_v26, %v6063_v36  ;;  %v2322_v10 = vsel %vm2290_vm12, %v2274_v7, %v2306_v25  ;;  %v2323_v54 = vsel %vm2291_vm13, %v2275_v60, %v2307_v22  ;;  %v4634_v22 = vld [vmem:[%s7215_s1 + $0x38] sm:$0xff]  }
 0x499   : > { %v2445_v33 = vpop.permute.xlu0 %2444  ;;  %v6300_v26 = vadd.f32 %v2322_v10, %v4905_v62  ;;  %v6303_v36 = vadd.f32 %v2323_v54, %v4907_v63  ;;  %v4635_v54 = vld [vmem:[%s7215_s1 + $0x78] sm:$0xff]  }
 0x49a   : > { %4001 = vmatprep.subr.bf16.mxu1 %v2445_v33  ;;  %v2308_v33 = vmul.f32 0.2, %v2276_v31  ;;  %vm2293_vm15 = vcmp.gt.f32.partialorder %v2277_v1, 0.0 }
 0x49b   : > { %v2429_v51 = vpop.permute.xlu1 %2428 }
 0x49c   : > { %4002 = vmatpush3.bf16.msra.mxu1 %v2429_v51  ;;  %v2309_v51 = vmul.f32 0.2, %v2277_v1 }
 0x49d   : > { %v2078_v50 = vpop.permute.xlu0 %2077 }
 0x49e   : > { %3963 = vmatprep.subr.bf16.mxu0 %v2078_v50  ;;  %v2325_v50 = vsel %vm2293_vm15, %v2277_v1, %v2309_v51  ;;  %v2625_v1 = vsub.s32 6, %v7540_v41  ;;  %v4636_v51 = vld [vmem:[%s7216_s2] sm:$0xff] }
 0x49f   : > { %v2062_v40 = vpop.permute.xlu1 %2061  ;;  %v6297_v24 = vadd.f32 %v2325_v50, %v4913_v13  ;;  %v4637_v50 = vld [vmem:[%s7216_s2 + $0x8] sm:$0xff] }
 0x4a0   : > { %3964 = vmatpush3.bf16.msra.mxu0 %v2062_v40  ;;  %v2324_v40 = vsel %vm2292_vm14, %v2276_v31, %v2308_v33  ;;  %v2360_v31 = vmax.f32 %v6300_v26, %v6303_v36 }
 0x4a1   : > { %v6294_v28 = vadd.f32 %v2324_v40, %v4911_v9  ;;  %v6329_v40 = vrot.slane %v4636_v51, %v2625_v1 }
 0x4a3   : > { %v2363_v49 = vmax.f32 %v6294_v28, %v6297_v24 }
 0x4b3   : > { %2361 = vmax.xlane.f32.xlu0 %v2360_v31  ;;  %v6334_v31 = vrot.slane %v4637_v50, %v2625_v1 }
 0x4b5   : > { %2364 = vmax.xlane.f32.xlu1 %v2363_v49 }
 0x4c6   : > { %2434 = vrot.lane.b32.xlu1 %v4632_v16, %s4664_s17 }
 0x4c9   : > { %2450 = vrot.lane.b32.xlu0 %v4633_v17, %s4664_s17 }
 0x4ca   : > { %2067 = vrot.lane.b32.xlu1 %v4634_v22, %s4663_s15 }
 0x4cd   : > { %2083 = vrot.lane.b32.xlu0 %v4635_v54, %s4663_s15  ;;  %s4674_s15 = smov 56  }
 0x4ce   : > { %2436 = vrot.lane.b32.xlu1 %v4634_v22, %s4664_s17  ;;  %v6322_v10 = vpop.xlane.xlu0 %2355  ;;  %v2631_v22 = vadd.f32 %v6329_v40, %v6030_v19 }
 0x4d0   : > { %v6320_v49 = vpop.xlane.xlu1 %2358  ;;  %vm2647_vm2 = vcmp.gt.f32.partialorder %v2631_v22, 0.0 }
 0x4d1   : > { %2452 = vrot.lane.b32.xlu0 %v4635_v54, %s4664_s17  ;;  %v2633_v54 = vadd.f32 %v6329_v40, %v6067_v2 }
 0x4d2   : > { %v2447_v7 = vpop.permute.xlu0 %2446 }
 0x4d3   : > { %4003 = vmatprep.subr.bf16.mxu1 %v2447_v7  ;;  %v2632_v7 = vadd.f32 %v6334_v31, %v6030_v19  ;;  %vm2649_vm0 = vcmp.gt.f32.partialorder %v2633_v54, 0.0 }
 0x4d4   : > { %v2431_v16 = vpop.permute.xlu1 %2430 }
 0x4d5   : > { %4004 = vmatpush3.bf16.msra.mxu1 %v2431_v16  ;;  %v2634_v16 = vadd.f32 %v6334_v31, %v6067_v2  ;;  %v2664_v9 = vmul.f32 0.2, %v2632_v7  ;;  %vm2648_vm3 = vcmp.gt.f32.partialorder %v2632_v7, 0.0 }
 0x4d6   : > { %v2080_v17 = vpop.permute.xlu0 %2079 }
 0x4d7   : > { %3965 = vmatprep.subr.bf16.mxu0 %v2080_v17  ;;  %v2665_v17 = vmul.f32 0.2, %v2633_v54  ;;  %v2666_v13 = vmul.f32 0.2, %v2634_v16  ;;  %vm2650_vm1 = vcmp.gt.f32.partialorder %v2634_v16, 0.0  ;;  %v2680_v63 = vsel %vm2648_vm3, %v2632_v7, %v2664_v9 }
 0x4d8   : > { %v2064_v60 = vpop.permute.xlu1 %2063  ;;  %v6354_v0 = vadd.f32 %v2680_v63, %v7548_v12  ;;  %v2994_v63 = vsub.s32 7, %v7540_v41 }
 0x4d9   : > { %3966 = vmatpush3.bf16.msra.mxu0 %v2064_v60  ;;  %v2663_v60 = vmul.f32 0.2, %v2631_v22  ;;  %v2681_v1 = vsel %vm2649_vm0, %v2633_v54, %v2665_v17 }
 0x4da   : > { %v2449_v33 = vpop.permute.xlu0 %2448  ;;  %v6345_v62 = vadd.f32 %v2681_v1, %v7543_v18  ;;  %v6369_v7 = vrot.slane %v4636_v51, %v2994_v63 }
 0x4db   : > { %4005 = vmatprep.subr.bf16.mxu1 %v2449_v33  ;;  %v2679_v33 = vsel %vm2647_vm2, %v2631_v22, %v2663_v60  ;;  %v6371_v60 = vrot.slane %v4637_v50, %v2994_v63 }
 0x4dc   : > { %v2433_v25 = vpop.permute.xlu1 %2432  ;;  %7598 = vst [vmem:[#allocation75_spill] sm:$0xff] %v6345_v62  ;;  %v6351_v19 = vadd.f32 %v2679_v33, %v7547_v38  ;;  %v3000_v17 = vadd.f32 %v6369_v7, %v6078_v5 }
 0x4dd   : > { %4006 = vmatpush3.bf16.msra.mxu1 %v2433_v25  ;;  %v2682_v25 = vsel %vm2650_vm1, %v2634_v16, %v2666_v13  ;;  %v3001_v1 = vadd.f32 %v6371_v60, %v6078_v5  ;;  %v3003_v41 = vadd.f32 %v6371_v60, %v6053_v11 }
 0x4de   : > { %v6348_v2 = vadd.f32 %v2682_v25, %v7544_v8  ;;  %7599 = vst [vmem:[#allocation76_spill] sm:$0xff] %v6351_v19  ;;  %v2711_v13 = vmax.f32 %v6351_v19, %v6354_v0  ;;  %v3032_v33 = vmul.f32 0.2, %v3000_v17  ;;  %vm3016_vm4 = vcmp.gt.f32.partialorder %v3000_v17, 0.0 }
 0x4df   : > { %v3033_v51 = vmul.f32 0.2, %v3001_v1  ;;  %vm3017_vm5 = vcmp.gt.f32.partialorder %v3001_v1, 0.0  ;;  %vm3019_vm7 = vcmp.gt.f32.partialorder %v3003_v41, 0.0 }
 0x4e0   : > { %v2714_v57 = vmax.f32 %v6345_v62, %v6348_v2  ;;  %v3048_v50 = vsel %vm3016_vm4, %v3000_v17, %v3032_v33 }
 0x4e1   : > { %v3049_v63 = vsel %vm3017_vm5, %v3001_v1, %v3033_v51  ;;  %v6382_v19 = vadd.f32 %v3048_v50, %v7547_v38  ;;  %v1999_v38 = vsub.f32 %v5881_v46, %v6001_v30  ;;  %v7602_v1 = vld [vmem:[#allocation3_spill] sm:$0xff]  ;;  %v7604_v46 = vld [vmem:[#allocation38_spill] sm:$0xff] }
 0x4e2   : > { %v6385_v5 = vadd.f32 %v3049_v63, %v7548_v12  ;;  %v1997_v12 = vsub.f32 %v5912_v4, %v6007_v14  ;;  %v2366_v30 = vsub.f32 %v7604_v46, %v6221_v48  ;;  %v2373_v4 = vsub.f32 %v6137_v32, %v6273_v20  ;;  %v7605_v14 = vld [vmem:[#allocation45_spill] sm:$0xff] }
 0x4e3   : > { %v7607_v48 = vld [vmem:[#allocation5_spill] sm:$0xff] }
 0x4e4   : > { %v3080_v3 = vmax.f32 %v6382_v19, %v6385_v5  ;;  %v2013_v51 = vmul.f32 1.442695, %v1997_v12  ;;  %v2382_v32 = vmul.f32 1.442695, %v2366_v30  ;;  %v2377_v30 = vsub.f32 %v6207_v53, %v6320_v49 }
 0x4e6   : > { %v2404_v53 = vmul.f32 1.442695, %v2377_v30 }
 0x4f0   : > { %2712 = vmax.xlane.f32.xlu0 %v2711_v13  ;;  %v3035_v13 = vmul.f32 0.2, %v3003_v41 }
 0x4f2   : > { %2715 = vmax.xlane.f32.xlu1 %v2714_v57  ;;  %v3002_v57 = vadd.f32 %v6369_v7, %v6053_v11 }
 0x4f4   : > { %v3034_v25 = vmul.f32 0.2, %v3002_v57  ;;  %vm3018_vm6 = vcmp.gt.f32.partialorder %v3002_v57, 0.0 }
 0x503   : > { %2791 = vrot.lane.b32.xlu1 %v5995_v27, %s4665_s6 }
 0x506   : > { %2807 = vrot.lane.b32.xlu0 %v5988_v34, %s4665_s6 }
 0x50b   : > { %v6366_v22 = vpop.xlane.xlu0 %1992 }
 0x50d   : > { %v6364_v9 = vpop.xlane.xlu1 %1995 }
 0x50f   : > { %v2082_v16 = vpop.permute.xlu0 %2081 }
 0x510   : > { %3967 = vmatprep.subr.bf16.mxu0 %v2082_v16  ;;  %v3051_v16 = vsel %vm3019_vm7, %v3003_v41, %v3035_v13 }
 0x511   : > { %v2066_v54 = vpop.permute.xlu1 %2065  ;;  %v6391_v62 = vadd.f32 %v3051_v16, %v7544_v8  ;;  %v7601_v8 = vld [vmem:[#allocation32_spill] sm:$0xff] }
 0x512   : > { %3968 = vmatpush3.bf16.msra.mxu0 %v2066_v54  ;;  %v3050_v54 = vsel %vm3018_vm6, %v3002_v57, %v3034_v25  ;;  %v2004_v41 = vsub.f32 %v7602_v1, %v7601_v8  ;;  %v2017_v25 = vmul.f32 1.442695, %v1999_v38  ;;  %v2003_v16 = vsub.f32 %v7607_v48, %v7601_v8  ;;  %v7609_v38 = vld [vmem:[#allocation13_spill] sm:$0xff] }
 0x513   : > { %v6388_v11 = vadd.f32 %v3050_v54, %v7543_v18  ;;  %v7600_v18 = vld [vmem:[#allocation11_spill] sm:$0xff]  ;;  %v2372_v8 = vsub.f32 %v6134_v35, %v6273_v20 }
 0x514   : > { %v2002_v57 = vsub.f32 %v7600_v18, %v6011_v42  ;;  %v2027_v50 = vmul.f32 1.442695, %v2004_v41  ;;  %4322 = vpow2.f32 %v2017_v25  ;;  %v2396_v18 = vmul.f32 1.442695, %v2373_v4 }
 0x515   : > { %v3083_v17 = vmax.f32 %v6388_v11, %v6391_v62  ;;  %4324 = vpow2.f32 %v2013_v51  ;;  %v2370_v51 = vsub.f32 %v6140_v29, %v6275_v61  ;;  %v2375_v4 = vsub.f32 %v6213_v37, %v6322_v10  ;;  %v7613_v29 = vld [vmem:[#allocation2_spill] sm:$0xff] }
 0x516   : > { %v2023_v13 = vmul.f32 1.442695, %v2002_v57  ;;  %v2394_v35 = vmul.f32 1.442695, %v2372_v8 }
 0x518   : > { %4326 = vpow2.f32 %v2023_v13 }
 0x519   : > { %4328 = vpow2.f32 %v2027_v50  ;;  %v2390_v50 = vmul.f32 1.442695, %v2370_v51 }
 0x525   : > { %3081 = vmax.xlane.f32.xlu0 %v3080_v3  ;;  %v7603_v3 = vld [vmem:[#allocation36_spill] sm:$0xff] }
 0x526   : > { %v2368_v33 = vsub.f32 %v7603_v3, %v6219_v15  ;;  %v7606_v15 = vld [vmem:[#allocation10_spill] sm:$0xff] }
 0x527   : > { %3084 = vmax.xlane.f32.xlu1 %v3083_v17  ;;  %v2001_v63 = vsub.f32 %v7606_v15, %v6011_v42  ;;  %v7608_v17 = vld [vmem:[#allocation37_spill] sm:$0xff]  ;;  %v7612_v42 = vld [vmem:[#allocation19_spill] sm:$0xff]  ;;  %v2012_v15 = vsub.f32 %v6261_v39, %v6364_v9  ;;  %v2376_v39 = vsub.f32 %v6204_v23, %v6320_v49 }
 0x528   : > { %v2386_v54 = vmul.f32 1.442695, %v2368_v33  ;;  %v2006_v12 = vsub.f32 %v7609_v38, %v7608_v17  ;;  %v2025_v33 = vmul.f32 1.442695, %v2003_v16  ;;  %v7614_v16 = vld [vmem:[#allocation12_spill] sm:$0xff] }
 0x529   : > { %v2021_v41 = vmul.f32 1.442695, %v2001_v63  ;;  %v2400_v63 = vmul.f32 1.442695, %v2375_v4  ;;  %v7615_v4 = vld [vmem:[#allocation20_spill] sm:$0xff] }
 0x52a   : > { %4330 = vpow2.f32 %v2386_v54  ;;  %v2031_v46 = vmul.f32 1.442695, %v2006_v12  ;;  %v2010_v54 = vsub.f32 %v6267_v59, %v6366_v22  ;;  %v2043_v59 = vmul.f32 1.442695, %v2012_v15 }
 0x52b   : > { %4332 = vpow2.f32 %v2382_v32  ;;  %v2005_v32 = vsub.f32 %v7614_v16, %v7608_v17 }
 0x52c   : > { %4334 = vpow2.f32 %v2396_v18  ;;  %v2039_v17 = vmul.f32 1.442695, %v2010_v54 }
 0x538   : > { %3160 = vrot.lane.b32.xlu1 %v5995_v27, %s4666_s7  ;;  %v2371_v27 = vsub.f32 %v6143_v58, %v6275_v61  ;;  %v7611_v58 = vld [vmem:[#allocation4_spill] sm:$0xff] }
 0x53a   : > { %v2392_v1 = vmul.f32 1.442695, %v2371_v27  ;;  %v4323_v27 = vpop.eup %4322 }
 0x53b   : > { %3176 = vrot.lane.b32.xlu0 %v5988_v34, %s4666_s7  ;;  %v7610_v34 = vld [vmem:[#allocation34_spill] sm:$0xff]  ;;  %v4325_v37 = vpop.eup %4324 }
 0x53c   : > { %2793 = vrot.lane.b32.xlu1 %v7605_v14, %s4665_s6  ;;  %v2008_v57 = vsub.f32 %v7611_v58, %v7610_v34  ;;  %4336 = vpow2.f32 %v2392_v1  ;;  %v2007_v61 = vsub.f32 %v7613_v29, %v7610_v34  ;;  %v4327_v48 = vpop.eup %4326 }
 0x53d   : > { %4338 = vpow2.f32 %v2021_v41  ;;  %v4329_v18 = vpop.eup %4328  ;;  %v2045_v41 = vpack.c.bf16 %v4323_v27, %v4325_v37 }
 0x53e   : > { %v2035_v13 = vmul.f32 1.442695, %v2008_v57  ;;  %4340 = vpow2.f32 %v2025_v33  ;;  %v2033_v34 = vmul.f32 1.442695, %v2007_v61  ;;  %v4331_v58 = vpop.eup %4330  ;;  %v2374_v57 = vsub.f32 %v6210_v21, %v6322_v10  ;;  %v7616_v61 = vld [vmem:[#allocation17_spill] sm:$0xff] }
 0x53f   : > { %2809 = vrot.lane.b32.xlu0 %v7612_v42, %s4665_s6  ;;  %4342 = vpow2.f32 %v2031_v46  ;;  %v4333_v1 = vpop.eup %4332  ;;  %v2029_v33 = vmul.f32 1.442695, %v2005_v32  ;;  %v2048_v46 = vpack.c.bf16 %v4329_v18, %v4327_v48  ;;  %v2402_v21 = vmul.f32 1.442695, %v2376_v39 }
 0x540   : > { %3162 = vrot.lane.b32.xlu1 %v7605_v14, %s4666_s7  ;;  %v6435_v3 = vpop.xlane.xlu0 %2361  ;;  %4344 = vpow2.f32 %v2035_v13  ;;  %v4335_v8 = vpop.eup %4334  ;;  %v2011_v10 = vsub.f32 %v6258_v6, %v6364_v9  ;;  %v2414_v6 = vpack.c.bf16 %v4331_v58, %v4333_v1 }
 0x541   : > { %4346 = vpow2.f32 %v2394_v35  ;;  %v2379_v23 = vsub.f32 %v6303_v36, %v6435_v3  ;;  %v2398_v35 = vmul.f32 1.442695, %v2374_v57  ;;  %v2009_v36 = vsub.f32 %v6264_v47, %v6366_v22 }
 0x542   : > { %v6433_v25 = vpop.xlane.xlu1 %2364  ;;  %4348 = vpow2.f32 %v2390_v50  ;;  %v2637_v50 = vadd.f32 %v6329_v40, %v7616_v61  ;;  %v2638_v47 = vadd.f32 %v6334_v31, %v7616_v61  ;;  %v2041_v22 = vmul.f32 1.442695, %v2011_v10 }
 0x543   : > { %3178 = vrot.lane.b32.xlu0 %v7612_v42, %s4666_s7  ;;  %4350 = vpow2.f32 %v2404_v53  ;;  %v2381_v42 = vsub.f32 %v6297_v24, %v6433_v25  ;;  %v2635_v24 = vadd.f32 %v6329_v40, %v7615_v4  ;;  %v2408_v27 = vmul.f32 1.442695, %v2379_v23 }
 0x544   : > { %v2451_v14 = vpop.permute.xlu0 %2450  ;;  %4352 = vpow2.f32 %v2400_v63  ;;  %v2380_v37 = vsub.f32 %v6294_v28, %v6433_v25  ;;  %v2037_v54 = vmul.f32 1.442695, %v2009_v36  ;;  %v2378_v48 = vsub.f32 %v6300_v26, %v6435_v3 }
 0x545   : > { %4007 = vmatprep.subr.bf16.mxu1 %v2451_v14  ;;  %4354 = vpow2.f32 %v2033_v34  ;;  %v2636_v14 = vadd.f32 %v6334_v31, %v7615_v4  ;;  %v2412_v29 = vmul.f32 1.442695, %v2381_v42  ;;  %vm2651_vm8 = vcmp.gt.f32.partialorder %v2635_v24, 0.0 }
 0x546   : > { %v2435_v20 = vpop.permute.xlu1 %2434  ;;  %v4337_v30 = vpop.eup %4336  ;;  %4356 = vpow2.f32 %v2043_v59  ;;  %v2669_v28 = vmul.f32 0.2, %v2637_v50  ;;  %v2670_v25 = vmul.f32 0.2, %v2638_v47  ;;  %v2410_v58 = vmul.f32 1.442695, %v2380_v37 }
 0x547   : > { %4008 = vmatpush3.bf16.msra.mxu1 %v2435_v20  ;;  %v4339_v13 = vpop.eup %4338  ;;  %4358 = vpow2.f32 %v2039_v17  ;;  %v2417_v53 = vpack.c.bf16 %v4335_v8, %v4337_v30  ;;  %vm2652_vm9 = vcmp.gt.f32.partialorder %v2636_v14, 0.0  ;;  %v2668_v18 = vmul.f32 0.2, %v2636_v14 }
 0x548   : > { %v2084_v12 = vpop.permute.xlu0 %2083  ;;  %v4341_v20 = vpop.eup %4340  ;;  %4360 = vpow2.f32 %v2029_v33  ;;  %vm2653_vm10 = vcmp.gt.f32.partialorder %v2637_v50, 0.0  ;;  %vm2654_vm11 = vcmp.gt.f32.partialorder %v2638_v47, 0.0  ;;  %v2406_v26 = vmul.f32 1.442695, %v2378_v48 }
 0x549   : > { %3969 = vmatprep.subr.bf16.mxu0 %v2084_v12  ;;  %v4343_v9 = vpop.eup %4342  ;;  %4362 = vpow2.f32 %v2402_v21  ;;  %v2047_v32 = vpack.c.bf16 %v4341_v20, %v4339_v13  ;;  %v2667_v12 = vmul.f32 0.2, %v2635_v24  ;;  %v2685_v8 = vsel %vm2653_vm10, %v2637_v50, %v2669_v28 }
 0x54a   : > { %v2068_v38 = vpop.permute.xlu1 %2067  ;;  %v4345_v15 = vpop.eup %4344  ;;  %4364 = vpow2.f32 %v2398_v35  ;;  %v2686_v33 = vsel %vm2654_vm11, %v2638_v47, %v2670_v25  ;;  %v6486_v13 = vadd.f32 %v2685_v8, %v4895_v55 }
 0x54b   : > { %3970 = vmatpush3.bf16.msra.mxu0 %v2068_v38  ;;  %v4347_v63 = vpop.eup %4346  ;;  %4366 = vpow2.f32 %v2412_v29  ;;  %v2050_v34 = vpack.c.bf16 %v4345_v15, %v4343_v9  ;;  %v2683_v17 = vsel %vm2651_vm8, %v2635_v24, %v2667_v12  ;;  %v6489_v4 = vadd.f32 %v2686_v33, %v4897_v56  ;;  %v7618_v12 = vld [vmem:[#allocation18_spill] sm:$0xff] }
 0x54c   : > { %v2453_v51 = vpop.permute.xlu0 %2452  ;;  %v4349_v16 = vpop.eup %4348  ;;  %4368 = vpow2.f32 %v2408_v27 }
 0x54d   : > { %4009 = vmatprep.subr.bf16.mxu1 %v2453_v51  ;;  %v4351_v38 = vpop.eup %4350  ;;  %4370 = vpow2.f32 %v2041_v22  ;;  %v2416_v57 = vpack.c.bf16 %v4347_v63, %v4349_v16 }
 0x54e   : > { %v2437_v49 = vpop.permute.xlu1 %2436  ;;  %2134 = vmatmul.mubr.bf16.vlgmr.msra.gmra.mrb[32].mxu0 %v2045_v41  ;;  %v4353_v39 = vpop.eup %4352  ;;  %4372 = vpow2.f32 %v2037_v54  ;;  %v2684_v41 = vsel %vm2652_vm9, %v2636_v14, %v2668_v18  ;;  %v3006_v18 = vadd.f32 %v6369_v7, %v7618_v12 }
 0x54f   : > { %2141 = vmatprep.mubr.bf16.mxu0 %v2048_v46  ;;  %4010 = vmatpush3.bf16.msra.mxu1 %v2437_v49  ;;  %v4355_v3 = vpop.eup %4354  ;;  %v2419_v1 = vpack.c.bf16 %v4351_v38, %v4353_v39  ;;  %4374 = vpow2.f32 %v2410_v58  ;;  %v6480_v46 = vadd.f32 %v2683_v17, %v4879_v44  ;;  %v6483_v10 = vadd.f32 %v2684_v41, %v4881_v45 }
 0x550   : > { %v4357_v59 = vpop.eup %4356  ;;  %4376 = vpow2.f32 %v2406_v26  ;;  %v3038_v39 = vmul.f32 0.2, %v3006_v18  ;;  %vm3022_vm12 = vcmp.gt.f32.partialorder %v3006_v18, 0.0 }
 0x551   : > { %v4359_v42 = vpop.eup %4358  ;;  %v2717_v29 = vmax.f32 %v6480_v46, %v6483_v10 }
 0x552   : > { %2503 = vmatmul.mubr.bf16.vlgmr.msra.gmra.mrb[32].mxu1 %v2414_v6  ;;  %v4361_v23 = vpop.eup %4360  ;;  %v2052_v21 = vpack.c.bf16 %v4357_v59, %v4359_v42  ;;  %v2720_v6 = vmax.f32 %v6486_v13, %v6489_v4  ;;  %v3054_v26 = vsel %vm3022_vm12, %v3006_v18, %v3038_v39 }
 0x553   : > { %2510 = vmatprep.mubr.bf16.mxu1 %v2417_v53  ;;  %v4363_v49 = vpop.eup %4362  ;;  %v2049_v51 = vpack.c.bf16 %v4355_v3, %v4361_v23  ;;  %v6516_v42 = vadd.f32 %v3054_v26, %v4895_v55  ;;  %v7619_v55 = vld [vmem:[#allocation69_spill] sm:$0xff] }
 0x554   : > { %v4365_v30 = vpop.eup %4364 }
 0x555   : > { %v4367_v24 = vpop.eup %4366  ;;  %v2418_v20 = vpack.c.bf16 %v4363_v49, %v4365_v30 }
 0x556   : > { %2142 = vmatmul.mubr.bf16.gmra.mrb[36].mxu0 %v2047_v32  ;;  %v4369_v35 = vpop.eup %4368  ;;  %v7617_v32 = vld [vmem:[#allocation47_spill] sm:$0xff] }
 0x557   : > { %2149 = vmatprep.mubr.bf16.mxu0 %v2050_v34  ;;  %v4371_v36 = vpop.eup %4370  ;;  %v2421_v9 = vpack.c.bf16 %v4367_v24, %v4369_v35  ;;  %v3004_v38 = vadd.f32 %v6369_v7, %v7617_v32 }
 0x558   : > { %v4373_v14 = vpop.eup %4372 }
 0x559   : > { %v4375_v61 = vpop.eup %4374  ;;  %v2051_v50 = vpack.c.bf16 %v4371_v36, %v4373_v14  ;;  %v3036_v34 = vmul.f32 0.2, %v3004_v38  ;;  %vm3020_vm14 = vcmp.gt.f32.partialorder %v3004_v38, 0.0  ;;  %v7621_v14 = vld [vmem:[#allocation46_spill] sm:$0xff] }
 0x55a   : > { %2511 = vmatmul.mubr.bf16.gmra.mrb[36].mxu1 %v2416_v57  ;;  %v4377_v27 = vpop.eup %4376 }
 0x55b   : > { %2518 = vmatprep.mubr.bf16.mxu1 %v2419_v1  ;;  %v2420_v53 = vpack.c.bf16 %v4375_v61, %v4377_v27  ;;  %v3052_v57 = vsel %vm3020_vm14, %v3004_v38, %v3036_v34  ;;  %v7625_v34 = vld [vmem:[#allocation21_spill] sm:$0xff] }
 0x55c   : > { %v6522_v8 = vadd.f32 %v3052_v57, %v4879_v44  ;;  %v7620_v44 = vld [vmem:[#allocation70_spill] sm:$0xff]  ;;  %v7629_v57 = vld [vmem:[#allocation72_spill] sm:$0xff] }
 0x55e   : > { %2150 = vmatmul.mubr.bf16.gmra.mrb[40].mxu0 %v2049_v51 }
 0x55f   : > { %2157 = vmatprep.mubr.bf16.mxu0 %v2052_v21 }
 0x562   : > { %2519 = vmatmul.mubr.bf16.gmra.mrb[40].mxu1 %v2418_v20  ;;  %2718 = vmax.xlane.f32.xlu0 %v2717_v29  ;;  %v2639_v29 = vadd.f32 %v6329_v40, %v7621_v14 }
 0x563   : > { %2526 = vmatprep.mubr.bf16.mxu1 %v2421_v9  ;;  %v7622_v9 = vld [vmem:[#allocation56_spill] sm:$0xff] }
 0x564   : > { %2721 = vmax.xlane.f32.xlu1 %v2720_v6  ;;  %v2640_v6 = vadd.f32 %v6334_v31, %v7621_v14  ;;  %v2641_v61 = vadd.f32 %v6329_v40, %v7622_v9  ;;  %vm2655_vm0 = vcmp.gt.f32.partialorder %v2639_v29, 0.0 }
 0x566   : > { %2158 = vmatmul.mubr.bf16.gmra.mrb[44].mxu0 %v2051_v50  ;;  %v2642_v50 = vadd.f32 %v6334_v31, %v7622_v9  ;;  %vm2656_vm1 = vcmp.gt.f32.partialorder %v2640_v6, 0.0  ;;  %vm2657_vm2 = vcmp.gt.f32.partialorder %v2641_v61, 0.0 }
 0x568   : > { %vm2658_vm3 = vcmp.gt.f32.partialorder %v2642_v50, 0.0 }
 0x56a   : > { %2527 = vmatmul.mubr.bf16.gmra.mrb[44].mxu1 %v2420_v53 }
 0x575   : > { %2795 = vrot.lane.b32.xlu1 %v6096_v52, %s4665_s6 }
 0x578   : > { %2811 = vrot.lane.b32.xlu0 %v6107_v43, %s4665_s6 }
 0x57d   : > { %v6501_v47 = vpop.xlane.xlu0 %2712 }
 0x57e   : > { %v2736_v37 = vsub.f32 %v6354_v0, %v6501_v47  ;;  %v3005_v0 = vadd.f32 %v6371_v60, %v7617_v32 }
 0x57f   : > { %v6499_v15 = vpop.xlane.xlu1 %2715 }
 0x580   : > { %v2738_v22 = vsub.f32 %v6348_v2, %v6499_v15  ;;  %v2753_v54 = vmul.f32 1.442695, %v2736_v37  ;;  %v3007_v2 = vadd.f32 %v6371_v60, %v7618_v12  ;;  %v3037_v25 = vmul.f32 0.2, %v3005_v0  ;;  %v7623_v12 = vld [vmem:[#allocation23_spill] sm:$0xff] }
 0x581   : > { %v2808_v16 = vpop.permute.xlu0 %2807  ;;  %vm3021_vm15 = vcmp.gt.f32.partialorder %v3005_v0, 0.0  ;;  %v2672_v37 = vmul.f32 0.2, %v2640_v6 }
 0x582   : > { %v2757_v63 = vmul.f32 1.442695, %v2738_v22  ;;  %4035 = vmatprep.subr.bf16.mxu0 %v2808_v16  ;;  %v3039_v28 = vmul.f32 0.2, %v3007_v2  ;;  %vm3023_vm13 = vcmp.gt.f32.partialorder %v3007_v2, 0.0  ;;  %v3053_v59 = vsel %vm3021_vm15, %v3005_v0, %v3037_v25 }
 0x583   : > { %v2792_v48 = vpop.permute.xlu1 %2791  ;;  %v6525_v33 = vadd.f32 %v3053_v59, %v4881_v45  ;;  %v2671_v22 = vmul.f32 0.2, %v2639_v29  ;;  %v2688_v38 = vsel %vm2656_vm1, %v2640_v6, %v2672_v37  ;;  %v4639_v37 = vld [vmem:[%s7215_s1 + $0x60] sm:$0xff]   ;;  %vm3562_vm1 = vcmask 130048  }
 0x584   : > { %4378 = vpow2.f32 %v2757_v63  ;;  %4036 = vmatpush3.bf16.msra.mxu0 %v2792_v48  ;;  %v3055_v3 = vsel %vm3023_vm13, %v3007_v2, %v3039_v28  ;;  %v2673_v63 = vmul.f32 0.2, %v2641_v61  ;;  %v7624_v2 = vld [vmem:[#allocation26_spill] sm:$0xff] }
 0x585   : > { %4380 = vpow2.f32 %v2753_v54  ;;  %v6519_v41 = vadd.f32 %v3055_v3, %v4897_v56  ;;  %v3086_v49 = vmax.f32 %v6522_v8, %v6525_v33  ;;  %v2674_v54 = vmul.f32 0.2, %v2642_v50  ;;  %v7627_v28 = vld [vmem:[#allocation22_spill] sm:$0xff]  ;;  %v7628_v3 = vld [vmem:[#allocation71_spill] sm:$0xff] }
 0x586   : > { %v2689_v48 = vsel %vm2657_vm2, %v2641_v61, %v2673_v63  ;;  %v2687_v32 = vsel %vm2655_vm0, %v2639_v29, %v2671_v22  ;;  %v6569_v25 = vadd.f32 %v2688_v38, %v7627_v28  ;;  %v7634_v22 = vld [vmem:[#allocation73_spill] sm:$0xff]  ;;  %vm3553_vm0 = vcmask 64512  }
 0x587   : > { %v3089_v23 = vmax.f32 %v6516_v42, %v6519_v41  ;;  %v2690_v16 = vsel %vm2658_vm3, %v2642_v50, %v2674_v54  ;;  %v6560_v18 = vadd.f32 %v2689_v48, %v7623_v12  ;;  %v6566_v39 = vadd.f32 %v2687_v32, %v7625_v34  ;;  %v7636_v32 = vld [vmem:[#allocation74_spill] sm:$0xff] }
 0x588   : > { %v6563_v0 = vadd.f32 %v2690_v16, %v7624_v2  ;;  %vm3571_vm2 = vcmask 195584   ;;  %vm3580_vm3 = vcmask 261120  }
 0x589   : > { %7626 = vst [vmem:[#allocation11_spill] sm:$0xff] %v6566_v39  ;;  %v2723_v26 = vmax.f32 %v6566_v39, %v6569_v25 }
 0x58e   : > { %v4379_v58 = vpop.eup %4378 }
 0x58f   : > { %v4381_v1 = vpop.eup %4380 }
 0x590   : > { %v2784_v17 = vpack.c.bf16 %v4379_v58, %v4381_v1  ;;  %v2726_v58 = vmax.f32 %v6560_v18, %v6563_v0 }
 0x592   : > { %2871 = vmatprep.mubr.bf16.mxu0 %v2784_v17 }
 0x597   : > { %3087 = vmax.xlane.f32.xlu0 %v3086_v49  ;;  %v7630_v49 = vld [vmem:[#allocation14_spill] sm:$0xff] }
 0x599   : > { %3090 = vmax.xlane.f32.xlu1 %v3089_v23 }
 0x5aa   : > { %3164 = vrot.lane.b32.xlu1 %v6096_v52, %s4666_s7 }
 0x5ad   : > { %3180 = vrot.lane.b32.xlu0 %v6107_v43, %s4666_s7 }
 0x5ae   : > { %2797 = vrot.lane.b32.xlu1 %v7619_v55, %s4665_s6 }
 0x5b1   : > { %2813 = vrot.lane.b32.xlu0 %v7620_v44, %s4665_s6 }
 0x5b2   : > { %3166 = vrot.lane.b32.xlu1 %v7619_v55, %s4666_s7  ;;  %v6543_v56 = vpop.xlane.xlu0 %3081  ;;  %v3010_v55 = vadd.f32 %v6369_v7, %v7630_v49 }
 0x5b3   : > { %v3105_v52 = vsub.f32 %v6385_v5, %v6543_v56 }
 0x5b4   : > { %v6541_v45 = vpop.xlane.xlu1 %3084  ;;  %vm3026_vm6 = vcmp.gt.f32.partialorder %v3010_v55, 0.0 }
 0x5b5   : > { %v3107_v51 = vsub.f32 %v6391_v62, %v6541_v45  ;;  %3182 = vrot.lane.b32.xlu0 %v7620_v44, %s4666_s7  ;;  %v3122_v43 = vmul.f32 1.442695, %v3105_v52  ;;  %v7631_v44 = vld [vmem:[#allocation57_spill] sm:$0xff] }
 0x5b6   : > { %v3177_v24 = vpop.permute.xlu0 %3176  ;;  %v3009_v52 = vadd.f32 %v6371_v60, %v7631_v44 }
 0x5b7   : > { %v3126_v30 = vmul.f32 1.442695, %v3107_v51  ;;  %4075 = vmatprep.subr.bf16.mxu1 %v3177_v24  ;;  %v3008_v51 = vadd.f32 %v6369_v7, %v7631_v44 }
 0x5b8   : > { %v3161_v21 = vpop.permute.xlu1 %3160  ;;  %v3041_v24 = vmul.f32 0.2, %v3009_v52  ;;  %vm3025_vm5 = vcmp.gt.f32.partialorder %v3009_v52, 0.0 }
 0x5b9   : > { %4382 = vpow2.f32 %v3126_v30  ;;  %4076 = vmatpush3.bf16.msra.mxu1 %v3161_v21  ;;  %v3011_v30 = vadd.f32 %v6371_v60, %v7630_v49  ;;  %v3040_v21 = vmul.f32 0.2, %v3008_v51  ;;  %vm3024_vm4 = vcmp.gt.f32.partialorder %v3008_v51, 0.0 }
 0x5ba   : > { %4384 = vpow2.f32 %v3122_v43  ;;  %v2810_v36 = vpop.permute.xlu0 %2809  ;;  %v3042_v43 = vmul.f32 0.2, %v3010_v55 }
 0x5bb   : > { %4037 = vmatprep.subr.bf16.mxu0 %v2810_v36  ;;  %v4667_v36 = vmov 8   ;;  %vm3027_vm7 = vcmp.gt.f32.partialorder %v3011_v30, 0.0 }
 0x5bc   : > { %v2794_v35 = vpop.permute.xlu1 %2793  ;;  %4169 = vset.pattern.permute.xlu1 %v4667_v36  ;;  %4168 = vset.pattern.permute.xlu0 %v4667_v36 }
 0x5bd   : > { %4038 = vmatpush3.bf16.msra.mxu0 %v2794_v35  ;;  %v3043_v35 = vmul.f32 0.2, %v3011_v30 }
 0x5be   : > { %v3179_v62 = vpop.permute.xlu0 %3178 }
 0x5bf   : > { %4077 = vmatprep.subr.bf16.mxu1 %v3179_v62  ;;  %v3057_v62 = vsel %vm3025_vm5, %v3009_v52, %v3041_v24  ;;  %v3059_v14 = vsel %vm3027_vm7, %v3011_v30, %v3043_v35  ;;  %vm3598_vm5 = vcmask 392192   ;;  %vm3678_vm7 = vcmask 523264  }
 0x5c0   : > { %v3163_v20 = vpop.permute.xlu1 %3162  ;;  %v6595_v6 = vadd.f32 %v3057_v62, %v7627_v28  ;;  %v6601_v61 = vadd.f32 %v3059_v14, %v7624_v2 }
 0x5c1   : > { %4078 = vmatpush3.bf16.msra.mxu1 %v3163_v20  ;;  %v3056_v20 = vsel %vm3024_vm4, %v3008_v51, %v3040_v21  ;;  %vm3589_vm4 = vcmask 326656  }
 0x5c2   : > { %v6592_v29 = vadd.f32 %v3056_v20, %v7625_v34 }
 0x5c3   : > { %v4383_v5 = vpop.eup %4382 }
 0x5c4   : > { %v4385_v27 = vpop.eup %4384  ;;  %7632 = vst [vmem:[#allocation32_spill] sm:$0xff] %v6592_v29  ;;  %v3092_v50 = vmax.f32 %v6592_v29, %v6595_v6 }
 0x5c5   : > { %v3153_v53 = vpack.c.bf16 %v4383_v5, %v4385_v27  ;;  %v3058_v5 = vsel %vm3026_vm6, %v3010_v55, %v3042_v43  ;;  %vm3607_vm6 = vcmask 457728  }
 0x5c6   : > { %v6598_v9 = vadd.f32 %v3058_v5, %v7623_v12 }
 0x5c7   : > { %3240 = vmatprep.mubr.bf16.mxu1 %v3153_v53  ;;  %v4638_v53 = vld [vmem:[%s7215_s1 + $0x20] sm:$0xff]  }
 0x5c8   : > { %7633 = vst [vmem:[#allocation3_spill] sm:$0xff] %v6598_v9  ;;  %v3095_v27 = vmax.f32 %v6598_v9, %v6601_v61 }
 0x5d4   : > { %2724 = vmax.xlane.f32.xlu0 %v2723_v26 }
 0x5d6   : > { %2727 = vmax.xlane.f32.xlu1 %v2726_v58 }
 0x5e7   : > { %2799 = vrot.lane.b32.xlu1 %v7628_v3, %s4665_s6 }
 0x5ea   : > { %2815 = vrot.lane.b32.xlu0 %v7629_v57, %s4665_s6 }
 0x5ef   : > { %v6581_v1 = vpop.xlane.xlu0 %2718 }
 0x5f1   : > { %v6579_v59 = vpop.xlane.xlu1 %2721 }
 0x5f3   : > { %v2812_v23 = vpop.permute.xlu0 %2811 }
 0x5f4   : > { %4039 = vmatprep.subr.bf16.mxu0 %v2812_v23 }
 0x5f5   : > { %v2796_v17 = vpop.permute.xlu1 %2795 }
 0x5f6   : > { %4040 = vmatpush3.bf16.msra.mxu0 %v2796_v17 }
 0x609   : > { %3093 = vmax.xlane.f32.xlu0 %v3092_v50 }
 0x60b   : > { %3096 = vmax.xlane.f32.xlu1 %v3095_v27 }
 0x61c   : > { %3168 = vrot.lane.b32.xlu1 %v4638_v53, %s4666_s7 }
 0x61f   : > { %3184 = vrot.lane.b32.xlu0 %v4639_v37, %s4666_s7 }
 0x620   : > { %2801 = vrot.lane.b32.xlu1 %v7634_v22, %s4665_s6 }
 0x621   : > { %v3971_v63 = vpop.f32.mrb[32].mxu0 }
 0x622   : > { %v3972_v54 = vpop.f32.mrb[33].mxu0 }
 0x623   : > { %v6617_v48 = vadd.f32 %v3972_v54, %v3971_v63  ;;  %v3974_v16 = vpop.f32.mrb[34].mxu0  ;;  %2817 = vrot.lane.b32.xlu0 %v7636_v32, %s4665_s6 }
 0x624   : > { %3170 = vrot.lane.b32.xlu1 %v7634_v22, %s4666_s7  ;;  %v3975_v38 = vpop.f32.mrb[35].mxu0  ;;  %v6627_v28 = vpop.xlane.xlu0 %3087 }
 0x625   : > { %7635 = vst [vmem:[#allocation36_spill] sm:$0xff] %v6617_v48  ;;  %v6623_v12 = vadd.f32 %v3975_v38, %v3974_v16  ;;  %v4011_v34 = vpop.f32.mrb[32].mxu1  ;;  %v7645_v16 = vld [vmem:[#allocation60_spill] sm:$0xff] }
 0x626   : > { %v6625_v2 = vpop.xlane.xlu1 %3090  ;;  %v4012_v58 = vpop.f32.mrb[33].mxu1  ;;  %v2644_v38 = vadd.f32 %v6334_v31, %v7645_v16 }
 0x627   : > { %7637 = vst [vmem:[#allocation38_spill] sm:$0xff] %v6623_v12  ;;  %v6629_v26 = vadd.f32 %v4012_v58, %v4011_v34  ;;  %v4014_v3 = vpop.f32.mrb[34].mxu1  ;;  %3186 = vrot.lane.b32.xlu0 %v7636_v32, %s4666_s7  ;;  %v2643_v32 = vadd.f32 %v6329_v40, %v7645_v16 }
 0x628   : > { %v4015_v57 = vpop.f32.mrb[35].mxu1  ;;  %v3181_v55 = vpop.permute.xlu0 %3180  ;;  %vm2660_vm9 = vcmp.gt.f32.partialorder %v2644_v38, 0.0 }
 0x629   : > { %7638 = vst [vmem:[#allocation45_spill] sm:$0xff] %v6629_v26  ;;  %v6633_v17 = vadd.f32 %v4015_v57, %v4014_v3  ;;  %v3977_v49 = vpop.f32.mrb[36].mxu0  ;;  %4079 = vmatprep.subr.bf16.mxu1 %v3181_v55  ;;  %v7647_v3 = vld [vmem:[#allocation62_spill] sm:$0xff]  ;;  %vm2659_vm8 = vcmp.gt.f32.partialorder %v2643_v32, 0.0 }
 0x62a   : > { %v3165_v23 = vpop.permute.xlu1 %3164  ;;  %v3978_v44 = vpop.f32.mrb[37].mxu0  ;;  %v2645_v57 = vadd.f32 %v6329_v40, %v7647_v3 }
 0x62b   : > { %7639 = vst [vmem:[#allocation10_spill] sm:$0xff] %v6633_v17  ;;  %v6635_v51 = vadd.f32 %v3978_v44, %v3977_v49  ;;  %v3980_v52 = vpop.f32.mrb[38].mxu0  ;;  %4080 = vmatpush3.bf16.msra.mxu1 %v3165_v23  ;;  %v2646_v23 = vadd.f32 %v6334_v31, %v7647_v3 }
 0x62c   : > { %v3981_v30 = vpop.f32.mrb[39].mxu0  ;;  %v2814_v35 = vpop.permute.xlu0 %2813  ;;  %vm2661_vm10 = vcmp.gt.f32.partialorder %v2645_v57, 0.0 }
 0x62d   : > { %7640 = vst [vmem:[#allocation5_spill] sm:$0xff] %v6635_v51  ;;  %v6637_v43 = vadd.f32 %v3981_v30, %v3980_v52  ;;  %v4017_v24 = vpop.f32.mrb[36].mxu1  ;;  %4041 = vmatprep.subr.bf16.mxu0 %v2814_v35  ;;  %v2675_v30 = vmul.f32 0.2, %v2643_v32  ;;  %vm2662_vm11 = vcmp.gt.f32.partialorder %v2646_v23, 0.0 }
 0x62e   : > { %v2798_v21 = vpop.permute.xlu1 %2797  ;;  %v4018_v36 = vpop.f32.mrb[37].mxu1 }
 0x62f   : > { %7641 = vst [vmem:[#allocation37_spill] sm:$0xff] %v6637_v43  ;;  %v6639_v20 = vadd.f32 %v4018_v36, %v4017_v24  ;;  %v4020_v62 = vpop.f32.mrb[38].mxu1  ;;  %4042 = vmatpush3.bf16.msra.mxu0 %v2798_v21  ;;  %v2676_v21 = vmul.f32 0.2, %v2644_v38  ;;  %v2677_v36 = vmul.f32 0.2, %v2645_v57 }
 0x630   : > { %v4021_v5 = vpop.f32.mrb[39].mxu1  ;;  %v3183_v53 = vpop.permute.xlu0 %3182 }
 0x631   : > { %7642 = vst [vmem:[#allocation13_spill] sm:$0xff] %v6639_v20  ;;  %v6641_v14 = vadd.f32 %v4021_v5, %v4020_v62  ;;  %v3983_v27 = vpop.f32.mrb[40].mxu0  ;;  %4081 = vmatprep.subr.bf16.mxu1 %v3183_v53  ;;  %v2678_v62 = vmul.f32 0.2, %v2646_v23  ;;  %v2693_v16 = vsel %vm2661_vm10, %v2645_v57, %v2677_v36 }
 0x632   : > { %v3167_v50 = vpop.permute.xlu1 %3166  ;;  %v3984_v22 = vpop.f32.mrb[41].mxu0 }
 0x633   : > { %7643 = vst [vmem:[#allocation34_spill] sm:$0xff] %v6641_v14  ;;  %v6643_v37 = vadd.f32 %v3984_v22, %v3983_v27  ;;  %v3986_v63 = vpop.f32.mrb[42].mxu0  ;;  %4082 = vmatpush3.bf16.msra.mxu1 %v3167_v50  ;;  %v2691_v22 = vsel %vm2659_vm8, %v2643_v32, %v2675_v30  ;;  %v7660_v32 = vld [vmem:[#allocation28_spill] sm:$0xff] }
 0x634   : > { %v3987_v54 = vpop.f32.mrb[43].mxu0 }
 0x635   : > { %7644 = vst [vmem:[#allocation4_spill] sm:$0xff] %v6643_v37  ;;  %v6649_v34 = vadd.f32 %v3987_v54, %v3986_v63  ;;  %v4023_v58 = vpop.f32.mrb[40].mxu1  ;;  %v2692_v54 = vsel %vm2660_vm9, %v2644_v38, %v2676_v21  ;;  %v6693_v21 = vld [vmem:[%s7215_s1 + $0x70] sm:$0xff]  }
 0x636   : > { %v4024_v49 = vpop.f32.mrb[41].mxu1 }
 0x637   : > { %7646 = vst [vmem:[#allocation19_spill] sm:$0xff] %v6649_v34  ;;  %v6655_v55 = vadd.f32 %v4024_v49, %v4023_v58  ;;  %v4026_v44 = vpop.f32.mrb[42].mxu1  ;;  %v2694_v58 = vsel %vm2662_vm11, %v2646_v23, %v2678_v62  ;;  %v6686_v23 = vld [vmem:[%s7215_s1 + $0x30] sm:$0xff]  }
 0x638   : > { %v4027_v52 = vpop.f32.mrb[43].mxu1  ;;  %v6677_v30 = vadd.f32 %v2694_v58, %v7660_v32  ;;  %v7663_v58 = vld [vmem:[#allocation64_spill] sm:$0xff] }
 0x639   : > { %7648 = vst [vmem:[#allocation2_spill] sm:$0xff] %v6655_v55  ;;  %v6657_v24 = vadd.f32 %v4027_v52, %v4026_v44  ;;  %v3989_v35 = vpop.f32.mrb[44].mxu0  ;;  %v7653_v52 = vld [vmem:[#allocation24_spill] sm:$0xff] }
 0x63a   : > { %v3990_v5 = vpop.f32.mrb[45].mxu0  ;;  %v6666_v29 = vadd.f32 %v2691_v22, %v7653_v52  ;;  %7661 = vst [vmem:[#allocation56_spill] sm:$0xff] %v6677_v30 }
 0x63b   : > { %7649 = vst [vmem:[#allocation12_spill] sm:$0xff] %v6657_v24  ;;  %v6659_v40 = vadd.f32 %v3990_v5, %v3989_v35  ;;  %v3992_v31 = vpop.f32.mrb[46].mxu0  ;;  %v7656_v35 = vld [vmem:[#allocation25_spill] sm:$0xff] }
 0x63c   : > { %v3993_v50 = vpop.f32.mrb[47].mxu0  ;;  %7654 = vst [vmem:[#allocation18_spill] sm:$0xff] %v6666_v29  ;;  %v6671_v5 = vadd.f32 %v2692_v54, %v7656_v35 }
 0x63d   : > { %7650 = vst [vmem:[#allocation20_spill] sm:$0xff] %v6659_v40  ;;  %v6661_v27 = vadd.f32 %v3993_v50, %v3992_v31  ;;  %v4029_v53 = vpop.f32.mrb[44].mxu1  ;;  %v7658_v31 = vld [vmem:[#allocation27_spill] sm:$0xff] }
 0x63e   : > { %v4030_v63 = vpop.f32.mrb[45].mxu1  ;;  %7657 = vst [vmem:[#allocation70_spill] sm:$0xff] %v6671_v5  ;;  %v6674_v50 = vadd.f32 %v2693_v16, %v7658_v31  ;;  %v2729_v38 = vmax.f32 %v6666_v29, %v6671_v5 }
 0x63f   : > { %7651 = vst [vmem:[#allocation17_spill] sm:$0xff] %v6661_v27  ;;  %v6663_v3 = vadd.f32 %v4030_v63, %v4029_v53  ;;  %v4032_v49 = vpop.f32.mrb[46].mxu1  ;;  %v7662_v63 = vld [vmem:[#allocation44_spill] sm:$0xff] }
 0x640   : > { %v4033_v44 = vpop.f32.mrb[47].mxu1  ;;  %7659 = vst [vmem:[#allocation46_spill] sm:$0xff] %v6674_v50  ;;  %v2732_v57 = vmax.f32 %v6674_v50, %v6677_v30  ;;  %v3012_v54 = vadd.f32 %v6369_v7, %v7662_v63  ;;  %v3013_v16 = vadd.f32 %v6371_v60, %v7662_v63 }
 0x641   : > { %7652 = vst [vmem:[#allocation47_spill] sm:$0xff] %v6663_v3  ;;  %v6668_v9 = vadd.f32 %v4033_v44, %v4032_v49  ;;  %v3014_v49 = vadd.f32 %v6369_v7, %v7663_v58  ;;  %v3015_v44 = vadd.f32 %v6371_v60, %v7663_v58 }
 0x642   : > { %vm3028_vm12 = vcmp.gt.f32.partialorder %v3012_v54, 0.0  ;;  %vm3029_vm13 = vcmp.gt.f32.partialorder %v3013_v16, 0.0 }
 0x643   : > { %7655 = vst [vmem:[#allocation69_spill] sm:$0xff] %v6668_v9  ;;  %v3046_v29 = vmul.f32 0.2, %v3014_v49  ;;  %v3047_v50 = vmul.f32 0.2, %v3015_v44  ;;  %vm3030_vm14 = vcmp.gt.f32.partialorder %v3014_v49, 0.0 }
 0x644   : > { %vm3031_vm15 = vcmp.gt.f32.partialorder %v3015_v44, 0.0 }
 0x646   : > { %2730 = vmax.xlane.f32.xlu0 %v2729_v38  ;;  %v3044_v38 = vmul.f32 0.2, %v3012_v54 }
 0x648   : > { %2733 = vmax.xlane.f32.xlu1 %v2732_v57  ;;  %v3045_v57 = vmul.f32 0.2, %v3013_v16  ;;  %v3060_v5 = vsel %vm3028_vm12, %v3012_v54, %v3044_v38  ;;  %v7667_v54 = vld [vmem:[#allocation42_spill] sm:$0xff] }
 0x649   : > { %v6716_v60 = vadd.f32 %v3060_v5, %v7653_v52  ;;  %v7668_v52 = vld [vmem:[#allocation49_spill] sm:$0xff]  ;;  %v7669_v5 = vld [vmem:[#allocation39_spill] sm:$0xff] }
 0x64a   : > { %v3061_v30 = vsel %vm3029_vm13, %v3013_v16, %v3045_v57 }
 0x64b   : > { %v6719_v58 = vadd.f32 %v3061_v30, %v7656_v35  ;;  %v7670_v30 = vld [vmem:[#allocation52_spill] sm:$0xff] }
 0x659   : > { %2803 = vrot.lane.b32.xlu1 %v6686_v23, %s4665_s6 }
 0x65c   : > { %2819 = vrot.lane.b32.xlu0 %v6693_v21, %s4665_s6 }
 0x661   : > { %v6699_v62 = vpop.xlane.xlu0 %2724 }
 0x663   : > { %v6697_v36 = vpop.xlane.xlu1 %2727 }
 0x665   : > { %v2816_v22 = vpop.permute.xlu0 %2815 }
 0x666   : > { %4043 = vmatprep.subr.bf16.mxu0 %v2816_v22  ;;  %v3063_v22 = vsel %vm3031_vm15, %v3015_v44, %v3047_v50  ;;  %v7664_v50 = vld [vmem:[#allocation35_spill] sm:$0xff]  ;;  %v7672_v44 = vld [vmem:[#allocation54_spill] sm:$0xff] }
 0x667   : > { %v2800_v53 = vpop.permute.xlu1 %2799  ;;  %v6713_v7 = vadd.f32 %v3063_v22, %v7660_v32  ;;  %4386 = vrcp.f32 %v7664_v50  ;;  %v7666_v32 = vld [vmem:[#allocation40_spill] sm:$0xff]  ;;  %v7674_v22 = vld [vmem:[#allocation6_spill] sm:$0xff] }
 0x668   : > { %4044 = vmatpush3.bf16.msra.mxu0 %v2800_v53  ;;  %v3062_v53 = vsel %vm3030_vm14, %v3014_v49, %v3046_v29  ;;  %v3098_v29 = vmax.f32 %v6716_v60, %v6719_v58 }
 0x669   : > { %v6710_v63 = vadd.f32 %v3062_v53, %v7658_v31  ;;  %v7665_v31 = vld [vmem:[#allocation41_spill] sm:$0xff]  ;;  %v7673_v53 = vld [vmem:[#allocation16_spill] sm:$0xff] }
 0x66a   : > { %4388 = vrcp.f32 %v7665_v31 }
 0x66b   : > { %v3101_v39 = vmax.f32 %v6710_v63, %v6713_v7  ;;  %4390 = vrcp.f32 %v7666_v32  ;;  %v7678_v32 = vld [vmem:[#allocation30_spill] sm:$0xff] }
 0x66c   : > { %4392 = vrcp.f32 %v7667_v54 }
 0x66d   : > { %4394 = vrcp.f32 %v7668_v52 }
 0x66e   : > { %4396 = vrcp.f32 %v7669_v5 }
 0x66f   : > { %4398 = vrcp.f32 %v7670_v30 }
 0x671   : > { %v4387_v35 = vpop.eup %4386 }
 0x674   : > { %v4389_v16 = vpop.eup %4388 }
 0x675   : > { %v4391_v49 = vpop.eup %4390 }
 0x676   : > { %v4393_v38 = vpop.eup %4392 }
 0x677   : > { %v4395_v57 = vpop.eup %4394 }
 0x678   : > { %v4397_v5 = vpop.eup %4396 }
 0x679   : > { %v4399_v54 = vpop.eup %4398 }
 0x67b   : > { %3099 = vmax.xlane.f32.xlu0 %v3098_v29 }
 0x67d   : > { %3102 = vmax.xlane.f32.xlu1 %v3101_v39  ;;  %v7671_v39 = vld [vmem:[#allocation15_spill] sm:$0xff] }
 0x67e   : > { %4400 = vrcp.f32 %v7671_v39 }
 0x67f   : > { %4402 = vrcp.f32 %v7672_v44 }
 0x680   : > { %4404 = vrcp.f32 %v7673_v53 }
 0x681   : > { %4406 = vrcp.f32 %v7674_v22 }
 0x68e   : > { %700 = vperm.xlu1 %4169, %v4387_v35  }
 0x691   : > { %705 = vperm.xlu0 %4168, %v4391_v49   ;;  %v7676_v49 = vld [vmem:[#allocation8_spill] sm:$0xff] }
 0x692   : > { %710 = vperm.xlu1 %4169, %v4389_v16   ;;  %v7675_v16 = vld [vmem:[#allocation43_spill] sm:$0xff] }
 0x693   : > { %4408 = vrcp.f32 %v7675_v16 }
 0x694   : > { %4410 = vrcp.f32 %v7676_v49  ;;  %v7680_v49 = vld [vmem:[#allocation59_spill] sm:$0xff] }
 0x695   : > { %1074 = vperm.xlu0 %4168, %v4395_v57   ;;  %v7677_v57 = vld [vmem:[#allocation48_spill] sm:$0xff] }
 0x696   : > { %715 = vperm.xlu1 %4169, %v4393_v38   ;;  %v6738_v35 = vpop.xlane.xlu0 %3093  ;;  %v4401_v38 = vpop.eup %4400  ;;  %4412 = vrcp.f32 %v7677_v57 }
 0x697   : > { %v4403_v53 = vpop.eup %4402  ;;  %4414 = vrcp.f32 %v7678_v32  ;;  %v7682_v32 = vld [vmem:[#allocation65_spill] sm:$0xff] }
 0x698   : > { %v6736_v29 = vpop.xlane.xlu1 %3096 }
 0x699   : > { %1089 = vperm.xlu0 %4168, %v4399_v54   ;;  %v7679_v54 = vld [vmem:[#allocation50_spill] sm:$0xff] }
 0x69a   : > { %720 = vperm.xlu1 %4169, %v4397_v5   ;;  %v3185_v31 = vpop.permute.xlu0 %3184  ;;  %v4405_v5 = vpop.eup %4404  ;;  %4416 = vrcp.f32 %v7679_v54 }
 0x69b   : > { %4083 = vmatprep.subr.bf16.mxu1 %v3185_v31  ;;  %v4407_v16 = vpop.eup %4406  ;;  %4418 = vrcp.f32 %v7680_v49 }
 0x69c   : > { %v3169_v39 = vpop.permute.xlu1 %3168 }
 0x69d   : > { %4084 = vmatpush3.bf16.msra.mxu1 %v3169_v39  ;;  %1099 = vperm.xlu0 %4168, %v4403_v53   ;;  %v4409_v39 = vpop.eup %4408  ;;  %v7681_v53 = vld [vmem:[#allocation51_spill] sm:$0xff] }
 0x69e   : > { %725 = vperm.xlu1 %4169, %v4401_v38   ;;  %v2818_v22 = vpop.permute.xlu0 %2817  ;;  %v4411_v44 = vpop.eup %4410  ;;  %4420 = vrcp.f32 %v7681_v53 }
 0x69f   : > { %4045 = vmatprep.subr.bf16.mxu0 %v2818_v22  ;;  %4422 = vrcp.f32 %v7682_v32 }
 0x6a0   : > { %v2802_v50 = vpop.permute.xlu1 %2801  ;;  %v4413_v22 = vpop.eup %4412 }
 0x6a1   : > { %4046 = vmatpush3.bf16.msra.mxu0 %v2802_v50  ;;  %1443 = vperm.xlu0 %4168, %v4407_v16   ;;  %v7683_v50 = vld [vmem:[#allocation53_spill] sm:$0xff]  ;;  %v7684_v16 = vld [vmem:[#allocation67_spill] sm:$0xff] }
 0x6a2   : > { %730 = vperm.xlu1 %4169, %v4405_v5   ;;  %v3187_v38 = vpop.permute.xlu0 %3186  ;;  %v4415_v5 = vpop.eup %4414  ;;  %4424 = vrcp.f32 %v7683_v50 }
 0x6a3   : > { %4085 = vmatprep.subr.bf16.mxu1 %v3187_v38  ;;  %4426 = vrcp.f32 %v7684_v16  ;;  %v7685_v38 = vld [vmem:[#allocation55_spill] sm:$0xff]  ;;  %v7688_v16 = vld [vmem:[#allocation29_spill] sm:$0xff] }
 0x6a4   : > { %v3171_v31 = vpop.permute.xlu1 %3170  ;;  %v4417_v49 = vpop.eup %4416  ;;  %4428 = vrcp.f32 %v7685_v38 }
 0x6a5   : > { %4086 = vmatpush3.bf16.msra.mxu1 %v3171_v31  ;;  %1458 = vperm.xlu0 %4168, %v4411_v44   ;;  %v4419_v30 = vpop.eup %4418  ;;  %v7686_v44 = vld [vmem:[#allocation7_spill] sm:$0xff] }
 0x6a6   : > { %735 = vperm.xlu1 %4169, %v4409_v39   ;;  %4430 = vrcp.f32 %v7686_v44 }
 0x6a8   : > { %v4421_v31 = vpop.eup %4420 }
 0x6a9   : > { %1468 = vperm.xlu0 %4168, %v4415_v5   ;;  %v4423_v39 = vpop.eup %4422 }
 0x6aa   : > { %1069 = vperm.xlu1 %4169, %v4413_v22   ;;  %v7687_v22 = vld [vmem:[#allocation9_spill] sm:$0xff] }
 0x6ab   : > { %4432 = vrcp.f32 %v7687_v22 }
 0x6ac   : > { %v4425_v32 = vpop.eup %4424  ;;  %4434 = vrcp.f32 %v7688_v16  ;;  %v2740_v16 = vsub.f32 %v6483_v10, %v6581_v1 }
 0x6ad   : > { %1812 = vperm.xlu0 %4168, %v4419_v30   ;;  %v4427_v53 = vpop.eup %4426  ;;  %4436 = vrcp.f32 %v6617_v48 }
 0x6ae   : > { %1079 = vperm.xlu1 %4169, %v4417_v49   ;;  %v4429_v5 = vpop.eup %4428  ;;  %v7689_v49 = vld [vmem:[#allocation31_spill] sm:$0xff] }
 0x6af   : > { %4438 = vrcp.f32 %v7689_v49  ;;  %v7714_v49 = vld [vmem:[#allocation76_spill] sm:$0xff] }
 0x6b0   : > { %v4431_v30 = vpop.eup %4430  ;;  %4440 = vrcp.f32 %v6637_v43  ;;  %v7692_v43 = vld [vmem:[#allocation61_spill] sm:$0xff] }
 0x6b1   : > { %1827 = vperm.xlu0 %4168, %v4423_v39  }
 0x6b2   : > { %1084 = vperm.xlu1 %4169, %v4421_v31   ;;  %v7690_v31 = vld [vmem:[#allocation33_spill] sm:$0xff] }
 0x6b3   : > { %4442 = vrcp.f32 %v7690_v31 }
 0x6b4   : > { %4444 = vrcp.f32 %v6649_v34  ;;  %v7693_v34 = vld [vmem:[#allocation63_spill] sm:$0xff] }
 0x6b5   : > { %1837 = vperm.xlu0 %4168, %v4427_v53   ;;  %v4433_v53 = vpop.eup %4432 }
 0x6b6   : > { %1094 = vperm.xlu1 %4169, %v4425_v32   ;;  %v4642_v32 = vld [vmem:[%s7215_s1 + $0x78] sm:$0xff]  }
 0x6b9   : > { %3188 = vrot.lane.b32.xlu0 %v6693_v21, %s4666_s7  ;;  %v4435_v21 = vpop.eup %4434 }
 0x6ba   : > { %1104 = vperm.xlu1 %4169, %v4429_v5   ;;  %v4437_v39 = vpop.eup %4436  ;;  %v7691_v5 = vld [vmem:[#allocation58_spill] sm:$0xff] }
 0x6bb   : > { %4446 = vrcp.f32 %v7691_v5 }
 0x6bc   : > { %4448 = vrcp.f32 %v6661_v27  ;;  %v7694_v27 = vld [vmem:[#allocation66_spill] sm:$0xff] }
 0x6bd   : > { %2821 = vrot.lane.b32.xlu0 %v4642_v32, %s4665_s6  ;;  %4450 = vrcp.f32 %v7692_v43 }
 0x6be   : > { %1438 = vperm.xlu1 %4169, %v4431_v30   ;;  %v4439_v30 = vpop.eup %4438  ;;  %4452 = vrcp.f32 %v6633_v17 }
 0x6bf   : > { %v4441_v48 = vpop.eup %4440  ;;  %4454 = vrcp.f32 %v7693_v34 }
 0x6c0   : > { %4456 = vrcp.f32 %v6641_v14 }
 0x6c1   : > { %3190 = vrot.lane.b32.xlu0 %v4642_v32, %s4666_s7  ;;  %4458 = vrcp.f32 %v7694_v27 }
 0x6c2   : > { %1448 = vperm.xlu1 %4169, %v4433_v53   ;;  %v4443_v53 = vpop.eup %4442  ;;  %4460 = vrcp.f32 %v6657_v24 }
 0x6c3   : > { %v4445_v32 = vpop.eup %4444 }
 0x6c5   : > { %2176 = vperm.xlu0 %4168, %v4437_v39  }
 0x6c6   : > { %1453 = vperm.xlu1 %4169, %v4435_v21   ;;  %v4447_v21 = vpop.eup %4446 }
 0x6c7   : > { %v4449_v39 = vpop.eup %4448 }
 0x6c9   : > { %2191 = vperm.xlu0 %4168, %v4441_v48  }
 0x6ca   : > { %1463 = vperm.xlu1 %4169, %v4439_v30   ;;  %v4451_v30 = vpop.eup %4450 }
 0x6cb   : > { %v4453_v43 = vpop.eup %4452 }
 0x6cd   : > { %2201 = vperm.xlu0 %4168, %v4445_v32   ;;  %v4455_v32 = vpop.eup %4454 }
 0x6ce   : > { %1473 = vperm.xlu1 %4169, %v4443_v53   ;;  %v7695_v53 = vld [vmem:[#allocation68_spill] sm:$0xff]  ;;  %v4457_v34 = vpop.eup %4456 }
 0x6cf   : > { %4462 = vrcp.f32 %v7695_v53 }
 0x6d0   : > { %4464 = vrcp.f32 %v6668_v9 }
 0x6d1   : > { %2211 = vperm.xlu0 %4168, %v4449_v39   ;;  %v4459_v39 = vpop.eup %4458  ;;  %4466 = vrcp.f32 %v6623_v12 }
 0x6d2   : > { %1807 = vperm.xlu1 %4169, %v4447_v21   ;;  %v4461_v24 = vpop.eup %4460  ;;  %4468 = vrcp.f32 %v6635_v51 }
 0x6d3   : > { %v6776_v17 = vpop.xlane.xlu0 %2730  ;;  %4470 = vrcp.f32 %v6643_v37 }
 0x6d4   : > { %4472 = vrcp.f32 %v6659_v40 }
 0x6d5   : > { %v6774_v48 = vpop.xlane.xlu1 %2733  ;;  %2550 = vperm.xlu0 %4168, %v4453_v43   ;;  %v4643_v43 = vld [vmem:[%s7215_s1 + $0x38] sm:$0xff]   ;;  %4474 = vrcp.f32 %v6629_v26 }
 0x6d6   : > { %1817 = vperm.xlu1 %4169, %v4451_v30   ;;  %4476 = vrcp.f32 %v6639_v20 }
 0x6d7   : > { %v2820_v21 = vpop.permute.xlu0 %2819  ;;  %4478 = vrcp.f32 %v6655_v55 }
 0x6d8   : > { %4047 = vmatprep.subr.bf16.mxu0 %v2820_v21  ;;  %4480 = vrcp.f32 %v6663_v3 }
 0x6d9   : > { %v2804_v14 = vpop.permute.xlu1 %2803  ;;  %2560 = vperm.xlu0 %4168, %v4457_v34   ;;  %v4463_v27 = vpop.eup %4462 }
 0x6da   : > { %1822 = vperm.xlu1 %4169, %v4455_v32   ;;  %4048 = vmatpush3.bf16.msra.mxu0 %v2804_v14  ;;  %v4465_v5 = vpop.eup %4464 }
 0x6db   : > { %v4467_v14 = vpop.eup %4466 }
 0x6dc   : > { %v4469_v34 = vpop.eup %4468 }
 0x6dd   : > { %2570 = vperm.xlu0 %4168, %v4461_v24   ;;  %v4471_v24 = vpop.eup %4470 }
 0x6de   : > { %1832 = vperm.xlu1 %4169, %v4459_v39  }
 0x6e1   : > { %2580 = vperm.xlu0 %4168, %v4465_v5  }
 0x6e2   : > { %1842 = vperm.xlu1 %4169, %v4463_v27   ;;  %v4473_v27 = vpop.eup %4472 }
 0x6e6   : > { %3172 = vrot.lane.b32.xlu1 %v6686_v23, %s4666_s7  ;;  %v4475_v23 = vpop.eup %4474 }
 0x6e7   : > { %v4477_v5 = vpop.eup %4476 }
 0x6e8   : > { %v4479_v30 = vpop.eup %4478 }
 0x6e9   : > { %v4481_v21 = vpop.eup %4480 }
 0x6ea   : > { %2805 = vrot.lane.b32.xlu1 %v4643_v43, %s4665_s6 }
 0x6ee   : > { %3174 = vrot.lane.b32.xlu1 %v4643_v43, %s4666_s7 }
 0x6f2   : > { %2181 = vperm.xlu1 %4169, %v4467_v14  }
 0x6f6   : > { %2186 = vperm.xlu1 %4169, %v4469_v34  }
 0x6fa   : > { %2196 = vperm.xlu1 %4169, %v4471_v24  }
 0x6fe   : > { %2206 = vperm.xlu1 %4169, %v4473_v27  }
 0x702   : > { %2545 = vperm.xlu1 %4169, %v4475_v23  }
 0x706   : > { %2555 = vperm.xlu1 %4169, %v4477_v5  }
 0x708   : > { %v6797_v39 = vpop.xlane.xlu0 %3099 }
 0x70a   : > { %v6795_v32 = vpop.xlane.xlu1 %3102  ;;  %2565 = vperm.xlu1 %4169, %v4479_v30  }
 0x70e   : > { %v6799_v43 = vpop.permute.xlu1 %700  ;;  %2575 = vperm.xlu1 %4169, %v4481_v21  }
 0x70f   : > { %7696 = vst [vmem:[#allocation23_spill] sm:$0xff] %v6799_v43 }
 0x710   : > { %v6803_v34 = vpop.permute.xlu0 %705 }
 0x711   : > { %7698 = vst [vmem:[#allocation21_spill] sm:$0xff] %v6803_v34 }
 0x712   : > { %v6801_v14 = vpop.permute.xlu1 %710 }
 0x713   : > { %7697 = vst [vmem:[#allocation26_spill] sm:$0xff] %v6801_v14 }
 0x714   : > { %v6807_v27 = vpop.permute.xlu0 %1074 }
 0x716   : > { %v6805_v24 = vpop.permute.xlu1 %715 }
 0x717   : > { %7699 = vst [vmem:[#allocation22_spill] sm:$0xff] %v6805_v24 }
 0x718   : > { %v6811_v5 = vpop.permute.xlu0 %1089 }
 0x71a   : > { %v6809_v23 = vpop.permute.xlu1 %720 }
 0x71b   : > { %7700 = vst [vmem:[#allocation71_spill] sm:$0xff] %v6809_v23 }
 0x71c   : > { %v6815_v30 = vpop.permute.xlu0 %1099 }
 0x71e   : > { %v6813_v9 = vpop.permute.xlu1 %725 }
 0x71f   : > { %7701 = vst [vmem:[#allocation72_spill] sm:$0xff] %v6813_v9 }
 0x720   : > { %v6819_v43 = vpop.permute.xlu0 %1443 }
 0x722   : > { %v6817_v3 = vpop.permute.xlu1 %730 }
 0x723   : > { %7702 = vst [vmem:[#allocation14_spill] sm:$0xff] %v6817_v3 }
 0x724   : > { %v6823_v14 = vpop.permute.xlu0 %1458 }
 0x725   : > { %7704 = vst [vmem:[#allocation73_spill] sm:$0xff] %v6823_v14 }
 0x726   : > { %v6821_v21 = vpop.permute.xlu1 %735 }
 0x727   : > { %7703 = vst [vmem:[#allocation57_spill] sm:$0xff] %v6821_v21 }
 0x728   : > { %v6827_v24 = vpop.permute.xlu0 %1468 }
 0x729   : > { %7705 = vst [vmem:[#allocation74_spill] sm:$0xff] %v6827_v24 }
 0x72a   : > { %v6825_v34 = vpop.permute.xlu1 %1069 }
 0x72c   : > { %v6831_v23 = vpop.permute.xlu0 %1812 }
 0x72d   : > { %7706 = vst [vmem:[#allocation60_spill] sm:$0xff] %v6831_v23 }
 0x72e   : > { %v6829_v55 = vpop.permute.xlu1 %1079 }
 0x730   : > { %v6835_v9 = vpop.permute.xlu0 %1827 }
 0x731   : > { %7707 = vst [vmem:[#allocation62_spill] sm:$0xff] %v6835_v9 }
 0x732   : > { %v6833_v20 = vpop.permute.xlu1 %1084 }
 0x734   : > { %v6839_v3 = vpop.permute.xlu0 %1837 }
 0x735   : > { %7708 = vst [vmem:[#allocation24_spill] sm:$0xff] %v6839_v3  ;;  %v7713_v3 = vld [vmem:[#allocation75_spill] sm:$0xff] }
 0x736   : > { %v6837_v26 = vpop.permute.xlu1 %1094  ;;  %v2737_v24 = vsub.f32 %v7713_v3, %v6499_v15 }
 0x738   : > { %v3189_v21 = vpop.permute.xlu0 %3188 }
 0x739   : > { %4087 = vmatprep.subr.bf16.mxu1 %v3189_v21  ;;  %v2735_v21 = vsub.f32 %v7714_v49, %v6501_v47  ;;  %v3111_v47 = vsub.f32 %v6519_v41, %v6625_v2  ;;  %v2761_v49 = vmul.f32 1.442695, %v2740_v16  ;;  %v2746_v41 = vsub.f32 %v6563_v0, %v6697_v36 }
 0x73a   : > { %v6841_v40 = vpop.permute.xlu1 %1104  ;;  %v3115_v0 = vsub.f32 %v6601_v61, %v6736_v29  ;;  %v7716_v61 = vld [vmem:[#allocation56_spill] sm:$0xff] }
 0x73c   : > { %v2822_v51 = vpop.permute.xlu0 %2821 }
 0x73d   : > { %4049 = vmatprep.subr.bf16.mxu0 %v2822_v51  ;;  %v2742_v51 = vsub.f32 %v6489_v4, %v6579_v59  ;;  %v3109_v4 = vsub.f32 %v6525_v33, %v6627_v28  ;;  %v2744_v33 = vsub.f32 %v6569_v25, %v6699_v62  ;;  %v3113_v25 = vsub.f32 %v6595_v6, %v6738_v35 }
 0x73e   : > { %v6843_v37 = vpop.permute.xlu1 %1438 }
 0x73f   : > { %v2765_v3 = vmul.f32 1.442695, %v2742_v51  ;;  %v3130_v16 = vmul.f32 1.442695, %v3109_v4  ;;  %v3138_v4 = vmul.f32 1.442695, %v3113_v25 }
 0x742   : > { %v6845_v12 = vpop.permute.xlu1 %1448 }
 0x746   : > { %v6847_v53 = vpop.permute.xlu1 %1453 }
 0x747   : > { %7709 = vst [vmem:[#allocation25_spill] sm:$0xff] %v6847_v53  ;;  %v2755_v53 = vmul.f32 1.442695, %v2737_v24  ;;  %v2741_v24 = vsub.f32 %v6486_v13, %v6579_v59  ;;  %v3110_v13 = vsub.f32 %v6516_v42, %v6625_v2  ;;  %v2745_v42 = vsub.f32 %v6560_v18, %v6697_v36 }
 0x749   : > { %4482 = vpow2.f32 %v2755_v53  ;;  %v2769_v53 = vmul.f32 1.442695, %v2744_v33 }
 0x74a   : > { %v6849_v23 = vpop.permute.xlu1 %1463 }
 0x74b   : > { %7710 = vst [vmem:[#allocation27_spill] sm:$0xff] %v6849_v23  ;;  %v2751_v23 = vmul.f32 1.442695, %v2735_v21 }
 0x74d   : > { %4484 = vpow2.f32 %v2751_v23  ;;  %v3132_v23 = vmul.f32 1.442695, %v3110_v13 }
 0x74e   : > { %v6851_v31 = vpop.permute.xlu1 %1473  ;;  %4486 = vpow2.f32 %v2765_v3  ;;  %v3142_v3 = vmul.f32 1.442695, %v3115_v0 }
 0x74f   : > { %7711 = vst [vmem:[#allocation28_spill] sm:$0xff] %v6851_v31  ;;  %v3106_v31 = vsub.f32 %v6388_v11, %v6541_v45  ;;  %4488 = vpow2.f32 %v2761_v49  ;;  %v3191_v49 = vpop.permute.xlu0 %3190 }
 0x751   : > { %v3124_v10 = vmul.f32 1.442695, %v3106_v31  ;;  %v2763_v31 = vmul.f32 1.442695, %v2741_v24  ;;  %v2771_v24 = vmul.f32 1.442695, %v2745_v42 }
 0x752   : > { %v6853_v9 = vpop.permute.xlu1 %1807 }
 0x753   : > { %7712 = vst [vmem:[#allocation44_spill] sm:$0xff] %v6853_v9  ;;  %v3104_v9 = vsub.f32 %v6382_v19, %v6543_v56  ;;  %v2739_v19 = vsub.f32 %v6480_v46, %v6581_v1  ;;  %v3134_v56 = vmul.f32 1.442695, %v3111_v47  ;;  %4490 = vpow2.f32 %v3124_v10  ;;  %v4483_v51 = vpop.eup %4482  ;;  %v7717_v10 = vld [vmem:[#allocation70_spill] sm:$0xff] }
 0x754   : > { %v3108_v46 = vsub.f32 %v6522_v8, %v6627_v28  ;;  %v7715_v8 = vld [vmem:[#allocation11_spill] sm:$0xff]  ;;  %v2750_v47 = vsub.f32 %v7716_v61, %v6774_v48  ;;  %v2748_v18 = vsub.f32 %v7717_v10, %v6776_v17  ;;  %v3118_v10 = vsub.f32 %v6710_v63, %v6795_v32 }
 0x755   : > { %v3120_v11 = vmul.f32 1.442695, %v3104_v9  ;;  %v2759_v59 = vmul.f32 1.442695, %v2739_v19  ;;  %v2773_v9 = vmul.f32 1.442695, %v2746_v41  ;;  %v2743_v28 = vsub.f32 %v7715_v8, %v6699_v62 }
 0x756   : > { %v6859_v14 = vpop.permute.xlu1 %1817  ;;  %v3128_v2 = vmul.f32 1.442695, %v3108_v46  ;;  %v7718_v62 = vld [vmem:[#allocation3_spill] sm:$0xff]  ;;  %v7719_v41 = vld [vmem:[#allocation32_spill] sm:$0xff]  ;;  %v2781_v13 = vmul.f32 1.442695, %v2750_v47 }
 0x757   : > { %4492 = vpow2.f32 %v3120_v11  ;;  %v4485_v6 = vpop.eup %4484  ;;  %v3114_v11 = vsub.f32 %v7718_v62, %v6736_v29  ;;  %v3117_v29 = vsub.f32 %v6719_v58, %v6797_v39 }
 0x758   : > { %4494 = vpow2.f32 %v3134_v56  ;;  %v4487_v36 = vpop.eup %4486  ;;  %v2767_v56 = vmul.f32 1.442695, %v2743_v28  ;;  %v2783_v0 = vpack.c.bf16 %v4483_v51, %v4485_v6 }
 0x759   : > { %4496 = vpow2.f32 %v3130_v16  ;;  %v4489_v19 = vpop.eup %4488  ;;  %v3112_v16 = vsub.f32 %v7719_v41, %v6738_v35  ;;  %v3140_v25 = vmul.f32 1.442695, %v3114_v11  ;;  %v3146_v51 = vmul.f32 1.442695, %v3117_v29 }
 0x75a   : > { %v6869_v15 = vpop.permute.xlu1 %1822  ;;  %4498 = vpow2.f32 %v2763_v31  ;;  %v3148_v41 = vmul.f32 1.442695, %v3118_v10 }
 0x75b   : > { %4500 = vpow2.f32 %v2759_v59  ;;  %v3119_v59 = vsub.f32 %v6713_v7, %v6795_v32  ;;  %v3136_v42 = vmul.f32 1.442695, %v3112_v16 }
 0x75c   : > { %4502 = vpow2.f32 %v2773_v9  ;;  %v2777_v9 = vmul.f32 1.442695, %v2748_v18 }
 0x75d   : > { %4504 = vpow2.f32 %v2769_v53  ;;  %v4491_v31 = vpop.eup %4490  ;;  %v3150_v61 = vmul.f32 1.442695, %v3119_v59 }
 0x75e   : > { %v6879_v45 = vpop.permute.xlu1 %1832  ;;  %4506 = vpow2.f32 %v3132_v23  ;;  %v2786_v23 = vpack.c.bf16 %v4487_v36, %v4489_v19 }
 0x75f   : > { %4508 = vpow2.f32 %v3128_v2  ;;  %v7720_v2 = vld [vmem:[#allocation46_spill] sm:$0xff] }
 0x760   : > { %4510 = vpow2.f32 %v3142_v3  ;;  %v2749_v8 = vsub.f32 %v7720_v2, %v6774_v48 }
 0x761   : > { %v4493_v46 = vpop.eup %4492  ;;  %4512 = vpow2.f32 %v3138_v4 }
 0x762   : > { %v6889_v1 = vpop.permute.xlu1 %1842  ;;  %v4495_v53 = vpop.eup %4494  ;;  %4514 = vpow2.f32 %v2771_v24  ;;  %v3152_v47 = vpack.c.bf16 %v4491_v31, %v4493_v46  ;;  %v2779_v48 = vmul.f32 1.442695, %v2749_v8 }
 0x763   : > { %v4497_v35 = vpop.eup %4496  ;;  %4516 = vpow2.f32 %v2767_v56 }
 0x764   : > { %v4499_v7 = vpop.eup %4498  ;;  %4518 = vpow2.f32 %v2781_v13  ;;  %v3155_v6 = vpack.c.bf16 %v4495_v53, %v4497_v35 }
 0x765   : > { %v4501_v58 = vpop.eup %4500  ;;  %4520 = vpow2.f32 %v2777_v9 }
 0x766   : > { %v3173_v21 = vpop.permute.xlu1 %3172  ;;  %4522 = vpow2.f32 %v3140_v25  ;;  %v2785_v62 = vpack.c.bf16 %v4499_v7, %v4501_v58 }
 0x767   : > { %4088 = vmatpush3.bf16.msra.mxu1 %v3173_v21  ;;  %v7721_v21 = vld [vmem:[#allocation18_spill] sm:$0xff]  ;;  %4524 = vpow2.f32 %v3136_v42 }
 0x768   : > { %4089 = vmatprep.subr.bf16.mxu1 %v3191_v49  ;;  %v2747_v3 = vsub.f32 %v7721_v21, %v6776_v17  ;;  %v4503_v49 = vpop.eup %4502  ;;  %4526 = vpow2.f32 %v3150_v61  ;;  %v3116_v17 = vsub.f32 %v6716_v60, %v6797_v39 }
 0x769   : > { %v4505_v4 = vpop.eup %4504  ;;  %4528 = vpow2.f32 %v3146_v51 }
 0x76a   : > { %v2806_v33 = vpop.permute.xlu1 %2805  ;;  %v4507_v18 = vpop.eup %4506  ;;  %v2775_v36 = vmul.f32 1.442695, %v2747_v3  ;;  %v2788_v19 = vpack.c.bf16 %v4503_v49, %v4505_v4  ;;  %4530 = vpow2.f32 %v2779_v48  ;;  %v3144_v63 = vmul.f32 1.442695, %v3116_v17 }
 0x76b   : > { %4050 = vmatpush3.bf16.msra.mxu0 %v2806_v33  ;;  %v4509_v24 = vpop.eup %4508 }
 0x76c   : > { %v4511_v11 = vpop.eup %4510  ;;  %4532 = vpow2.f32 %v2775_v36  ;;  %v3154_v33 = vpack.c.bf16 %v4507_v18, %v4509_v24 }
 0x76d   : > { %v4513_v56 = vpop.eup %4512  ;;  %4534 = vpow2.f32 %v3148_v41 }
 0x76e   : > { %v3175_v28 = vpop.permute.xlu1 %3174  ;;  %2872 = vmatmul.mubr.bf16.vlgmr.msra.gmra.mrb[48].mxu0 %v2783_v0  ;;  %v4515_v16 = vpop.eup %4514  ;;  %v3157_v13 = vpack.c.bf16 %v4511_v11, %v4513_v56  ;;  %4536 = vpow2.f32 %v3144_v63 }
 0x76f   : > { %2879 = vmatprep.mubr.bf16.mxu0 %v2786_v23  ;;  %4090 = vmatpush3.bf16.msra.mxu1 %v3175_v28  ;;  %v4517_v32 = vpop.eup %4516 }
 0x770   : > { %v4519_v31 = vpop.eup %4518  ;;  %v2787_v46 = vpack.c.bf16 %v4515_v16, %v4517_v32 }
 0x771   : > { %v4521_v59 = vpop.eup %4520 }
 0x772   : > { %3241 = vmatmul.mubr.bf16.vlgmr.msra.gmra.mrb[48].mxu1 %v3152_v47  ;;  %v4523_v60 = vpop.eup %4522  ;;  %v2790_v29 = vpack.c.bf16 %v4519_v31, %v4521_v59 }
 0x773   : > { %3248 = vmatprep.mubr.bf16.mxu1 %v3155_v6  ;;  %v4525_v39 = vpop.eup %4524 }
 0x774   : > { %v4527_v9 = vpop.eup %4526  ;;  %v3156_v25 = vpack.c.bf16 %v4523_v60, %v4525_v39 }
 0x775   : > { %v4529_v0 = vpop.eup %4528 }
 0x776   : > { %2880 = vmatmul.mubr.bf16.gmra.mrb[52].mxu0 %v2785_v62  ;;  %v4531_v53 = vpop.eup %4530  ;;  %v3159_v35 = vpack.c.bf16 %v4527_v9, %v4529_v0 }
 0x777   : > { %2887 = vmatprep.mubr.bf16.mxu0 %v2788_v19  ;;  %v4533_v23 = vpop.eup %4532 }
 0x778   : > { %v4535_v42 = vpop.eup %4534  ;;  %v2789_v2 = vpack.c.bf16 %v4531_v53, %v4533_v23 }
 0x779   : > { %v4537_v8 = vpop.eup %4536 }
 0x77a   : > { %3249 = vmatmul.mubr.bf16.gmra.mrb[52].mxu1 %v3154_v33  ;;  %v3158_v28 = vpack.c.bf16 %v4535_v42, %v4537_v8 }
 0x77b   : > { %3256 = vmatprep.mubr.bf16.mxu1 %v3157_v13 }
 0x77e   : > { %2888 = vmatmul.mubr.bf16.gmra.mrb[56].mxu0 %v2787_v46 }
 0x77f   : > { %2895 = vmatprep.mubr.bf16.mxu0 %v2790_v29 }
 0x782   : > { %3257 = vmatmul.mubr.bf16.gmra.mrb[56].mxu1 %v3156_v25 }
 0x783   : > { %3264 = vmatprep.mubr.bf16.mxu1 %v3159_v35 }
 0x786   : > { %2896 = vmatmul.mubr.bf16.gmra.mrb[60].mxu0 %v2789_v2 }
 0x78a   : > { %3265 = vmatmul.mubr.bf16.gmra.mrb[60].mxu1 %v3158_v28 }
 0x841   : > { %v4051_v7 = vpop.f32.mrb[48].mxu0 }
 0x842   : > { %v4052_v21 = vpop.f32.mrb[49].mxu0 }
 0x843   : > { %v6919_v3 = vadd.f32 %v4052_v21, %v4051_v7  ;;  %v4054_v61 = vpop.f32.mrb[50].mxu0 }
 0x844   : > { %v4055_v58 = vpop.f32.mrb[51].mxu0 }
 0x845   : > { %4538 = vrcp.f32 %v6919_v3  ;;  %v6922_v51 = vadd.f32 %v4055_v58, %v4054_v61  ;;  %v4091_v47 = vpop.f32.mrb[48].mxu1 }
 0x846   : > { %v4092_v49 = vpop.f32.mrb[49].mxu1 }
 0x847   : > { %4540 = vrcp.f32 %v6922_v51  ;;  %v6925_v6 = vadd.f32 %v4092_v49, %v4091_v47  ;;  %v4094_v4 = vpop.f32.mrb[50].mxu1 }
 0x848   : > { %v4095_v48 = vpop.f32.mrb[51].mxu1 }
 0x849   : > { %v6927_v10 = vadd.f32 %v4095_v48, %v4094_v4  ;;  %v4057_v18 = vpop.f32.mrb[52].mxu0 }
 0x84a   : > { %v4058_v36 = vpop.f32.mrb[53].mxu0 }
 0x84b   : > { %v6929_v17 = vadd.f32 %v4058_v36, %v4057_v18  ;;  %v4060_v24 = vpop.f32.mrb[54].mxu0 }
 0x84c   : > { %v4061_v62 = vpop.f32.mrb[55].mxu0 }
 0x84d   : > { %4542 = vrcp.f32 %v6929_v17  ;;  %v6932_v11 = vadd.f32 %v4061_v62, %v4060_v24  ;;  %v4097_v19 = vpop.f32.mrb[52].mxu1 }
 0x84e   : > { %v4098_v56 = vpop.f32.mrb[53].mxu1 }
 0x84f   : > { %v4539_v41 = vpop.eup %4538  ;;  %4544 = vrcp.f32 %v6932_v11  ;;  %v6935_v16 = vadd.f32 %v4098_v56, %v4097_v19  ;;  %v4100_v63 = vpop.f32.mrb[54].mxu1 }
 0x850   : > { %2914 = vperm.xlu1 %4169, %v4539_v41   ;;  %v4101_v32 = vpop.f32.mrb[55].mxu1 }
 0x851   : > { %v4541_v33 = vpop.eup %4540  ;;  %v6937_v31 = vadd.f32 %v4101_v32, %v4100_v63  ;;  %v4063_v13 = vpop.f32.mrb[56].mxu0 }
 0x852   : > { %v4064_v59 = vpop.f32.mrb[57].mxu0  ;;  %2919 = vperm.xlu0 %4168, %v4541_v33  }
 0x853   : > { %v6939_v60 = vadd.f32 %v4064_v59, %v4063_v13  ;;  %v4066_v39 = vpop.f32.mrb[58].mxu0 }
 0x854   : > { %v4067_v46 = vpop.f32.mrb[59].mxu0 }
 0x855   : > { %4546 = vrcp.f32 %v6939_v60  ;;  %v6942_v9 = vadd.f32 %v4067_v46, %v4066_v39  ;;  %v4103_v29 = vpop.f32.mrb[56].mxu1 }
 0x856   : > { %v4104_v0 = vpop.f32.mrb[57].mxu1 }
 0x857   : > { %v4543_v53 = vpop.eup %4542  ;;  %4548 = vrcp.f32 %v6942_v9  ;;  %v6945_v25 = vadd.f32 %v4104_v0, %v4103_v29  ;;  %v4106_v23 = vpop.f32.mrb[58].mxu1  ;;  %v1107_v29 = vmul.f32 %v7677_v57, %v6825_v34  ;;  %v1108_v0 = vmul.f32 %v7668_v52, %v6807_v27  ;;  %v7724_v52 = vld [vmem:[#allocation54_spill] sm:$0xff] }
 0x858   : > { %2924 = vperm.xlu1 %4169, %v4543_v53   ;;  %v4107_v35 = vpop.f32.mrb[59].mxu1  ;;  %v1109_v53 = vmul.f32 %v7679_v54, %v6829_v55  ;;  %v1112_v57 = vmul.f32 %v7683_v50, %v6837_v26  ;;  %v1113_v34 = vmul.f32 %v7724_v52, %v6815_v30  ;;  %v1114_v55 = vmul.f32 %v7685_v38, %v6841_v40  ;;  %v7725_v54 = vld [vmem:[#allocation6_spill] sm:$0xff]  ;;  %v7726_v50 = vld [vmem:[#allocation25_spill] sm:$0xff]  ;;  %v7729_v40 = vld [vmem:[#allocation8_spill] sm:$0xff] }
 0x859   : > { %v4545_v42 = vpop.eup %4544  ;;  %v6947_v2 = vadd.f32 %v4107_v35, %v4106_v23  ;;  %v4069_v8 = vpop.f32.mrb[60].mxu0  ;;  %v7722_v23 = vld [vmem:[#allocation51_spill] sm:$0xff]  ;;  %v1477_v27 = vmul.f32 %v7725_v54, %v6819_v43  ;;  %v1478_v26 = vmul.f32 %v7687_v22, %v6845_v12  ;;  %v7733_v43 = vld [vmem:[#allocation30_spill] sm:$0xff] }
 0x85a   : > { %v4070_v28 = vpop.f32.mrb[61].mxu0  ;;  %2929 = vperm.xlu0 %4168, %v4545_v42   ;;  %v1110_v35 = vmul.f32 %v7722_v23, %v6833_v20  ;;  %v7723_v42 = vld [vmem:[#allocation52_spill] sm:$0xff]  ;;  %v1476_v20 = vmul.f32 %v7686_v44, %v6843_v37  ;;  %v7731_v37 = vld [vmem:[#allocation31_spill] sm:$0xff]  ;;  %v2182_v22 = vpop.permute.xlu1 %2181  ;;  %v7744_v23 = vld [vmem:[#allocation66_spill] sm:$0xff] }
 0x85b   : > { %v6949_v7 = vadd.f32 %v4070_v28, %v4069_v8  ;;  %v4072_v21 = vpop.f32.mrb[62].mxu0  ;;  %v1111_v8 = vmul.f32 %v7723_v42, %v6811_v5  ;;  %v7727_v5 = vld [vmem:[#allocation29_spill] sm:$0xff] }
 0x85c   : > { %v4073_v61 = vpop.f32.mrb[63].mxu0  ;;  %v1479_v30 = vmul.f32 %v7727_v5, %v7726_v50  ;;  %v7728_v28 = vld [vmem:[#allocation73_spill] sm:$0xff] }
 0x85d   : > { %4550 = vrcp.f32 %v6949_v7  ;;  %v6952_v58 = vadd.f32 %v4073_v61, %v4072_v21  ;;  %v4109_v47 = vpop.f32.mrb[60].mxu1  ;;  %v1480_v38 = vmul.f32 %v7729_v40, %v7728_v28  ;;  %v7730_v21 = vld [vmem:[#allocation27_spill] sm:$0xff]  ;;  %v7732_v61 = vld [vmem:[#allocation74_spill] sm:$0xff]  ;;  %v7750_v50 = vld [vmem:[#allocation5_spill] sm:$0xff] }
 0x85e   : > { %v4110_v49 = vpop.f32.mrb[61].mxu1  ;;  %v1481_v44 = vmul.f32 %v7731_v37, %v7730_v21  ;;  %v7753_v37 = vld [vmem:[#allocation19_spill] sm:$0xff] }
 0x85f   : > { %v4547_v4 = vpop.eup %4546  ;;  %4552 = vrcp.f32 %v6952_v58  ;;  %v6955_v48 = vadd.f32 %v4110_v49, %v4109_v47  ;;  %v4112_v18 = vpop.f32.mrb[62].mxu1  ;;  %v1482_v47 = vmul.f32 %v7733_v43, %v7732_v61  ;;  %v7734_v49 = vld [vmem:[#allocation28_spill] sm:$0xff] }
 0x860   : > { %2934 = vperm.xlu1 %4169, %v4547_v4   ;;  %v4113_v36 = vpop.f32.mrb[63].mxu1  ;;  %4554 = vrcp.f32 %v6925_v6  ;;  %v7735_v4 = vld [vmem:[#allocation33_spill] sm:$0xff]  ;;  %v7754_v61 = vld [vmem:[#allocation20_spill] sm:$0xff] }
 0x861   : > { %v4549_v24 = vpop.eup %4548  ;;  %v6958_v62 = vadd.f32 %v4113_v36, %v4112_v18  ;;  %4556 = vrcp.f32 %v6927_v10  ;;  %v1483_v12 = vmul.f32 %v7735_v4, %v7734_v49  ;;  %v7736_v18 = vld [vmem:[#allocation44_spill] sm:$0xff]  ;;  %v7737_v36 = vld [vmem:[#allocation58_spill] sm:$0xff]  ;;  %v7755_v49 = vld [vmem:[#allocation17_spill] sm:$0xff] }
 0x862   : > { %2939 = vperm.xlu0 %4168, %v4549_v24   ;;  %4558 = vrcp.f32 %v6935_v16  ;;  %v1845_v24 = vmul.f32 %v7737_v36, %v7736_v18  ;;  %v7757_v36 = vld [vmem:[#allocation10_spill] sm:$0xff] }
 0x863   : > { %4560 = vrcp.f32 %v6937_v31 }
 0x864   : > { %4562 = vrcp.f32 %v6945_v25 }
 0x865   : > { %4564 = vrcp.f32 %v6947_v2 }
 0x866   : > { %4566 = vrcp.f32 %v6955_v48 }
 0x867   : > { %v4551_v19 = vpop.eup %4550  ;;  %4568 = vrcp.f32 %v6958_v62 }
 0x868   : > { %2944 = vperm.xlu1 %4169, %v4551_v19   ;;  %v2177_v19 = vpop.permute.xlu0 %2176 }
 0x869   : > { %v4553_v56 = vpop.eup %4552 }
 0x86a   : > { %2949 = vperm.xlu0 %4168, %v4553_v56   ;;  %v4555_v41 = vpop.eup %4554  ;;  %v7738_v56 = vld [vmem:[#allocation60_spill] sm:$0xff] }
 0x86b   : > { %v4557_v63 = vpop.eup %4556 }
 0x86c   : > { %3283 = vperm.xlu1 %4169, %v4555_v41   ;;  %v4559_v32 = vpop.eup %4558  ;;  %v7739_v41 = vld [vmem:[#allocation59_spill] sm:$0xff] }
 0x86d   : > { %v4561_v33 = vpop.eup %4560 }
 0x86e   : > { %3288 = vperm.xlu0 %4168, %v4557_v63   ;;  %v4563_v13 = vpop.eup %4562  ;;  %v1846_v63 = vmul.f32 %v7739_v41, %v7738_v56  ;;  %v7758_v56 = vld [vmem:[#allocation13_spill] sm:$0xff] }
 0x86f   : > { %v4565_v59 = vpop.eup %4564 }
 0x870   : > { %3293 = vperm.xlu1 %4169, %v4559_v32   ;;  %v4567_v39 = vpop.eup %4566  ;;  %v7740_v32 = vld [vmem:[#allocation61_spill] sm:$0xff] }
 0x871   : > { %v4569_v46 = vpop.eup %4568 }
 0x872   : > { %3298 = vperm.xlu0 %4168, %v4561_v33   ;;  %v1847_v33 = vmul.f32 %v7740_v32, %v6859_v14  ;;  %v7759_v32 = vld [vmem:[#allocation34_spill] sm:$0xff] }
 0x874   : > { %3303 = vperm.xlu1 %4169, %v4563_v13   ;;  %v2187_v13 = vpop.permute.xlu1 %2186 }
 0x875   : > { %v2216_v5 = vmul.f32 %v7750_v50, %v2187_v13  ;;  %v7760_v13 = vld [vmem:[#allocation2_spill] sm:$0xff] }
 0x876   : > { %3308 = vperm.xlu0 %4168, %v4565_v59   ;;  %v7741_v59 = vld [vmem:[#allocation63_spill] sm:$0xff] }
 0x878   : > { %3313 = vperm.xlu1 %4169, %v4567_v39   ;;  %v1848_v39 = vmul.f32 %v7741_v59, %v6869_v15  ;;  %v2197_v42 = vpop.permute.xlu1 %2196  ;;  %v7748_v15 = vld [vmem:[#allocation36_spill] sm:$0xff] }
 0x87a   : > { %3318 = vperm.xlu0 %4168, %v4569_v46   ;;  %v2192_v46 = vpop.permute.xlu0 %2191 }
 0x87c   : > { %3337 = vrot.lane.b32.xlu1 %v1107_v29, %s4668_s20  ;;  %v7742_v29 = vld [vmem:[#allocation62_spill] sm:$0xff]  ;;  %v2207_v54 = vpop.permute.xlu1 %2206 }
 0x87d   : > { %v2220_v43 = vmul.f32 %v7754_v61, %v2207_v54 }
 0x87e   : > { %3339 = vrot.lane.b32.xlu0 %v1108_v0, %s4668_s20  ;;  %v7743_v0 = vld [vmem:[#allocation65_spill] sm:$0xff]  ;;  %v2202_v14 = vpop.permute.xlu0 %2201 }
 0x880   : > { %3341 = vrot.lane.b32.xlu1 %v1109_v53, %s4668_s20  ;;  %v1849_v53 = vmul.f32 %v7743_v0, %v7742_v29  ;;  %v2546_v40 = vpop.permute.xlu1 %2545 }
 0x882   : > { %3343 = vrot.lane.b32.xlu0 %v1110_v35, %s4668_s20  ;;  %v1850_v35 = vmul.f32 %v7744_v23, %v6879_v45  ;;  %v2212_v45 = vpop.permute.xlu0 %2211 }
 0x883   : > { %v2221_v4 = vmul.f32 %v7755_v49, %v2212_v45 }
 0x884   : > { %3345 = vrot.lane.b32.xlu1 %v1111_v8, %s4668_s20  ;;  %v7745_v8 = vld [vmem:[#allocation24_spill] sm:$0xff] }
 0x886   : > { %3347 = vrot.lane.b32.xlu0 %v1112_v57, %s4668_s20  ;;  %v7746_v57 = vld [vmem:[#allocation67_spill] sm:$0xff] }
 0x887   : > { %v1851_v52 = vmul.f32 %v7746_v57, %v7745_v8 }
 0x888   : > { %3349 = vrot.lane.b32.xlu1 %v1113_v34, %s4668_s20  ;;  %v7747_v34 = vld [vmem:[#allocation68_spill] sm:$0xff] }
 0x88a   : > { %3351 = vrot.lane.b32.xlu0 %v1114_v55, %s4668_s20  ;;  %v1852_v55 = vmul.f32 %v7747_v34, %v6889_v1  ;;  %v2551_v1 = vpop.permute.xlu0 %2550 }
 0x88c   : > { %3369 = vrot.lane.b32.xlu1 %v1476_v20, %s4669_s23  ;;  %v2214_v20 = vmul.f32 %v7748_v15, %v2177_v19 }
 0x88e   : > { %3371 = vrot.lane.b32.xlu0 %v1477_v27, %s4669_s23  ;;  %v7749_v27 = vld [vmem:[#allocation38_spill] sm:$0xff] }
 0x890   : > { %3373 = vrot.lane.b32.xlu1 %v1478_v26, %s4669_s23  ;;  %v2215_v26 = vmul.f32 %v7749_v27, %v2182_v22  ;;  %v7756_v22 = vld [vmem:[#allocation45_spill] sm:$0xff] }
 0x891   : > { %v2583_v18 = vmul.f32 %v7756_v22, %v2546_v40 }
 0x892   : > { %3375 = vrot.lane.b32.xlu0 %v1479_v30, %s4669_s23  ;;  %v7751_v30 = vld [vmem:[#allocation37_spill] sm:$0xff] }
 0x893   : > { %v2217_v28 = vmul.f32 %v7751_v30, %v2192_v46  ;;  %v7761_v46 = vld [vmem:[#allocation12_spill] sm:$0xff] }
 0x894   : > { %3377 = vrot.lane.b32.xlu1 %v1480_v38, %s4669_s23  ;;  %v7752_v38 = vld [vmem:[#allocation4_spill] sm:$0xff] }
 0x895   : > { %v2218_v21 = vmul.f32 %v7752_v38, %v2197_v42 }
 0x896   : > { %3379 = vrot.lane.b32.xlu0 %v1481_v44, %s4669_s23  ;;  %v2219_v44 = vmul.f32 %v7753_v37, %v2202_v14 }
 0x898   : > { %3381 = vrot.lane.b32.xlu1 %v1482_v47, %s4669_s23  ;;  %v2556_v47 = vpop.permute.xlu1 %2555 }
 0x899   : > { %v2585_v41 = vmul.f32 %v7758_v56, %v2556_v47  ;;  %v7768_v56 = vld [vmem:[#allocation26_spill] sm:$0xff] }
 0x89a   : > { %3383 = vrot.lane.b32.xlu0 %v1483_v12, %s4669_s23  ;;  %v2561_v12 = vpop.permute.xlu0 %2560 }
 0x89c   : > { %3401 = vrot.lane.b32.xlu1 %v1845_v24, %s4670_s25  ;;  %v2584_v24 = vmul.f32 %v7757_v36, %v2551_v1  ;;  %v2566_v19 = vpop.permute.xlu1 %2565 }
 0x89d   : > { %v2587_v59 = vmul.f32 %v7760_v13, %v2566_v19 }
 0x89e   : > { %3403 = vrot.lane.b32.xlu0 %v1846_v63, %s4670_s25  ;;  %v2571_v63 = vpop.permute.xlu0 %2570 }
 0x89f   : > { %v2588_v29 = vmul.f32 %v7761_v46, %v2571_v63 }
 0x8a0   : > { %3405 = vrot.lane.b32.xlu1 %v1847_v33, %s4670_s25  ;;  %v2586_v33 = vmul.f32 %v7759_v32, %v2561_v12 }
 0x8a2   : > { %3407 = vrot.lane.b32.xlu0 %v1848_v39, %s4670_s25  ;;  %v2576_v39 = vpop.permute.xlu1 %2575  ;;  %v2581_v0 = vpop.permute.xlu0 %2580 }
 0x8a4   : > { %3409 = vrot.lane.b32.xlu1 %v1849_v53, %s4670_s25  ;;  %v7762_v53 = vld [vmem:[#allocation47_spill] sm:$0xff] }
 0x8a5   : > { %v2589_v23 = vmul.f32 %v7762_v53, %v2576_v39  ;;  %v7771_v39 = vld [vmem:[#allocation42_spill] sm:$0xff] }
 0x8a6   : > { %3411 = vrot.lane.b32.xlu0 %v1850_v35, %s4670_s25  ;;  %v7763_v35 = vld [vmem:[#allocation69_spill] sm:$0xff] }
 0x8a7   : > { %v2590_v42 = vmul.f32 %v7763_v35, %v2581_v0  ;;  %v7773_v35 = vld [vmem:[#allocation39_spill] sm:$0xff] }
 0x8a8   : > { %3413 = vrot.lane.b32.xlu1 %v1851_v52, %s4670_s25 }
 0x8aa   : > { %3415 = vrot.lane.b32.xlu0 %v1852_v55, %s4670_s25 }
 0x8ac   : > { %3433 = vrot.lane.b32.xlu1 %v2214_v20, %s4671_s26 }
 0x8ae   : > { %3435 = vrot.lane.b32.xlu0 %v2215_v26, %s4671_s26 }
 0x8b0   : > { %3437 = vrot.lane.b32.xlu1 %v2216_v5, %s4671_s26 }
 0x8b2   : > { %3439 = vrot.lane.b32.xlu0 %v2217_v28, %s4671_s26 }
 0x8b4   : > { %3441 = vrot.lane.b32.xlu1 %v2218_v21, %s4671_s26 }
 0x8b6   : > { %3443 = vrot.lane.b32.xlu0 %v2219_v44, %s4671_s26 }
 0x8b8   : > { %3445 = vrot.lane.b32.xlu1 %v2220_v43, %s4671_s26 }
 0x8ba   : > { %3447 = vrot.lane.b32.xlu0 %v2221_v4, %s4671_s26  ;;  %v7764_v4 = vld [vmem:[#allocation23_spill] sm:$0xff] }
 0x8bc   : > { %3465 = vrot.lane.b32.xlu1 %v2583_v18, %s4672_s28  ;;  %v7767_v18 = vld [vmem:[#allocation40_spill] sm:$0xff] }
 0x8be   : > { %3467 = vrot.lane.b32.xlu0 %v2584_v24, %s4672_s28 }
 0x8c0   : > { %3469 = vrot.lane.b32.xlu1 %v2585_v41, %s4672_s28  ;;  %v7769_v41 = vld [vmem:[#allocation41_spill] sm:$0xff] }
 0x8c1   : > { %v740_v63 = vmul.f32 %v7769_v41, %v7768_v56 }
 0x8c2   : > { %3471 = vrot.lane.b32.xlu0 %v2586_v33, %s4672_s28 }
 0x8c4   : > { %3473 = vrot.lane.b32.xlu1 %v2587_v59, %s4672_s28  ;;  %v7770_v59 = vld [vmem:[#allocation22_spill] sm:$0xff] }
 0x8c5   : > { %v741_v46 = vmul.f32 %v7771_v39, %v7770_v59 }
 0x8c6   : > { %3475 = vrot.lane.b32.xlu0 %v2588_v29, %s4672_s28 }
 0x8c8   : > { %3477 = vrot.lane.b32.xlu1 %v2589_v23, %s4672_s28  ;;  %v7772_v23 = vld [vmem:[#allocation71_spill] sm:$0xff] }
 0x8ca   : > { %3479 = vrot.lane.b32.xlu0 %v2590_v42, %s4672_s28  ;;  %v742_v42 = vmul.f32 %v7773_v35, %v7772_v23 }
 0x8cf   : > { %v2915_v8 = vpop.permute.xlu1 %2914 }
 0x8d0   : > { %v2952_v57 = vmul.f32 %v6919_v3, %v2915_v8 }
 0x8d1   : > { %v2920_v52 = vpop.permute.xlu0 %2919 }
 0x8d2   : > { %v2953_v14 = vmul.f32 %v6922_v51, %v2920_v52  ;;  %3497 = vrot.lane.b32.xlu1 %v2952_v57, %s4673_s29 }
 0x8d4   : > { %3499 = vrot.lane.b32.xlu0 %v2953_v14, %s4673_s29  ;;  %v7774_v14 = vld [vmem:[#allocation72_spill] sm:$0xff] }
 0x8d7   : > { %v2925_v34 = vpop.permute.xlu1 %2924 }
 0x8d8   : > { %v2954_v55 = vmul.f32 %v6929_v17, %v2925_v34  ;;  %v7775_v34 = vld [vmem:[#allocation15_spill] sm:$0xff] }
 0x8d9   : > { %v2930_v15 = vpop.permute.xlu0 %2929 }
 0x8da   : > { %v2955_v20 = vmul.f32 %v6932_v11, %v2930_v15  ;;  %3501 = vrot.lane.b32.xlu1 %v2954_v55, %s4673_s29  ;;  %v743_v55 = vmul.f32 %v7775_v34, %v7774_v14 }
 0x8dc   : > { %3503 = vrot.lane.b32.xlu0 %v2955_v20, %s4673_s29 }
 0x8df   : > { %v2935_v54 = vpop.permute.xlu1 %2934 }
 0x8e0   : > { %v2956_v27 = vmul.f32 %v6939_v60, %v2935_v54 }
 0x8e1   : > { %v2940_v26 = vpop.permute.xlu0 %2939 }
 0x8e2   : > { %v2957_v3 = vmul.f32 %v6942_v9, %v2940_v26  ;;  %3505 = vrot.lane.b32.xlu1 %v2956_v27, %s4673_s29  ;;  %v7776_v27 = vld [vmem:[#allocation14_spill] sm:$0xff]  ;;  %v7777_v26 = vld [vmem:[#allocation16_spill] sm:$0xff] }
 0x8e4   : > { %3507 = vrot.lane.b32.xlu0 %v2957_v3, %s4673_s29  ;;  %v744_v3 = vmul.f32 %v7777_v26, %v7776_v27 }
 0x8e7   : > { %v2945_v51 = vpop.permute.xlu1 %2944 }
 0x8e8   : > { %v2958_v45 = vmul.f32 %v6949_v7, %v2945_v51 }
 0x8e9   : > { %v2950_v50 = vpop.permute.xlu0 %2949 }
 0x8ea   : > { %v2959_v5 = vmul.f32 %v6952_v58, %v2950_v50  ;;  %3509 = vrot.lane.b32.xlu1 %v2958_v45, %s4673_s29 }
 0x8eb   : > { %v3284_v17 = vpop.permute.xlu1 %3283 }
 0x8ec   : > { %v3321_v11 = vmul.f32 %v6925_v6, %v3284_v17  ;;  %3511 = vrot.lane.b32.xlu0 %v2959_v5, %s4673_s29  ;;  %v7778_v5 = vld [vmem:[#allocation57_spill] sm:$0xff]  ;;  %v7779_v17 = vld [vmem:[#allocation43_spill] sm:$0xff] }
 0x8ed   : > { %v3289_v30 = vpop.permute.xlu0 %3288 }
 0x8ee   : > { %v3322_v28 = vmul.f32 %v6927_v10, %v3289_v30  ;;  %3529 = vrot.lane.b32.xlu1 %v3321_v11, %s4674_s15  ;;  %v745_v11 = vmul.f32 %v7779_v17, %v7778_v5 }
 0x8ef   : > { %v3294_v60 = vpop.permute.xlu1 %3293 }
 0x8f0   : > { %v3323_v9 = vmul.f32 %v6935_v16, %v3294_v60  ;;  %3531 = vrot.lane.b32.xlu0 %v3322_v28, %s4674_s15 }
 0x8f1   : > { %v3299_v40 = vpop.permute.xlu0 %3298 }
 0x8f2   : > { %v3324_v7 = vmul.f32 %v6937_v31, %v3299_v40  ;;  %3533 = vrot.lane.b32.xlu1 %v3323_v9, %s4674_s15 }
 0x8f3   : > { %v3304_v38 = vpop.permute.xlu1 %3303 }
 0x8f4   : > { %v3325_v58 = vmul.f32 %v6945_v25, %v3304_v38  ;;  %3535 = vrot.lane.b32.xlu0 %v3324_v7, %s4674_s15 }
 0x8f5   : > { %v3309_v21 = vpop.permute.xlu0 %3308 }
 0x8f6   : > { %v3326_v6 = vmul.f32 %v6947_v2, %v3309_v21  ;;  %3537 = vrot.lane.b32.xlu1 %v3325_v58, %s4674_s15  ;;  %v7765_v2 = vld [vmem:[#allocation35_spill] sm:$0xff] }
 0x8f7   : > { %v3314_v1 = vpop.permute.xlu1 %3313  ;;  %v738_v12 = vmul.f32 %v7765_v2, %v7764_v4 }
 0x8f8   : > { %v3327_v10 = vmul.f32 %v6955_v48, %v3314_v1  ;;  %3539 = vrot.lane.b32.xlu0 %v3326_v6, %s4674_s15  ;;  %v7766_v48 = vld [vmem:[#allocation21_spill] sm:$0xff] }
 0x8f9   : > { %v3319_v37 = vpop.permute.xlu0 %3318  ;;  %v739_v36 = vmul.f32 %v7767_v18, %v7766_v48 }
 0x8fa   : > { %v3328_v16 = vmul.f32 %v6958_v62, %v3319_v37  ;;  %3541 = vrot.lane.b32.xlu1 %v3327_v10, %s4674_s15 }
 0x8fb   : > { %v3338_v44 = vpop.permute.xlu1 %3337 }
 0x8fc   : > { %3543 = vrot.lane.b32.xlu0 %v3328_v16, %s4674_s15  ;;  %v3554_v62 = vsel %vm3553_vm0, %v738_v12, %v3338_v44 }
 0x8fd   : > { %v3340_v31 = vpop.permute.xlu0 %3339 }
 0x8fe   : > { %v3555_v32 = vsel %vm3553_vm0, %v739_v36, %v3340_v31 }
 0x8ff   : > { %v3342_v61 = vpop.permute.xlu1 %3341 }
 0x900   : > { %v3556_v29 = vsel %vm3553_vm0, %v740_v63, %v3342_v61 }
 0x901   : > { %v3344_v43 = vpop.permute.xlu0 %3343 }
 0x902   : > { %v3557_v8 = vsel %vm3553_vm0, %v741_v46, %v3344_v43 }
 0x903   : > { %v3346_v47 = vpop.permute.xlu1 %3345 }
 0x904   : > { %v3558_v15 = vsel %vm3553_vm0, %v742_v42, %v3346_v47  ;;  %v7116_v42 = vld [vmem:[%s7218_s4] ss:$0 sm:$0xff] }
 0x905   : > { %v3348_v25 = vpop.permute.xlu0 %3347 }
 0x906   : > { %v3559_v51 = vsel %vm3553_vm0, %v743_v55, %v3348_v25 }
 0x907   : > { %v3350_v49 = vpop.permute.xlu1 %3349 }
 0x908   : > { %v3560_v30 = vsel %vm3553_vm0, %v744_v3, %v3350_v49 }
 0x909   : > { %v3352_v22 = vpop.permute.xlu0 %3351 }
 0x90a   : > { %v3561_v9 = vsel %vm3553_vm0, %v745_v11, %v3352_v22 }
 0x90b   : > { %v3370_v24 = vpop.permute.xlu1 %3369 }
 0x90c   : > { %v7053_v19 = vsel %vm3562_vm1, %v3554_v62, %v3370_v24 }
 0x90d   : > { %v3372_v33 = vpop.permute.xlu0 %3371 }
 0x90e   : > { %v7059_v13 = vsel %vm3562_vm1, %v3555_v32, %v3372_v33 }
 0x90f   : > { %v3374_v0 = vpop.permute.xlu1 %3373 }
 0x910   : > { %v7065_v53 = vsel %vm3562_vm1, %v3556_v29, %v3374_v0 }
 0x911   : > { %v3376_v57 = vpop.permute.xlu0 %3375 }
 0x912   : > { %v7071_v52 = vsel %vm3562_vm1, %v3557_v8, %v3376_v57 }
 0x913   : > { %v3378_v20 = vpop.permute.xlu1 %3377 }
 0x914   : > { %v7077_v54 = vsel %vm3562_vm1, %v3558_v15, %v3378_v20 }
 0x915   : > { %v3380_v45 = vpop.permute.xlu0 %3379 }
 0x916   : > { %v7083_v50 = vsel %vm3562_vm1, %v3559_v51, %v3380_v45 }
 0x917   : > { %v3382_v28 = vpop.permute.xlu1 %3381 }
 0x918   : > { %v7089_v60 = vsel %vm3562_vm1, %v3560_v30, %v3382_v28 }
 0x919   : > { %v3384_v40 = vpop.permute.xlu0 %3383 }
 0x91a   : > { %v7093_v7 = vsel %vm3562_vm1, %v3561_v9, %v3384_v40 }
 0x91b   : > { %v3402_v38 = vpop.permute.xlu1 %3401 }
 0x91c   : > { %v3572_v46 = vsel %vm3571_vm2, %v7053_v19, %v3402_v38 }
 0x91d   : > { %v3404_v58 = vpop.permute.xlu0 %3403 }
 0x91e   : > { %v3573_v23 = vsel %vm3571_vm2, %v7059_v13, %v3404_v58 }
 0x91f   : > { %v3406_v21 = vpop.permute.xlu1 %3405 }
 0x920   : > { %v3574_v14 = vsel %vm3571_vm2, %v7065_v53, %v3406_v21 }
 0x921   : > { %v3408_v6 = vpop.permute.xlu0 %3407 }
 0x922   : > { %v3575_v13 = vsel %vm3571_vm2, %v7071_v52, %v3408_v6 }
 0x923   : > { %v3410_v1 = vpop.permute.xlu1 %3409 }
 0x924   : > { %v3576_v3 = vsel %vm3571_vm2, %v7077_v54, %v3410_v1 }
 0x925   : > { %v3412_v10 = vpop.permute.xlu0 %3411 }
 0x926   : > { %v3577_v53 = vsel %vm3571_vm2, %v7083_v50, %v3412_v10 }
 0x927   : > { %v3414_v37 = vpop.permute.xlu1 %3413 }
 0x928   : > { %v3578_v54 = vsel %vm3571_vm2, %v7089_v60, %v3414_v37 }
 0x929   : > { %v7095_v16 = vpop.permute.xlu0 %3415 }
 0x92a   : > { %v3579_v1 = vsel %vm3571_vm2, %v7093_v7, %v7095_v16 }
 0x92b   : > { %v3434_v44 = vpop.permute.xlu1 %3433 }
 0x92c   : > { %v3581_v29 = vsel %vm3580_vm3, %v3572_v46, %v3434_v44 }
 0x92d   : > { %v3436_v31 = vpop.permute.xlu0 %3435 }
 0x92e   : > { %v3582_v8 = vsel %vm3580_vm3, %v3573_v23, %v3436_v31 }
 0x92f   : > { %v3438_v61 = vpop.permute.xlu1 %3437 }
 0x930   : > { %v3583_v15 = vsel %vm3580_vm3, %v3574_v14, %v3438_v61 }
 0x931   : > { %v3440_v43 = vpop.permute.xlu0 %3439 }
 0x932   : > { %v3584_v52 = vsel %vm3580_vm3, %v3575_v13, %v3440_v43 }
 0x933   : > { %v3442_v47 = vpop.permute.xlu1 %3441 }
 0x934   : > { %v3585_v28 = vsel %vm3580_vm3, %v3576_v3, %v3442_v47 }
 0x935   : > { %v3444_v25 = vpop.permute.xlu0 %3443 }
 0x936   : > { %v3586_v60 = vsel %vm3580_vm3, %v3577_v53, %v3444_v25 }
 0x937   : > { %v7097_v49 = vpop.permute.xlu1 %3445 }
 0x938   : > { %v3587_v47 = vsel %vm3580_vm3, %v3578_v54, %v7097_v49 }
 0x939   : > { %v7099_v4 = vpop.permute.xlu0 %3447 }
 0x93b   : > { %v3466_v2 = vpop.permute.xlu1 %3465 }
 0x93c   : > { %v3590_v35 = vsel %vm3589_vm4, %v3581_v29, %v3466_v2 }
 0x93d   : > { %v3468_v12 = vpop.permute.xlu0 %3467 }
 0x93e   : > { %v3591_v34 = vsel %vm3589_vm4, %v3582_v8, %v3468_v12 }
 0x93f   : > { %v3470_v22 = vpop.permute.xlu1 %3469 }
 0x940   : > { %v3592_v51 = vsel %vm3589_vm4, %v3583_v15, %v3470_v22 }
 0x941   : > { %v3472_v48 = vpop.permute.xlu0 %3471 }
 0x942   : > { %v3593_v50 = vsel %vm3589_vm4, %v3584_v52, %v3472_v48 }
 0x943   : > { %v3474_v18 = vpop.permute.xlu1 %3473 }
 0x944   : > { %v3594_v10 = vsel %vm3589_vm4, %v3585_v28, %v3474_v18  ;;  %v3588_v18 = vsel %vm3580_vm3, %v3579_v1, %v7099_v4 }
 0x945   : > { %v3476_v36 = vpop.permute.xlu0 %3475 }
 0x946   : > { %v3595_v2 = vsel %vm3589_vm4, %v3586_v60, %v3476_v36 }
 0x947   : > { %v7101_v62 = vpop.permute.xlu1 %3477 }
 0x949   : > { %v7103_v24 = vpop.permute.xlu0 %3479 }
 0x94b   : > { %v3498_v56 = vpop.permute.xlu1 %3497 }
 0x94c   : > { %v3599_v19 = vsel %vm3598_vm5, %v3590_v35, %v3498_v56  ;;  %v3596_v56 = vsel %vm3589_vm4, %v3587_v47, %v7101_v62 }
 0x94d   : > { %v3500_v41 = vpop.permute.xlu0 %3499 }
 0x94e   : > { %v3600_v20 = vsel %vm3598_vm5, %v3591_v34, %v3500_v41 }
 0x94f   : > { %v3502_v63 = vpop.permute.xlu1 %3501 }
 0x950   : > { %v3601_v5 = vsel %vm3598_vm5, %v3592_v51, %v3502_v63 }
 0x951   : > { %v3504_v32 = vpop.permute.xlu0 %3503 }
 0x952   : > { %v3602_v40 = vsel %vm3598_vm5, %v3593_v50, %v3504_v32 }
 0x954   : > { %v3506_v33 = vpop.permute.xlu1 %3505 }
 0x955   : > { %v3603_v44 = vsel %vm3598_vm5, %v3594_v10, %v3506_v33 }
 0x956   : > { %v3508_v59 = vpop.permute.xlu0 %3507 }
 0x957   : > { %v3604_v25 = vsel %vm3598_vm5, %v3595_v2, %v3508_v59  ;;  %v3597_v59 = vsel %vm3589_vm4, %v3588_v18, %v7103_v24 }
 0x95c   : > { %v3510_v39 = vpop.permute.xlu1 %3509 }
 0x95d   : > { %v3605_v41 = vsel %vm3598_vm5, %v3596_v56, %v3510_v39 }
 0x95e   : > { %v7108_v0 = vpop.permute.xlu0 %3511 }
 0x95f   : > { %v3606_v62 = vsel %vm3598_vm5, %v3597_v59, %v7108_v0 }
 0x960   : > { %v3530_v57 = vpop.permute.xlu1 %3529 }
 0x961   : > { %v3608_v55 = vsel %vm3607_vm6, %v3599_v19, %v3530_v57 }
 0x962   : > { %v7129_v27 = vadd.f32 %v7116_v42, %v3608_v55  ;;  %v3532_v26 = vpop.permute.xlu0 %3531 }
 0x963   : > { %v3609_v45 = vsel %vm3607_vm6, %v3600_v20, %v3532_v26 }
 0x964   : > { %v3638_v17 = vmin.f32 %v7129_v27, 0.0  ;;  %v7141_v11 = vadd.f32 %v7116_v42, %v3609_v45  ;;  %v3534_v30 = vpop.permute.xlu1 %3533  ;;  %vm3630_vm8 = vcmp.gt.f32.partialorder %v7129_v27, 0.0 }
 0x965   : > { %v3610_v9 = vsel %vm3607_vm6, %v3601_v5, %v3534_v30 }
 0x966   : > { %v3646_v38 = vmul.f32 1.442695, %v3638_v17  ;;  %v3639_v58 = vmin.f32 %v7141_v11, 0.0  ;;  %v7151_v21 = vadd.f32 %v7116_v42, %v3610_v9  ;;  %v3536_v6 = vpop.permute.xlu0 %3535  ;;  %vm3631_vm9 = vcmp.gt.f32.partialorder %v7141_v11, 0.0 }
 0x967   : > { %v3611_v37 = vsel %vm3607_vm6, %v3602_v40, %v3536_v6 }
 0x968   : > { %4570 = vpow2.f32 %v3646_v38  ;;  %v3648_v31 = vmul.f32 1.442695, %v3639_v58  ;;  %v3640_v61 = vmin.f32 %v7151_v21, 0.0  ;;  %v3538_v43 = vpop.permute.xlu1 %3537  ;;  %v3625_v7 = vadd.f32 %v7116_v42, %v3611_v37 }
 0x969   : > { %v3612_v16 = vsel %vm3607_vm6, %v3603_v44, %v3538_v43  ;;  %vm3632_vm10 = vcmp.gt.f32.partialorder %v7151_v21, 0.0 }
 0x96a   : > { %4572 = vpow2.f32 %v3648_v31  ;;  %v3650_v12 = vmul.f32 1.442695, %v3640_v61  ;;  %v3626_v22 = vadd.f32 %v7116_v42, %v3612_v16  ;;  %v3540_v48 = vpop.permute.xlu0 %3539  ;;  %v3641_v49 = vmin.f32 %v3625_v7, 0.0 }
 0x96b   : > { %v3613_v36 = vsel %vm3607_vm6, %v3604_v25, %v3540_v48  ;;  %vm3633_vm11 = vcmp.gt.f32.partialorder %v3625_v7, 0.0 }
 0x96c   : > { %4574 = vpow2.f32 %v3650_v12  ;;  %v3642_v63 = vmin.f32 %v3626_v22, 0.0  ;;  %v3627_v32 = vadd.f32 %v7116_v42, %v3613_v36  ;;  %v3542_v33 = vpop.permute.xlu1 %3541  ;;  %v3652_v46 = vmul.f32 1.442695, %v3641_v49 }
 0x96d   : > { %v3614_v4 = vsel %vm3607_vm6, %v3605_v41, %v3542_v33  ;;  %vm3634_vm12 = vcmp.gt.f32.partialorder %v3626_v22, 0.0 }
 0x96e   : > { %v3654_v29 = vmul.f32 1.442695, %v3642_v63  ;;  %v3643_v23 = vmin.f32 %v3627_v32, 0.0  ;;  %v3628_v35 = vadd.f32 %v7116_v42, %v3614_v4  ;;  %v3544_v39 = vpop.permute.xlu0 %3543  ;;  %4576 = vpow2.f32 %v3652_v46 }
 0x96f   : > { %v3615_v8 = vsel %vm3607_vm6, %v3606_v62, %v3544_v39  ;;  %vm3635_vm13 = vcmp.gt.f32.partialorder %v3627_v32, 0.0 }
 0x970   : > { %4578 = vpow2.f32 %v3654_v29  ;;  %v3656_v19 = vmul.f32 1.442695, %v3643_v23  ;;  %v3644_v57 = vmin.f32 %v3628_v35, 0.0  ;;  %v3629_v24 = vadd.f32 %v7116_v42, %v3615_v8 }
 0x971   : > { %vm3636_vm14 = vcmp.gt.f32.partialorder %v3628_v35, 0.0 }
 0x972   : > { %v4571_v14 = vpop.eup %4570  ;;  %4580 = vpow2.f32 %v3656_v19  ;;  %v3658_v34 = vmul.f32 1.442695, %v3644_v57  ;;  %v3645_v55 = vmin.f32 %v3629_v24, 0.0  ;;  %vm3637_vm15 = vcmp.gt.f32.partialorder %v3629_v24, 0.0 }
 0x973   : > { %v3784_v0 = vadd.f32 -1.0, %v4571_v14 }
 0x974   : > { %v4573_v13 = vpop.eup %4572  ;;  %4582 = vpow2.f32 %v3658_v34  ;;  %v3660_v20 = vmul.f32 1.442695, %v3645_v55 }
 0x975   : > { %v3670_v42 = vsel %vm3630_vm8, %v7129_v27, %v3784_v0  ;;  %v3785_v15 = vadd.f32 -1.0, %v4573_v13 }
 0x976   : > { %v4575_v26 = vpop.eup %4574  ;;  %3679 = vst.msk [vmem:[%s7187_s8] sm:$0xff] %vm3678_vm7, %v3670_v42  ;;  %4584 = vpow2.f32 %v3660_v20 }
 0x977   : > { %v3671_v3 = vsel %vm3631_vm9, %v7141_v11, %v3785_v15  ;;  %v3786_v53 = vadd.f32 -1.0, %v4575_v26 }
 0x978   : > { %3680 = vst.msk [vmem:[%s7187_s8 + $0x8] sm:$0xff] %vm3678_vm7, %v3671_v3  ;;  %v4577_v51 = vpop.eup %4576 }
 0x979   : > { %v3672_v27 = vsel %vm3632_vm10, %v7151_v21, %v3786_v53  ;;  %v3787_v52 = vadd.f32 -1.0, %v4577_v51 }
 0x97a   : > { %v4579_v45 = vpop.eup %4578  ;;  %3681 = vst.msk [vmem:[%s7187_s8 + $0x10] sm:$0xff] %vm3678_vm7, %v3672_v27 }
 0x97b   : > { %v3788_v5 = vadd.f32 -1.0, %v4579_v45  ;;  %v3673_v11 = vsel %vm3633_vm11, %v3625_v7, %v3787_v52 }
 0x97c   : > { %v4581_v17 = vpop.eup %4580  ;;  %3682 = vst.msk [vmem:[%s7187_s8 + $0x18] sm:$0xff] %vm3678_vm7, %v3673_v11 }
 0x97d   : > { %v3674_v30 = vsel %vm3634_vm12, %v3626_v22, %v3788_v5  ;;  %v3789_v54 = vadd.f32 -1.0, %v4581_v17 }
 0x97e   : > { %v4583_v28 = vpop.eup %4582  ;;  %3683 = vst.msk [vmem:[%s7187_s8 + $0x20] sm:$0xff] %vm3678_vm7, %v3674_v30 }
 0x97f   : > { %v3675_v50 = vsel %vm3635_vm13, %v3627_v32, %v3789_v54  ;;  %v3790_v9 = vadd.f32 -1.0, %v4583_v28 }
 0x980   : > { %3684 = vst.msk [vmem:[%s7187_s8 + $0x28] sm:$0xff] %vm3678_vm7, %v3675_v50  ;;  %v4585_v40 = vpop.eup %4584 }
 0x981   : > { %v3676_v38 = vsel %vm3636_vm14, %v3628_v35, %v3790_v9  ;;  %v3791_v58 = vadd.f32 -1.0, %v4585_v40 }
 0x982   : > { %3685 = vst.msk [vmem:[%s7187_s8 + $0x30] sm:$0xff] %vm3678_vm7, %v3676_v38 }
 0x983   : > { %v3677_v21 = vsel %vm3637_vm15, %v3629_v24, %v3791_v58 }
 0x984   : > { %3686 = vst.msk [vmem:[%s7187_s8 + $0x38] sm:$0xff] %vm3678_vm7, %v3677_v21 }
 0x985 PF: > { %s15_s18 = sadd.s32 1, %s4650_s18  }
 0x986   : > { %p12_p4 = scmp.ge.s32.totalorder %s15_s18, 6  }
 0x988   :  { %14 = sbr.rel (!%p12_p4) target bundleno = 1 (0x1), region = 73 }

</bundles_post_ra>
